<compile_context>
chip_gen: v6e
topology: v6e:2x2x1
jax: 0.10.0
libtpu: 0.0.40
codegen_flags: <defaults>
</compile_context>

<pallas_src>
import functools

import jax
import jax.numpy as jnp
import numpy as np
from jax.experimental import pallas as pl
from jax.experimental.pallas import tpu as pltpu

EPS = 1e-3


# ----------------------------------------------------------------------------
# Fused Block17 kernel
# ----------------------------------------------------------------------------
def _block17_kernel(x_ref, scale_ref,
                    w01_ref, s01_ref, b01_ref,
                    w1b_ref, s1b_ref, b1b_ref,
                    w1c_ref, s1c_ref, b1c_ref,
                    w2a_ref, w2b_ref, b2_ref,
                    o_ref,
                    pw_ref, ph_ref, *, H, W):
    HW = H * W
    C1A = 128            # branch1a channels (first 128 lanes of the fused matmul)

    x_bf = x_ref[...].astype(jnp.bfloat16)                       # (HW, 1088)

    # ---- branch1a (1x1 -> 128) and branch0 (1x1 -> 192), one fused matmul ----
    y01 = jnp.dot(x_bf, w01_ref[...], preferred_element_type=jnp.float32)
    y01 = jnp.maximum(y01 * s01_ref[...] + b01_ref[...], 0.0)    # (HW, 320) f32
    y1a = y01[:, :C1A]                                           # (HW, 128)
    x0 = y01[:, C1A:]                                            # (HW, 192)

    # ---- branch1b: 1x7 conv along W (padding 3) as 7 shifted-window matmuls ----
    pw_ref[...] = jnp.zeros_like(pw_ref)                         # (H, 3W, 128)
    pw_ref[:, W:2 * W, :] = y1a.reshape(H, W, C1A)               # aligned write
    acc = jnp.zeros((HW, 160), jnp.float32)
    for t in range(7):                                           # tap t <-> kw=t
        win = pw_ref[:, pl.ds(W - 3 + t, W), :].reshape(HW, C1A)
        acc = acc + jnp.dot(win.astype(jnp.bfloat16), w1b_ref[t],
                            preferred_element_type=jnp.float32)
    y1b = jnp.maximum(acc * s1b_ref[...] + b1b_ref[...], 0.0)    # (HW, 160)

    # ---- branch1c: 7x1 conv along H (padding 3) ----
    ph_ref[...] = jnp.zeros_like(ph_ref)                         # (H+6, W, 160)
    ph_ref[3:3 + H, :, :] = y1b.reshape(H, W, 160)
    acc = jnp.zeros((HW, 192), jnp.float32)
    for t in range(7):                                           # tap t <-> kh=t
        win = ph_ref[pl.ds(t, H), :, :].reshape(HW, 160)
        acc = acc + jnp.dot(win.astype(jnp.bfloat16), w1c_ref[t],
                            preferred_element_type=jnp.float32)
    x1 = jnp.maximum(acc * s1c_ref[...] + b1c_ref[...], 0.0)     # (HW, 192)

    # ---- final 1x1 conv (concat-free: two accumulated matmuls) + residual ----
    acc2 = jnp.dot(x0.astype(jnp.bfloat16), w2a_ref[...],
                   preferred_element_type=jnp.float32)
    acc2 = acc2 + jnp.dot(x1.astype(jnp.bfloat16), w2b_ref[...],
                          preferred_element_type=jnp.float32)
    o_ref[...] = jnp.maximum(
        (acc2 + b2_ref[...]) * scale_ref[...] + x_ref[...], 0.0)


# ----------------------------------------------------------------------------
# Glue: BN folding, weight reshaping
# ----------------------------------------------------------------------------
def fold_bn(bn):
    gamma, beta, mean, var = bn
    s = gamma / jnp.sqrt(var + EPS)
    return s, beta - mean * s


def w1x1_to_mat(w):          # (O, I, 1, 1) -> (I, O)
    return jnp.transpose(w[:, :, 0, 0], (1, 0))


# ----------------------------------------------------------------------------
# Block17 forward (fused Pallas path)
# ----------------------------------------------------------------------------
def block17_forward(x_nchw, params, scale=1.0):
    N, C, H, W = x_nchw.shape                   # C == 1088 (fixed by the module)
    assert C == 1088
    HW = H * W
    assert W % 8 == 0 and HW % 8 == 0           # lane/sublane friendly test shapes

    xf = jnp.transpose(x_nchw, (0, 2, 3, 1)).reshape(N * HW, C).astype(jnp.float32)

    s0, b0 = fold_bn(params["b0_bn"])
    s1a, b1a = fold_bn(params["b1a_bn"])
    s1b, b1b = fold_bn(params["b1b_bn"])
    s1c, b1c = fold_bn(params["b1c_bn"])

    # Fused [branch1a | branch0] 1x1 weight (1088, 128+192): branch1a first so
    # both in-kernel slices start at lane-aligned offsets (0 and 128).
    w01 = jnp.concatenate([w1x1_to_mat(params["b1a_w"]),
                           w1x1_to_mat(params["b0_w"])], axis=1).astype(jnp.bfloat16)
    s01 = jnp.concatenate([s1a, s0]).reshape(1, 320).astype(jnp.float32)
    b01 = jnp.concatenate([b1a, b0]).reshape(1, 320).astype(jnp.float32)

    # (O,I,1,7) -> (7, I, O) and (O,I,7,1) -> (7, I, O), per-tap matmul weights.
    w1b = jnp.transpose(params["b1b_w"][:, :, 0, :], (2, 1, 0)).astype(jnp.bfloat16)
    w1c = jnp.transpose(params["b1c_w"][:, :, :, 0], (2, 1, 0)).astype(jnp.bfloat16)

    # Final 1x1 conv weight split into the two concat halves (concat-free).
    w2 = w1x1_to_mat(params["c2_w"])            # (384, 1088); rows 0:192 = x0
    w2a = w2[:192].astype(jnp.bfloat16)
    w2b = w2[192:].astype(jnp.bfloat16)
    b2 = params["c2_b"].reshape(1, C).astype(jnp.float32)

    scale_arr = jnp.full((1, 1), scale, jnp.float32)

    kernel = functools.partial(_block17_kernel, H=H, W=W)
    cmap2 = lambda n: (0, 0)
    cmap3 = lambda n: (0, 0, 0)

    out = pl.pallas_call(
        kernel,
        out_shape=jax.ShapeDtypeStruct((N * HW, C), jnp.float32),
        grid_spec=pltpu.PrefetchScalarGridSpec(
            num_scalar_prefetch=0,
            grid=(N,),
            in_specs=[
                pl.BlockSpec((HW, C), lambda n: (n, 0)),      # x (f32 residual)
                pl.BlockSpec((1, 1), cmap2),                  # scale
                pl.BlockSpec((C, 320), cmap2),                # fused 1x1 weight
                pl.BlockSpec((1, 320), cmap2),                # fused scale
                pl.BlockSpec((1, 320), cmap2),                # fused bias
                pl.BlockSpec((7, 128, 160), cmap3),           # 1x7 taps
                pl.BlockSpec((1, 160), cmap2),
                pl.BlockSpec((1, 160), cmap2),
                pl.BlockSpec((7, 160, 192), cmap3),           # 7x1 taps
                pl.BlockSpec((1, 192), cmap2),
                pl.BlockSpec((1, 192), cmap2),
                pl.BlockSpec((192, C), cmap2),                # c2 weight half (x0)
                pl.BlockSpec((192, C), cmap2),                # c2 weight half (x1)
                pl.BlockSpec((1, C), cmap2),                  # c2 bias
            ],
            out_specs=pl.BlockSpec((HW, C), lambda n: (n, 0)),
            scratch_shapes=[
                pltpu.VMEM((H, 3 * W, 128), jnp.float32),     # W-padded branch1a
                pltpu.VMEM((H + 6, W, 160), jnp.float32),     # H-padded branch1b
            ],
        ),
        compiler_params=pltpu.CompilerParams(
            dimension_semantics=("parallel",)),
    )(xf, scale_arr,
      w01, s01, b01,
      w1b, s1b.reshape(1, 160).astype(jnp.float32), b1b.reshape(1, 160).astype(jnp.float32),
      w1c, s1c.reshape(1, 192).astype(jnp.float32), b1c.reshape(1, 192).astype(jnp.float32),
      w2a, w2b, b2)

    out = out.reshape(N, H, W, C)
    return jnp.transpose(out, (0, 3, 1, 2))     # back to NCHW


# ----------------------------------------------------------------------------
# Pure-JAX reference (NCHW convs) for verification
# ----------------------------------------------------------------------------
def ref_block17(x, p, scale=1.0):
    dn = ("NCHW", "OIHW", "NCHW")

    def bconv(x, w, bn, pad):
        y = jax.lax.conv_general_dilated(x, w, (1, 1), pad, dimension_numbers=dn)
        g, b, m, v = bn
        y = (y - m[None, :, None, None]) / jnp.sqrt(v[None, :, None, None] + EPS)
        y = y * g[None, :, None, None] + b[None, :, None, None]
        return jnp.maximum(y, 0.0)

    x0 = bconv(x, p["b0_w"], p["b0_bn"], "VALID")
    y = bconv(x, p["b1a_w"], p["b1a_bn"], "VALID")
    y = bconv(y, p["b1b_w"], p["b1b_bn"], ((0, 0), (3, 3)))
    y = bconv(y, p["b1c_w"], p["b1c_bn"], ((3, 3), (0, 0)))
    out = jnp.concatenate([x0, y], axis=1)
    out = jax.lax.conv_general_dilated(out, p["c2_w"], (1, 1), "VALID",
                                       dimension_numbers=dn)
    out = out + p["c2_b"][None, :, None, None]
    return jnp.maximum(out * scale + x, 0.0)


# ----------------------------------------------------------------------------
# Deterministic parameter initialization
# ----------------------------------------------------------------------------
def init_params(key):
    ks = iter(jax.random.split(key, 24))

    def conv_w(o, i, kh, kw):
        fan_in = i * kh * kw
        return jax.random.normal(next(ks), (o, i, kh, kw), jnp.float32) / jnp.sqrt(fan_in)

    def bn(c):
        gamma = jax.random.uniform(next(ks), (c,), jnp.float32, 0.5, 1.5)
        beta = 0.1 * jax.random.normal(next(ks), (c,), jnp.float32)
        mean = 0.1 * jax.random.normal(next(ks), (c,), jnp.float32)
        var = jax.random.uniform(next(ks), (c,), jnp.float32, 0.5, 1.5)
        return (gamma, beta, mean, var)

    return {
        "b0_w": conv_w(192, 1088, 1, 1), "b0_bn": bn(192),
        "b1a_w": conv_w(128, 1088, 1, 1), "b1a_bn": bn(128),
        "b1b_w": conv_w(160, 128, 1, 7), "b1b_bn": bn(160),
        "b1c_w": conv_w(192, 160, 7, 1), "b1c_bn": bn(192),
        "c2_w": conv_w(1088, 384, 1, 1),
        "c2_b": 0.1 * jax.random.normal(next(ks), (1088,), jnp.float32),
    }


if __name__ == "__main__":
    key = jax.random.PRNGKey(0)
    kx, kp = jax.random.split(key)

    # small spatial extent; channel counts are fixed by the module (1088 in/out)
    x = jax.random.normal(kx, (2, 1088, 8, 8), jnp.float32)   # NCHW
    params = init_params(kp)
    scale = 0.17

    out = block17_forward(x, params, scale=scale)
    out = jax.block_until_ready(out)

    ref = jax.block_until_ready(ref_block17(x, params, scale=scale))
    # bf16 matmuls with f32 accumulation: small drift vs the f32 reference.
    np.testing.assert_allclose(np.asarray(out), np.asarray(ref), rtol=5e-2, atol=5e-2)

    assert out.shape == x.shape and out.dtype == jnp.float32
    print("KERNEL_OK")
</pallas_src>

<mosaic_0001>
module attributes {stable_mosaic.version = 11 : i64} {
  func.func @_block17_kernel(%arg0: i32, %arg1: memref<64x1088xf32, #tpu.memory_space<vmem>>, %arg2: memref<1x1xf32, #tpu.memory_space<vmem>>, %arg3: memref<1088x320xbf16, #tpu.memory_space<vmem>>, %arg4: memref<1x320xf32, #tpu.memory_space<vmem>>, %arg5: memref<1x320xf32, #tpu.memory_space<vmem>>, %arg6: memref<7x128x160xbf16, #tpu.memory_space<vmem>>, %arg7: memref<1x160xf32, #tpu.memory_space<vmem>>, %arg8: memref<1x160xf32, #tpu.memory_space<vmem>>, %arg9: memref<7x160x192xbf16, #tpu.memory_space<vmem>>, %arg10: memref<1x192xf32, #tpu.memory_space<vmem>>, %arg11: memref<1x192xf32, #tpu.memory_space<vmem>>, %arg12: memref<192x1088xbf16, #tpu.memory_space<vmem>>, %arg13: memref<192x1088xbf16, #tpu.memory_space<vmem>>, %arg14: memref<1x1088xf32, #tpu.memory_space<vmem>>, %arg15: memref<64x1088xf32, #tpu.memory_space<vmem>>, %arg16: memref<8x24x128xf32, #tpu.memory_space<vmem>>, %arg17: memref<14x8x160xf32, #tpu.memory_space<vmem>>) attributes {dimension_semantics = [#tpu.dimension_semantics<parallel>], iteration_bounds = array<i64: 2>, scalar_prefetch = 0 : i64, scratch_operands = 2 : i64, tpu.core_type = #tpu.core_type<tc>, window_params = [{transform_indices = @transform_0, window_bounds = array<i64: 64, 1088>}, {pipeline_mode = #tpu.pipeline_mode<synchronous>, transform_indices = @transform_1, window_bounds = array<i64: 1, 1>}, {pipeline_mode = #tpu.pipeline_mode<synchronous>, transform_indices = @transform_2, window_bounds = array<i64: 1088, 320>}, {pipeline_mode = #tpu.pipeline_mode<synchronous>, transform_indices = @transform_3, window_bounds = array<i64: 1, 320>}, {pipeline_mode = #tpu.pipeline_mode<synchronous>, transform_indices = @transform_4, window_bounds = array<i64: 1, 320>}, {pipeline_mode = #tpu.pipeline_mode<synchronous>, transform_indices = @transform_5, window_bounds = array<i64: 7, 128, 160>}, {pipeline_mode = #tpu.pipeline_mode<synchronous>, transform_indices = @transform_6, window_bounds = array<i64: 1, 160>}, {pipeline_mode = #tpu.pipeline_mode<synchronous>, transform_indices = @transform_7, window_bounds = array<i64: 1, 160>}, {pipeline_mode = #tpu.pipeline_mode<synchronous>, transform_indices = @transform_8, window_bounds = array<i64: 7, 160, 192>}, {pipeline_mode = #tpu.pipeline_mode<synchronous>, transform_indices = @transform_9, window_bounds = array<i64: 1, 192>}, {pipeline_mode = #tpu.pipeline_mode<synchronous>, transform_indices = @transform_10, window_bounds = array<i64: 1, 192>}, {pipeline_mode = #tpu.pipeline_mode<synchronous>, transform_indices = @transform_11, window_bounds = array<i64: 192, 1088>}, {pipeline_mode = #tpu.pipeline_mode<synchronous>, transform_indices = @transform_12, window_bounds = array<i64: 192, 1088>}, {pipeline_mode = #tpu.pipeline_mode<synchronous>, transform_indices = @transform_13, window_bounds = array<i64: 1, 1088>}, {transform_indices = @transform_14, window_bounds = array<i64: 64, 1088>}]} {
    %c0 = arith.constant 0 : index
    %c0_0 = arith.constant 0 : index
    %0 = vector.load %arg1[%c0, %c0_0] : memref<64x1088xf32, #tpu.memory_space<vmem>>, vector<64x1088xf32>
    %1 = arith.truncf %0 : vector<64x1088xf32> to vector<64x1088xbf16>
    %c0_1 = arith.constant 0 : index
    %c0_2 = arith.constant 0 : index
    %2 = vector.load %arg3[%c0_1, %c0_2] : memref<1088x320xbf16, #tpu.memory_space<vmem>>, vector<1088x320xbf16>
    %cst = arith.constant dense<0.000000e+00> : vector<64x320xf32>
    %3 = tpu.matmul %1, %2, %cst {dimension_numbers = #tpu.dot_dimension_numbers<[1], [0], [0], [1], [0, 0, 1, 1], [], []>} : vector<64x1088xbf16>, vector<1088x320xbf16>, vector<64x320xf32> -> vector<64x320xf32>
    %c0_3 = arith.constant 0 : index
    %c0_4 = arith.constant 0 : index
    %4 = vector.load %arg4[%c0_3, %c0_4] : memref<1x320xf32, #tpu.memory_space<vmem>>, vector<1x320xf32>
    %5 = vector.broadcast %4 : vector<1x320xf32> to vector<64x320xf32>
    %6 = arith.mulf %3, %5 : vector<64x320xf32>
    %c0_5 = arith.constant 0 : index
    %c0_6 = arith.constant 0 : index
    %7 = vector.load %arg5[%c0_5, %c0_6] : memref<1x320xf32, #tpu.memory_space<vmem>>, vector<1x320xf32>
    %8 = vector.broadcast %7 : vector<1x320xf32> to vector<64x320xf32>
    %9 = arith.addf %6, %8 : vector<64x320xf32>
    %cst_7 = arith.constant 0.000000e+00 : f32
    %10 = vector.broadcast %cst_7 : f32 to vector<64x320xf32>
    %11 = arith.maximumf %9, %10 : vector<64x320xf32>
    %12 = vector.extract_strided_slice %11 {offsets = [0, 0], sizes = [64, 128], strides = [1, 1]} : vector<64x320xf32> to vector<64x128xf32>
    %13 = vector.extract_strided_slice %11 {offsets = [0, 128], sizes = [64, 192], strides = [1, 1]} : vector<64x320xf32> to vector<64x192xf32>
    %cst_8 = arith.constant 0.000000e+00 : f32
    %14 = vector.broadcast %cst_8 : f32 to vector<8x24x128xf32>
    %c0_9 = arith.constant 0 : index
    %c0_10 = arith.constant 0 : index
    %c0_11 = arith.constant 0 : index
    %15 = vector.load %arg16[%c0_9, %c0_10, %c0_11] : memref<8x24x128xf32, #tpu.memory_space<vmem>>, vector<8x24x128xf32>
    tpu.vector_store %arg16[%c0_9, %c0_10, %c0_11], %14 {strides = array<i32>} : memref<8x24x128xf32, #tpu.memory_space<vmem>>, vector<8x24x128xf32>,
    %16 = vector.shape_cast %12 : vector<64x128xf32> to vector<8x8x128xf32>
    %c0_12 = arith.constant 0 : index
    %c8 = arith.constant 8 : index
    %c0_13 = arith.constant 0 : index
    %17 = vector.load %arg16[%c0_12, %c8, %c0_13] : memref<8x24x128xf32, #tpu.memory_space<vmem>>, vector<8x8x128xf32>
    tpu.vector_store %arg16[%c0_12, %c8, %c0_13], %16 {strides = array<i32>} : memref<8x24x128xf32, #tpu.memory_space<vmem>>, vector<8x8x128xf32>,
    %cst_14 = arith.constant 0.000000e+00 : f32
    %18 = vector.broadcast %cst_14 : f32 to vector<64x160xf32>
    %c0_15 = arith.constant 0 : index
    %c5 = arith.constant 5 : index
    %c0_16 = arith.constant 0 : index
    %19 = vector.load %arg16[%c0_15, %c5, %c0_16] : memref<8x24x128xf32, #tpu.memory_space<vmem>>, vector<8x8x128xf32>
    %20 = vector.shape_cast %19 : vector<8x8x128xf32> to vector<64x128xf32>
    %21 = arith.truncf %20 : vector<64x128xf32> to vector<64x128xbf16>
    %c0_17 = arith.constant 0 : index
    %c0_18 = arith.constant 0 : index
    %c0_19 = arith.constant 0 : index
    %22 = vector.load %arg6[%c0_17, %c0_18, %c0_19] : memref<7x128x160xbf16, #tpu.memory_space<vmem>>, vector<1x128x160xbf16>
    %23 = vector.shape_cast %22 : vector<1x128x160xbf16> to vector<128x160xbf16>
    %cst_20 = arith.constant dense<0.000000e+00> : vector<64x160xf32>
    %24 = tpu.matmul %21, %23, %cst_20 {dimension_numbers = #tpu.dot_dimension_numbers<[1], [0], [0], [1], [0, 0, 1, 1], [], []>} : vector<64x128xbf16>, vector<128x160xbf16>, vector<64x160xf32> -> vector<64x160xf32>
    %25 = arith.addf %18, %24 : vector<64x160xf32>
    %c0_21 = arith.constant 0 : index
    %c6 = arith.constant 6 : index
    %c0_22 = arith.constant 0 : index
    %26 = vector.load %arg16[%c0_21, %c6, %c0_22] : memref<8x24x128xf32, #tpu.memory_space<vmem>>, vector<8x8x128xf32>
    %27 = vector.shape_cast %26 : vector<8x8x128xf32> to vector<64x128xf32>
    %28 = arith.truncf %27 : vector<64x128xf32> to vector<64x128xbf16>
    %c1 = arith.constant 1 : index
    %c0_23 = arith.constant 0 : index
    %c0_24 = arith.constant 0 : index
    %29 = vector.load %arg6[%c1, %c0_23, %c0_24] : memref<7x128x160xbf16, #tpu.memory_space<vmem>>, vector<1x128x160xbf16>
    %30 = vector.shape_cast %29 : vector<1x128x160xbf16> to vector<128x160xbf16>
    %cst_25 = arith.constant dense<0.000000e+00> : vector<64x160xf32>
    %31 = tpu.matmul %28, %30, %cst_25 {dimension_numbers = #tpu.dot_dimension_numbers<[1], [0], [0], [1], [0, 0, 1, 1], [], []>} : vector<64x128xbf16>, vector<128x160xbf16>, vector<64x160xf32> -> vector<64x160xf32>
    %32 = arith.addf %25, %31 : vector<64x160xf32>
    %c0_26 = arith.constant 0 : index
    %c7 = arith.constant 7 : index
    %c0_27 = arith.constant 0 : index
    %33 = vector.load %arg16[%c0_26, %c7, %c0_27] : memref<8x24x128xf32, #tpu.memory_space<vmem>>, vector<8x8x128xf32>
    %34 = vector.shape_cast %33 : vector<8x8x128xf32> to vector<64x128xf32>
    %35 = arith.truncf %34 : vector<64x128xf32> to vector<64x128xbf16>
    %c2 = arith.constant 2 : index
    %c0_28 = arith.constant 0 : index
    %c0_29 = arith.constant 0 : index
    %36 = vector.load %arg6[%c2, %c0_28, %c0_29] : memref<7x128x160xbf16, #tpu.memory_space<vmem>>, vector<1x128x160xbf16>
    %37 = vector.shape_cast %36 : vector<1x128x160xbf16> to vector<128x160xbf16>
    %cst_30 = arith.constant dense<0.000000e+00> : vector<64x160xf32>
    %38 = tpu.matmul %35, %37, %cst_30 {dimension_numbers = #tpu.dot_dimension_numbers<[1], [0], [0], [1], [0, 0, 1, 1], [], []>} : vector<64x128xbf16>, vector<128x160xbf16>, vector<64x160xf32> -> vector<64x160xf32>
    %39 = arith.addf %32, %38 : vector<64x160xf32>
    %c0_31 = arith.constant 0 : index
    %c8_32 = arith.constant 8 : index
    %c0_33 = arith.constant 0 : index
    %40 = vector.load %arg16[%c0_31, %c8_32, %c0_33] : memref<8x24x128xf32, #tpu.memory_space<vmem>>, vector<8x8x128xf32>
    %41 = vector.shape_cast %40 : vector<8x8x128xf32> to vector<64x128xf32>
    %42 = arith.truncf %41 : vector<64x128xf32> to vector<64x128xbf16>
    %c3 = arith.constant 3 : index
    %c0_34 = arith.constant 0 : index
    %c0_35 = arith.constant 0 : index
    %43 = vector.load %arg6[%c3, %c0_34, %c0_35] : memref<7x128x160xbf16, #tpu.memory_space<vmem>>, vector<1x128x160xbf16>
    %44 = vector.shape_cast %43 : vector<1x128x160xbf16> to vector<128x160xbf16>
    %cst_36 = arith.constant dense<0.000000e+00> : vector<64x160xf32>
    %45 = tpu.matmul %42, %44, %cst_36 {dimension_numbers = #tpu.dot_dimension_numbers<[1], [0], [0], [1], [0, 0, 1, 1], [], []>} : vector<64x128xbf16>, vector<128x160xbf16>, vector<64x160xf32> -> vector<64x160xf32>
    %46 = arith.addf %39, %45 : vector<64x160xf32>
    %c0_37 = arith.constant 0 : index
    %c9 = arith.constant 9 : index
    %c0_38 = arith.constant 0 : index
    %47 = vector.load %arg16[%c0_37, %c9, %c0_38] : memref<8x24x128xf32, #tpu.memory_space<vmem>>, vector<8x8x128xf32>
    %48 = vector.shape_cast %47 : vector<8x8x128xf32> to vector<64x128xf32>
    %49 = arith.truncf %48 : vector<64x128xf32> to vector<64x128xbf16>
    %c4 = arith.constant 4 : index
    %c0_39 = arith.constant 0 : index
    %c0_40 = arith.constant 0 : index
    %50 = vector.load %arg6[%c4, %c0_39, %c0_40] : memref<7x128x160xbf16, #tpu.memory_space<vmem>>, vector<1x128x160xbf16>
    %51 = vector.shape_cast %50 : vector<1x128x160xbf16> to vector<128x160xbf16>
    %cst_41 = arith.constant dense<0.000000e+00> : vector<64x160xf32>
    %52 = tpu.matmul %49, %51, %cst_41 {dimension_numbers = #tpu.dot_dimension_numbers<[1], [0], [0], [1], [0, 0, 1, 1], [], []>} : vector<64x128xbf16>, vector<128x160xbf16>, vector<64x160xf32> -> vector<64x160xf32>
    %53 = arith.addf %46, %52 : vector<64x160xf32>
    %c0_42 = arith.constant 0 : index
    %c10 = arith.constant 10 : index
    %c0_43 = arith.constant 0 : index
    %54 = vector.load %arg16[%c0_42, %c10, %c0_43] : memref<8x24x128xf32, #tpu.memory_space<vmem>>, vector<8x8x128xf32>
    %55 = vector.shape_cast %54 : vector<8x8x128xf32> to vector<64x128xf32>
    %56 = arith.truncf %55 : vector<64x128xf32> to vector<64x128xbf16>
    %c5_44 = arith.constant 5 : index
    %c0_45 = arith.constant 0 : index
    %c0_46 = arith.constant 0 : index
    %57 = vector.load %arg6[%c5_44, %c0_45, %c0_46] : memref<7x128x160xbf16, #tpu.memory_space<vmem>>, vector<1x128x160xbf16>
    %58 = vector.shape_cast %57 : vector<1x128x160xbf16> to vector<128x160xbf16>
    %cst_47 = arith.constant dense<0.000000e+00> : vector<64x160xf32>
    %59 = tpu.matmul %56, %58, %cst_47 {dimension_numbers = #tpu.dot_dimension_numbers<[1], [0], [0], [1], [0, 0, 1, 1], [], []>} : vector<64x128xbf16>, vector<128x160xbf16>, vector<64x160xf32> -> vector<64x160xf32>
    %60 = arith.addf %53, %59 : vector<64x160xf32>
    %c0_48 = arith.constant 0 : index
    %c11 = arith.constant 11 : index
    %c0_49 = arith.constant 0 : index
    %61 = vector.load %arg16[%c0_48, %c11, %c0_49] : memref<8x24x128xf32, #tpu.memory_space<vmem>>, vector<8x8x128xf32>
    %62 = vector.shape_cast %61 : vector<8x8x128xf32> to vector<64x128xf32>
    %63 = arith.truncf %62 : vector<64x128xf32> to vector<64x128xbf16>
    %c6_50 = arith.constant 6 : index
    %c0_51 = arith.constant 0 : index
    %c0_52 = arith.constant 0 : index
    %64 = vector.load %arg6[%c6_50, %c0_51, %c0_52] : memref<7x128x160xbf16, #tpu.memory_space<vmem>>, vector<1x128x160xbf16>
    %65 = vector.shape_cast %64 : vector<1x128x160xbf16> to vector<128x160xbf16>
    %cst_53 = arith.constant dense<0.000000e+00> : vector<64x160xf32>
    %66 = tpu.matmul %63, %65, %cst_53 {dimension_numbers = #tpu.dot_dimension_numbers<[1], [0], [0], [1], [0, 0, 1, 1], [], []>} : vector<64x128xbf16>, vector<128x160xbf16>, vector<64x160xf32> -> vector<64x160xf32>
    %67 = arith.addf %60, %66 : vector<64x160xf32>
    %c0_54 = arith.constant 0 : index
    %c0_55 = arith.constant 0 : index
    %68 = vector.load %arg7[%c0_54, %c0_55] : memref<1x160xf32, #tpu.memory_space<vmem>>, vector<1x160xf32>
    %69 = vector.broadcast %68 : vector<1x160xf32> to vector<64x160xf32>
    %70 = arith.mulf %67, %69 : vector<64x160xf32>
    %c0_56 = arith.constant 0 : index
    %c0_57 = arith.constant 0 : index
    %71 = vector.load %arg8[%c0_56, %c0_57] : memref<1x160xf32, #tpu.memory_space<vmem>>, vector<1x160xf32>
    %72 = vector.broadcast %71 : vector<1x160xf32> to vector<64x160xf32>
    %73 = arith.addf %70, %72 : vector<64x160xf32>
    %cst_58 = arith.constant 0.000000e+00 : f32
    %74 = vector.broadcast %cst_58 : f32 to vector<64x160xf32>
    %75 = arith.maximumf %73, %74 : vector<64x160xf32>
    %cst_59 = arith.constant 0.000000e+00 : f32
    %76 = vector.broadcast %cst_59 : f32 to vector<14x8x160xf32>
    %c0_60 = arith.constant 0 : index
    %c0_61 = arith.constant 0 : index
    %c0_62 = arith.constant 0 : index
    %77 = vector.load %arg17[%c0_60, %c0_61, %c0_62] : memref<14x8x160xf32, #tpu.memory_space<vmem>>, vector<14x8x160xf32>
    tpu.vector_store %arg17[%c0_60, %c0_61, %c0_62], %76 {strides = array<i32>} : memref<14x8x160xf32, #tpu.memory_space<vmem>>, vector<14x8x160xf32>,
    %78 = vector.shape_cast %75 : vector<64x160xf32> to vector<8x8x160xf32>
    %c3_63 = arith.constant 3 : index
    %c0_64 = arith.constant 0 : index
    %c0_65 = arith.constant 0 : index
    %79 = vector.load %arg17[%c3_63, %c0_64, %c0_65] : memref<14x8x160xf32, #tpu.memory_space<vmem>>, vector<8x8x160xf32>
    tpu.vector_store %arg17[%c3_63, %c0_64, %c0_65], %78 {strides = array<i32>} : memref<14x8x160xf32, #tpu.memory_space<vmem>>, vector<8x8x160xf32>,
    %cst_66 = arith.constant 0.000000e+00 : f32
    %80 = vector.broadcast %cst_66 : f32 to vector<64x192xf32>
    %c0_67 = arith.constant 0 : index
    %c0_68 = arith.constant 0 : index
    %c0_69 = arith.constant 0 : index
    %81 = vector.load %arg17[%c0_67, %c0_68, %c0_69] : memref<14x8x160xf32, #tpu.memory_space<vmem>>, vector<8x8x160xf32>
    %82 = vector.shape_cast %81 : vector<8x8x160xf32> to vector<64x160xf32>
    %83 = arith.truncf %82 : vector<64x160xf32> to vector<64x160xbf16>
    %c0_70 = arith.constant 0 : index
    %c0_71 = arith.constant 0 : index
    %c0_72 = arith.constant 0 : index
    %84 = vector.load %arg9[%c0_70, %c0_71, %c0_72] : memref<7x160x192xbf16, #tpu.memory_space<vmem>>, vector<1x160x192xbf16>
    %85 = vector.shape_cast %84 : vector<1x160x192xbf16> to vector<160x192xbf16>
    %cst_73 = arith.constant dense<0.000000e+00> : vector<64x192xf32>
    %86 = tpu.matmul %83, %85, %cst_73 {dimension_numbers = #tpu.dot_dimension_numbers<[1], [0], [0], [1], [0, 0, 1, 1], [], []>} : vector<64x160xbf16>, vector<160x192xbf16>, vector<64x192xf32> -> vector<64x192xf32>
    %87 = arith.addf %80, %86 : vector<64x192xf32>
    %c1_74 = arith.constant 1 : index
    %c0_75 = arith.constant 0 : index
    %c0_76 = arith.constant 0 : index
    %88 = vector.load %arg17[%c1_74, %c0_75, %c0_76] : memref<14x8x160xf32, #tpu.memory_space<vmem>>, vector<8x8x160xf32>
    %89 = vector.shape_cast %88 : vector<8x8x160xf32> to vector<64x160xf32>
    %90 = arith.truncf %89 : vector<64x160xf32> to vector<64x160xbf16>
    %c1_77 = arith.constant 1 : index
    %c0_78 = arith.constant 0 : index
    %c0_79 = arith.constant 0 : index
    %91 = vector.load %arg9[%c1_77, %c0_78, %c0_79] : memref<7x160x192xbf16, #tpu.memory_space<vmem>>, vector<1x160x192xbf16>
    %92 = vector.shape_cast %91 : vector<1x160x192xbf16> to vector<160x192xbf16>
    %cst_80 = arith.constant dense<0.000000e+00> : vector<64x192xf32>
    %93 = tpu.matmul %90, %92, %cst_80 {dimension_numbers = #tpu.dot_dimension_numbers<[1], [0], [0], [1], [0, 0, 1, 1], [], []>} : vector<64x160xbf16>, vector<160x192xbf16>, vector<64x192xf32> -> vector<64x192xf32>
    %94 = arith.addf %87, %93 : vector<64x192xf32>
    %c2_81 = arith.constant 2 : index
    %c0_82 = arith.constant 0 : index
    %c0_83 = arith.constant 0 : index
    %95 = vector.load %arg17[%c2_81, %c0_82, %c0_83] : memref<14x8x160xf32, #tpu.memory_space<vmem>>, vector<8x8x160xf32>
    %96 = vector.shape_cast %95 : vector<8x8x160xf32> to vector<64x160xf32>
    %97 = arith.truncf %96 : vector<64x160xf32> to vector<64x160xbf16>
    %c2_84 = arith.constant 2 : index
    %c0_85 = arith.constant 0 : index
    %c0_86 = arith.constant 0 : index
    %98 = vector.load %arg9[%c2_84, %c0_85, %c0_86] : memref<7x160x192xbf16, #tpu.memory_space<vmem>>, vector<1x160x192xbf16>
    %99 = vector.shape_cast %98 : vector<1x160x192xbf16> to vector<160x192xbf16>
    %cst_87 = arith.constant dense<0.000000e+00> : vector<64x192xf32>
    %100 = tpu.matmul %97, %99, %cst_87 {dimension_numbers = #tpu.dot_dimension_numbers<[1], [0], [0], [1], [0, 0, 1, 1], [], []>} : vector<64x160xbf16>, vector<160x192xbf16>, vector<64x192xf32> -> vector<64x192xf32>
    %101 = arith.addf %94, %100 : vector<64x192xf32>
    %c3_88 = arith.constant 3 : index
    %c0_89 = arith.constant 0 : index
    %c0_90 = arith.constant 0 : index
    %102 = vector.load %arg17[%c3_88, %c0_89, %c0_90] : memref<14x8x160xf32, #tpu.memory_space<vmem>>, vector<8x8x160xf32>
    %103 = vector.shape_cast %102 : vector<8x8x160xf32> to vector<64x160xf32>
    %104 = arith.truncf %103 : vector<64x160xf32> to vector<64x160xbf16>
    %c3_91 = arith.constant 3 : index
    %c0_92 = arith.constant 0 : index
    %c0_93 = arith.constant 0 : index
    %105 = vector.load %arg9[%c3_91, %c0_92, %c0_93] : memref<7x160x192xbf16, #tpu.memory_space<vmem>>, vector<1x160x192xbf16>
    %106 = vector.shape_cast %105 : vector<1x160x192xbf16> to vector<160x192xbf16>
    %cst_94 = arith.constant dense<0.000000e+00> : vector<64x192xf32>
    %107 = tpu.matmul %104, %106, %cst_94 {dimension_numbers = #tpu.dot_dimension_numbers<[1], [0], [0], [1], [0, 0, 1, 1], [], []>} : vector<64x160xbf16>, vector<160x192xbf16>, vector<64x192xf32> -> vector<64x192xf32>
    %108 = arith.addf %101, %107 : vector<64x192xf32>
    %c4_95 = arith.constant 4 : index
    %c0_96 = arith.constant 0 : index
    %c0_97 = arith.constant 0 : index
    %109 = vector.load %arg17[%c4_95, %c0_96, %c0_97] : memref<14x8x160xf32, #tpu.memory_space<vmem>>, vector<8x8x160xf32>
    %110 = vector.shape_cast %109 : vector<8x8x160xf32> to vector<64x160xf32>
    %111 = arith.truncf %110 : vector<64x160xf32> to vector<64x160xbf16>
    %c4_98 = arith.constant 4 : index
    %c0_99 = arith.constant 0 : index
    %c0_100 = arith.constant 0 : index
    %112 = vector.load %arg9[%c4_98, %c0_99, %c0_100] : memref<7x160x192xbf16, #tpu.memory_space<vmem>>, vector<1x160x192xbf16>
    %113 = vector.shape_cast %112 : vector<1x160x192xbf16> to vector<160x192xbf16>
    %cst_101 = arith.constant dense<0.000000e+00> : vector<64x192xf32>
    %114 = tpu.matmul %111, %113, %cst_101 {dimension_numbers = #tpu.dot_dimension_numbers<[1], [0], [0], [1], [0, 0, 1, 1], [], []>} : vector<64x160xbf16>, vector<160x192xbf16>, vector<64x192xf32> -> vector<64x192xf32>
    %115 = arith.addf %108, %114 : vector<64x192xf32>
    %c5_102 = arith.constant 5 : index
    %c0_103 = arith.constant 0 : index
    %c0_104 = arith.constant 0 : index
    %116 = vector.load %arg17[%c5_102, %c0_103, %c0_104] : memref<14x8x160xf32, #tpu.memory_space<vmem>>, vector<8x8x160xf32>
    %117 = vector.shape_cast %116 : vector<8x8x160xf32> to vector<64x160xf32>
    %118 = arith.truncf %117 : vector<64x160xf32> to vector<64x160xbf16>
    %c5_105 = arith.constant 5 : index
    %c0_106 = arith.constant 0 : index
    %c0_107 = arith.constant 0 : index
    %119 = vector.load %arg9[%c5_105, %c0_106, %c0_107] : memref<7x160x192xbf16, #tpu.memory_space<vmem>>, vector<1x160x192xbf16>
    %120 = vector.shape_cast %119 : vector<1x160x192xbf16> to vector<160x192xbf16>
    %cst_108 = arith.constant dense<0.000000e+00> : vector<64x192xf32>
    %121 = tpu.matmul %118, %120, %cst_108 {dimension_numbers = #tpu.dot_dimension_numbers<[1], [0], [0], [1], [0, 0, 1, 1], [], []>} : vector<64x160xbf16>, vector<160x192xbf16>, vector<64x192xf32> -> vector<64x192xf32>
    %122 = arith.addf %115, %121 : vector<64x192xf32>
    %c6_109 = arith.constant 6 : index
    %c0_110 = arith.constant 0 : index
    %c0_111 = arith.constant 0 : index
    %123 = vector.load %arg17[%c6_109, %c0_110, %c0_111] : memref<14x8x160xf32, #tpu.memory_space<vmem>>, vector<8x8x160xf32>
    %124 = vector.shape_cast %123 : vector<8x8x160xf32> to vector<64x160xf32>
    %125 = arith.truncf %124 : vector<64x160xf32> to vector<64x160xbf16>
    %c6_112 = arith.constant 6 : index
    %c0_113 = arith.constant 0 : index
    %c0_114 = arith.constant 0 : index
    %126 = vector.load %arg9[%c6_112, %c0_113, %c0_114] : memref<7x160x192xbf16, #tpu.memory_space<vmem>>, vector<1x160x192xbf16>
    %127 = vector.shape_cast %126 : vector<1x160x192xbf16> to vector<160x192xbf16>
    %cst_115 = arith.constant dense<0.000000e+00> : vector<64x192xf32>
    %128 = tpu.matmul %125, %127, %cst_115 {dimension_numbers = #tpu.dot_dimension_numbers<[1], [0], [0], [1], [0, 0, 1, 1], [], []>} : vector<64x160xbf16>, vector<160x192xbf16>, vector<64x192xf32> -> vector<64x192xf32>
    %129 = arith.addf %122, %128 : vector<64x192xf32>
    %c0_116 = arith.constant 0 : index
    %c0_117 = arith.constant 0 : index
    %130 = vector.load %arg10[%c0_116, %c0_117] : memref<1x192xf32, #tpu.memory_space<vmem>>, vector<1x192xf32>
    %131 = vector.broadcast %130 : vector<1x192xf32> to vector<64x192xf32>
    %132 = arith.mulf %129, %131 : vector<64x192xf32>
    %c0_118 = arith.constant 0 : index
    %c0_119 = arith.constant 0 : index
    %133 = vector.load %arg11[%c0_118, %c0_119] : memref<1x192xf32, #tpu.memory_space<vmem>>, vector<1x192xf32>
    %134 = vector.broadcast %133 : vector<1x192xf32> to vector<64x192xf32>
    %135 = arith.addf %132, %134 : vector<64x192xf32>
    %cst_120 = arith.constant 0.000000e+00 : f32
    %136 = vector.broadcast %cst_120 : f32 to vector<64x192xf32>
    %137 = arith.maximumf %135, %136 : vector<64x192xf32>
    %138 = arith.truncf %13 : vector<64x192xf32> to vector<64x192xbf16>
    %c0_121 = arith.constant 0 : index
    %c0_122 = arith.constant 0 : index
    %139 = vector.load %arg12[%c0_121, %c0_122] : memref<192x1088xbf16, #tpu.memory_space<vmem>>, vector<192x1088xbf16>
    %cst_123 = arith.constant dense<0.000000e+00> : vector<64x1088xf32>
    %140 = tpu.matmul %138, %139, %cst_123 {dimension_numbers = #tpu.dot_dimension_numbers<[1], [0], [0], [1], [0, 0, 1, 1], [], []>} : vector<64x192xbf16>, vector<192x1088xbf16>, vector<64x1088xf32> -> vector<64x1088xf32>
    %141 = arith.truncf %137 : vector<64x192xf32> to vector<64x192xbf16>
    %c0_124 = arith.constant 0 : index
    %c0_125 = arith.constant 0 : index
    %142 = vector.load %arg13[%c0_124, %c0_125] : memref<192x1088xbf16, #tpu.memory_space<vmem>>, vector<192x1088xbf16>
    %cst_126 = arith.constant dense<0.000000e+00> : vector<64x1088xf32>
    %143 = tpu.matmul %141, %142, %cst_126 {dimension_numbers = #tpu.dot_dimension_numbers<[1], [0], [0], [1], [0, 0, 1, 1], [], []>} : vector<64x192xbf16>, vector<192x1088xbf16>, vector<64x1088xf32> -> vector<64x1088xf32>
    %144 = arith.addf %140, %143 : vector<64x1088xf32>
    %c0_127 = arith.constant 0 : index
    %c0_128 = arith.constant 0 : index
    %145 = vector.load %arg14[%c0_127, %c0_128] : memref<1x1088xf32, #tpu.memory_space<vmem>>, vector<1x1088xf32>
    %146 = vector.broadcast %145 : vector<1x1088xf32> to vector<64x1088xf32>
    %147 = arith.addf %144, %146 : vector<64x1088xf32>
    %c0_129 = arith.constant 0 : index
    %c0_130 = arith.constant 0 : index
    %148 = vector.load %arg2[%c0_129, %c0_130] : memref<1x1xf32, #tpu.memory_space<vmem>>, vector<1x1xf32>
    %149 = vector.broadcast %148 : vector<1x1xf32> to vector<64x1088xf32>
    %150 = arith.mulf %147, %149 : vector<64x1088xf32>
    %c0_131 = arith.constant 0 : index
    %c0_132 = arith.constant 0 : index
    %151 = vector.load %arg1[%c0_131, %c0_132] : memref<64x1088xf32, #tpu.memory_space<vmem>>, vector<64x1088xf32>
    %152 = arith.addf %150, %151 : vector<64x1088xf32>
    %cst_133 = arith.constant 0.000000e+00 : f32
    %153 = vector.broadcast %cst_133 : f32 to vector<64x1088xf32>
    %154 = arith.maximumf %152, %153 : vector<64x1088xf32>
    %c0_134 = arith.constant 0 : index
    %c0_135 = arith.constant 0 : index
    %155 = vector.load %arg15[%c0_134, %c0_135] : memref<64x1088xf32, #tpu.memory_space<vmem>>, vector<64x1088xf32>
    tpu.vector_store %arg15[%c0_134, %c0_135], %154 {strides = array<i32>} : memref<64x1088xf32, #tpu.memory_space<vmem>>, vector<64x1088xf32>,
    return
  }
  func.func @transform_0(%arg0: i32) -> (i32, i32) {
    %c0_i32 = arith.constant 0 : i32
    %c0_i32_0 = arith.constant 0 : i32
    return %arg0, %c0_i32 : i32, i32
  }
  func.func @transform_1(%arg0: i32) -> (i32, i32) {
    %c0_i32 = arith.constant 0 : i32
    %c0_i32_0 = arith.constant 0 : i32
    %c0_i32_1 = arith.constant 0 : i32
    return %c0_i32, %c0_i32_0 : i32, i32
  }
  func.func @transform_2(%arg0: i32) -> (i32, i32) {
    %c0_i32 = arith.constant 0 : i32
    %c0_i32_0 = arith.constant 0 : i32
    %c0_i32_1 = arith.constant 0 : i32
    return %c0_i32, %c0_i32_0 : i32, i32
  }
  func.func @transform_3(%arg0: i32) -> (i32, i32) {
    %c0_i32 = arith.constant 0 : i32
    %c0_i32_0 = arith.constant 0 : i32
    %c0_i32_1 = arith.constant 0 : i32
    return %c0_i32, %c0_i32_0 : i32, i32
  }
  func.func @transform_4(%arg0: i32) -> (i32, i32) {
    %c0_i32 = arith.constant 0 : i32
    %c0_i32_0 = arith.constant 0 : i32
    %c0_i32_1 = arith.constant 0 : i32
    return %c0_i32, %c0_i32_0 : i32, i32
  }
  func.func @transform_5(%arg0: i32) -> (i32, i32, i32) {
    %c0_i32 = arith.constant 0 : i32
    %c0_i32_0 = arith.constant 0 : i32
    %c0_i32_1 = arith.constant 0 : i32
    %c0_i32_2 = arith.constant 0 : i32
    return %c0_i32, %c0_i32_0, %c0_i32_1 : i32, i32, i32
  }
  func.func @transform_6(%arg0: i32) -> (i32, i32) {
    %c0_i32 = arith.constant 0 : i32
    %c0_i32_0 = arith.constant 0 : i32
    %c0_i32_1 = arith.constant 0 : i32
    return %c0_i32, %c0_i32_0 : i32, i32
  }
  func.func @transform_7(%arg0: i32) -> (i32, i32) {
    %c0_i32 = arith.constant 0 : i32
    %c0_i32_0 = arith.constant 0 : i32
    %c0_i32_1 = arith.constant 0 : i32
    return %c0_i32, %c0_i32_0 : i32, i32
  }
  func.func @transform_8(%arg0: i32) -> (i32, i32, i32) {
    %c0_i32 = arith.constant 0 : i32
    %c0_i32_0 = arith.constant 0 : i32
    %c0_i32_1 = arith.constant 0 : i32
    %c0_i32_2 = arith.constant 0 : i32
    return %c0_i32, %c0_i32_0, %c0_i32_1 : i32, i32, i32
  }
  func.func @transform_9(%arg0: i32) -> (i32, i32) {
    %c0_i32 = arith.constant 0 : i32
    %c0_i32_0 = arith.constant 0 : i32
    %c0_i32_1 = arith.constant 0 : i32
    return %c0_i32, %c0_i32_0 : i32, i32
  }
  func.func @transform_10(%arg0: i32) -> (i32, i32) {
    %c0_i32 = arith.constant 0 : i32
    %c0_i32_0 = arith.constant 0 : i32
    %c0_i32_1 = arith.constant 0 : i32
    return %c0_i32, %c0_i32_0 : i32, i32
  }
  func.func @transform_11(%arg0: i32) -> (i32, i32) {
    %c0_i32 = arith.constant 0 : i32
    %c0_i32_0 = arith.constant 0 : i32
    %c0_i32_1 = arith.constant 0 : i32
    return %c0_i32, %c0_i32_0 : i32, i32
  }
  func.func @transform_12(%arg0: i32) -> (i32, i32) {
    %c0_i32 = arith.constant 0 : i32
    %c0_i32_0 = arith.constant 0 : i32
    %c0_i32_1 = arith.constant 0 : i32
    return %c0_i32, %c0_i32_0 : i32, i32
  }
  func.func @transform_13(%arg0: i32) -> (i32, i32) {
    %c0_i32 = arith.constant 0 : i32
    %c0_i32_0 = arith.constant 0 : i32
    %c0_i32_1 = arith.constant 0 : i32
    return %c0_i32, %c0_i32_0 : i32, i32
  }
  func.func @transform_14(%arg0: i32) -> (i32, i32) {
    %c0_i32 = arith.constant 0 : i32
    %c0_i32_0 = arith.constant 0 : i32
    return %arg0, %c0_i32 : i32, i32
  }
}

</mosaic_0001>

<bundles_post_ra>
// kernel: tpu_custom_call.1
= control target key start
LH: loop header
LB: loop body
LE: loop exit
PB: predicated region body
PF: predicated region fallthrough
CT: control target
= control target key end

     0   :  { %s10899_s15 = smov 0   ;;  %s15038_s0 = inlined_call_operand.vmem [shape: f32[128,1088], index: 0, kind: input, shape index: {}]   ;;  %s15039_s1 = inlined_call_operand.<no memory space> [shape: f32[1,1], index: 1, kind: input, shape index: {}]   ;;  %s15040_s2 = inlined_call_operand.vmem [shape: bf16[1088,320], index: 2, kind: input, shape index: {}]   ;;  %s15041_s3 = inlined_call_operand.vmem [shape: f32[1,320], index: 3, kind: input, shape index: {}]   ;;  %s15042_s4 = inlined_call_operand.vmem [shape: f32[1,320], index: 4, kind: input, shape index: {}]   ;;  %s15043_s5 = inlined_call_operand.vmem [shape: bf16[7,128,160], index: 5, kind: input, shape index: {}]   ;;  %s15044_s6 = inlined_call_operand.vmem [shape: f32[1,160], index: 6, kind: input, shape index: {}]   ;;  %s15045_s7 = inlined_call_operand.vmem [shape: f32[1,160], index: 7, kind: input, shape index: {}]   ;;  %s15046_s8 = inlined_call_operand.vmem [shape: bf16[7,160,192], index: 8, kind: input, shape index: {}]   ;;  %s15047_s9 = inlined_call_operand.vmem [shape: f32[1,192], index: 9, kind: input, shape index: {}]   ;;  %s15048_s10 = inlined_call_operand.vmem [shape: f32[1,192], index: 10, kind: input, shape index: {}]   ;;  %s15049_s11 = inlined_call_operand.vmem [shape: bf16[192,1088], index: 11, kind: input, shape index: {}]   ;;  %s15050_s12 = inlined_call_operand.vmem [shape: bf16[192,1088], index: 12, kind: input, shape index: {}]   ;;  %s15051_s13 = inlined_call_operand.vmem [shape: f32[1,1088], index: 13, kind: input, shape index: {}]   ;;  %s15052_s14 = inlined_call_operand.vmem [shape: f32[128,1088], index: 14, kind: output, shape index: {}]  }
   0x1   :  { %v19_v0 = vstv %s15039_s1 }
   0x2   :  { %20 = vst [vmem:[#allocation4] sm:$0x1] %v19_v0 }
   0x3 LB: > { %s8672_s16 = sadd.s32 4294967295, %s10817_s15   ;;  %p8676_p0 = scmp.ge.s32.totalorder %s10817_s15, 1  ;;  %s10817_s15 = sphi %s10899_s15, %s26_s15  }
   0x4   : > { %p416_p1 = scmp.lt.s32.totalorder %s10817_s15, 3 }
   0x6   : > { %p417_p2 = pnand %p8676_p0, %p416_p1 }
   0x8   : > { %420 = sbr.rel (%p417_p2) target bundleno = 1448 (0x5a8), region = 76 }
   0xd   : > { %v9845_v1 = vld [vmem:[%s15040_s2 + $0xac] ss:$12 sps:$4 sm:$0xff]   ;;  %v9849_v3 = vld [vmem:[%s15040_s2 + $0xa8] ss:$12 sps:$4 sm:$0xff]   ;;  %v9855_v7 = vld [vmem:[%s15040_s2 + $0x90] ss:$12 sps:$4 sm:$0xff]  }
   0xe   : > { %v9847_v2 = vld [vmem:[%s15040_s2 + $0x22c] ss:$12 sps:$4 sm:$0xff]   ;;  %1960 = vmatprep.subr.bf16.mxu0 %v9845_v1  ;;  %v9850_v4 = vld [vmem:[%s15040_s2 + $0x228] ss:$12 sps:$4 sm:$0xff]   ;;  %v9856_v8 = vld [vmem:[%s15040_s2 + $0x210] ss:$12 sps:$4 sm:$0xff]  }
   0xf   : > { %2033 = vmatprep.subr.bf16.mxu1 %v9847_v2  ;;  %v9851_v5 = vld [vmem:[%s15040_s2 + $0x94] ss:$12 sps:$4 sm:$0xff]   ;;  %1961 = vmatpush1.bf16.msra.mxu0 %v9849_v3  ;;  %v9857_v9 = vld [vmem:[%s15040_s2 + $0x7c] ss:$12 sps:$4 sm:$0xff]   ;;  %v9861_v11 = vld [vmem:[%s15040_s2 + $0x78] ss:$12 sps:$4 sm:$0xff]  }
  0x10   : > { %2034 = vmatpush1.bf16.msra.mxu1 %v9850_v4  ;;  %v9853_v6 = vld [vmem:[%s15040_s2 + $0x214] ss:$12 sps:$4 sm:$0xff]   ;;  %1962 = vmatprep.subr.bf16.mxu0 %v9851_v5  ;;  %v9859_v10 = vld [vmem:[%s15040_s2 + $0x1fc] ss:$12 sps:$4 sm:$0xff]   ;;  %v9862_v12 = vld [vmem:[%s15040_s2 + $0x1f8] ss:$12 sps:$4 sm:$0xff]  }
  0x11   : > { %2035 = vmatprep.subr.bf16.mxu1 %v9853_v6  ;;  %v9863_v13 = vld [vmem:[%s15040_s2 + $0x64] ss:$12 sps:$4 sm:$0xff]   ;;  %v9867_v15 = vld [vmem:[%s15040_s2 + $0x60] ss:$12 sps:$4 sm:$0xff]   ;;  %v9873_v19 = vld [vmem:[%s15040_s2 + $0x48] ss:$12 sps:$4 sm:$0xff]  }
  0x12   : > { %v9865_v14 = vld [vmem:[%s15040_s2 + $0x1e4] ss:$12 sps:$4 sm:$0xff]   ;;  %v9868_v16 = vld [vmem:[%s15040_s2 + $0x1e0] ss:$12 sps:$4 sm:$0xff]   ;;  %v9874_v20 = vld [vmem:[%s15040_s2 + $0x1c8] ss:$12 sps:$4 sm:$0xff]  }
  0x13   : > { %1963 = vmatpush1.bf16.msra.mxu0 %v9855_v7  ;;  %v9869_v17 = vld [vmem:[%s15040_s2 + $0x4c] ss:$12 sps:$4 sm:$0xff]   ;;  %v9875_v21 = vld [vmem:[%s15040_s2 + $0x34] ss:$12 sps:$4 sm:$0xff]   ;;  %v9879_v23 = vld [vmem:[%s15040_s2 + $0x30] ss:$12 sps:$4 sm:$0xff]  }
  0x14   : > { %2036 = vmatpush1.bf16.msra.mxu1 %v9856_v8  ;;  %1964 = vmatprep.subr.bf16.mxu0 %v9857_v9  ;;  %v9871_v18 = vld [vmem:[%s15040_s2 + $0x1cc] ss:$12 sps:$4 sm:$0xff]   ;;  %v9877_v22 = vld [vmem:[%s15040_s2 + $0x1b4] ss:$12 sps:$4 sm:$0xff]   ;;  %v9880_v24 = vld [vmem:[%s15040_s2 + $0x1b0] ss:$12 sps:$4 sm:$0xff]  }
  0x15   : > { %2037 = vmatprep.subr.bf16.mxu1 %v9859_v10  ;;  %v9881_v25 = vld [vmem:[%s15040_s2 + $0x1c] ss:$12 sps:$4 sm:$0xff]   ;;  %v9885_v27 = vld [vmem:[%s15040_s2 + $0x18] ss:$12 sps:$4 sm:$0xff]   ;;  %s8677_s29 = sshll.u32 %s8672_s16, 3  ;;  %v15053_v35 = vmov 0  }
  0x16   : > { %v9883_v26 = vld [vmem:[%s15040_s2 + $0x19c] ss:$12 sps:$4 sm:$0xff]   ;;  %v9886_v28 = vld [vmem:[%s15040_s2 + $0x198] ss:$12 sps:$4 sm:$0xff]   ;;  %v9891_v31 = vld [vmem:[%s15040_s2] ss:$12 sps:$4 sm:$0xff]   ;;  %9844 = vset.pattern.permute.xlu0 %v15053_v35 }
  0x17   : > { %1965 = vmatpush1.bf16.msra.mxu0 %v9861_v11  ;;  %v9887_v29 = vld [vmem:[%s15040_s2 + $0x4] ss:$12 sps:$4 sm:$0xff]   ;;  %p465_p3 = scmp.lt.s32.totalorder %s8677_s29, 15  ;;  %v9892_v32 = vld [vmem:[%s15040_s2 + $0x180] ss:$12 sps:$4 sm:$0xff]   ;;  %vm1947_vm0 = vcmask 523264  }
  0x18   : > { %2038 = vmatpush1.bf16.msra.mxu1 %v9862_v12  ;;  %1966 = vmatprep.subr.bf16.mxu0 %v9863_v13  ;;  %v9889_v30 = vld [vmem:[%s15040_s2 + $0x184] ss:$12 sps:$4 sm:$0xff]   ;;  %v9893_v33 = vld [vmem:[%s15040_s2 + $0x16c] ss:$12 sps:$4 sm:$0xff]   ;;  %v9897_v36 = vld [vmem:[%s15040_s2 + $0x168] ss:$12 sps:$4 sm:$0xff]  }
  0x19   : > { %2039 = vmatprep.subr.bf16.mxu1 %v9865_v14  ;;  %v9895_v34 = vld [vmem:[%s15040_s2 + $0x2ec] ss:$12 sps:$4 sm:$0xff]   ;;  %v9898_v37 = vld [vmem:[%s15040_s2 + $0x2e8] ss:$12 sps:$4 sm:$0xff]   ;;  %s15302_s29 = smov (!%p465_p3, %s8677_s29), 15  ;;  %vm4214_vm1 = vcmask 261120  }
  0x1a   : > { %v9899_v38 = vld [vmem:[%s15040_s2 + $0x154] ss:$12 sps:$4 sm:$0xff]   ;;  %v9903_v40 = vld [vmem:[%s15040_s2 + $0x150] ss:$12 sps:$4 sm:$0xff]   ;;  %s9833_s20 = smul.u32 72, %s15302_s29 }
  0x1b   : > { %1967 = vmatpush1.bf16.msra.mxu0 %v9867_v15  ;;  %v9901_v39 = vld [vmem:[%s15040_s2 + $0x2d4] ss:$12 sps:$4 sm:$0xff]   ;;  %v9904_v41 = vld [vmem:[%s15040_s2 + $0x2d0] ss:$12 sps:$4 sm:$0xff]   ;;  %v9909_v44 = vld [vmem:[%s15040_s2 + $0x138] ss:$12 sps:$4 sm:$0xff]  }
  0x1c   : > { %2040 = vmatpush1.bf16.msra.mxu1 %v9868_v16  ;;  %1968 = vmatprep.subr.bf16.mxu0 %v9869_v17  ;;  %v9905_v42 = vld [vmem:[%s15040_s2 + $0x13c] ss:$12 sps:$4 sm:$0xff]   ;;  %v9910_v45 = vld [vmem:[%s15040_s2 + $0x2b8] ss:$12 sps:$4 sm:$0xff]   ;;  %s11050_s1 = scalar_lea.vmem %s15038_s0, %s9833_s20  ;;  %v9915_v52 = vld [vmem:[%s15040_s2 + $0x120] ss:$12 sps:$4 sm:$0xff]   ;;  %s14635_s22 = scalar_lea.vmem %s15052_s14, %s9833_s20 }
  0x1d   : > { %2041 = vmatprep.subr.bf16.mxu1 %v9871_v18  ;;  %v9907_v43 = vld [vmem:[%s15040_s2 + $0x2bc] ss:$12 sps:$4 sm:$0xff]   ;;  %v9911_v46 = vld [vmem:[%s15040_s2 + $0x124] ss:$12 sps:$4 sm:$0xff]   ;;  %v9916_v53 = vld [vmem:[%s15040_s2 + $0x2a0] ss:$12 sps:$4 sm:$0xff]  }
  0x1e   : > { %v9913_v47 = vld [vmem:[%s15040_s2 + $0x2a4] ss:$12 sps:$4 sm:$0xff]   ;;  %v480_v48 = vld [vmem:[%s11050_s1 + $0x8] sm:$0xff]  ;;  %v482_v50 = vld [vmem:[%s11050_s1 + $0x18] sm:$0xff] }
  0x1f   : > { %1969 = vmatpush1.bf16.msra.mxu0 %v9873_v19  ;;  %v489_v49 = vld [vmem:[%s11050_s1 + $0x50] sm:$0xff]  ;;  %v491_v51 = vld [vmem:[%s11050_s1 + $0x60] sm:$0xff]  ;;  %v9917_v54 = vld [vmem:[%s15040_s2 + $0x10c] ss:$12 sps:$4 sm:$0xff]  }
  0x20   : > { %2042 = vmatpush1.bf16.msra.mxu1 %v9874_v20  ;;  %1970 = vmatprep.subr.bf16.mxu0 %v9875_v21  ;;  %v11071_v55 = vpack.c.bf16 %v489_v49, %v480_v48  ;;  %v11073_v56 = vpack.c.bf16 %v491_v51, %v482_v50  ;;  %v9919_v57 = vld [vmem:[%s15040_s2 + $0x28c] ss:$12 sps:$4 sm:$0xff]   ;;  %v9921_v58 = vld [vmem:[%s15040_s2 + $0x108] ss:$12 sps:$4 sm:$0xff]   ;;  %v9927_v62 = vld [vmem:[%s15040_s2 + $0xf0] ss:$12 sps:$4 sm:$0xff]  }
  0x21   : > { %2043 = vmatprep.subr.bf16.mxu1 %v9877_v22  ;;  %v9922_v59 = vld [vmem:[%s15040_s2 + $0x288] ss:$12 sps:$4 sm:$0xff]   ;;  %v9928_v63 = vld [vmem:[%s15040_s2 + $0x270] ss:$12 sps:$4 sm:$0xff]   ;;  %v9933_v2 = vld [vmem:[%s15040_s2 + $0xd8] ss:$12 sps:$4 sm:$0xff]  }
  0x22   : > { %1992 = vmatprep.mubr.bf16.mxu0 %v11071_v55  ;;  %2065 = vmatprep.mubr.bf16.mxu1 %v11073_v56  ;;  %v9923_v60 = vld [vmem:[%s15040_s2 + $0xf4] ss:$12 sps:$4 sm:$0xff]   ;;  %v9929_v0 = vld [vmem:[%s15040_s2 + $0xdc] ss:$12 sps:$4 sm:$0xff]   ;;  %v9934_v3 = vld [vmem:[%s15040_s2 + $0x258] ss:$12 sps:$4 sm:$0xff]  }
  0x23   : > { %1971 = vmatpush1.bf16.msra.mxu0 %v9879_v23  ;;  %v9925_v61 = vld [vmem:[%s15040_s2 + $0x274] ss:$12 sps:$4 sm:$0xff]   ;;  %v9931_v1 = vld [vmem:[%s15040_s2 + $0x25c] ss:$12 sps:$4 sm:$0xff]   ;;  %v9935_v4 = vld [vmem:[%s15040_s2 + $0xc4] ss:$12 sps:$4 sm:$0xff]  }
  0x24   : > { %2044 = vmatpush1.bf16.msra.mxu1 %v9880_v24  ;;  %1972 = vmatprep.subr.bf16.mxu0 %v9881_v25  ;;  %v9937_v5 = vld [vmem:[%s15040_s2 + $0x244] ss:$12 sps:$4 sm:$0xff]   ;;  %v9939_v6 = vld [vmem:[%s15040_s2 + $0xc0] ss:$12 sps:$4 sm:$0xff]   ;;  %v490_v11 = vld [vmem:[%s11050_s1 + $0x58] sm:$0xff] }
  0x25   : > { %2045 = vmatprep.subr.bf16.mxu1 %v9883_v26  ;;  %v9940_v7 = vld [vmem:[%s15040_s2 + $0x240] ss:$12 sps:$4 sm:$0xff]   ;;  %v481_v10 = vld [vmem:[%s11050_s1 + $0x10] sm:$0xff]  ;;  %v9955_v22 = vld [vmem:[%s15040_s2 + $0x37c] ss:$12 sps:$4 sm:$0xff]  }
  0x26   : > { %v479_v8 = vld [vmem:[%s11050_s1] sm:$0xff]  ;;  %v488_v9 = vld [vmem:[%s11050_s1 + $0x48] sm:$0xff]  ;;  %v11134_v15 = vpack.c.bf16 %v490_v11, %v481_v10  ;;  %v9947_v20 = vld [vmem:[%s15040_s2 + $0x390] ss:$12 sps:$4 sm:$0xff]  }
  0x27   : > { %1973 = vmatpush1.bf16.msra.mxu0 %v9885_v27  ;;  %v9943_v12 = vld [vmem:[%s15040_s2 + $0x3ac] ss:$12 sps:$4 sm:$0xff]   ;;  %v11132_v14 = vpack.c.bf16 %v488_v9, %v479_v8  ;;  %v9941_v16 = vld [vmem:[%s15040_s2 + $0x3a8] ss:$12 sps:$4 sm:$0xff]   ;;  %v9950_v21 = vld [vmem:[%s15040_s2 + $0x510] ss:$12 sps:$4 sm:$0xff]  }
  0x28   : > { %2046 = vmatpush1.bf16.msra.mxu1 %v9886_v28  ;;  %1974 = vmatprep.subr.bf16.mxu0 %v9887_v29  ;;  %v9946_v13 = vld [vmem:[%s15040_s2 + $0x52c] ss:$12 sps:$4 sm:$0xff]   ;;  %v9944_v17 = vld [vmem:[%s15040_s2 + $0x528] ss:$12 sps:$4 sm:$0xff]   ;;  %v507_v25 = vld [vmem:[%s11050_s1 + $0xe0] sm:$0xff] }
  0x29   : > { %2047 = vmatprep.subr.bf16.mxu1 %v9889_v30  ;;  %v9949_v18 = vld [vmem:[%s15040_s2 + $0x394] ss:$12 sps:$4 sm:$0xff]   ;;  %v9958_v23 = vld [vmem:[%s15040_s2 + $0x4fc] ss:$12 sps:$4 sm:$0xff]   ;;  %v9953_v29 = vld [vmem:[%s15040_s2 + $0x378] ss:$12 sps:$4 sm:$0xff]  }
  0x2a   : > { %v9952_v19 = vld [vmem:[%s15040_s2 + $0x514] ss:$12 sps:$4 sm:$0xff]   ;;  %v498_v24 = vld [vmem:[%s11050_s1 + $0x98] sm:$0xff]  ;;  %v500_v26 = vld [vmem:[%s11050_s1 + $0xa8] sm:$0xff] }
  0x2b   : > { %1975 = vmatpush1.bf16.msra.mxu0 %v9891_v31  ;;  %v11165_v27 = vpack.c.bf16 %v507_v25, %v498_v24  ;;  %v509_v28 = vld [vmem:[%s11050_s1 + $0xf0] sm:$0xff]  ;;  %v9956_v30 = vld [vmem:[%s15040_s2 + $0x4f8] ss:$12 sps:$4 sm:$0xff]  }
  0x2c   : > { %2048 = vmatpush1.bf16.msra.mxu1 %v9892_v32  ;;  %1976 = vmatprep.subr.bf16.mxu0 %v9893_v33  ;;  %v11174_v31 = vpack.c.bf16 %v509_v28, %v500_v26  ;;  %v497_v32 = vld [vmem:[%s11050_s1 + $0x90] sm:$0xff]  ;;  %v506_v33 = vld [vmem:[%s11050_s1 + $0xd8] sm:$0xff]  ;;  %v527_v49 = vld [vmem:[%s11050_s1 + $0x180] sm:$0xff] }
  0x2d   : > { %2049 = vmatprep.subr.bf16.mxu1 %v9895_v34  ;;  %v499_v34 = vld [vmem:[%s11050_s1 + $0xa0] sm:$0xff]  ;;  %v9965_v50 = vld [vmem:[%s15040_s2 + $0x348] ss:$12 sps:$4 sm:$0xff]   ;;  %v9994_v24 = vld [vmem:[%s15040_s2 + $0x5ec] ss:$12 sps:$4 sm:$0xff]  }
  0x2e   : > { %v9968_v51 = vld [vmem:[%s15040_s2 + $0x4c8] ss:$12 sps:$4 sm:$0xff]   ;;  %v9977_v8 = vld [vmem:[%s15040_s2 + $0x318] ss:$12 sps:$4 sm:$0xff]  }
  0x2f   : > { %1977 = vmatpush2.bf16.msra.mxu0 %v9897_v36  ;;  %v508_v36 = vld [vmem:[%s11050_s1 + $0xe8] sm:$0xff]  ;;  %v9980_v9 = vld [vmem:[%s15040_s2 + $0x498] ss:$12 sps:$4 sm:$0xff]   ;;  %v533_v11 = vld [vmem:[%s11050_s1 + $0x1b0] sm:$0xff] }
  0x30   : > { %2050 = vmatpush2.bf16.msra.mxu1 %v9898_v37  ;;  %1978 = vmatprep.subr.bf16.mxu0 %v9899_v38  ;;  %v9961_v37 = vld [vmem:[%s15040_s2 + $0x364] ss:$12 sps:$4 sm:$0xff]   ;;  %v11184_v38 = vpack.c.bf16 %v506_v33, %v497_v32  ;;  %v9989_v25 = vld [vmem:[%s15040_s2 + $0x468] ss:$12 sps:$4 sm:$0xff]  }
  0x31   : > { %2051 = vmatprep.subr.bf16.mxu1 %v9901_v39  ;;  %v11186_v39 = vpack.c.bf16 %v508_v36, %v499_v34  ;;  %v9992_v26 = vld [vmem:[%s15040_s2 + $0x5e8] ss:$12 sps:$4 sm:$0xff]   ;;  %v486_v34 = vld [vmem:[%s11050_s1 + $0x38] sm:$0xff]  ;;  %v495_v36 = vld [vmem:[%s11050_s1 + $0x80] sm:$0xff] }
  0x32   : > { %v9997_v28 = vld [vmem:[%s15040_s2 + $0x454] ss:$12 sps:$4 sm:$0xff]  }
  0x33   : > { %1979 = vmatpush2.bf16.msra.mxu0 %v9903_v40  ;;  %v9964_v40 = vld [vmem:[%s15040_s2 + $0x4e4] ss:$12 sps:$4 sm:$0xff]   ;;  %v10000_v32 = vld [vmem:[%s15040_s2 + $0x5d4] ss:$12 sps:$4 sm:$0xff]  }
  0x34   : > { %2052 = vmatpush2.bf16.msra.mxu1 %v9904_v41  ;;  %1980 = vmatprep.subr.bf16.mxu0 %v9905_v42  ;;  %v9959_v41 = vld [vmem:[%s15040_s2 + $0x360] ss:$12 sps:$4 sm:$0xff]  }
  0x35   : > { %2053 = vmatprep.subr.bf16.mxu1 %v9907_v43  ;;  %v9962_v42 = vld [vmem:[%s15040_s2 + $0x4e0] ss:$12 sps:$4 sm:$0xff]  }
  0x36   : > { %v9967_v43 = vld [vmem:[%s15040_s2 + $0x34c] ss:$12 sps:$4 sm:$0xff]  }
  0x37   : > { %1981 = vmatpush2.bf16.msra.mxu0 %v9909_v44  ;;  %v9970_v44 = vld [vmem:[%s15040_s2 + $0x4cc] ss:$12 sps:$4 sm:$0xff]  }
  0x38   : > { %2054 = vmatpush2.bf16.msra.mxu1 %v9910_v45  ;;  %1982 = vmatprep.subr.bf16.mxu0 %v9911_v46  ;;  %v516_v45 = vld [vmem:[%s11050_s1 + $0x128] sm:$0xff]  ;;  %v525_v46 = vld [vmem:[%s11050_s1 + $0x170] sm:$0xff] }
  0x39   : > { %2055 = vmatprep.subr.bf16.mxu1 %v9913_v47  ;;  %v518_v47 = vld [vmem:[%s11050_s1 + $0x138] sm:$0xff]  ;;  %v11209_v48 = vpack.c.bf16 %v525_v46, %v516_v45  ;;  %v10009_v46 = vld [vmem:[%s15040_s2 + $0x424] ss:$12 sps:$4 sm:$0xff]  }
  0x3a   : > { %v10004_v45 = vld [vmem:[%s15040_s2 + $0x5b8] ss:$12 sps:$4 sm:$0xff]  }
  0x3b   : > { %1983 = vmatpush2.bf16.msra.mxu0 %v9915_v52  ;;  %v11218_v52 = vpack.c.bf16 %v527_v49, %v518_v47  ;;  %v10012_v47 = vld [vmem:[%s15040_s2 + $0x5a4] ss:$12 sps:$4 sm:$0xff]   ;;  %v10007_v49 = vld [vmem:[%s15040_s2 + $0x420] ss:$12 sps:$4 sm:$0xff]  }
  0x3c   : > { %2056 = vmatpush2.bf16.msra.mxu1 %v9916_v53  ;;  %1984 = vmatprep.subr.bf16.mxu0 %v9917_v54  ;;  %v515_v53 = vld [vmem:[%s11050_s1 + $0x120] sm:$0xff]  ;;  %v524_v54 = vld [vmem:[%s11050_s1 + $0x168] sm:$0xff] }
  0x3d   : > { %2057 = vmatprep.subr.bf16.mxu1 %v9919_v57  ;;  %v517_v57 = vld [vmem:[%s11050_s1 + $0x130] sm:$0xff] }
  0x3f   : > { %1985 = vmatpush2.bf16.msra.mxu0 %v9921_v58  ;;  %v526_v58 = vld [vmem:[%s11050_s1 + $0x178] sm:$0xff] }
  0x40   : > { %2058 = vmatpush2.bf16.msra.mxu1 %v9922_v59  ;;  %1986 = vmatprep.subr.bf16.mxu0 %v9923_v60  ;;  %v9973_v59 = vld [vmem:[%s15040_s2 + $0x334] ss:$12 sps:$4 sm:$0xff]   ;;  %v11228_v60 = vpack.c.bf16 %v524_v54, %v515_v53  ;;  %v10018_v53 = vld [vmem:[%s15040_s2 + $0x58c] ss:$12 sps:$4 sm:$0xff]  }
  0x41   : > { %2059 = vmatprep.subr.bf16.mxu1 %v9925_v61  ;;  %v11230_v61 = vpack.c.bf16 %v526_v58, %v517_v57  ;;  %v10013_v54 = vld [vmem:[%s15040_s2 + $0x408] ss:$12 sps:$4 sm:$0xff]  }
  0x42   : > { %v10016_v57 = vld [vmem:[%s15040_s2 + $0x588] ss:$12 sps:$4 sm:$0xff]  }
  0x43   : > { %1987 = vmatpush2.bf16.msra.mxu0 %v9927_v62  ;;  %v9976_v62 = vld [vmem:[%s15040_s2 + $0x4b4] ss:$12 sps:$4 sm:$0xff]  }
  0x44   : > { %2060 = vmatpush2.bf16.msra.mxu1 %v9928_v63  ;;  %1988 = vmatprep.subr.bf16.mxu0 %v9929_v0  ;;  %v9971_v63 = vld [vmem:[%s15040_s2 + $0x330] ss:$12 sps:$4 sm:$0xff]   ;;  %v10021_v58 = vld [vmem:[%s15040_s2 + $0x3f4] ss:$12 sps:$4 sm:$0xff]  }
  0x45   : > { %2061 = vmatprep.subr.bf16.mxu1 %v9931_v1  ;;  %v9974_v0 = vld [vmem:[%s15040_s2 + $0x4b0] ss:$12 sps:$4 sm:$0xff]  }
  0x46   : > { %v9979_v1 = vld [vmem:[%s15040_s2 + $0x31c] ss:$12 sps:$4 sm:$0xff]  }
  0x47   : > { %1989 = vmatpush2.bf16.msra.mxu0 %v9933_v2  ;;  %v9982_v2 = vld [vmem:[%s15040_s2 + $0x49c] ss:$12 sps:$4 sm:$0xff]  }
  0x48   : > { %2062 = vmatpush2.bf16.msra.mxu1 %v9934_v3  ;;  %1990 = vmatprep.subr.bf16.mxu0 %v9935_v4  ;;  %v534_v3 = vld [vmem:[%s11050_s1 + $0x1b8] sm:$0xff]  ;;  %v543_v4 = vld [vmem:[%s11050_s1 + $0x200] sm:$0xff] }
  0x49   : > { %2063 = vmatprep.subr.bf16.mxu1 %v9937_v5  ;;  %v536_v5 = vld [vmem:[%s11050_s1 + $0x1c8] sm:$0xff] }
  0x4b   : > { %1991 = vmatpush2.bf16.msra.mxu0 %v9939_v6  ;;  %v11253_v6 = vpack.c.bf16 %v543_v4, %v534_v3  ;;  %v10028_v3 = vld [vmem:[%s15040_s2 + $0x558] ss:$12 sps:$4 sm:$0xff]  }
  0x4c   : > { %2064 = vmatpush2.bf16.msra.mxu1 %v9940_v7  ;;  %2106 = vmatprep.subr.bf16.mxu0 %v9943_v12  ;;  %v545_v7 = vld [vmem:[%s11050_s1 + $0x210] sm:$0xff]  ;;  %v542_v12 = vld [vmem:[%s11050_s1 + $0x1f8] sm:$0xff] }
  0x4d   : > { %2179 = vmatprep.subr.bf16.mxu1 %v9946_v13  ;;  %v11262_v10 = vpack.c.bf16 %v545_v7, %v536_v5  ;;  %v535_v13 = vld [vmem:[%s11050_s1 + $0x1c0] sm:$0xff] }
  0x4e   : > { %1993 = vmatmul.mubr.bf16.vlgmr.msra.gmra.mxu0 %v11132_v14  ;;  %v10033_v4 = vld [vmem:[%s15040_s2 + $0x3c4] ss:$12 sps:$4 sm:$0xff]   ;;  %v10031_v7 = vld [vmem:[%s15040_s2 + $0x3c0] ss:$12 sps:$4 sm:$0xff]  }
  0x4f   : > { %2066 = vmatmul.mubr.bf16.vlgmr.msra.gmra.mxu1 %v11134_v15  ;;  %2107 = vmatpush1.bf16.msra.mxu0 %v9941_v16  ;;  %v544_v16 = vld [vmem:[%s11050_s1 + $0x208] sm:$0xff]  ;;  %v10036_v5 = vld [vmem:[%s15040_s2 + $0x544] ss:$12 sps:$4 sm:$0xff]  }
  0x50   : > { %2180 = vmatpush1.bf16.msra.mxu1 %v9944_v17  ;;  %2108 = vmatprep.subr.bf16.mxu0 %v9949_v18  ;;  %v9985_v17 = vld [vmem:[%s15040_s2 + $0x304] ss:$12 sps:$4 sm:$0xff]   ;;  %v11272_v18 = vpack.c.bf16 %v542_v12, %v533_v11  ;;  %v492_v11 = vld [vmem:[%s11050_s1 + $0x68] sm:$0xff] }
  0x51   : > { %2181 = vmatprep.subr.bf16.mxu1 %v9952_v19  ;;  %2002 = vmatprep.mubr.bf16.mxu0 %v11165_v27  ;;  %v11274_v19 = vpack.c.bf16 %v544_v16, %v535_v13  ;;  %v485_v12 = vld [vmem:[%s11050_s1 + $0x30] sm:$0xff]  ;;  %v494_v13 = vld [vmem:[%s11050_s1 + $0x78] sm:$0xff] }
  0x52   : > { %2075 = vmatprep.mubr.bf16.mxu1 %v11174_v31  ;;  %v10039_v16 = vld [vmem:[%s15040_s2 + $0x64c] ss:$12 sps:$4 sm:$0xff]  }
  0x53   : > { %2109 = vmatpush1.bf16.msra.mxu0 %v9947_v20  ;;  %v9988_v20 = vld [vmem:[%s15040_s2 + $0x484] ss:$12 sps:$4 sm:$0xff]  }
  0x54   : > { %2182 = vmatpush1.bf16.msra.mxu1 %v9950_v21  ;;  %2110 = vmatprep.subr.bf16.mxu0 %v9955_v22  ;;  %v9983_v21 = vld [vmem:[%s15040_s2 + $0x300] ss:$12 sps:$4 sm:$0xff]  }
  0x55   : > { %2183 = vmatprep.subr.bf16.mxu1 %v9958_v23  ;;  %v9986_v22 = vld [vmem:[%s15040_s2 + $0x480] ss:$12 sps:$4 sm:$0xff]  }
  0x56   : > { %2003 = vmatmul.mubr.bf16.gmra.mxu0 %v11184_v38  ;;  %v9991_v23 = vld [vmem:[%s15040_s2 + $0x46c] ss:$12 sps:$4 sm:$0xff]  }
  0x57   : > { %2076 = vmatmul.mubr.bf16.gmra.mxu1 %v11186_v39  ;;  %2111 = vmatpush1.bf16.msra.mxu0 %v9953_v29  ;;  %v484_v29 = vld [vmem:[%s11050_s1 + $0x28] sm:$0xff] }
  0x58   : > { %2184 = vmatpush1.bf16.msra.mxu1 %v9956_v30  ;;  %2112 = vmatprep.subr.bf16.mxu0 %v9961_v37  ;;  %v493_v30 = vld [vmem:[%s11050_s1 + $0x70] sm:$0xff] }
  0x59   : > { %2185 = vmatprep.subr.bf16.mxu1 %v9964_v40  ;;  %2012 = vmatprep.mubr.bf16.mxu0 %v11209_v48  ;;  %v11308_v33 = vpack.c.bf16 %v493_v30, %v484_v29  ;;  %v9995_v37 = vld [vmem:[%s15040_s2 + $0x450] ss:$12 sps:$4 sm:$0xff]   ;;  %v10042_v29 = vld [vmem:[%s15040_s2 + $0x634] ss:$12 sps:$4 sm:$0xff]  }
  0x5a   : > { %2085 = vmatprep.mubr.bf16.mxu1 %v11218_v52  ;;  %v9998_v40 = vld [vmem:[%s15040_s2 + $0x5d0] ss:$12 sps:$4 sm:$0xff]  }
  0x5b   : > { %2113 = vmatpush1.bf16.msra.mxu0 %v9959_v41  ;;  %v10003_v41 = vld [vmem:[%s15040_s2 + $0x43c] ss:$12 sps:$4 sm:$0xff]  }
  0x5c   : > { %2186 = vmatpush1.bf16.msra.mxu1 %v9962_v42  ;;  %2114 = vmatprep.subr.bf16.mxu0 %v9967_v43  ;;  %v11322_v42 = vpack.c.bf16 %v495_v36, %v486_v34  ;;  %v10006_v43 = vld [vmem:[%s15040_s2 + $0x5bc] ss:$12 sps:$4 sm:$0xff]  }
  0x5d   : > { %2187 = vmatprep.subr.bf16.mxu1 %v9970_v44  ;;  %v10001_v44 = vld [vmem:[%s15040_s2 + $0x438] ss:$12 sps:$4 sm:$0xff]   ;;  %v10040_v36 = vld [vmem:[%s15040_s2 + $0x630] ss:$12 sps:$4 sm:$0xff]  }
  0x5e   : > { %2013 = vmatmul.mubr.bf16.gmra.mxu0 %v11228_v60  ;;  %v510_v34 = vld [vmem:[%s11050_s1 + $0xf8] sm:$0xff] }
  0x5f   : > { %2086 = vmatmul.mubr.bf16.gmra.mxu1 %v11230_v61  ;;  %2115 = vmatpush1.bf16.msra.mxu0 %v9965_v50  ;;  %v10010_v50 = vld [vmem:[%s15040_s2 + $0x5a0] ss:$12 sps:$4 sm:$0xff]  }
  0x60   : > { %2188 = vmatpush1.bf16.msra.mxu1 %v9968_v51  ;;  %2116 = vmatprep.subr.bf16.mxu0 %v9973_v59  ;;  %v10015_v51 = vld [vmem:[%s15040_s2 + $0x40c] ss:$12 sps:$4 sm:$0xff]   ;;  %v10024_v59 = vld [vmem:[%s15040_s2 + $0x574] ss:$12 sps:$4 sm:$0xff]  }
  0x61   : > { %2189 = vmatprep.subr.bf16.mxu1 %v9976_v62  ;;  %2022 = vmatprep.mubr.bf16.mxu0 %v11253_v6  ;;  %v10019_v62 = vld [vmem:[%s15040_s2 + $0x3f0] ss:$12 sps:$4 sm:$0xff]  }
  0x62   : > { %2095 = vmatprep.mubr.bf16.mxu1 %v11262_v10 }
  0x63   : > { %2117 = vmatpush1.bf16.msra.mxu0 %v9971_v63  ;;  %v10022_v63 = vld [vmem:[%s15040_s2 + $0x570] ss:$12 sps:$4 sm:$0xff]  }
  0x64   : > { %2190 = vmatpush1.bf16.msra.mxu1 %v9974_v0  ;;  %2118 = vmatprep.subr.bf16.mxu0 %v9979_v1  ;;  %v10027_v0 = vld [vmem:[%s15040_s2 + $0x3dc] ss:$12 sps:$4 sm:$0xff]  }
  0x65   : > { %2191 = vmatprep.subr.bf16.mxu1 %v9982_v2  ;;  %v10030_v1 = vld [vmem:[%s15040_s2 + $0x55c] ss:$12 sps:$4 sm:$0xff]   ;;  %v10025_v2 = vld [vmem:[%s15040_s2 + $0x3d8] ss:$12 sps:$4 sm:$0xff]  }
  0x66   : > { %2023 = vmatmul.mubr.bf16.gmra.mxu0 %v11272_v18 }
  0x67   : > { %2096 = vmatmul.mubr.bf16.gmra.mxu1 %v11274_v19  ;;  %2119 = vmatpush1.bf16.msra.mxu0 %v9977_v8  ;;  %v10034_v8 = vld [vmem:[%s15040_s2 + $0x540] ss:$12 sps:$4 sm:$0xff]  }
  0x68   : > { %2192 = vmatpush1.bf16.msra.mxu1 %v9980_v9  ;;  %2120 = vmatprep.subr.bf16.mxu0 %v9985_v17  ;;  %v483_v9 = vld [vmem:[%s11050_s1 + $0x20] sm:$0xff]  ;;  %v502_v17 = vld [vmem:[%s11050_s1 + $0xb8] sm:$0xff] }
  0x69   : > { %2193 = vmatprep.subr.bf16.mxu1 %v9988_v20  ;;  %2138 = vmatprep.mubr.bf16.mxu0 %v11308_v33  ;;  %v511_v20 = vld [vmem:[%s11050_s1 + $0x100] sm:$0xff] }
  0x6a   : > { %2211 = vmatprep.mubr.bf16.mxu1 %v11322_v42 }
  0x6b   : > { %2121 = vmatpush1.bf16.msra.mxu0 %v9983_v21  ;;  %v504_v21 = vld [vmem:[%s11050_s1 + $0xc8] sm:$0xff] }
  0x6c   : > { %2194 = vmatpush1.bf16.msra.mxu1 %v9986_v22  ;;  %2122 = vmatprep.subr.bf16.mxu0 %v9991_v23  ;;  %v10049_v22 = vld [vmem:[%s15040_s2 + $0x170] ss:$12 sps:$4 sm:$0xff]  }
  0x6d   : > { %2195 = vmatprep.subr.bf16.mxu1 %v9994_v24  ;;  %v513_v23 = vld [vmem:[%s11050_s1 + $0x110] sm:$0xff]  ;;  %v11408_v24 = vpack.c.bf16 %v492_v11, %v483_v9 }
  0x6e   : > { %v11420_v30 = vpack.c.bf16 %v513_v23, %v504_v21  ;;  %v10055_v9 = vld [vmem:[%s15040_s2 + $0x128] ss:$12 sps:$4 sm:$0xff]  }
  0x6f   : > { %2123 = vmatpush2.bf16.msra.mxu0 %v9989_v25  ;;  %v11410_v25 = vpack.c.bf16 %v494_v13, %v485_v12  ;;  %v549_v11 = vld [vmem:[%s11050_s1 + $0x230] sm:$0xff] }
  0x70   : > { %2196 = vmatpush2.bf16.msra.mxu1 %v9992_v26  ;;  %2124 = vmatprep.subr.bf16.mxu0 %v9997_v28  ;;  %v10037_v26 = vld [vmem:[%s15040_s2 + $0x648] ss:$12 sps:$4 sm:$0xff]   ;;  %v11415_v28 = vpack.c.bf16 %v511_v20, %v502_v17  ;;  %v10064_v13 = vld [vmem:[%s15040_s2 + $0x2f0] ss:$12 sps:$4 sm:$0xff]  }
  0x71   : > { %2197 = vmatprep.subr.bf16.mxu1 %v10000_v32  ;;  %v501_v32 = vld [vmem:[%s11050_s1 + $0xb0] sm:$0xff] }
  0x72   : > { %v10056_v12 = vld [vmem:[%s15040_s2 + $0x68] ss:$12 sps:$4 sm:$0xff]  }
  0x73   : > { %2125 = vmatpush2.bf16.msra.mxu0 %v9995_v37  ;;  %v503_v37 = vld [vmem:[%s11050_s1 + $0xc0] sm:$0xff]  ;;  %v537_v23 = vld [vmem:[%s11050_s1 + $0x1d0] sm:$0xff] }
  0x74   : > { %2198 = vmatpush2.bf16.msra.mxu1 %v9998_v40  ;;  %2126 = vmatprep.subr.bf16.mxu0 %v10003_v41  ;;  %v512_v40 = vld [vmem:[%s11050_s1 + $0x108] sm:$0xff]  ;;  %v10050_v41 = vld [vmem:[%s15040_s2 + $0xb0] ss:$12 sps:$4 sm:$0xff]  }
  0x75   : > { %2199 = vmatprep.subr.bf16.mxu1 %v10006_v43  ;;  %v520_v43 = vld [vmem:[%s11050_s1 + $0x148] sm:$0xff] }
  0x77   : > { %2127 = vmatpush2.bf16.msra.mxu0 %v10001_v44  ;;  %v529_v44 = vld [vmem:[%s11050_s1 + $0x190] sm:$0xff] }
  0x78   : > { %2200 = vmatpush2.bf16.msra.mxu1 %v10004_v45  ;;  %2128 = vmatprep.subr.bf16.mxu0 %v10009_v46  ;;  %v10045_v45 = vld [vmem:[%s15040_s2 + $0x61c] ss:$12 sps:$4 sm:$0xff]   ;;  %v10051_v46 = vld [vmem:[%s15040_s2 + $0x158] ss:$12 sps:$4 sm:$0xff]  }
  0x79   : > { %2201 = vmatprep.subr.bf16.mxu1 %v10012_v47  ;;  %v522_v47 = vld [vmem:[%s11050_s1 + $0x158] sm:$0xff] }
  0x7b   : > { %2129 = vmatpush2.bf16.msra.mxu0 %v10007_v49  ;;  %v531_v49 = vld [vmem:[%s11050_s1 + $0x1a0] sm:$0xff] }
  0x7c   : > { %2202 = vmatpush2.bf16.msra.mxu1 %v10010_v50  ;;  %2130 = vmatprep.subr.bf16.mxu0 %v10015_v51  ;;  %v10052_v50 = vld [vmem:[%s15040_s2 + $0x98] ss:$12 sps:$4 sm:$0xff]   ;;  %v11449_v51 = vpack.c.bf16 %v510_v34, %v501_v32  ;;  %v10058_v32 = vld [vmem:[%s15040_s2 + $0x50] ss:$12 sps:$4 sm:$0xff]  }
  0x7d   : > { %2203 = vmatprep.subr.bf16.mxu1 %v10018_v53  ;;  %v11451_v53 = vpack.c.bf16 %v512_v40, %v503_v37  ;;  %v10059_v34 = vld [vmem:[%s15040_s2 + $0xf8] ss:$12 sps:$4 sm:$0xff]  }
  0x7e   : > { %v10060_v37 = vld [vmem:[%s15040_s2 + $0x38] ss:$12 sps:$4 sm:$0xff]  }
  0x7f   : > { %2131 = vmatpush2.bf16.msra.mxu0 %v10013_v54  ;;  %v10043_v54 = vld [vmem:[%s15040_s2 + $0x618] ss:$12 sps:$4 sm:$0xff]  }
  0x80   : > { %2204 = vmatpush2.bf16.msra.mxu1 %v10016_v57  ;;  %2132 = vmatprep.subr.bf16.mxu0 %v10021_v58  ;;  %v11456_v57 = vpack.c.bf16 %v529_v44, %v520_v43  ;;  %v11458_v58 = vpack.c.bf16 %v531_v49, %v522_v47  ;;  %v10061_v43 = vld [vmem:[%s15040_s2 + $0xe0] ss:$12 sps:$4 sm:$0xff]   ;;  %v10065_v49 = vld [vmem:[%s15040_s2 + $0x8] ss:$12 sps:$4 sm:$0xff]  }
  0x81   : > { %2205 = vmatprep.subr.bf16.mxu1 %v10024_v59  ;;  %v10048_v59 = vld [vmem:[%s15040_s2 + $0x604] ss:$12 sps:$4 sm:$0xff]   ;;  %v496_v47 = vld [vmem:[%s11050_s1 + $0x88] sm:$0xff] }
  0x82   : > { %v487_v44 = vld [vmem:[%s11050_s1 + $0x40] sm:$0xff] }
  0x83   : > { %2133 = vmatpush2.bf16.msra.mxu0 %v10019_v62  ;;  %v10053_v62 = vld [vmem:[%s15040_s2 + $0x140] ss:$12 sps:$4 sm:$0xff]  }
  0x84   : > { %2206 = vmatpush2.bf16.msra.mxu1 %v10022_v63  ;;  %2134 = vmatprep.subr.bf16.mxu0 %v10027_v0  ;;  %v519_v63 = vld [vmem:[%s11050_s1 + $0x140] sm:$0xff]  ;;  %v528_v0 = vld [vmem:[%s11050_s1 + $0x188] sm:$0xff] }
  0x85   : > { %2207 = vmatprep.subr.bf16.mxu1 %v10030_v1  ;;  %v521_v1 = vld [vmem:[%s11050_s1 + $0x150] sm:$0xff] }
  0x87   : > { %2135 = vmatpush2.bf16.msra.mxu0 %v10025_v2  ;;  %v530_v2 = vld [vmem:[%s11050_s1 + $0x198] sm:$0xff] }
  0x88   : > { %2208 = vmatpush2.bf16.msra.mxu1 %v10028_v3  ;;  %2136 = vmatprep.subr.bf16.mxu0 %v10033_v4  ;;  %v10054_v3 = vld [vmem:[%s15040_s2 + $0x80] ss:$12 sps:$4 sm:$0xff]   ;;  %v538_v4 = vld [vmem:[%s11050_s1 + $0x1d8] sm:$0xff]  ;;  %v11495_v17 = vpack.c.bf16 %v530_v2, %v521_v1 }
  0x89   : > { %2209 = vmatprep.subr.bf16.mxu1 %v10036_v5  ;;  %v547_v5 = vld [vmem:[%s11050_s1 + $0x220] sm:$0xff] }
  0x8a   : > { %v11497_v20 = vpack.c.bf16 %v547_v5, %v538_v4  ;;  %v10072_v1 = vld [vmem:[%s15040_s2 + $0x458] ss:$12 sps:$4 sm:$0xff]  }
  0x8b   : > { %2137 = vmatpush2.bf16.msra.mxu0 %v10031_v7  ;;  %v10046_v7 = vld [vmem:[%s15040_s2 + $0x600] ss:$12 sps:$4 sm:$0xff]   ;;  %v10069_v2 = vld [vmem:[%s15040_s2 + $0x218] ss:$12 sps:$4 sm:$0xff]  }
  0x8c   : > { %2210 = vmatpush2.bf16.msra.mxu1 %v10034_v8  ;;  %2260 = vmatprep.subr.bf16.mxu0 %v10039_v16  ;;  %v540_v8 = vld [vmem:[%s11050_s1 + $0x1e8] sm:$0xff]  ;;  %v11493_v16 = vpack.c.bf16 %v528_v0, %v519_v63  ;;  %v514_v63 = vld [vmem:[%s11050_s1 + $0x118] sm:$0xff] }
  0x8d   : > { %9649 = vmatprep.subr.bf16.mxu1 %v10049_v22  ;;  %v11499_v21 = vpack.c.bf16 %v549_v11, %v540_v8  ;;  %v10057_v22 = vld [vmem:[%s15040_s2 + $0x110] ss:$12 sps:$4 sm:$0xff]   ;;  %v10074_v4 = vld [vmem:[%s15040_s2 + $0x398] ss:$12 sps:$4 sm:$0xff]   ;;  %v10075_v8 = vld [vmem:[%s15040_s2 + $0x2a8] ss:$12 sps:$4 sm:$0xff]  }
  0x8e   : > { %2139 = vmatmul.mubr.bf16.vlgmr.msra.gmra.mxu0 %v11408_v24  ;;  %v10070_v0 = vld [vmem:[%s15040_s2 + $0x3b0] ss:$12 sps:$4 sm:$0xff]   ;;  %v532_v11 = vld [vmem:[%s11050_s1 + $0x1a8] sm:$0xff] }
  0x8f   : > { %2212 = vmatmul.mubr.bf16.vlgmr.msra.gmra.mxu1 %v11410_v25  ;;  %2261 = vmatpush1.bf16.msra.mxu0 %v10037_v26  ;;  %v546_v26 = vld [vmem:[%s11050_s1 + $0x218] sm:$0xff] }
  0x90   : > { %2148 = vmatprep.mubr.bf16.mxu0 %v11415_v28  ;;  %2262 = vmatprep.subr.bf16.mxu0 %v10042_v29  ;;  %v539_v29 = vld [vmem:[%s11050_s1 + $0x1e0] sm:$0xff]  ;;  %v11521_v40 = vpack.c.bf16 %v546_v26, %v537_v23  ;;  %v10082_v23 = vld [vmem:[%s15040_s2 + $0x368] ss:$12 sps:$4 sm:$0xff]  }
  0x91   : > { %2221 = vmatprep.mubr.bf16.mxu1 %v11420_v30  ;;  %9650 = vmatpush3.bf16.msra.mxu1 %v10050_v41 }
  0x92   : > { %9651 = vmatprep.subr.bf16.mxu1 %v10051_v46  ;;  %v10063_v46 = vld [vmem:[%s15040_s2 + $0xc8] ss:$12 sps:$4 sm:$0xff]  }
  0x93   : > { %2263 = vmatpush1.bf16.msra.mxu0 %v10040_v36  ;;  %v548_v36 = vld [vmem:[%s11050_s1 + $0x228] sm:$0xff] }
  0x94   : > { %2264 = vmatprep.subr.bf16.mxu0 %v10045_v45  ;;  %v11523_v41 = vpack.c.bf16 %v548_v36, %v539_v29  ;;  %v10062_v45 = vld [vmem:[%s15040_s2 + $0x20] ss:$12 sps:$4 sm:$0xff]   ;;  %v10084_v29 = vld [vmem:[%s15040_s2 + $0x410] ss:$12 sps:$4 sm:$0xff]  }
  0x95   : > { %9652 = vmatpush3.bf16.msra.mxu1 %v10052_v50  ;;  %v11543_v50 = vpack.c.bf16 %v496_v47, %v487_v44  ;;  %v550_v36 = vld [vmem:[%s11050_s1 + $0x238] sm:$0xff]  ;;  %v10087_v44 = vld [vmem:[%s15040_s2 + $0x260] ss:$12 sps:$4 sm:$0xff]  }
  0x96   : > { %2149 = vmatmul.mubr.bf16.gmra.mxu0 %v11449_v51  ;;  %9653 = vmatprep.subr.bf16.mxu1 %v10053_v62  ;;  %v505_v62 = vld [vmem:[%s11050_s1 + $0xd0] sm:$0xff]  ;;  %v10092_v47 = vld [vmem:[%s15040_s2 + $0x3e0] ss:$12 sps:$4 sm:$0xff]  }
  0x97   : > { %2222 = vmatmul.mubr.bf16.gmra.mxu1 %v11451_v53  ;;  %2158 = vmatprep.mubr.bf16.mxu0 %v11456_v57  ;;  %v11576_v5 = vpack.c.bf16 %v514_v63, %v505_v62  ;;  %v10097_v62 = vld [vmem:[%s15040_s2 + $0x308] ss:$12 sps:$4 sm:$0xff]   ;;  %v10108_v63 = vld [vmem:[%s15040_s2 + $0x650] ss:$12 sps:$4 sm:$0xff]  }
  0x98   : > { %2231 = vmatprep.mubr.bf16.mxu1 %v11458_v58  ;;  %2265 = vmatpush1.bf16.msra.mxu0 %v10043_v54  ;;  %v10068_v54 = vld [vmem:[%s15040_s2 + $0x470] ss:$12 sps:$4 sm:$0xff]  }
  0x99   : > { %2266 = vmatprep.subr.bf16.mxu0 %v10048_v59  ;;  %9654 = vmatpush3.bf16.msra.mxu1 %v10054_v3  ;;  %v10066_v59 = vld [vmem:[%s15040_s2 + $0x230] ss:$12 sps:$4 sm:$0xff]   ;;  %v10071_v3 = vld [vmem:[%s15040_s2 + $0x2c0] ss:$12 sps:$4 sm:$0xff]  }
  0x9a   : > { %9655 = vmatprep.subr.bf16.mxu1 %v10055_v9  ;;  %v523_v9 = vld [vmem:[%s11050_s1 + $0x160] sm:$0xff] }
  0x9b   : > { %v11609_v26 = vpack.c.bf16 %v532_v11, %v523_v9  ;;  %v10137_v9 = vld [vmem:[%s15043_s5 + $0xc4] ss:$8 sps:$4 sm:$0xff]  }
  0x9c   : > { %2267 = vmatpush1.bf16.msra.mxu0 %v10046_v7  ;;  %v10076_v7 = vld [vmem:[%s15040_s2 + $0x440] ss:$12 sps:$4 sm:$0xff]  }
  0x9d   : > { %9656 = vmatpush3.bf16.msra.mxu1 %v10056_v12  ;;  %9689 = vmatprep.subr.bf16.mxu0 %v10064_v13  ;;  %v10080_v12 = vld [vmem:[%s15040_s2 + $0x428] ss:$12 sps:$4 sm:$0xff]   ;;  %v10140_v11 = vld [vmem:[%s15043_s5 + $0x44] ss:$8 sps:$4 sm:$0xff]  }
  0x9e   : > { %2159 = vmatmul.mubr.bf16.gmra.mxu0 %v11493_v16  ;;  %9657 = vmatprep.subr.bf16.mxu1 %v10057_v22  ;;  %v10077_v13 = vld [vmem:[%s15040_s2 + $0x1e8] ss:$12 sps:$4 sm:$0xff]   ;;  %v10079_v22 = vld [vmem:[%s15040_s2 + $0x290] ss:$12 sps:$4 sm:$0xff]  }
  0x9f   : > { %2232 = vmatmul.mubr.bf16.gmra.mxu1 %v11495_v17  ;;  %2168 = vmatprep.mubr.bf16.mxu0 %v11497_v20 }
  0xa0   : > { %2241 = vmatprep.mubr.bf16.mxu1 %v11499_v21 }
  0xa1   : > { %9658 = vmatpush3.bf16.msra.mxu1 %v10058_v32  ;;  %v10083_v32 = vld [vmem:[%s15040_s2 + $0x278] ss:$12 sps:$4 sm:$0xff]  }
  0xa2   : > { %9659 = vmatprep.subr.bf16.mxu1 %v10059_v34  ;;  %v541_v34 = vld [vmem:[%s11050_s1 + $0x1f0] sm:$0xff] }
  0xa5   : > { %9660 = vmatpush3.bf16.msra.mxu1 %v10060_v37  ;;  %v10086_v37 = vld [vmem:[%s15040_s2 + $0x350] ss:$12 sps:$4 sm:$0xff]  }
  0xa6   : > { %2169 = vmatmul.mubr.bf16.gmra.mxu0 %v11521_v40  ;;  %9661 = vmatprep.subr.bf16.mxu1 %v10061_v43  ;;  %v10088_v43 = vld [vmem:[%s15040_s2 + $0x3f8] ss:$12 sps:$4 sm:$0xff]  }
  0xa7   : > { %2242 = vmatmul.mubr.bf16.gmra.mxu1 %v11523_v41  ;;  %2284 = vmatprep.mubr.bf16.mxu0 %v15053_v35 }
  0xa8   : > { %2357 = vmatprep.mubr.bf16.mxu1 %v11071_v55  ;;  %v10067_v55 = vld [vmem:[%s15040_s2 + $0x2d8] ss:$12 sps:$4 sm:$0xff]  }
  0xa9   : > { %9662 = vmatpush3.bf16.msra.mxu1 %v10062_v45  ;;  %v10090_v45 = vld [vmem:[%s15040_s2 + $0x338] ss:$12 sps:$4 sm:$0xff]  }
  0xaa   : > { %9663 = vmatprep.subr.bf16.mxu1 %v10063_v46  ;;  %v10089_v46 = vld [vmem:[%s15040_s2 + $0x1a0] ss:$12 sps:$4 sm:$0xff]  }
  0xad   : > { %9664 = vmatpush3.bf16.msra.mxu1 %v10065_v49  ;;  %v11648_v49 = vpack.c.bf16 %v550_v36, %v541_v34  ;;  %v10155_v34 = vld [vmem:[%s15043_s5 + $0x94] ss:$8 sps:$4 sm:$0xff]   ;;  %v10153_v36 = vld [vmem:[%s15043_s5 + $0x90] ss:$8 sps:$4 sm:$0xff]  }
  0xae   : > { %8885 = vmatmul.mubr.msk.bf16.vlgmr.msra.gmra.mxu0 %vm1947_vm0, %v11543_v50  ;;  %9729 = vmatprep.subr.bf16.mxu1 %v10068_v54  ;;  %v10094_v54 = vld [vmem:[%s15040_s2 + $0x320] ss:$12 sps:$4 sm:$0xff]  }
  0xaf   : > { %2294 = vmatprep.mubr.bf16.mxu0 %v15053_v35  ;;  %9690 = vmatpush3.bf16.msra.mxu0 %v10066_v59  ;;  %v10093_v59 = vld [vmem:[%s15040_s2 + $0x188] ss:$12 sps:$4 sm:$0xff]  }
  0xb0   : > { %2358 = vmatmul.mubr.bf16.vlgmr.msra.gmra.mxu1 %v11132_v14  ;;  %9691 = vmatprep.subr.bf16.mxu0 %v10067_v55  ;;  %v10073_v14 = vld [vmem:[%s15040_s2 + $0x200] ss:$12 sps:$4 sm:$0xff]   ;;  %v10096_v55 = vld [vmem:[%s15040_s2 + $0x5f0] ss:$12 sps:$4 sm:$0xff]  }
  0xb1   : > { %9730 = vmatpush3.bf16.msra.mxu1 %v10070_v0  ;;  %2365 = vmatprep.mubr.bf16.mxu1 %v11165_v27  ;;  %v10078_v27 = vld [vmem:[%s15040_s2 + $0x380] ss:$12 sps:$4 sm:$0xff]   ;;  %v10098_v0 = vld [vmem:[%s15040_s2 + $0x530] ss:$12 sps:$4 sm:$0xff]  }
  0xb2   : > { %9731 = vmatprep.subr.bf16.mxu1 %v10072_v1  ;;  %v10100_v1 = vld [vmem:[%s15040_s2 + $0x518] ss:$12 sps:$4 sm:$0xff]  }
  0xb3   : > { %9692 = vmatpush3.bf16.msra.mxu0 %v10069_v2  ;;  %v10114_v2 = vld [vmem:[%s15040_s2 + $0x620] ss:$12 sps:$4 sm:$0xff]  }
  0xb4   : > { %9693 = vmatprep.subr.bf16.mxu0 %v10071_v3  ;;  %v10102_v3 = vld [vmem:[%s15040_s2 + $0x500] ss:$12 sps:$4 sm:$0xff]  }
  0xb5   : > { %9732 = vmatpush3.bf16.msra.mxu1 %v10074_v4  ;;  %v10106_v4 = vld [vmem:[%s15040_s2 + $0x4d0] ss:$12 sps:$4 sm:$0xff]  }
  0xb6   : > { %8886 = vmatmul.mubr.msk.bf16.gmra.mxu0 %vm1947_vm0, %v11576_v5  ;;  %9733 = vmatprep.subr.bf16.mxu1 %v10076_v7  ;;  %v10113_v7 = vld [vmem:[%s15040_s2 + $0x548] ss:$12 sps:$4 sm:$0xff]  }
  0xb7   : > { %2304 = vmatprep.mubr.bf16.mxu0 %v15053_v35  ;;  %9694 = vmatpush3.bf16.msra.mxu0 %v10073_v14  ;;  %v10126_v14 = vld [vmem:[%s15043_s5 + $0x60] ss:$8 sps:$4 sm:$0xff]  }
  0xb8   : > { %2366 = vmatmul.mubr.bf16.gmra.mxu1 %v11184_v38  ;;  %9695 = vmatprep.subr.bf16.mxu0 %v10075_v8  ;;  %v10081_v38 = vld [vmem:[%s15040_s2 + $0x1d0] ss:$12 sps:$4 sm:$0xff]  }
  0xb9   : > { %9734 = vmatpush3.bf16.msra.mxu1 %v10078_v27  ;;  %2373 = vmatprep.mubr.bf16.mxu1 %v11209_v48  ;;  %v10085_v48 = vld [vmem:[%s15040_s2 + $0x1b8] ss:$12 sps:$4 sm:$0xff]   ;;  %v10820_v27 = vmov 0.0  }
  0xba   : > { %9735 = vmatprep.subr.bf16.mxu1 %v10080_v12  ;;  %v10132_v8 = vld [vmem:[%s15043_s5 + $0x50] ss:$8 sps:$4 sm:$0xff]   ;;  %2756 = vst [vmem:[#allocation2] sm:$0xff] %v10820_v27  ;;  %2758 = vst [vmem:[#allocation2 + $0x10] sm:$0xff] %v10820_v27  ;;  %v10138_v12 = vld [vmem:[%s15043_s5 + $0x40] ss:$8 sps:$4 sm:$0xff]  }
  0xbb   : > { %9696 = vmatpush3.bf16.msra.mxu0 %v10077_v13  ;;  %2759 = vst [vmem:[#allocation2 + $0x18] sm:$0xff] %v10820_v27  ;;  %2761 = vst [vmem:[#allocation2 + $0x28] sm:$0xff] %v10820_v27  ;;  %v10143_v13 = vld [vmem:[%s15043_s5 + $0xb4] ss:$8 sps:$4 sm:$0xff]  }
  0xbc   : > { %9697 = vmatprep.subr.bf16.mxu0 %v10079_v22  ;;  %2762 = vst [vmem:[#allocation2 + $0x30] sm:$0xff] %v10820_v27  ;;  %2764 = vst [vmem:[#allocation2 + $0x40] sm:$0xff] %v10820_v27  ;;  %v10141_v22 = vld [vmem:[%s15043_s5 + $0xb0] ss:$8 sps:$4 sm:$0xff]  }
  0xbd   : > { %9736 = vmatpush3.bf16.msra.mxu1 %v10082_v23  ;;  %2765 = vst [vmem:[#allocation2 + $0x48] sm:$0xff] %v10820_v27  ;;  %2767 = vst [vmem:[#allocation2 + $0x58] sm:$0xff] %v10820_v27  ;;  %v10144_v23 = vld [vmem:[%s15043_s5 + $0x30] ss:$8 sps:$4 sm:$0xff]  }
  0xbe   : > { %8887 = vmatmul.mubr.msk.bf16.gmra.mxu0 %vm1947_vm0, %v11609_v26  ;;  %9737 = vmatprep.subr.bf16.mxu1 %v10084_v29  ;;  %2768 = vst [vmem:[#allocation2 + $0x60] sm:$0xff] %v10820_v27  ;;  %2770 = vst [vmem:[#allocation2 + $0x70] sm:$0xff] %v10820_v27  ;;  %v10147_v29 = vld [vmem:[%s15043_s5 + $0xa0] ss:$8 sps:$4 sm:$0xff]  }
  0xbf   : > { %2314 = vmatprep.mubr.bf16.mxu0 %v15053_v35  ;;  %9698 = vmatpush3.bf16.msra.mxu0 %v10081_v38  ;;  %2771 = vst [vmem:[#allocation2 + $0x78] sm:$0xff] %v10820_v27  ;;  %2773 = vst [vmem:[#allocation2 + $0x88] sm:$0xff] %v10820_v27  ;;  %v10152_v38 = vld [vmem:[%s15043_s5 + $0x24] ss:$8 sps:$4 sm:$0xff]  }
  0xc0   : > { %2374 = vmatmul.mubr.bf16.gmra.mxu1 %v11228_v60  ;;  %9699 = vmatprep.subr.bf16.mxu0 %v10083_v32  ;;  %v10091_v60 = vld [vmem:[%s15040_s2 + $0x248] ss:$12 sps:$4 sm:$0xff]   ;;  %2774 = vst [vmem:[#allocation2 + $0x90] sm:$0xff] %v10820_v27  ;;  %2776 = vst [vmem:[#allocation2 + $0xa0] sm:$0xff] %v10820_v27 }
  0xc1   : > { %9738 = vmatpush3.bf16.msra.mxu1 %v10086_v37  ;;  %2381 = vmatprep.mubr.bf16.mxu1 %v11253_v6  ;;  %v10095_v6 = vld [vmem:[%s15040_s2 + $0x3c8] ss:$12 sps:$4 sm:$0xff]   ;;  %2777 = vst [vmem:[#allocation2 + $0xa8] sm:$0xff] %v10820_v27  ;;  %2779 = vst [vmem:[#allocation2 + $0xb8] sm:$0xff] %v10820_v27 }
  0xc2   : > { %9739 = vmatprep.subr.bf16.mxu1 %v10088_v43  ;;  %v10150_v32 = vld [vmem:[%s15043_s5 + $0x20] ss:$8 sps:$4 sm:$0xff]   ;;  %v10164_v43 = vld [vmem:[%s15043_s5 + $0x4] ss:$8 sps:$4 sm:$0xff]  }
  0xc3   : > { %9700 = vmatpush3.bf16.msra.mxu0 %v10085_v48  ;;  %v10161_v48 = vld [vmem:[%s15043_s5 + $0x84] ss:$8 sps:$4 sm:$0xff]   ;;  %v10159_v37 = vld [vmem:[%s15043_s5 + $0x80] ss:$8 sps:$4 sm:$0xff]  }
  0xc4   : > { %9701 = vmatprep.subr.bf16.mxu0 %v10087_v44  ;;  %v10167_v44 = vld [vmem:[%s15043_s5 + $0x174] ss:$8 sps:$4 sm:$0xff]  }
  0xc5   : > { %9740 = vmatpush3.bf16.msra.mxu1 %v10090_v45  ;;  %v10162_v45 = vld [vmem:[%s15043_s5] ss:$8 sps:$4 sm:$0xff]  }
  0xc6   : > { %8888 = vmatmul.mubr.msk.bf16.gmra.mxu0 %vm1947_vm0, %v11648_v49  ;;  %9741 = vmatprep.subr.bf16.mxu1 %v10092_v47 }
  0xc7   : > { %9702 = vmatpush3.bf16.msra.mxu0 %v10089_v46  ;;  %2422 = vmatprep.mubr.bf16.mxu0 %v11073_v56  ;;  %v10099_v56 = vld [vmem:[%s15040_s2 + $0x5d8] ss:$12 sps:$4 sm:$0xff]   ;;  %v10170_v46 = vld [vmem:[%s15043_s5 + $0x1f4] ss:$8 sps:$4 sm:$0xff]  }
  0xc8   : > { %2382 = vmatmul.mubr.bf16.gmra.mxu1 %v11272_v18  ;;  %9703 = vmatprep.subr.bf16.mxu0 %v10091_v60  ;;  %v10111_v18 = vld [vmem:[%s15040_s2 + $0x638] ss:$12 sps:$4 sm:$0xff]  }
  0xc9   : > { %9742 = vmatpush3.bf16.msra.mxu1 %v10094_v54  ;;  %2487 = vmatprep.mubr.bf16.mxu1 %v11308_v33  ;;  %v10101_v33 = vld [vmem:[%s15040_s2 + $0x5c0] ss:$12 sps:$4 sm:$0xff]  }
  0xca   : > { %9743 = vmatprep.subr.bf16.mxu1 %v10095_v6 }
  0xcb   : > { %9704 = vmatpush3.bf16.msra.mxu0 %v10093_v59 }
  0xcc   : > { %9769 = vmatprep.subr.bf16.mxu0 %v10096_v55 }
  0xcd   : > { %9744 = vmatpush3.bf16.msra.mxu1 %v10097_v62 }
  0xce   : > { %2423 = vmatmul.mubr.bf16.vlgmr.msra.gmra.mxu0 %v11134_v15  ;;  %9817 = vmatprep.subr.bf16.mxu1 %v10108_v63  ;;  %v10103_v15 = vld [vmem:[%s15040_s2 + $0x5a8] ss:$12 sps:$4 sm:$0xff]  }
  0xcf   : > { %9770 = vmatpush3.bf16.msra.mxu0 %v10098_v0  ;;  %2430 = vmatprep.mubr.bf16.mxu0 %v11174_v31  ;;  %v10116_v31 = vld [vmem:[%s15040_s2 + $0x608] ss:$12 sps:$4 sm:$0xff]  }
  0xd0   : > { %2488 = vmatmul.mubr.bf16.vlgmr.msra.gmra.mxu1 %v11408_v24  ;;  %9771 = vmatprep.subr.bf16.mxu0 %v10099_v56  ;;  %v10104_v24 = vld [vmem:[%s15040_s2 + $0x4e8] ss:$12 sps:$4 sm:$0xff]  }
  0xd1   : > { %2495 = vmatprep.mubr.bf16.mxu1 %v11415_v28  ;;  %9818 = vmatpush3.bf16.msra.mxu1 %v10108_v63  ;;  %v10105_v28 = vld [vmem:[%s15040_s2 + $0x590] ss:$12 sps:$4 sm:$0xff]  }
  0xd2   : > { %9819 = vmatprep.subr.bf16.mxu1 %v10111_v18 }
  0xd3   : > { %9772 = vmatpush3.bf16.msra.mxu0 %v10100_v1 }
  0xd4   : > { %9773 = vmatprep.subr.bf16.mxu0 %v10101_v33 }
  0xd5   : > { %9820 = vmatpush3.bf16.msra.mxu1 %v10111_v18 }
  0xd6   : > { %2431 = vmatmul.mubr.bf16.gmra.mxu0 %v11186_v39  ;;  %9821 = vmatprep.subr.bf16.mxu1 %v10114_v2  ;;  %v10107_v39 = vld [vmem:[%s15040_s2 + $0x578] ss:$12 sps:$4 sm:$0xff]  }
  0xd7   : > { %9774 = vmatpush3.bf16.msra.mxu0 %v10102_v3  ;;  %2438 = vmatprep.mubr.bf16.mxu0 %v11218_v52  ;;  %v10109_v52 = vld [vmem:[%s15040_s2 + $0x4b8] ss:$12 sps:$4 sm:$0xff]  }
  0xd8   : > { %2496 = vmatmul.mubr.bf16.gmra.mxu1 %v11449_v51  ;;  %9775 = vmatprep.subr.bf16.mxu0 %v10103_v15  ;;  %v10110_v51 = vld [vmem:[%s15040_s2 + $0x560] ss:$12 sps:$4 sm:$0xff]  }
  0xd9   : > { %2503 = vmatprep.mubr.bf16.mxu1 %v11456_v57  ;;  %9822 = vmatpush3.bf16.msra.mxu1 %v10114_v2  ;;  %v10112_v57 = vld [vmem:[%s15040_s2 + $0x4a0] ss:$12 sps:$4 sm:$0xff]  }
  0xda   : > { %9823 = vmatprep.subr.bf16.mxu1 %v10116_v31 }
  0xdb   : > { %9776 = vmatpush3.bf16.msra.mxu0 %v10104_v24 }
  0xdc   : > { %9777 = vmatprep.subr.bf16.mxu0 %v10105_v28 }
  0xdd   : > { %9824 = vmatpush3.bf16.msra.mxu1 %v10116_v31 }
  0xde   : > { %2439 = vmatmul.mubr.bf16.gmra.mxu0 %v11230_v61  ;;  %v10122_v61 = vld [vmem:[%s15043_s5 + $0x74] ss:$8 sps:$4 sm:$0xff]  }
  0xdf   : > { %9778 = vmatpush3.bf16.msra.mxu0 %v10106_v4  ;;  %2446 = vmatprep.mubr.bf16.mxu0 %v11262_v10  ;;  %v10115_v10 = vld [vmem:[%s15040_s2 + $0x488] ss:$12 sps:$4 sm:$0xff]  }
  0xe0   : > { %2504 = vmatmul.mubr.bf16.gmra.mxu1 %v11493_v16  ;;  %9779 = vmatprep.subr.bf16.mxu0 %v10107_v39  ;;  %v10119_v16 = vld [vmem:[%s15043_s5 + $0xf4] ss:$8 sps:$4 sm:$0xff]  }
  0xe1   : > { %2511 = vmatprep.mubr.bf16.mxu1 %v11497_v20  ;;  %3078 = vmatprep.subr.bf16.mxu1 %v10122_v61  ;;  %v10125_v20 = vld [vmem:[%s15043_s5 + $0xe4] ss:$8 sps:$4 sm:$0xff]  }
  0xe3   : > { %9780 = vmatpush3.bf16.msra.mxu0 %v10109_v52 }
  0xe4   : > { %9781 = vmatprep.subr.bf16.mxu0 %v10110_v51 }
  0xe6   : > { %2447 = vmatmul.mubr.bf16.gmra.mxu0 %v11274_v19  ;;  %v10117_v19 = vld [vmem:[%s15043_s5 + $0xf0] ss:$8 sps:$4 sm:$0xff]  }
  0xe7   : > { %9782 = vmatpush3.bf16.msra.mxu0 %v10112_v57  ;;  %2552 = vmatprep.mubr.bf16.mxu0 %v11322_v42  ;;  %v10120_v42 = vld [vmem:[%s15043_s5 + $0x70] ss:$8 sps:$4 sm:$0xff]  }
  0xe8   : > { %2512 = vmatmul.mubr.bf16.gmra.mxu1 %v11521_v40  ;;  %9783 = vmatprep.subr.bf16.mxu0 %v10113_v7  ;;  %v10128_v40 = vld [vmem:[%s15043_s5 + $0x64] ss:$8 sps:$4 sm:$0xff]  }
  0xe9   : > { %9825 = vmatprep.mubr.msk.bf16.mxu1 %vm1947_vm0, %v11543_v50  ;;  %v10123_v50 = vld [vmem:[%s15043_s5 + $0xe0] ss:$8 sps:$4 sm:$0xff]  }
  0xeb   : > { %9784 = vmatpush3.bf16.msra.mxu0 %v10115_v10 }
  0xec   : > { %2925 = vmatprep.subr.bf16.mxu0 %v10119_v16 }
  0xee   : > { %2553 = vmatmul.mubr.bf16.vlgmr.msra.gmra.mxu0 %v11410_v25  ;;  %v10131_v25 = vld [vmem:[%s15043_s5 + $0xd4] ss:$8 sps:$4 sm:$0xff]  }
  0xef   : > { %2560 = vmatprep.mubr.bf16.mxu0 %v11420_v30  ;;  %2926 = vmatpush1.bf16.msra.mxu0 %v10117_v19  ;;  %v10134_v30 = vld [vmem:[%s15043_s5 + $0x54] ss:$8 sps:$4 sm:$0xff]  }
  0xf0   : > { %9826 = vmatmul.mubr.msk.bf16.vlgmr.msra.gmra.mxu1 %vm1947_vm0, %v11576_v5  ;;  %2927 = vmatprep.subr.bf16.mxu0 %v10125_v20  ;;  %v10129_v5 = vld [vmem:[%s15043_s5 + $0xd0] ss:$8 sps:$4 sm:$0xff]  }
  0xf1   : > { %9829 = vmatprep.mubr.msk.bf16.mxu1 %vm1947_vm0, %v11609_v26  ;;  %3079 = vmatpush1.bf16.msra.mxu1 %v10120_v42  ;;  %v10149_v26 = vld [vmem:[%s15043_s5 + $0xa4] ss:$8 sps:$4 sm:$0xff]  }
  0xf2   : > { %3080 = vmatprep.subr.bf16.mxu1 %v10128_v40 }
  0xf3   : > { %2928 = vmatpush1.bf16.msra.mxu0 %v10123_v50 }
  0xf4   : > { %2929 = vmatprep.subr.bf16.mxu0 %v10131_v25 }
  0xf5   : > { %3081 = vmatpush1.bf16.msra.mxu1 %v10126_v14 }
  0xf6   : > { %2561 = vmatmul.mubr.bf16.gmra.mxu0 %v11451_v53  ;;  %3082 = vmatprep.subr.bf16.mxu1 %v10134_v30  ;;  %v10135_v53 = vld [vmem:[%s15043_s5 + $0xc0] ss:$8 sps:$4 sm:$0xff]  }
  0xf7   : > { %2568 = vmatprep.mubr.bf16.mxu0 %v11458_v58  ;;  %2930 = vmatpush1.bf16.msra.mxu0 %v10129_v5  ;;  %v10146_v58 = vld [vmem:[%s15043_s5 + $0x34] ss:$8 sps:$4 sm:$0xff]  }
  0xf8   : > { %9830 = vmatmul.mubr.msk.bf16.gmra.mxu1 %vm1947_vm0, %v11648_v49  ;;  %2931 = vmatprep.subr.bf16.mxu0 %v10137_v9 }
  0xf9   : > { %3083 = vmatpush1.bf16.msra.mxu1 %v10132_v8  ;;  %3110 = vmatprep.mubr.bf16.mxu1 %v15053_v35 }
  0xfa   : > { %3084 = vmatprep.subr.bf16.mxu1 %v10140_v11 }
  0xfb   : > { %2932 = vmatpush1.bf16.msra.mxu0 %v10135_v53 }
  0xfc   : > { %2933 = vmatprep.subr.bf16.mxu0 %v10143_v13 }
  0xfd   : > { %3085 = vmatpush1.bf16.msra.mxu1 %v10138_v12 }
  0xfe   : > { %2569 = vmatmul.mubr.bf16.gmra.mxu0 %v11495_v17  ;;  %3086 = vmatprep.subr.bf16.mxu1 %v10146_v58  ;;  %v10158_v17 = vld [vmem:[%s15043_s5 + $0x14] ss:$8 sps:$4 sm:$0xff]  }
  0xff   : > { %2576 = vmatprep.mubr.bf16.mxu0 %v11499_v21  ;;  %2934 = vmatpush1.bf16.msra.mxu0 %v10141_v22  ;;  %v10156_v21 = vld [vmem:[%s15043_s5 + $0x10] ss:$8 sps:$4 sm:$0xff]  }
 0x100   : > { %2935 = vmatprep.subr.bf16.mxu0 %v10149_v26 }
 0x101   : > { %3087 = vmatpush1.bf16.msra.mxu1 %v10144_v23 }
 0x102   : > { %3088 = vmatprep.subr.bf16.mxu1 %v10152_v38 }
 0x103   : > { %2936 = vmatpush1.bf16.msra.mxu0 %v10147_v29 }
 0x104   : > { %2937 = vmatprep.subr.bf16.mxu0 %v10155_v34 }
 0x105   : > { %3089 = vmatpush1.bf16.msra.mxu1 %v10150_v32 }
 0x106   : > { %2577 = vmatmul.mubr.bf16.gmra.mxu0 %v11523_v41  ;;  %3090 = vmatprep.subr.bf16.mxu1 %v10158_v17 }
 0x107   : > { %2938 = vmatpush1.bf16.msra.mxu0 %v10153_v36  ;;  %2957 = vmatprep.mubr.bf16.mxu0 %v15053_v35 }
 0x108   : > { %2939 = vmatprep.subr.bf16.mxu0 %v10161_v48 }
 0x109   : > { %3091 = vmatpush1.bf16.msra.mxu1 %v10156_v21 }
 0x10a   : > { %3092 = vmatprep.subr.bf16.mxu1 %v10164_v43 }
 0x10b   : > { %2940 = vmatpush1.bf16.msra.mxu0 %v10159_v37 }
 0x10c   : > { %3260 = vmatprep.subr.bf16.mxu0 %v10167_v44 }
 0x10d   : > { %3093 = vmatpush1.bf16.msra.mxu1 %v10162_v45  ;;  %v2652_v45 = vlaneseq }
 0x10e   : > { %v11864_v41 = vpop.f32.mrf.mxu0  ;;  %3458 = vmatprep.subr.bf16.mxu1 %v10170_v46 }
 0x10f   : > { %v11866_v47 = vpop.f32.mrf.mxu1 }
 0x110   : > { %v1996_v49 = vpop.f32.mrf.mxu0 }
 0x111   : > { %v2069_v60 = vpop.f32.mrf.mxu1 }
 0x112   : > { %v2070_v54 = vadd.f32 %v2069_v60, %v1996_v49  ;;  %v11868_v6 = vpop.f32.mrf.mxu0 }
 0x113   : > { %v11870_v59 = vpop.f32.mrf.mxu1 }
 0x114   : > { %v11872_v55 = vpop.f32.mrf.mxu0 }
 0x115   : > { %15073 = vst [vmem:[#allocation5_spill] sm:$0xff] %v11872_v55  ;;  %v11874_v62 = vpop.f32.mrf.mxu1 }
 0x116   : > { %15074 = vst [vmem:[#allocation6_spill] sm:$0xff] %v11874_v62  ;;  %v11876_v63 = vpop.f32.mrf.mxu0 }
 0x117   : > { %v11878_v0 = vpop.f32.mrf.mxu1 }
 0x118   : > { %v2006_v56 = vpop.f32.mrf.mxu0 }
 0x119   : > { %v2079_v18 = vpop.f32.mrf.mxu1 }
 0x11a   : > { %v2080_v1 = vadd.f32 %v2079_v18, %v2006_v56  ;;  %v11880_v33 = vpop.f32.mrf.mxu0  ;;  %v11936_v18 = vshrl.u32 %v2652_v45, 7 }
 0x11b   : > { %v11882_v2 = vpop.f32.mrf.mxu1 }
 0x11c   : > { %v11884_v3 = vpop.f32.mrf.mxu0  ;;  %15087 = vst [vmem:[#allocation19_spill] sm:$0xff] %v11936_v18 }
 0x11d   : > { %15075 = vst [vmem:[#allocation7_spill] sm:$0xff] %v11884_v3  ;;  %v11886_v15 = vpop.f32.mrf.mxu1 }
 0x11e   : > { %15076 = vst [vmem:[#allocation8_spill] sm:$0xff] %v11886_v15  ;;  %v11888_v31 = vpop.f32.mrf.mxu0 }
 0x11f   : > { %v11890_v24 = vpop.f32.mrf.mxu1 }
 0x120   : > { %v2016_v28 = vpop.f32.mrf.mxu0 }
 0x121   : > { %v2089_v4 = vpop.f32.mrf.mxu1 }
 0x122   : > { %v2090_v39 = vadd.f32 %v2089_v4, %v2016_v28  ;;  %v11892_v52 = vpop.f32.mrf.mxu0  ;;  %v2068_v4 = vadd.f32 %v11866_v47, %v11864_v41  ;;  %v11959_v41 = vld [vmem:[%s15042_s4] sm:$0x7]  ;;  %v2072_v47 = vadd.f32 %v11870_v59, %v11868_v6 }
 0x123   : > { %v11894_v51 = vpop.f32.mrf.mxu1 }
 0x124   : > { %v11896_v57 = vpop.f32.mrf.mxu0 }
 0x125   : > { %15077 = vst [vmem:[#allocation9_spill] sm:$0xff] %v11896_v57  ;;  %v11898_v61 = vpop.f32.mrf.mxu1 }
 0x126   : > { %15078 = vst [vmem:[#allocation10_spill] sm:$0xff] %v11898_v61  ;;  %v11900_v7 = vpop.f32.mrf.mxu0 }
 0x127   : > { %v11902_v10 = vpop.f32.mrf.mxu1 }
 0x128   : > { %v2026_v16 = vpop.f32.mrf.mxu0 }
 0x129   : > { %v2099_v19 = vpop.f32.mrf.mxu1 }
 0x12a   : > { %v2100_v42 = vadd.f32 %v2099_v19, %v2026_v16  ;;  %v11904_v20 = vpop.f32.mrf.mxu0  ;;  %v11947_v19 = vld [vmem:[%s15041_s3] sm:$0x7] }
 0x12b   : > { %v11906_v40 = vpop.f32.mrf.mxu1 }
 0x12c   : > { %v11908_v50 = vpop.f32.mrf.mxu0 }
 0x12d   : > { %15079 = vst [vmem:[#allocation11_spill] sm:$0xff] %v11908_v50  ;;  %v11910_v14 = vpop.f32.mrf.mxu1 }
 0x12e   : > { %15080 = vst [vmem:[#allocation12_spill] sm:$0xff] %v11910_v14 }
 0x14e   : > { %v2140_v25 = vpop.f32.mrf.mxu0 }
 0x14f   : > { %v2213_v30 = vpop.f32.mrf.mxu1 }
 0x150   : > { %v2142_v5 = vpop.f32.mrf.mxu0 }
 0x151   : > { %v2215_v8 = vpop.f32.mrf.mxu1  ;;  %v2143_v9 = vadd.f32 %v2142_v5, %v2070_v54  ;;  %v2141_v5 = vadd.f32 %v2140_v25, %v2068_v4  ;;  %v2078_v4 = vadd.f32 %v11878_v0, %v11876_v63 }
 0x152   : > { %v2144_v11 = vpop.f32.mrf.mxu0 }
 0x153   : > { %v2217_v27 = vpop.f32.mrf.mxu1  ;;  %v2216_v53 = vadd.f32 %v2215_v8, %v2143_v9  ;;  %v11950_v9 = vsub.s32 0, %v11936_v18  ;;  %v2145_v25 = vadd.f32 %v2144_v11, %v2072_v47  ;;  %v2082_v47 = vadd.f32 %v11882_v2, %v11880_v33 }
 0x154   : > { %v11912_v12 = vpop.f32.mrf.mxu0  ;;  %v2088_v2 = vadd.f32 %v11890_v24, %v11888_v31  ;;  %v2092_v31 = vadd.f32 %v11894_v51, %v11892_v52 }
 0x155   : > { %15081 = vst [vmem:[#allocation13_spill] sm:$0xff] %v11912_v12  ;;  %v11914_v13 = vpop.f32.mrf.mxu1  ;;  %v11977_v6 = vrot.slane %v11959_v41, %v11950_v9 }
 0x156   : > { %15082 = vst [vmem:[#allocation14_spill] sm:$0xff] %v11914_v13  ;;  %v2150_v58 = vpop.f32.mrf.mxu0 }
 0x157   : > { %v2223_v22 = vpop.f32.mrf.mxu1 }
 0x158   : > { %v2152_v23 = vpop.f32.mrf.mxu0 }
 0x159   : > { %v2225_v26 = vpop.f32.mrf.mxu1  ;;  %v2153_v29 = vadd.f32 %v2152_v23, %v2080_v1 }
 0x15a   : > { %v2154_v38 = vpop.f32.mrf.mxu0 }
 0x15b   : > { %v11916_v32 = vpop.f32.mrf.mxu1  ;;  %v11918_v34 = vadd.f32 %v2225_v26, %v2153_v29 }
 0x15c   : > { %v11920_v36 = vpop.f32.mrf.mxu0 }
 0x15d   : > { %15083 = vst [vmem:[#allocation15_spill] sm:$0xff] %v11920_v36  ;;  %v11922_v17 = vpop.f32.mrf.mxu1 }
 0x15e   : > { %15084 = vst [vmem:[#allocation16_spill] sm:$0xff] %v11922_v17  ;;  %v2160_v21 = vpop.f32.mrf.mxu0 }
 0x15f   : > { %v11924_v48 = vpop.f32.mrf.mxu1 }
 0x160   : > { %v2162_v37 = vpop.f32.mrf.mxu0 }
 0x161   : > { %v2235_v43 = vpop.f32.mrf.mxu1  ;;  %v2163_v44 = vadd.f32 %v2162_v37, %v2090_v39 }
 0x162   : > { %v11926_v46 = vpop.f32.mrf.mxu0 }
 0x163   : > { %v11928_v49 = vpop.f32.mrf.mxu1  ;;  %v11930_v60 = vadd.f32 %v2235_v43, %v2163_v44  ;;  %v11969_v43 = vrot.slane %v11947_v19, %v11950_v9 }
 0x164   : > { %v11932_v54 = vpop.f32.mrf.mxu0 }
 0x165   : > { %15085 = vst [vmem:[#allocation17_spill] sm:$0xff] %v11932_v54  ;;  %v11934_v56 = vpop.f32.mrf.mxu1 }
 0x166   : > { %15086 = vst [vmem:[#allocation18_spill] sm:$0xff] %v11934_v56  ;;  %v11938_v1 = vpop.f32.mrf.mxu0 }
 0x167   : > { %v11940_v28 = vpop.f32.mrf.mxu1 }
 0x168   : > { %v2172_v39 = vpop.f32.mrf.mxu0 }
 0x169   : > { %v2245_v16 = vpop.f32.mrf.mxu1  ;;  %v2173_v8 = vadd.f32 %v2172_v39, %v2100_v42  ;;  %v2214_v42 = vadd.f32 %v2213_v30, %v2141_v5  ;;  %v2151_v30 = vadd.f32 %v2150_v58, %v2078_v4 }
 0x16a   : > { %v11952_v23 = vpop.f32.mrf.mxu0 }
 0x16b   : > { %v11954_v26 = vpop.f32.mrf.mxu1  ;;  %v11963_v29 = vadd.f32 %v2245_v16, %v2173_v8  ;;  %v2218_v8 = vadd.f32 %v2217_v27, %v2145_v25  ;;  %v2224_v58 = vadd.f32 %v2223_v22, %v2151_v30 }
 0x16c   : > { %v11965_v37 = vpop.f32.mrf.mxu0 }
 0x16d   : > { %15088 = vst [vmem:[#allocation20_spill] sm:$0xff] %v11965_v37  ;;  %v11971_v44 = vpop.f32.mrf.mxu1 }
 0x16e   : > { %15089 = vst [vmem:[#allocation21_spill] sm:$0xff] %v11971_v44  ;;  %v2286_v45 = vpop.f32.mrf.mxu0 }
 0x16f   : > { %v2287_v39 = vadd.f32 %v2286_v45, %v2214_v42  ;;  %v2155_v45 = vadd.f32 %v2154_v38, %v2082_v47 }
 0x170   : > { %v2288_v59 = vpop.f32.mrf.mxu0  ;;  %v9665_v16 = vpop.f32.mrf.mxu1 }
 0x171   : > { %v2667_v11 = vmul.f32 %v11969_v43, %v2287_v39  ;;  %v11980_v5 = vadd.f32 %v2288_v59, %v2216_v53  ;;  %v2161_v59 = vadd.f32 %v2160_v21, %v2088_v2  ;;  %v2165_v21 = vadd.f32 %v11926_v46, %v2092_v31  ;;  %v10168_v31 = vld [vmem:[%s15043_s5 + $0x1f0] ss:$8 sps:$4 sm:$0xff]  }
 0x172   : > { %v2290_v35 = vpop.f32.mrf.mxu0  ;;  %v9666_v44 = vpop.f32.mrf.mxu1  ;;  %v2098_v2 = vadd.f32 %v11902_v10, %v11900_v7 }
 0x173   : > { %15090 = vst [vmem:[#allocation22_spill] sm:$0xff] %v11980_v5  ;;  %v11985_v63 = vadd.f32 %v11977_v6, %v2667_v11  ;;  %v2291_v0 = vadd.f32 %v2290_v35, %v2218_v8  ;;  %v11987_v42 = vadd.f32 %v9666_v44, %v9665_v16  ;;  %v2228_v44 = vadd.f32 %v11916_v32, %v2155_v45 }
 0x174   : > { %v11989_v37 = vpop.f32.mrf.mxu0  ;;  %v11991_v27 = vpop.f32.mrf.mxu1 }
 0x175   : > { %15091 = vst [vmem:[#allocation23_spill] sm:$0xff] %v11989_v37  ;;  %v15059_v53 = vmax.f32 %v11985_v63, 0.0  ;;  %v2670_v25 = vmul.f32 %v11969_v43, %v2291_v0 }
 0x176   : > { %v2296_v4 = vpop.f32.mrf.mxu0  ;;  %v11995_v33 = vpop.f32.mrf.mxu1 }
 0x177   : > { %2780 = vst [vmem:[#allocation2 + $0x8] sm:$0xff] %v15059_v53  ;;  %v12002_v35 = vadd.f32 %v11977_v6, %v2670_v25  ;;  %v2297_v38 = vadd.f32 %v2296_v4, %v2224_v58  ;;  %v2234_v58 = vadd.f32 %v11924_v48, %v2161_v59  ;;  %v2171_v59 = vadd.f32 %v11938_v1, %v2098_v2  ;;  %v10173_v2 = vld [vmem:[%s15043_s5 + $0x164] ss:$8 sps:$4 sm:$0xff]  }
 0x178   : > { %v2298_v22 = vpop.f32.mrf.mxu0  ;;  %v9671_v39 = vpop.f32.mrf.mxu1 }
 0x179   : > { %v15058_v16 = vmax.f32 %v12002_v35, 0.0  ;;  %v2673_v8 = vmul.f32 %v11969_v43, %v2297_v38  ;;  %v12008_v30 = vadd.f32 %v2298_v22, %v11918_v34  ;;  %v10165_v22 = vld [vmem:[%s15043_s5 + $0x170] ss:$8 sps:$4 sm:$0xff]  }
 0x17a   : > { %v2300_v24 = vpop.f32.mrf.mxu0  ;;  %v9672_v11 = vpop.f32.mrf.mxu1 }
 0x17b   : > { %15092 = vst [vmem:[#allocation24_spill] sm:$0xff] %v12008_v30  ;;  %2781 = vst [vmem:[#allocation2 + $0x20] sm:$0xff] %v15058_v16  ;;  %v12015_v32 = vadd.f32 %v11977_v6, %v2673_v8  ;;  %v2301_v47 = vadd.f32 %v2300_v24, %v2228_v44  ;;  %v12020_v45 = vadd.f32 %v9672_v11, %v9671_v39 }
 0x17c   : > { %v12018_v0 = vpop.f32.mrf.mxu0  ;;  %v12022_v34 = vpop.f32.mrf.mxu1  ;;  %v2238_v44 = vadd.f32 %v11928_v49, %v2165_v21 }
 0x17d   : > { %15093 = vst [vmem:[#allocation25_spill] sm:$0xff] %v12018_v0  ;;  %v15056_v52 = vmax.f32 %v12015_v32, 0.0  ;;  %v2676_v51 = vmul.f32 %v11969_v43, %v2301_v47 }
 0x17e   : > { %v2306_v25 = vpop.f32.mrf.mxu0  ;;  %v12027_v4 = vpop.f32.mrf.mxu1  ;;  %v2816_v24 = vld [vmem:[#allocation2 + $0x6] sm:$0xff] }
 0x17f   : > { %2782 = vst [vmem:[#allocation2 + $0x38] sm:$0xff] %v15056_v52  ;;  %v12034_v46 = vadd.f32 %v11977_v6, %v2676_v51  ;;  %v2307_v38 = vadd.f32 %v2306_v25, %v2234_v58  ;;  %v2102_v58 = vadd.f32 %v11906_v40, %v11904_v20  ;;  %v2788_v25 = vld [vmem:[#allocation2 + $0x5] sm:$0xff] }
 0x180   : > { %v2308_v48 = vpop.f32.mrf.mxu0  ;;  %v9677_v39 = vpop.f32.mrf.mxu1 }
 0x181   : > { %v15055_v8 = vmax.f32 %v12034_v46, 0.0  ;;  %v2679_v7 = vmul.f32 %v11969_v43, %v2307_v38  ;;  %v12044_v10 = vadd.f32 %v2308_v48, %v11930_v60  ;;  %v10176_v38 = vld [vmem:[%s15043_s5 + $0x1e4] ss:$8 sps:$4 sm:$0xff]  }
 0x182   : > { %v2310_v49 = vpop.f32.mrf.mxu0  ;;  %v2817_v11 = vld [vmem:[#allocation2 + $0x1e] sm:$0xff]  ;;  %v9678_v21 = vpop.f32.mrf.mxu1 }
 0x183   : > { %15094 = vst [vmem:[#allocation26_spill] sm:$0xff] %v12044_v10  ;;  %v2789_v47 = vld [vmem:[#allocation2 + $0x1d] sm:$0xff]  ;;  %2783 = vst [vmem:[#allocation2 + $0x50] sm:$0xff] %v15055_v8  ;;  %v12054_v1 = vadd.f32 %v11977_v6, %v2679_v7  ;;  %v2311_v60 = vadd.f32 %v2310_v49, %v2238_v44  ;;  %v2824_v51 = vpack.c.bf16 %v2817_v11, %v2816_v24 }
 0x184   : > { %v12062_v48 = vpop.f32.mrf.mxu0  ;;  %v2796_v20 = vpack.c.bf16 %v2789_v47, %v2788_v25  ;;  %v12064_v40 = vpop.f32.mrf.mxu1  ;;  %v2244_v8 = vadd.f32 %v11940_v28, %v2171_v59  ;;  %v2175_v7 = vadd.f32 %v11952_v23, %v2102_v58  ;;  %v10171_v11 = vld [vmem:[%s15043_s5 + $0x160] ss:$8 sps:$4 sm:$0xff]   ;;  %v10182_v47 = vld [vmem:[%s15043_s5 + $0x1d4] ss:$8 sps:$4 sm:$0xff]  }
 0x185   : > { %15095 = vst [vmem:[#allocation27_spill] sm:$0xff] %v12062_v48  ;;  %v15057_v44 = vmax.f32 %v12054_v1, 0.0  ;;  %v2682_v49 = vmul.f32 %v11969_v43, %v2311_v60  ;;  %2958 = vmatmul.mubr.bf16.vlgmr.msra.gmra.mxu0 %v2824_v51  ;;  %v10174_v59 = vld [vmem:[%s15043_s5 + $0x1e0] ss:$8 sps:$4 sm:$0xff]   ;;  %v15096_v60 = vmov 0   ;;  %v12090_v51 = vadd.f32 %v9678_v21, %v9677_v39 }
 0x186   : > { %3111 = vmatmul.mubr.bf16.vlgmr.msra.gmra.mxu1 %v2796_v20  ;;  %v2316_v24 = vpop.f32.mrf.mxu0  ;;  %3261 = vmatpush1.bf16.msra.mxu0 %v10165_v22  ;;  %v12073_v52 = vpop.f32.mrf.mxu1  ;;  %v10179_v22 = vld [vmem:[%s15043_s5 + $0x154] ss:$8 sps:$4 sm:$0xff]   ;;  %v10180_v39 = vld [vmem:[%s15043_s5 + $0x1d0] ss:$8 sps:$4 sm:$0xff]  }
 0x187   : > { %2784 = vst [vmem:[#allocation2 + $0x68] sm:$0xff] %v15057_v44  ;;  %v12078_v28 = vadd.f32 %v11977_v6, %v2682_v49  ;;  %v2317_v23 = vadd.f32 %v2316_v24, %v2244_v8  ;;  %3459 = vmatpush1.bf16.msra.mxu1 %v10168_v31  ;;  %3262 = vmatprep.subr.bf16.mxu0 %v10173_v2  ;;  %v10185_v49 = vld [vmem:[%s15043_s5 + $0x144] ss:$8 sps:$4 sm:$0xff]   ;;  %v2790_v44 = vld [vmem:[#allocation2 + $0x35] sm:$0xff] }
 0x188   : > { %v2318_v58 = vpop.f32.mrf.mxu0  ;;  %3460 = vmatprep.subr.bf16.mxu1 %v10176_v38  ;;  %2967 = vmatprep.mubr.bf16.mxu0 %v15096_v60  ;;  %v9683_v8 = vpop.f32.mrf.mxu1  ;;  %v2248_v31 = vadd.f32 %v11954_v26, %v2175_v7  ;;  %v10177_v38 = vld [vmem:[%s15043_s5 + $0x150] ss:$8 sps:$4 sm:$0xff]  }
 0x189   : > { %v15060_v25 = vmax.f32 %v12078_v28, 0.0  ;;  %v2685_v2 = vmul.f32 %v11969_v43, %v2317_v23  ;;  %v12096_v20 = vadd.f32 %v2318_v58, %v11963_v29  ;;  %3120 = vmatprep.mubr.bf16.mxu1 %v15096_v60  ;;  %v2818_v58 = vld [vmem:[#allocation2 + $0x36] sm:$0xff] }
 0x18a   : > { %v2320_v21 = vpop.f32.mrf.mxu0  ;;  %3263 = vmatpush1.bf16.msra.mxu0 %v10171_v11  ;;  %v2819_v26 = vld [vmem:[#allocation2 + $0x4e] sm:$0xff]  ;;  %v9684_v29 = vpop.f32.mrf.mxu1 }
 0x18b   : > { %15097 = vst [vmem:[#allocation28_spill] sm:$0xff] %v12096_v20  ;;  %v2791_v7 = vld [vmem:[#allocation2 + $0x4d] sm:$0xff]  ;;  %2785 = vst [vmem:[#allocation2 + $0x80] sm:$0xff] %v15060_v25  ;;  %v12111_v24 = vadd.f32 %v11977_v6, %v2685_v2  ;;  %v2321_v23 = vadd.f32 %v2320_v21, %v2248_v31  ;;  %3461 = vmatpush1.bf16.msra.mxu1 %v10174_v59  ;;  %3264 = vmatprep.subr.bf16.mxu0 %v10179_v22  ;;  %v10183_v59 = vld [vmem:[%s15043_s5 + $0x140] ss:$8 sps:$4 sm:$0xff]  }
 0x18c   : > { %v10188_v11 = vld [vmem:[%s15043_s5 + $0x1c4] ss:$8 sps:$4 sm:$0xff]   ;;  %v12116_v16 = vpop.f32.mrf.mxu0  ;;  %v2825_v53 = vpack.c.bf16 %v2819_v26, %v2818_v58  ;;  %v2797_v20 = vpack.c.bf16 %v2791_v7, %v2790_v44  ;;  %3462 = vmatprep.subr.bf16.mxu1 %v10182_v47  ;;  %v12118_v10 = vpop.f32.mrf.mxu1  ;;  %v10194_v47 = vld [vmem:[%s15043_s5 + $0x1b4] ss:$8 sps:$4 sm:$0xff]   ;;  %v10189_v26 = vld [vmem:[%s15043_s5 + $0x130] ss:$8 sps:$4 sm:$0xff]  }
 0x18d   : > { %15098 = vst [vmem:[#allocation29_spill] sm:$0xff] %v12116_v16  ;;  %v15061_v25 = vmax.f32 %v12111_v24, 0.0  ;;  %v2688_v2 = vmul.f32 %v11969_v43, %v2321_v23  ;;  %v10186_v43 = vld [vmem:[%s15043_s5 + $0x1c0] ss:$8 sps:$4 sm:$0xff]   ;;  %v9670_v16 = vadd.f32 %v11995_v33, %v11991_v27  ;;  %v10206_v33 = vld [vmem:[%s15043_s5 + $0x194] ss:$8 sps:$4 sm:$0xff]  }
 0x18e   : > { %2968 = vmatmul.mubr.bf16.gmra.mxu0 %v2825_v53  ;;  %3121 = vmatmul.mubr.bf16.gmra.mxu1 %v2797_v20  ;;  %v9705_v22 = vpop.f32.mrf.mxu0  ;;  %v12125_v31 = vpop.f32.mrf.mxu1  ;;  %v10191_v53 = vld [vmem:[%s15043_s5 + $0x134] ss:$8 sps:$4 sm:$0xff]   ;;  %v12141_v20 = vadd.f32 %v9684_v29, %v9683_v8  ;;  %v2792_v58 = vld [vmem:[#allocation2 + $0x65] sm:$0xff] }
 0x18f   : > { %2786 = vst [vmem:[#allocation2 + $0x98] sm:$0xff] %v15061_v25  ;;  %v12130_v44 = vadd.f32 %v11977_v6, %v2688_v2  ;;  %3265 = vmatpush1.bf16.msra.mxu0 %v10177_v38  ;;  %3463 = vmatpush1.bf16.msra.mxu1 %v10180_v39  ;;  %v2820_v6 = vld [vmem:[#allocation2 + $0x66] sm:$0xff]  ;;  %v10192_v25 = vld [vmem:[%s15043_s5 + $0x1b0] ss:$8 sps:$4 sm:$0xff]  }
 0x190   : > { %3266 = vmatprep.subr.bf16.mxu0 %v10185_v49  ;;  %3464 = vmatprep.subr.bf16.mxu1 %v10188_v11  ;;  %v9706_v21 = vpop.f32.mrf.mxu0  ;;  %v9745_v38 = vpop.f32.mrf.mxu1  ;;  %v10198_v27 = vld [vmem:[%s15043_s5 + $0x1a0] ss:$8 sps:$4 sm:$0xff]  }
 0x191   : > { %v15062_v39 = vmax.f32 %v12130_v44, 0.0  ;;  %2977 = vmatprep.mubr.bf16.mxu0 %v15096_v60  ;;  %3130 = vmatprep.mubr.bf16.mxu1 %v15096_v60  ;;  %v9707_v7 = vadd.f32 %v9706_v21, %v9705_v22  ;;  %v10197_v22 = vld [vmem:[%s15043_s5 + $0x124] ss:$8 sps:$4 sm:$0xff]  }
 0x192   : > { %v2821_v23 = vld [vmem:[#allocation2 + $0x7e] sm:$0xff]  ;;  %v9708_v29 = vpop.f32.mrf.mxu0  ;;  %v9746_v49 = vpop.f32.mrf.mxu1 }
 0x193   : > { %v2793_v8 = vld [vmem:[#allocation2 + $0x7d] sm:$0xff]  ;;  %2787 = vst [vmem:[#allocation2 + $0xb0] sm:$0xff] %v15062_v39  ;;  %3267 = vmatpush1.bf16.msra.mxu0 %v10183_v59  ;;  %3465 = vmatpush1.bf16.msra.mxu1 %v10186_v43  ;;  %v2826_v11 = vpack.c.bf16 %v2821_v23, %v2820_v6  ;;  %v2425_v6 = vadd.f32 %v9707_v7, %v11987_v42 }
 0x194   : > { %v2798_v2 = vpack.c.bf16 %v2793_v8, %v2792_v58  ;;  %v10200_v21 = vld [vmem:[%s15043_s5 + $0x1a4] ss:$8 sps:$4 sm:$0xff]   ;;  %3268 = vmatprep.subr.bf16.mxu0 %v10191_v53  ;;  %3466 = vmatprep.subr.bf16.mxu1 %v10194_v47  ;;  %v9709_v59 = vpop.f32.mrf.mxu0  ;;  %v9748_v43 = vpop.f32.mrf.mxu1  ;;  %v9747_v58 = vadd.f32 %v9746_v49, %v9745_v38  ;;  %v10195_v8 = vld [vmem:[%s15043_s5 + $0x120] ss:$8 sps:$4 sm:$0xff]   ;;  %v10203_v42 = vld [vmem:[%s15043_s5 + $0x114] ss:$8 sps:$4 sm:$0xff]  }
 0x195   : > { %v9710_v23 = vadd.f32 %v9709_v59, %v9708_v29 }
 0x196   : > { %2978 = vmatmul.mubr.bf16.gmra.mxu0 %v2826_v11  ;;  %3131 = vmatmul.mubr.bf16.gmra.mxu1 %v2798_v2  ;;  %v9711_v39 = vpop.f32.mrf.mxu0  ;;  %v9749_v48 = vpop.f32.mrf.mxu1  ;;  %v12175_v47 = vadd.f32 %v9747_v58, %v2425_v6  ;;  %v2822_v7 = vld [vmem:[#allocation2 + $0x96] sm:$0xff]  ;;  %v10209_v6 = vld [vmem:[%s15043_s5 + $0x104] ss:$8 sps:$4 sm:$0xff]  }
 0x197   : > { %3269 = vmatpush1.bf16.msra.mxu0 %v10189_v26  ;;  %3467 = vmatpush1.bf16.msra.mxu1 %v10192_v25  ;;  %v2428_v53 = vadd.f32 %v9710_v23, %v9670_v16  ;;  %v9750_v38 = vadd.f32 %v9749_v48, %v9748_v43  ;;  %v2794_v2 = vld [vmem:[#allocation2 + $0x95] sm:$0xff]  ;;  %v10212_v23 = vld [vmem:[%s15043_s5 + $0x184] ss:$8 sps:$4 sm:$0xff]  }
 0x198   : > { %3270 = vmatprep.subr.bf16.mxu0 %v10197_v22  ;;  %3468 = vmatprep.subr.bf16.mxu1 %v10200_v21  ;;  %v9712_v26 = vpop.f32.mrf.mxu0  ;;  %v9751_v25 = vpop.f32.mrf.mxu1  ;;  %v10201_v21 = vld [vmem:[%s15043_s5 + $0x110] ss:$8 sps:$4 sm:$0xff]  }
 0x199   : > { %2987 = vmatprep.mubr.bf16.mxu0 %v15096_v60  ;;  %3140 = vmatprep.mubr.bf16.mxu1 %v15096_v60  ;;  %v9713_v29 = vadd.f32 %v9712_v26, %v9711_v39  ;;  %v12179_v49 = vadd.f32 %v9750_v38, %v2428_v53  ;;  %v10204_v43 = vld [vmem:[%s15043_s5 + $0x190] ss:$8 sps:$4 sm:$0xff]   ;;  %v9676_v39 = vadd.f32 %v12027_v4, %v12022_v34  ;;  %v10207_v4 = vld [vmem:[%s15043_s5 + $0x100] ss:$8 sps:$4 sm:$0xff]  }
 0x19a   : > { %v2823_v11 = vld [vmem:[#allocation2 + $0xae] sm:$0xff]  ;;  %v9714_v14 = vpop.f32.mrf.mxu0  ;;  %v9752_v16 = vpop.f32.mrf.mxu1 }
 0x19b   : > { %v2795_v59 = vld [vmem:[#allocation2 + $0xad] sm:$0xff]  ;;  %3271 = vmatpush1.bf16.msra.mxu0 %v10195_v8  ;;  %3469 = vmatpush1.bf16.msra.mxu1 %v10198_v27  ;;  %v2827_v48 = vpack.c.bf16 %v2823_v11, %v2822_v7  ;;  %v2433_v58 = vadd.f32 %v9713_v29, %v12020_v45  ;;  %v9753_v38 = vadd.f32 %v9752_v16, %v9751_v25 }
 0x19c   : > { %v2799_v22 = vpack.c.bf16 %v2795_v59, %v2794_v2  ;;  %3272 = vmatprep.subr.bf16.mxu0 %v10203_v42  ;;  %3470 = vmatprep.subr.bf16.mxu1 %v10206_v33  ;;  %v9715_v8 = vpop.f32.mrf.mxu0  ;;  %v9754_v27 = vpop.f32.mrf.mxu1  ;;  %v10210_v42 = vld [vmem:[%s15043_s5 + $0x180] ss:$8 sps:$4 sm:$0xff]   ;;  %v10218_v25 = vld [vmem:[%s15043_s5 + $0x2f4] ss:$8 sps:$4 sm:$0xff]  }
 0x19d   : > { %v9716_v53 = vadd.f32 %v9715_v8, %v9714_v14  ;;  %v12202_v45 = vadd.f32 %v9753_v38, %v2433_v58  ;;  %v10215_v14 = vld [vmem:[%s15043_s5 + $0x274] ss:$8 sps:$4 sm:$0xff]  }
 0x19e   : > { %2988 = vmatmul.mubr.bf16.gmra.mxu0 %v2827_v48  ;;  %3141 = vmatmul.mubr.bf16.gmra.mxu1 %v2799_v22  ;;  %v9717_v26 = vpop.f32.mrf.mxu0  ;;  %v9755_v34 = vpop.f32.mrf.mxu1  ;;  %v3152_v2 = vld [vmem:[#allocation2 + $0x1f] sm:$0xff] }
 0x19f   : > { %3273 = vmatpush1.bf16.msra.mxu0 %v10201_v21  ;;  %3471 = vmatpush1.bf16.msra.mxu1 %v10204_v43  ;;  %v2436_v33 = vadd.f32 %v9716_v53, %v9676_v39  ;;  %v9756_v7 = vadd.f32 %v9755_v34, %v9754_v27  ;;  %v3151_v21 = vld [vmem:[#allocation2 + $0x7] sm:$0xff]  ;;  %v10213_v43 = vld [vmem:[%s15043_s5 + $0x270] ss:$8 sps:$4 sm:$0xff]   ;;  %v15099_v27 = vmax.f32 %v11985_v63, 0.0  ;;  %v15100_v53 = vmax.f32 %v12002_v35, 0.0 }
 0x1a0   : > { %3274 = vmatprep.subr.bf16.mxu0 %v10209_v6  ;;  %3472 = vmatprep.subr.bf16.mxu1 %v10212_v23  ;;  %v9718_v29 = vpop.f32.mrf.mxu0  ;;  %v9757_v11 = vpop.f32.mrf.mxu1  ;;  %v10216_v39 = vld [vmem:[%s15043_s5 + $0x2f0] ss:$8 sps:$4 sm:$0xff]   ;;  %v9682_v6 = vadd.f32 %v12073_v52, %v12064_v40  ;;  %v3159_v8 = vpack.c.bf16 %v3152_v2, %v3151_v21  ;;  %v10224_v34 = vld [vmem:[%s15043_s5 + $0x2e4] ss:$8 sps:$4 sm:$0xff]  }
 0x1a1   : > { %3292 = vmatprep.mubr.bf16.mxu0 %v15096_v60  ;;  %3490 = vmatprep.mubr.bf16.mxu1 %v15096_v60  ;;  %v9719_v59 = vadd.f32 %v9718_v29, %v9717_v26  ;;  %v12212_v16 = vadd.f32 %v9756_v7, %v2436_v33  ;;  %v3357_v38 = vpack.c.bf16 %v15100_v53, %v15099_v27  ;;  %v10221_v26 = vld [vmem:[%s15043_s5 + $0x264] ss:$8 sps:$4 sm:$0xff]   ;;  %v10222_v33 = vld [vmem:[%s15043_s5 + $0x2e0] ss:$8 sps:$4 sm:$0xff]   ;;  %v10230_v29 = vld [vmem:[%s15043_s5 + $0x2d4] ss:$8 sps:$4 sm:$0xff]  }
 0x1a2   : > { %v9720_v48 = vpop.f32.mrf.mxu0  ;;  %v9758_v22 = vpop.f32.mrf.mxu1 }
 0x1a3   : > { %3275 = vmatpush1.bf16.msra.mxu0 %v10207_v4  ;;  %3473 = vmatpush1.bf16.msra.mxu1 %v10210_v42  ;;  %v2441_v23 = vadd.f32 %v9719_v59, %v12090_v51  ;;  %v9759_v58 = vadd.f32 %v9758_v22, %v9757_v11  ;;  %v10219_v42 = vld [vmem:[%s15043_s5 + $0x260] ss:$8 sps:$4 sm:$0xff]   ;;  %v3154_v59 = vld [vmem:[#allocation2 + $0x4f] sm:$0xff] }
 0x1a4   : > { %3656 = vmatprep.subr.bf16.mxu0 %v10215_v14  ;;  %3854 = vmatprep.subr.bf16.mxu1 %v10218_v25  ;;  %v9721_v52 = vpop.f32.mrf.mxu0  ;;  %v9760_v40 = vpop.f32.mrf.mxu1  ;;  %v10227_v25 = vld [vmem:[%s15043_s5 + $0x254] ss:$8 sps:$4 sm:$0xff]  }
 0x1a5   : > { %v9722_v51 = vadd.f32 %v9721_v52, %v9720_v48  ;;  %v12233_v4 = vadd.f32 %v9759_v58, %v2441_v23  ;;  %v10228_v23 = vld [vmem:[%s15043_s5 + $0x2d0] ss:$8 sps:$4 sm:$0xff]   ;;  %v9688_v58 = vadd.f32 %v12125_v31, %v12118_v10  ;;  %v10233_v52 = vld [vmem:[%s15043_s5 + $0x244] ss:$8 sps:$4 sm:$0xff]  }
 0x1a6   : > { %3293 = vmatmul.mubr.bf16.vlgmr.msra.gmra.mxu0 %v3159_v8  ;;  %3491 = vmatmul.mubr.bf16.vlgmr.msra.gmra.mxu1 %v3357_v38  ;;  %v9723_v63 = vpop.f32.mrf.mxu0  ;;  %v9761_v35 = vpop.f32.mrf.mxu1  ;;  %v15101_v38 = vmax.f32 %v12015_v32, 0.0 }
 0x1a7   : > { %3657 = vmatpush1.bf16.msra.mxu0 %v10213_v43  ;;  %3855 = vmatpush1.bf16.msra.mxu1 %v10216_v39  ;;  %v2444_v7 = vadd.f32 %v9722_v51, %v9682_v6  ;;  %v9762_v14 = vadd.f32 %v9761_v35, %v9760_v40  ;;  %v3153_v39 = vld [vmem:[#allocation2 + $0x37] sm:$0xff]  ;;  %v10236_v40 = vld [vmem:[%s15043_s5 + $0x2c4] ss:$8 sps:$4 sm:$0xff]   ;;  %v10234_v35 = vld [vmem:[%s15043_s5 + $0x2c0] ss:$8 sps:$4 sm:$0xff]  }
 0x1a8   : > { %3658 = vmatprep.subr.bf16.mxu0 %v10221_v26  ;;  %3856 = vmatprep.subr.bf16.mxu1 %v10224_v34  ;;  %v9724_v11 = vpop.f32.mrf.mxu0  ;;  %v9763_v2 = vpop.f32.mrf.mxu1  ;;  %v10225_v6 = vld [vmem:[%s15043_s5 + $0x250] ss:$8 sps:$4 sm:$0xff]   ;;  %v3160_v53 = vpack.c.bf16 %v3154_v59, %v3153_v39  ;;  %v15102_v26 = vmax.f32 %v12034_v46, 0.0  ;;  %v3155_v39 = vld [vmem:[#allocation2 + $0x67] sm:$0xff] }
 0x1a9   : > { %3302 = vmatprep.mubr.bf16.mxu0 %v15096_v60  ;;  %3500 = vmatprep.mubr.bf16.mxu1 %v15096_v60  ;;  %v9725_v48 = vadd.f32 %v9724_v11, %v9723_v63  ;;  %v12249_v22 = vadd.f32 %v9762_v14, %v2444_v7  ;;  %v10231_v63 = vld [vmem:[%s15043_s5 + $0x240] ss:$8 sps:$4 sm:$0xff]   ;;  %v12279_v7 = vsub.s32 2, %v11936_v18  ;;  %v10239_v14 = vld [vmem:[%s15043_s5 + $0x234] ss:$8 sps:$4 sm:$0xff]  }
 0x1aa   : > { %v9726_v21 = vpop.f32.mrf.mxu0  ;;  %v9764_v43 = vpop.f32.mrf.mxu1  ;;  %v3358_v34 = vpack.c.bf16 %v15102_v26, %v15101_v38  ;;  %v15105_v38 = vmax.f32 %v12078_v28, 0.0 }
 0x1ab   : > { %3659 = vmatpush1.bf16.msra.mxu0 %v10219_v42  ;;  %3857 = vmatpush1.bf16.msra.mxu1 %v10222_v33  ;;  %v2449_v8 = vadd.f32 %v9725_v48, %v12141_v20  ;;  %v9765_v27 = vadd.f32 %v9764_v43, %v9763_v2  ;;  %15103 = vst [vmem:[#allocation30_spill] sm:$0xff] %v12279_v7  ;;  %v3156_v2 = vld [vmem:[#allocation2 + $0x7f] sm:$0xff] }
 0x1ac   : > { %3660 = vmatprep.subr.bf16.mxu0 %v10227_v25  ;;  %3858 = vmatprep.subr.bf16.mxu1 %v10230_v29  ;;  %v9727_v10 = vpop.f32.mrf.mxu0  ;;  %v9766_v31 = vpop.f32.mrf.mxu1  ;;  %v10242_v25 = vld [vmem:[%s15043_s5 + $0x2b4] ss:$8 sps:$4 sm:$0xff]  }
 0x1ad   : > { %v9728_v20 = vadd.f32 %v9727_v10, %v9726_v21  ;;  %v12270_v51 = vadd.f32 %v9765_v27, %v2449_v8  ;;  %v12302_v8 = vrot.slane %v11947_v19, %v12279_v7  ;;  %v3161_v27 = vpack.c.bf16 %v3156_v2, %v3155_v39 }
 0x1ae   : > { %3303 = vmatmul.mubr.bf16.gmra.mxu0 %v3160_v53  ;;  %3501 = vmatmul.mubr.bf16.gmra.mxu1 %v3358_v34  ;;  %v9785_v32 = vpop.f32.mrf.mxu0  ;;  %v9767_v46 = vpop.f32.mrf.mxu1  ;;  %v15104_v53 = vmax.f32 %v12054_v1, 0.0  ;;  %v10245_v34 = vld [vmem:[%s15043_s5 + $0x224] ss:$8 sps:$4 sm:$0xff]   ;;  %v12318_v1 = vrot.slane %v11959_v41, %v12279_v7  ;;  %v10251_v41 = vld [vmem:[%s15043_s5 + $0x214] ss:$8 sps:$4 sm:$0xff]  }
 0x1af   : > { %3661 = vmatpush1.bf16.msra.mxu0 %v10225_v6  ;;  %3859 = vmatpush1.bf16.msra.mxu1 %v10228_v23  ;;  %v2452_v42 = vadd.f32 %v9728_v20, %v9688_v58  ;;  %v9768_v33 = vadd.f32 %v9767_v46, %v9766_v31  ;;  %v10237_v6 = vld [vmem:[%s15043_s5 + $0x230] ss:$8 sps:$4 sm:$0xff]   ;;  %v10243_v20 = vld [vmem:[%s15043_s5 + $0x220] ss:$8 sps:$4 sm:$0xff]  }
 0x1b0   : > { %3662 = vmatprep.subr.bf16.mxu0 %v10233_v52  ;;  %3860 = vmatprep.subr.bf16.mxu1 %v10236_v40  ;;  %v9786_v29 = vpop.f32.mrf.mxu0  ;;  %v12287_v11 = vpop.f32.mrf.mxu1  ;;  %v10240_v23 = vld [vmem:[%s15043_s5 + $0x2b0] ss:$8 sps:$4 sm:$0xff]   ;;  %v3359_v26 = vpack.c.bf16 %v15105_v38, %v15104_v53  ;;  %v10257_v38 = vld [vmem:[%s15043_s5 + $0x204] ss:$8 sps:$4 sm:$0xff]  }
 0x1b1   : > { %3312 = vmatprep.mubr.bf16.mxu0 %v15096_v60  ;;  %3510 = vmatprep.mubr.bf16.mxu1 %v15096_v60  ;;  %v12291_v59 = vadd.f32 %v9768_v33, %v2452_v42  ;;  %v9787_v48 = vadd.f32 %v9786_v29, %v9785_v32  ;;  %v10246_v32 = vld [vmem:[%s15043_s5 + $0x2a0] ss:$8 sps:$4 sm:$0xff]   ;;  %v3158_v33 = vld [vmem:[#allocation2 + $0xaf] sm:$0xff] }
 0x1b2   : > { %v9788_v21 = vpop.f32.mrf.mxu0  ;;  %v2619_v43 = vpop.f32.mrf.mxu1 }
 0x1b3   : > { %3663 = vmatpush1.bf16.msra.mxu0 %v10231_v63  ;;  %3861 = vmatpush1.bf16.msra.mxu1 %v10234_v35  ;;  %v2555_v58 = vadd.f32 %v9787_v48, %v12175_v47  ;;  %v10248_v47 = vld [vmem:[%s15043_s5 + $0x2a4] ss:$8 sps:$4 sm:$0xff]   ;;  %v10254_v35 = vld [vmem:[%s15043_s5 + $0x294] ss:$8 sps:$4 sm:$0xff]  }
 0x1b4   : > { %3664 = vmatprep.subr.bf16.mxu0 %v10239_v14  ;;  %3862 = vmatprep.subr.bf16.mxu1 %v10242_v25  ;;  %v9789_v52 = vpop.f32.mrf.mxu0  ;;  %v12314_v40 = vpop.f32.mrf.mxu1  ;;  %v3157_v48 = vld [vmem:[#allocation2 + $0x97] sm:$0xff] }
 0x1b5   : > { %v9790_v19 = vadd.f32 %v9789_v52, %v9788_v21  ;;  %v2620_v10 = vadd.f32 %v2619_v43, %v2555_v58  ;;  %v10249_v21 = vld [vmem:[%s15043_s5 + $0x210] ss:$8 sps:$4 sm:$0xff]   ;;  %v15106_v58 = vmax.f32 %v12111_v24, 0.0 }
 0x1b6   : > { %3313 = vmatmul.mubr.bf16.gmra.mxu0 %v3161_v27  ;;  %3511 = vmatmul.mubr.bf16.gmra.mxu1 %v3359_v26  ;;  %v9791_v28 = vpop.f32.mrf.mxu0  ;;  %v2622_v31 = vpop.f32.mrf.mxu1  ;;  %v10252_v43 = vld [vmem:[%s15043_s5 + $0x290] ss:$8 sps:$4 sm:$0xff]   ;;  %v15107_v27 = vmax.f32 %v12130_v44, 0.0  ;;  %v10260_v26 = vld [vmem:[%s15043_s5 + $0x284] ss:$8 sps:$4 sm:$0xff]  }
 0x1b7   : > { %3665 = vmatpush1.bf16.msra.mxu0 %v10237_v6  ;;  %3863 = vmatpush1.bf16.msra.mxu1 %v10240_v23  ;;  %v2669_v46 = vmul.f32 %v12302_v8, %v2620_v10  ;;  %v2558_v63 = vadd.f32 %v9790_v19, %v12179_v49  ;;  %v3162_v23 = vpack.c.bf16 %v3158_v33, %v3157_v48  ;;  %v10255_v10 = vld [vmem:[%s15043_s5 + $0x200] ss:$8 sps:$4 sm:$0xff]   ;;  %v10261_v48 = vld [vmem:[%s15043_s5 + $0x370] ss:$8 sps:$4 sm:$0xff]  }
 0x1b8   : > { %3666 = vmatprep.subr.bf16.mxu0 %v10245_v34  ;;  %3864 = vmatprep.subr.bf16.mxu1 %v10248_v47  ;;  %v9792_v42 = vpop.f32.mrf.mxu0  ;;  %v12337_v2 = vpop.f32.mrf.mxu1  ;;  %v3360_v53 = vpack.c.bf16 %v15107_v27, %v15106_v58 }
 0x1b9   : > { %3322 = vmatprep.mubr.bf16.mxu0 %v15096_v60  ;;  %3520 = vmatprep.mubr.bf16.mxu1 %v15096_v60  ;;  %v2710_v14 = vadd.f32 %v12318_v1, %v2669_v46  ;;  %v9793_v25 = vadd.f32 %v9792_v42, %v9791_v28  ;;  %v2623_v49 = vadd.f32 %v2622_v31, %v2558_v63  ;;  %v10258_v28 = vld [vmem:[%s15043_s5 + $0x280] ss:$8 sps:$4 sm:$0xff]  }
 0x1ba   : > { %v9794_v29 = vpop.f32.mrf.mxu0  ;;  %v2635_v19 = vpop.f32.mrf.mxu1  ;;  %v3548_v63 = vld [vmem:[#allocation2 + $0x21] sm:$0xff] }
 0x1bb   : > { %3667 = vmatpush1.bf16.msra.mxu0 %v10243_v20  ;;  %3865 = vmatpush1.bf16.msra.mxu1 %v10246_v32  ;;  %v2563_v39 = vadd.f32 %v9793_v25, %v12202_v45  ;;  %v2672_v6 = vmul.f32 %v12302_v8, %v2623_v49  ;;  %v2734_v45 = vmax.f32 %v2710_v14, 0.0  ;;  %v10263_v32 = vld [vmem:[%s15043_s5 + $0x374] ss:$8 sps:$4 sm:$0xff]   ;;  %v3547_v49 = vld [vmem:[#allocation2 + $0x9] sm:$0xff] }
 0x1bc   : > { %3668 = vmatprep.subr.bf16.mxu0 %v10251_v41  ;;  %3866 = vmatprep.subr.bf16.mxu1 %v10254_v35  ;;  %v9795_v34 = vpop.f32.mrf.mxu0  ;;  %v3746_v41 = vld [vmem:[#allocation2 + $0x22] sm:$0xff]  ;;  %v12376_v25 = vpop.f32.mrf.mxu1 }
 0x1bd   : > { %v2628_v47 = vadd.f32 %v12287_v11, %v2563_v39  ;;  %v2713_v52 = vadd.f32 %v12318_v1, %v2672_v6  ;;  %v9796_v24 = vadd.f32 %v9795_v34, %v9794_v29  ;;  %v3745_v29 = vld [vmem:[#allocation2 + $0xa] sm:$0xff] }
 0x1be   : > { %3323 = vmatmul.mubr.bf16.gmra.mxu0 %v3162_v23  ;;  %3521 = vmatmul.mubr.bf16.gmra.mxu1 %v3360_v53  ;;  %v9797_v44 = vpop.f32.mrf.mxu0  ;;  %v3753_v39 = vpack.c.bf16 %v3746_v41, %v3745_v29  ;;  %v2638_v34 = vpop.f32.mrf.mxu1 }
 0x1bf   : > { %3669 = vmatpush1.bf16.msra.mxu0 %v10249_v21  ;;  %3867 = vmatpush1.bf16.msra.mxu1 %v10252_v43  ;;  %v2675_v31 = vmul.f32 %v12302_v8, %v2628_v47  ;;  %v2737_v11 = vmax.f32 %v2713_v52, 0.0  ;;  %v2566_v20 = vadd.f32 %v9796_v24, %v12212_v16  ;;  %v3555_v43 = vpack.c.bf16 %v3548_v63, %v3547_v49  ;;  %v10267_v63 = vld [vmem:[%s15043_s5 + $0x350] ss:$8 sps:$4 sm:$0xff]  }
 0x1c0   : > { %3670 = vmatprep.subr.bf16.mxu0 %v10257_v38  ;;  %3868 = vmatprep.subr.bf16.mxu1 %v10260_v26  ;;  %v9798_v46 = vpop.f32.mrf.mxu0 }
 0x1c1   : > { %3688 = vmatprep.mubr.bf16.mxu0 %v15096_v60  ;;  %3886 = vmatprep.mubr.bf16.mxu1 %v15096_v60  ;;  %v2716_v35 = vadd.f32 %v12318_v1, %v2675_v31  ;;  %v12373_v42 = vpack.c.bf16 %v2737_v11, %v2734_v45  ;;  %v2631_v33 = vadd.f32 %v12314_v40, %v2566_v20  ;;  %v10266_v40 = vld [vmem:[%s15043_s5 + $0x364] ss:$8 sps:$4 sm:$0xff]   ;;  %v10264_v45 = vld [vmem:[%s15043_s5 + $0x360] ss:$8 sps:$4 sm:$0xff]  }
 0x1c2   : > { %v9799_v16 = vadd.f32 %v9798_v46, %v9797_v44  ;;  %v9800_v14 = vpop.f32.mrf.mxu0  ;;  %v3747_v46 = vld [vmem:[#allocation2 + $0x3a] sm:$0xff] }
 0x1c3   : > { %15108 = vst [vmem:[#allocation31_spill] sm:$0xff] %v12373_v42  ;;  %3671 = vmatpush1.bf16.msra.mxu0 %v10255_v10  ;;  %3869 = vmatpush1.bf16.msra.mxu1 %v10258_v28  ;;  %v2678_v21 = vmul.f32 %v12302_v8, %v2631_v33  ;;  %v2740_v58 = vmax.f32 %v2716_v35, 0.0  ;;  %v3748_v10 = vld [vmem:[#allocation2 + $0x52] sm:$0xff] }
 0x1c4   : > { %4052 = vmatprep.subr.bf16.mxu0 %v10263_v32  ;;  %v9801_v6 = vpop.f32.mrf.mxu0  ;;  %v2571_v23 = vadd.f32 %v9799_v16, %v12233_v4  ;;  %v10269_v4 = vld [vmem:[%s15043_s5 + $0x354] ss:$8 sps:$4 sm:$0xff]   ;;  %v3754_v16 = vpack.c.bf16 %v3748_v10, %v3747_v46 }
 0x1c5   : > { %v2719_v27 = vadd.f32 %v12318_v1, %v2678_v21  ;;  %v9802_v53 = vadd.f32 %v9801_v6, %v9800_v14  ;;  %v10272_v14 = vld [vmem:[%s15043_s5 + $0x344] ss:$8 sps:$4 sm:$0xff]   ;;  %v3554_v10 = vld [vmem:[#allocation2 + $0xb1] sm:$0xff] }
 0x1c6   : > { %3689 = vmatmul.mubr.bf16.vlgmr.msra.gmra.mxu0 %v3555_v43  ;;  %3887 = vmatmul.mubr.bf16.vlgmr.msra.gmra.mxu1 %v3753_v39  ;;  %v2636_v38 = vadd.f32 %v2635_v19, %v2571_v23  ;;  %v9803_v26 = vpop.f32.mrf.mxu0  ;;  %v3550_v19 = vld [vmem:[#allocation2 + $0x51] sm:$0xff]  ;;  %v3552_v23 = vld [vmem:[#allocation2 + $0x81] sm:$0xff] }
 0x1c7   : > { %4053 = vmatpush1.bf16.msra.mxu0 %v10261_v48  ;;  %3698 = vmatprep.mubr.bf16.mxu0 %v15096_v60  ;;  %v2743_v47 = vmax.f32 %v2719_v27, 0.0  ;;  %v2574_v52 = vadd.f32 %v9802_v53, %v12249_v22  ;;  %v3549_v22 = vld [vmem:[#allocation2 + $0x39] sm:$0xff] }
 0x1c8   : > { %4054 = vmatprep.subr.bf16.mxu0 %v10266_v40  ;;  %3896 = vmatprep.mubr.bf16.mxu1 %v15096_v60  ;;  %v2681_v24 = vmul.f32 %v12302_v8, %v2636_v38  ;;  %v9804_v44 = vpop.f32.mrf.mxu0  ;;  %v3556_v33 = vpack.c.bf16 %v3550_v19, %v3549_v22  ;;  %v10281_v19 = vld [vmem:[%s15043_s5 + $0x314] ss:$8 sps:$4 sm:$0xff]  }
 0x1c9   : > { %v9805_v28 = vadd.f32 %v9804_v44, %v9803_v26  ;;  %v2639_v31 = vadd.f32 %v2638_v34, %v2574_v52  ;;  %v12397_v11 = vpack.c.bf16 %v2743_v47, %v2740_v58  ;;  %v3750_v58 = vld [vmem:[#allocation2 + $0x82] sm:$0xff]  ;;  %v3749_v34 = vld [vmem:[#allocation2 + $0x6a] sm:$0xff] }
 0x1ca   : > { %v2722_v20 = vadd.f32 %v12318_v1, %v2681_v24  ;;  %v9806_v32 = vpop.f32.mrf.mxu0  ;;  %v3551_v26 = vld [vmem:[#allocation2 + $0x69] sm:$0xff]  ;;  %v3755_v52 = vpack.c.bf16 %v3750_v58, %v3749_v34 }
 0x1cb   : > { %15109 = vst [vmem:[#allocation32_spill] sm:$0xff] %v12397_v11  ;;  %4055 = vmatpush1.bf16.msra.mxu0 %v10264_v45  ;;  %v2579_v41 = vadd.f32 %v9805_v28, %v12270_v51  ;;  %v2684_v35 = vmul.f32 %v12302_v8, %v2639_v31  ;;  %v10270_v51 = vld [vmem:[%s15043_s5 + $0x340] ss:$8 sps:$4 sm:$0xff]   ;;  %v3557_v47 = vpack.c.bf16 %v3552_v23, %v3551_v26  ;;  %v3752_v28 = vld [vmem:[#allocation2 + $0xb2] sm:$0xff] }
 0x1cc   : > { %4056 = vmatprep.subr.bf16.mxu0 %v10269_v4  ;;  %v9807_v49 = vpop.f32.mrf.mxu0  ;;  %v2746_v29 = vmax.f32 %v2722_v20, 0.0  ;;  %v10278_v4 = vld [vmem:[%s15043_s5 + $0x324] ss:$8 sps:$4 sm:$0xff]   ;;  %v3553_v31 = vld [vmem:[#allocation2 + $0x99] sm:$0xff] }
 0x1cd   : > { %v2644_v48 = vadd.f32 %v12337_v2, %v2579_v41  ;;  %v2725_v21 = vadd.f32 %v12318_v1, %v2684_v35  ;;  %v9808_v43 = vadd.f32 %v9807_v49, %v9806_v32  ;;  %v10275_v2 = vld [vmem:[%s15043_s5 + $0x334] ss:$8 sps:$4 sm:$0xff]   ;;  %v10279_v32 = vld [vmem:[%s15043_s5 + $0x310] ss:$8 sps:$4 sm:$0xff]   ;;  %v3558_v22 = vpack.c.bf16 %v3554_v10, %v3553_v31  ;;  %v10282_v41 = vld [vmem:[%s15043_s5 + $0x300] ss:$8 sps:$4 sm:$0xff]  }
 0x1ce   : > { %3699 = vmatmul.mubr.bf16.gmra.mxu0 %v3556_v33  ;;  %3897 = vmatmul.mubr.bf16.gmra.mxu1 %v3754_v16  ;;  %v3751_v20 = vld [vmem:[#allocation2 + $0x9a] sm:$0xff]  ;;  %v3944_v35 = vld [vmem:[#allocation2 + $0x23] sm:$0xff]  ;;  %v3943_v33 = vld [vmem:[#allocation2 + $0xb] sm:$0xff] }
 0x1cf   : > { %4057 = vmatpush1.bf16.msra.mxu0 %v10267_v63  ;;  %3708 = vmatprep.mubr.bf16.mxu0 %v15096_v60  ;;  %v2687_v39 = vmul.f32 %v12302_v8, %v2644_v48  ;;  %v2749_v40 = vmax.f32 %v2725_v21, 0.0  ;;  %v2582_v6 = vadd.f32 %v9808_v43, %v12291_v59  ;;  %v10273_v59 = vld [vmem:[%s15043_s5 + $0x330] ss:$8 sps:$4 sm:$0xff]   ;;  %v3756_v46 = vpack.c.bf16 %v3752_v28, %v3751_v20  ;;  %v10284_v63 = vld [vmem:[%s15043_s5 + $0x304] ss:$8 sps:$4 sm:$0xff]  }
 0x1d0   : > { %4058 = vmatprep.subr.bf16.mxu0 %v10272_v14  ;;  %3906 = vmatprep.mubr.bf16.mxu1 %v15096_v60  ;;  %v3951_v16 = vpack.c.bf16 %v3944_v35, %v3943_v33  ;;  %v3946_v14 = vld [vmem:[#allocation2 + $0x53] sm:$0xff]  ;;  %v3945_v49 = vld [vmem:[#allocation2 + $0x3b] sm:$0xff]  ;;  %v3948_v48 = vld [vmem:[#allocation2 + $0x83] sm:$0xff] }
 0x1d1   : > { %v2728_v27 = vadd.f32 %v12318_v1, %v2687_v39  ;;  %v12421_v53 = vpack.c.bf16 %v2749_v40, %v2746_v29  ;;  %v2647_v38 = vadd.f32 %v12376_v25, %v2582_v6  ;;  %v10276_v25 = vld [vmem:[%s15043_s5 + $0x320] ss:$8 sps:$4 sm:$0xff]   ;;  %v3952_v29 = vpack.c.bf16 %v3946_v14, %v3945_v49  ;;  %v10287_v6 = vld [vmem:[%s15046_s8 + $0x114] ss:$8 sps:$4 sm:$0xff]   ;;  %v10285_v23 = vld [vmem:[%s15046_s8 + $0x110] ss:$8 sps:$4 sm:$0xff]  }
 0x1d2   : > { %v3947_v21 = vld [vmem:[#allocation2 + $0x6b] sm:$0xff]  ;;  %v3949_v39 = vld [vmem:[#allocation2 + $0x9b] sm:$0xff]  ;;  %4461 = vmatprep.subr.bf16.mxu1 %v10287_v6 }
 0x1d3   : > { %15110 = vst [vmem:[#allocation33_spill] sm:$0xff] %v12421_v53  ;;  %4059 = vmatpush1.bf16.msra.mxu0 %v10270_v51  ;;  %v2690_v45 = vmul.f32 %v12302_v8, %v2647_v38  ;;  %v2752_v24 = vmax.f32 %v2728_v27, 0.0  ;;  %v3953_v43 = vpack.c.bf16 %v3948_v48, %v3947_v21  ;;  %v3950_v51 = vld [vmem:[#allocation2 + $0xb3] sm:$0xff]  ;;  %4462 = vmatpush1.bf16.msra.mxu1 %v10285_v23  ;;  %v10293_v27 = vld [vmem:[%s15046_s8 + $0x104] ss:$8 sps:$4 sm:$0xff]  }
 0x1d4   : > { %4060 = vmatprep.subr.bf16.mxu0 %v10275_v2  ;;  %v3954_v40 = vpack.c.bf16 %v3950_v51, %v3949_v39  ;;  %v10290_v2 = vld [vmem:[%s15046_s8 + $0x74] ss:$8 sps:$4 sm:$0xff]   ;;  %v10288_v58 = vld [vmem:[%s15046_s8 + $0x70] ss:$8 sps:$4 sm:$0xff]   ;;  %v10296_v38 = vld [vmem:[%s15046_s8 + $0x64] ss:$8 sps:$4 sm:$0xff]   ;;  %4463 = vmatprep.subr.bf16.mxu1 %v10293_v27 }
 0x1d5   : > { %v2731_v44 = vadd.f32 %v12318_v1, %v2690_v45  ;;  %v10291_v26 = vld [vmem:[%s15046_s8 + $0x100] ss:$8 sps:$4 sm:$0xff]   ;;  %v10302_v45 = vld [vmem:[%s15046_s8 + $0x54] ss:$8 sps:$4 sm:$0xff]   ;;  %v10309_v10 = vld [vmem:[%s15046_s8 + $0xd0] ss:$8 sps:$4 sm:$0xff]  }
 0x1d6   : > { %3709 = vmatmul.mubr.bf16.gmra.mxu0 %v3557_v47  ;;  %3907 = vmatmul.mubr.bf16.gmra.mxu1 %v3755_v52  ;;  %v10294_v34 = vld [vmem:[%s15046_s8 + $0x60] ss:$8 sps:$4 sm:$0xff]   ;;  %v10297_v47 = vld [vmem:[%s15046_s8 + $0xf0] ss:$8 sps:$4 sm:$0xff]   ;;  %v10317_v31 = vld [vmem:[%s15046_s8 + $0xc4] ss:$8 sps:$4 sm:$0xff]  }
 0x1d7   : > { %4061 = vmatpush1.bf16.msra.mxu0 %v10273_v59  ;;  %3718 = vmatprep.mubr.bf16.mxu0 %v15096_v60  ;;  %v2755_v8 = vmax.f32 %v2731_v44, 0.0  ;;  %v10299_v59 = vld [vmem:[%s15046_s8 + $0xf4] ss:$8 sps:$4 sm:$0xff]   ;;  %v10300_v52 = vld [vmem:[%s15046_s8 + $0x50] ss:$8 sps:$4 sm:$0xff]  }
 0x1d8   : > { %4062 = vmatprep.subr.bf16.mxu0 %v10278_v4  ;;  %3916 = vmatprep.mubr.bf16.mxu1 %v15096_v60  ;;  %v10305_v4 = vld [vmem:[%s15046_s8 + $0xe4] ss:$8 sps:$4 sm:$0xff]   ;;  %v10303_v44 = vld [vmem:[%s15046_s8 + $0xe0] ss:$8 sps:$4 sm:$0xff]   ;;  %v10312_v28 = vld [vmem:[%s15046_s8 + $0x30] ss:$8 sps:$4 sm:$0xff]  }
 0x1d9   : > { %v12440_v1 = vpack.c.bf16 %v2755_v8, %v2752_v24  ;;  %4464 = vmatpush1.bf16.msra.mxu1 %v10291_v26  ;;  %v10308_v24 = vld [vmem:[%s15046_s8 + $0x44] ss:$8 sps:$4 sm:$0xff]   ;;  %v10311_v8 = vld [vmem:[%s15046_s8 + $0xd4] ss:$8 sps:$4 sm:$0xff]   ;;  %v10324_v35 = vld [vmem:[%s15046_s8 + $0x10] ss:$8 sps:$4 sm:$0xff]  }
 0x1da   : > { %4465 = vmatprep.subr.bf16.mxu1 %v10299_v59  ;;  %v10320_v20 = vld [vmem:[%s15046_s8 + $0x24] ss:$8 sps:$4 sm:$0xff]   ;;  %v10327_v14 = vld [vmem:[%s15046_s8 + $0xa0] ss:$8 sps:$4 sm:$0xff]   ;;  %v10335_v48 = vld [vmem:[%s15046_s8 + $0x134] ss:$8 sps:$4 sm:$0xff]  }
 0x1db   : > { %15111 = vst [vmem:[#allocation34_spill] sm:$0xff] %v12440_v1  ;;  %4063 = vmatpush1.bf16.msra.mxu0 %v10276_v25  ;;  %v10306_v25 = vld [vmem:[%s15046_s8 + $0x40] ss:$8 sps:$4 sm:$0xff]   ;;  %v10329_v33 = vld [vmem:[%s15046_s8 + $0xa4] ss:$8 sps:$4 sm:$0xff]  }
 0x1dc   : > { %4064 = vmatprep.subr.bf16.mxu0 %v10281_v19  ;;  %v10314_v19 = vld [vmem:[%s15046_s8 + $0x34] ss:$8 sps:$4 sm:$0xff]   ;;  %v10330_v49 = vld [vmem:[%s15046_s8] ss:$8 sps:$4 sm:$0xff]   ;;  %v10336_v51 = vld [vmem:[%s15046_s8 + $0x90] ss:$8 sps:$4 sm:$0xff]  }
 0x1dd   : > { %4466 = vmatpush1.bf16.msra.mxu1 %v10297_v47  ;;  %v10338_v21 = vld [vmem:[%s15046_s8 + $0x94] ss:$8 sps:$4 sm:$0xff]   ;;  %v10341_v39 = vld [vmem:[%s15046_s8 + $0x124] ss:$8 sps:$4 sm:$0xff]   ;;  %v10339_v6 = vld [vmem:[%s15046_s8 + $0x120] ss:$8 sps:$4 sm:$0xff]  }
 0x1de   : > { %3719 = vmatmul.mubr.bf16.gmra.mxu0 %v3558_v22  ;;  %3917 = vmatmul.mubr.bf16.gmra.mxu1 %v3756_v46  ;;  %v10318_v22 = vld [vmem:[%s15046_s8 + $0x20] ss:$8 sps:$4 sm:$0xff]   ;;  %v10323_v46 = vld [vmem:[%s15046_s8 + $0xb4] ss:$8 sps:$4 sm:$0xff]  }
 0x1df   : > { %4065 = vmatpush1.bf16.msra.mxu0 %v10279_v32  ;;  %4084 = vmatprep.mubr.bf16.mxu0 %v15096_v60  ;;  %v10315_v32 = vld [vmem:[%s15046_s8 + $0xc0] ss:$8 sps:$4 sm:$0xff]   ;;  %v10347_v59 = vld [vmem:[%s15046_s8 + $0x254] ss:$8 sps:$4 sm:$0xff]  }
 0x1e0   : > { %4066 = vmatprep.subr.bf16.mxu0 %v10284_v63  ;;  %4467 = vmatprep.subr.bf16.mxu1 %v10305_v4  ;;  %v10326_v63 = vld [vmem:[%s15046_s8 + $0x14] ss:$8 sps:$4 sm:$0xff]   ;;  %v10348_v4 = vld [vmem:[%s15046_s8 + $0x1b0] ss:$8 sps:$4 sm:$0xff]  }
 0x1e1   : > { %4468 = vmatpush1.bf16.msra.mxu1 %v10303_v44  ;;  %v10350_v47 = vld [vmem:[%s15046_s8 + $0x1b4] ss:$8 sps:$4 sm:$0xff]   ;;  %v10356_v44 = vld [vmem:[%s15046_s8 + $0x1a4] ss:$8 sps:$4 sm:$0xff]  }
 0x1e2   : > { %4469 = vmatprep.subr.bf16.mxu1 %v10311_v8  ;;  %v10354_v8 = vld [vmem:[%s15046_s8 + $0x1a0] ss:$8 sps:$4 sm:$0xff]  }
 0x1e3   : > { %4067 = vmatpush1.bf16.msra.mxu0 %v10282_v41  ;;  %v10321_v41 = vld [vmem:[%s15046_s8 + $0xb0] ss:$8 sps:$4 sm:$0xff]  }
 0x1e4   : > { %4646 = vmatprep.subr.bf16.mxu0 %v10290_v2  ;;  %v10342_v2 = vld [vmem:[%s15046_s8 + $0x80] ss:$8 sps:$4 sm:$0xff]  }
 0x1e5   : > { %4470 = vmatpush1.bf16.msra.mxu1 %v10309_v10  ;;  %v10362_v10 = vld [vmem:[%s15046_s8 + $0x194] ss:$8 sps:$4 sm:$0xff]  }
 0x1e6   : > { %4085 = vmatmul.mubr.bf16.vlgmr.msra.gmra.mxu0 %v3951_v16  ;;  %4471 = vmatprep.subr.bf16.mxu1 %v10317_v31  ;;  %v10332_v16 = vld [vmem:[%s15046_s8 + $0x4] ss:$8 sps:$4 sm:$0xff]   ;;  %v10360_v31 = vld [vmem:[%s15046_s8 + $0x190] ss:$8 sps:$4 sm:$0xff]  }
 0x1e7   : > { %4094 = vmatprep.mubr.bf16.mxu0 %v15096_v60  ;;  %4647 = vmatpush1.bf16.msra.mxu0 %v10288_v58 }
 0x1e8   : > { %4648 = vmatprep.subr.bf16.mxu0 %v10296_v38 }
 0x1e9   : > { %4472 = vmatpush1.bf16.msra.mxu1 %v10315_v32  ;;  %v10368_v32 = vld [vmem:[%s15046_s8 + $0x184] ss:$8 sps:$4 sm:$0xff]  }
 0x1ea   : > { %4473 = vmatprep.subr.bf16.mxu1 %v10323_v46  ;;  %v10366_v46 = vld [vmem:[%s15046_s8 + $0x180] ss:$8 sps:$4 sm:$0xff]  }
 0x1eb   : > { %4649 = vmatpush1.bf16.msra.mxu0 %v10294_v34 }
 0x1ec   : > { %4650 = vmatprep.subr.bf16.mxu0 %v10302_v45  ;;  %v10345_v45 = vld [vmem:[%s15046_s8 + $0x250] ss:$8 sps:$4 sm:$0xff]  }
 0x1ed   : > { %4474 = vmatpush1.bf16.msra.mxu1 %v10321_v41  ;;  %v10374_v41 = vld [vmem:[%s15046_s8 + $0x174] ss:$8 sps:$4 sm:$0xff]  }
 0x1ee   : > { %4095 = vmatmul.mubr.bf16.gmra.mxu0 %v3952_v29  ;;  %4475 = vmatprep.subr.bf16.mxu1 %v10329_v33  ;;  %v12551_v29 = vld [vmem:[#allocation2] sm:$0xff]  ;;  %v10372_v33 = vld [vmem:[%s15046_s8 + $0x170] ss:$8 sps:$4 sm:$0xff]  }
 0x1ef   : > { %4104 = vmatprep.mubr.bf16.mxu0 %v15096_v60  ;;  %4651 = vmatpush1.bf16.msra.mxu0 %v10300_v52  ;;  %15112 = vst [vmem:[#allocation35_spill] sm:$0xff] %v12551_v29  ;;  %4221 = vst.msk [vmem:[#allocation3 + $0x38] sm:$0xff] %vm4214_vm1, %v12551_v29  ;;  %v4320_v34 = vpack.c.bf16 %v12551_v29, %v12551_v29  ;;  %v10353_v52 = vld [vmem:[%s15046_s8 + $0x244] ss:$8 sps:$4 sm:$0xff]  }
 0x1f0   : > { %4652 = vmatprep.subr.bf16.mxu0 %v10308_v24  ;;  %4215 = vst.msk [vmem:[#allocation3 + $0x8] sm:$0xff] %vm4214_vm1, %v12551_v29  ;;  %4217 = vst.msk [vmem:[#allocation3 + $0x18] sm:$0xff] %vm4214_vm1, %v12551_v29  ;;  %v10351_v24 = vld [vmem:[%s15046_s8 + $0x240] ss:$8 sps:$4 sm:$0xff]  }
 0x1f1   : > { %4476 = vmatpush1.bf16.msra.mxu1 %v10327_v14  ;;  %4219 = vst.msk [vmem:[#allocation3 + $0x28] sm:$0xff] %vm4214_vm1, %v12551_v29  ;;  %4223 = vst.msk [vmem:[#allocation3 + $0x48] sm:$0xff] %vm4214_vm1, %v12551_v29 }
 0x1f2   : > { %4225 = vst.msk [vmem:[#allocation3 + $0x58] sm:$0xff] %vm4214_vm1, %v12551_v29  ;;  %4227 = vst.msk [vmem:[#allocation3 + $0x68] sm:$0xff] %vm4214_vm1, %v12551_v29  ;;  %4489 = vmatprep.subr.bf16.mxu1 %v10335_v48  ;;  %v10383_v48 = vld [vmem:[%s15046_s8 + $0x1f4] ss:$8 sps:$4 sm:$0xff]  }
 0x1f3   : > { %4653 = vmatpush1.bf16.msra.mxu0 %v10306_v25  ;;  %4229 = vst.msk [vmem:[#allocation3 + $0x78] sm:$0xff] %vm4214_vm1, %v12551_v29  ;;  %4231 = vst.msk [vmem:[#allocation3 + $0x88] sm:$0xff] %vm4214_vm1, %v12551_v29  ;;  %v10359_v25 = vld [vmem:[%s15046_s8 + $0x234] ss:$8 sps:$4 sm:$0xff]  }
 0x1f4   : > { %4654 = vmatprep.subr.bf16.mxu0 %v10314_v19  ;;  %4233 = vst.msk [vmem:[#allocation3 + $0x98] sm:$0xff] %vm4214_vm1, %v12551_v29  ;;  %4235 = vst.msk [vmem:[#allocation3 + $0xa8] sm:$0xff] %vm4214_vm1, %v12551_v29  ;;  %v10357_v19 = vld [vmem:[%s15046_s8 + $0x230] ss:$8 sps:$4 sm:$0xff]  }
 0x1f5   : > { %4237 = vst.msk [vmem:[#allocation3 + $0xb8] sm:$0xff] %vm4214_vm1, %v12551_v29  ;;  %4239 = vst.msk [vmem:[#allocation3 + $0xc8] sm:$0xff] %vm4214_vm1, %v12551_v29 }
 0x1f6   : > { %4105 = vmatmul.mubr.bf16.gmra.mxu0 %v3953_v43  ;;  %4241 = vst.msk [vmem:[#allocation3 + $0xd8] sm:$0xff] %vm4214_vm1, %v12551_v29  ;;  %v10333_v43 = vld [vmem:[%s15046_s8 + $0x130] ss:$8 sps:$4 sm:$0xff]  }
 0x1f7   : > { %4114 = vmatprep.mubr.bf16.mxu0 %v15096_v60  ;;  %4655 = vmatpush1.bf16.msra.mxu0 %v10312_v28  ;;  %v4305_v23 = vld [vmem:[#allocation3 + $0x18] sm:$0xff]  ;;  %v4260_v27 = vld [vmem:[#allocation3 + $0x8] sm:$0xff] }
 0x1f8   : > { %4656 = vmatprep.subr.bf16.mxu0 %v10320_v20  ;;  %4490 = vmatpush2.bf16.msra.mxu1 %v10333_v43  ;;  %v12605_v58 = vld [vmem:[#allocation3 + $0x28] sm:$0xff]  ;;  %v4276_v26 = vpack.c.bf16 %v4305_v23, %v4260_v27 }
 0x1f9   : > { %4491 = vmatprep.subr.bf16.mxu1 %v10341_v39  ;;  %15113 = vst [vmem:[#allocation36_spill] sm:$0xff] %v12605_v58  ;;  %v4321_v38 = vpack.c.bf16 %v12605_v58, %v4305_v23  ;;  %v10365_v28 = vld [vmem:[%s15046_s8 + $0x224] ss:$8 sps:$4 sm:$0xff]   ;;  %v10363_v20 = vld [vmem:[%s15046_s8 + $0x220] ss:$8 sps:$4 sm:$0xff]  }
 0x1fa   : > { %v10378_v43 = vld [vmem:[%s15046_s8 + $0x160] ss:$8 sps:$4 sm:$0xff]   ;;  %v10389_v23 = vld [vmem:[%s15046_s8 + $0x1e4] ss:$8 sps:$4 sm:$0xff]  }
 0x1fb   : > { %4657 = vmatpush1.bf16.msra.mxu0 %v10318_v22  ;;  %9141 = vmatprep.mubr.msk.bf16.mxu1 %vm4214_vm1, %v4321_v38  ;;  %v10371_v22 = vld [vmem:[%s15046_s8 + $0x214] ss:$8 sps:$4 sm:$0xff]   ;;  %v10384_v38 = vld [vmem:[%s15046_s8 + $0x150] ss:$8 sps:$4 sm:$0xff]  }
 0x1fc   : > { %4658 = vmatprep.subr.bf16.mxu0 %v10326_v63  ;;  %4492 = vmatpush2.bf16.msra.mxu1 %v10339_v6  ;;  %v10369_v63 = vld [vmem:[%s15046_s8 + $0x210] ss:$8 sps:$4 sm:$0xff]  }
 0x1fd   : > { %4877 = vmatprep.subr.bf16.mxu1 %v10350_v47  ;;  %v10392_v47 = vld [vmem:[%s15046_s8 + $0x144] ss:$8 sps:$4 sm:$0xff]  }
 0x1fe   : > { %4115 = vmatmul.mubr.bf16.gmra.mxu0 %v3954_v40  ;;  %v10344_v40 = vld [vmem:[%s15046_s8 + $0x84] ss:$8 sps:$4 sm:$0xff]  }
 0x1ff   : > { %4659 = vmatpush1.bf16.msra.mxu0 %v10324_v35  ;;  %9165 = vmatprep.mubr.msk.bf16.mxu0 %vm4214_vm1, %v4276_v26  ;;  %v10377_v35 = vld [vmem:[%s15046_s8 + $0x204] ss:$8 sps:$4 sm:$0xff]   ;;  %v10387_v26 = vld [vmem:[%s15046_s8 + $0x1e0] ss:$8 sps:$4 sm:$0xff]  }
 0x200   : > { %4660 = vmatprep.subr.bf16.mxu0 %v10332_v16  ;;  %4494 = vmatmul.mubr.bf16.vlgmr.msra.gmra.mxu1 %v4320_v34  ;;  %v10375_v16 = vld [vmem:[%s15046_s8 + $0x200] ss:$8 sps:$4 sm:$0xff]  }
 0x201   : > { %4878 = vmatpush1.bf16.msra.mxu1 %v10348_v4 }
 0x202   : > { %4879 = vmatprep.subr.bf16.mxu1 %v10356_v44  ;;  %v10395_v44 = vld [vmem:[%s15046_s8 + $0x274] ss:$8 sps:$4 sm:$0xff]  }
 0x203   : > { %4661 = vmatpush1.bf16.msra.mxu0 %v10330_v49  ;;  %v10380_v49 = vld [vmem:[%s15046_s8 + $0x164] ss:$8 sps:$4 sm:$0xff]  }
 0x204   : > { %4674 = vmatprep.subr.bf16.mxu0 %v10338_v21 }
 0x205   : > { %4880 = vmatpush1.bf16.msra.mxu1 %v10354_v8 }
 0x206   : > { %4881 = vmatprep.subr.bf16.mxu1 %v10362_v10  ;;  %v10396_v10 = vld [vmem:[%s15046_s8 + $0x1d0] ss:$8 sps:$4 sm:$0xff]  }
 0x207   : > { %4675 = vmatpush2.bf16.msra.mxu0 %v10336_v51  ;;  %v10381_v51 = vld [vmem:[%s15046_s8 + $0x1f0] ss:$8 sps:$4 sm:$0xff]  }
 0x208   : > { %4676 = vmatprep.subr.bf16.mxu0 %v10344_v40 }
 0x209   : > { %4882 = vmatpush1.bf16.msra.mxu1 %v10360_v31  ;;  %v10399_v31 = vld [vmem:[%s15046_s8 + $0x260] ss:$8 sps:$4 sm:$0xff]  }
 0x20a   : > { %4883 = vmatprep.subr.bf16.mxu1 %v10368_v32 }
 0x20b   : > { %4677 = vmatpush2.bf16.msra.mxu0 %v10342_v2  ;;  %v10386_v2 = vld [vmem:[%s15046_s8 + $0x154] ss:$8 sps:$4 sm:$0xff]  }
 0x20c   : > { %5123 = vmatprep.subr.bf16.mxu0 %v10347_v59 }
 0x20d   : > { %4884 = vmatpush1.bf16.msra.mxu1 %v10366_v46  ;;  %v10407_v46 = vld [vmem:[%s15046_s8 + $0x394] ss:$8 sps:$4 sm:$0xff]  }
 0x20e   : > { %4679 = vmatmul.mubr.bf16.vlgmr.msra.gmra.mxu0 %v4320_v34  ;;  %4885 = vmatprep.subr.bf16.mxu1 %v10374_v41 }
 0x20f   : > { %5124 = vmatpush1.bf16.msra.mxu0 %v10345_v45  ;;  %v10390_v45 = vld [vmem:[%s15046_s8 + $0x140] ss:$8 sps:$4 sm:$0xff]  }
 0x210   : > { %5125 = vmatprep.subr.bf16.mxu0 %v10353_v52  ;;  %v10393_v52 = vld [vmem:[%s15046_s8 + $0x270] ss:$8 sps:$4 sm:$0xff]  }
 0x211   : > { %4886 = vmatpush1.bf16.msra.mxu1 %v10372_v33 }
 0x212   : > { %4887 = vmatprep.subr.bf16.mxu1 %v10380_v49  ;;  %v10410_v49 = vld [vmem:[%s15046_s8 + $0x2f4] ss:$8 sps:$4 sm:$0xff]  }
 0x213   : > { %5126 = vmatpush1.bf16.msra.mxu0 %v10351_v24 }
 0x214   : > { %5127 = vmatprep.subr.bf16.mxu0 %v10359_v25  ;;  %v10398_v25 = vld [vmem:[%s15046_s8 + $0x1d4] ss:$8 sps:$4 sm:$0xff]  }
 0x215   : > { %4888 = vmatpush1.bf16.msra.mxu1 %v10378_v43 }
 0x216   : > { %4889 = vmatprep.subr.bf16.mxu1 %v10386_v2 }
 0x217   : > { %5128 = vmatpush1.bf16.msra.mxu0 %v10357_v19 }
 0x218   : > { %5129 = vmatprep.subr.bf16.mxu0 %v10365_v28  ;;  %v10401_v28 = vld [vmem:[%s15046_s8 + $0x264] ss:$8 sps:$4 sm:$0xff]  }
 0x219   : > { %4890 = vmatpush1.bf16.msra.mxu1 %v10384_v38 }
 0x21a   : > { %4891 = vmatprep.subr.bf16.mxu1 %v10392_v47 }
 0x21b   : > { %5130 = vmatpush1.bf16.msra.mxu0 %v10363_v20 }
 0x21c   : > { %5131 = vmatprep.subr.bf16.mxu0 %v10371_v22  ;;  %v10404_v22 = vld [vmem:[%s15046_s8 + $0x1c4] ss:$8 sps:$4 sm:$0xff]  }
 0x21d   : > { %4892 = vmatpush1.bf16.msra.mxu1 %v10390_v45 }
 0x21e   : > { %4905 = vmatprep.subr.bf16.mxu1 %v10398_v25 }
 0x21f   : > { %5132 = vmatpush1.bf16.msra.mxu0 %v10369_v63 }
 0x220   : > { %5133 = vmatprep.subr.bf16.mxu0 %v10377_v35  ;;  %v10402_v35 = vld [vmem:[%s15046_s8 + $0x1c0] ss:$8 sps:$4 sm:$0xff]  }
 0x221   : > { %4906 = vmatpush2.bf16.msra.mxu1 %v10396_v10 }
 0x222   : > { %4907 = vmatprep.subr.bf16.mxu1 %v10404_v22 }
 0x223   : > { %5134 = vmatpush1.bf16.msra.mxu0 %v10375_v16 }
 0x224   : > { %5135 = vmatprep.subr.bf16.mxu0 %v10383_v48 }
 0x225   : > { %4908 = vmatpush2.bf16.msra.mxu1 %v10402_v35 }
 0x226   : > { %5370 = vmatprep.subr.bf16.mxu1 %v10410_v49 }
 0x227   : > { %5136 = vmatpush1.bf16.msra.mxu0 %v10381_v51 }
 0x228   : > { %5137 = vmatprep.subr.bf16.mxu0 %v10389_v23 }
 0x22b   : > { %5138 = vmatpush1.bf16.msra.mxu0 %v10387_v26 }
 0x22c   : > { %5151 = vmatprep.subr.bf16.mxu0 %v10395_v44 }
 0x22f   : > { %5152 = vmatpush2.bf16.msra.mxu0 %v10393_v52 }
 0x230   : > { %5153 = vmatprep.subr.bf16.mxu0 %v10401_v28 }
 0x233   : > { %5154 = vmatpush2.bf16.msra.mxu0 %v10399_v31 }
 0x234   : > { %5617 = vmatprep.subr.bf16.mxu0 %v10407_v46 }
 0x245   : > { %v12678_v14 = vpop.f32.mrf.mxu0 }
 0x246   : > { %v12686_v21 = vpop.f32.mrf.mxu1 }
 0x247   : > { %v12694_v39 = vpop.f32.mrf.mxu0 }
 0x248   : > { %v12696_v40 = vpop.f32.mrf.mxu1 }
 0x249   : > { %v12698_v6 = vpop.f32.mrf.mxu0 }
 0x24a   : > { %v12706_v27 = vpop.f32.mrf.mxu1 }
 0x24b   : > { %v12714_v34 = vpop.f32.mrf.mxu0 }
 0x24c   : > { %v12716_v59 = vpop.f32.mrf.mxu1 }
 0x24e   : > { %v12727_v4 = vpop.f32.mrf.mxu0  ;;  %v12729_v24 = vpop.f32.mrf.mxu1 }
 0x250   : > { %v12737_v8 = vpop.f32.mrf.mxu0  ;;  %v12739_v19 = vpop.f32.mrf.mxu1 }
 0x252   : > { %v12750_v20 = vpop.f32.mrf.mxu0  ;;  %v12752_v32 = vpop.f32.mrf.mxu1 }
 0x254   : > { %v12760_v63 = vpop.f32.mrf.mxu0  ;;  %v12762_v41 = vpop.f32.mrf.mxu1 }
 0x256   : > { %v12767_v33 = vpop.f32.mrf.mxu0  ;;  %v12769_v16 = vpop.f32.mrf.mxu1 }
 0x258   : > { %v12774_v48 = vpop.f32.mrf.mxu0  ;;  %v12776_v43 = vpop.f32.mrf.mxu1 }
 0x25a   : > { %v12778_v51 = vpop.f32.mrf.mxu0  ;;  %v12780_v2 = vpop.f32.mrf.mxu1 }
 0x25c   : > { %v12782_v23 = vpop.f32.mrf.mxu0  ;;  %v12784_v38 = vpop.f32.mrf.mxu1 }
 0x25e   : > { %v12786_v26 = vpop.f32.mrf.mxu0  ;;  %v12788_v45 = vpop.f32.mrf.mxu1 }
 0x260   : > { %v12790_v47 = vpop.f32.mrf.mxu0  ;;  %v12792_v52 = vpop.f32.mrf.mxu1 }
 0x262   : > { %v12794_v44 = vpop.f32.mrf.mxu0  ;;  %v12796_v25 = vpop.f32.mrf.mxu1 }
 0x264   : > { %v12798_v10 = vpop.f32.mrf.mxu0  ;;  %v12800_v28 = vpop.f32.mrf.mxu1 }
 0x266   : > { %v3294_v31 = vpop.f32.mrf.mxu0  ;;  %v3492_v22 = vpop.f32.mrf.mxu1 }
 0x268   : > { %v3296_v46 = vpop.f32.mrf.mxu0  ;;  %v12802_v35 = vpop.f32.mrf.mxu1 }
 0x26a   : > { %v3298_v49 = vpop.f32.mrf.mxu0  ;;  %v12804_v7 = vpop.f32.mrf.mxu1 }
 0x26c   : > { %v3300_v1 = vpop.f32.mrf.mxu0  ;;  %v12806_v53 = vpop.f32.mrf.mxu1 }
 0x26e   : > { %v12808_v11 = vpop.f32.mrf.mxu0  ;;  %v12810_v50 = vpop.f32.mrf.mxu1 }
 0x270   : > { %v12812_v30 = vpop.f32.mrf.mxu0  ;;  %v12814_v56 = vpop.f32.mrf.mxu1 }
 0x272   : > { %v12816_v54 = vpop.f32.mrf.mxu0  ;;  %v12818_v0 = vpop.f32.mrf.mxu1 }
 0x273   : > { %15114 = vst [vmem:[#allocation37_spill] sm:$0xff] %v12818_v0 }
 0x274   : > { %v12820_v61 = vpop.f32.mrf.mxu0  ;;  %v12822_v57 = vpop.f32.mrf.mxu1 }
 0x275   : > { %15115 = vst [vmem:[#allocation38_spill] sm:$0xff] %v12822_v57 }
 0x276   : > { %v12824_v5 = vpop.f32.mrf.mxu0  ;;  %v12826_v17 = vpop.f32.mrf.mxu1 }
 0x277   : > { %15116 = vst [vmem:[#allocation39_spill] sm:$0xff] %v12824_v5  ;;  %15117 = vst [vmem:[#allocation40_spill] sm:$0xff] %v12826_v17  ;;  %v3113_v5 = vadd.f32 %v12686_v21, %v12678_v14  ;;  %v4141_v14 = vld [vmem:[%s15044_s6] sm:$0x3] }
 0x278   : > { %v12828_v36 = vpop.f32.mrf.mxu0  ;;  %v12830_v37 = vpop.f32.mrf.mxu1  ;;  %v4169_v21 = vld [vmem:[%s15045_s7] sm:$0x3] }
 0x279   : > { %15118 = vst [vmem:[#allocation41_spill] sm:$0xff] %v12828_v36  ;;  %15119 = vst [vmem:[#allocation42_spill] sm:$0xff] %v12830_v37 }
 0x27a   : > { %v12832_v15 = vpop.f32.mrf.mxu0  ;;  %v12834_v3 = vpop.f32.mrf.mxu1 }
 0x27b   : > { %15120 = vst [vmem:[#allocation43_spill] sm:$0xff] %v12832_v15  ;;  %15121 = vst [vmem:[#allocation44_spill] sm:$0xff] %v12834_v3 }
 0x27c   : > { %v12836_v13 = vpop.f32.mrf.mxu0  ;;  %v12838_v42 = vpop.f32.mrf.mxu1 }
 0x27d   : > { %15122 = vst [vmem:[#allocation45_spill] sm:$0xff] %v12836_v13  ;;  %15123 = vst [vmem:[#allocation46_spill] sm:$0xff] %v12838_v42 }
 0x27e   : > { %v12840_v12 = vpop.f32.mrf.mxu0  ;;  %v12842_v62 = vpop.f32.mrf.mxu1 }
 0x27f   : > { %15124 = vst [vmem:[#allocation47_spill] sm:$0xff] %v12840_v12  ;;  %15125 = vst [vmem:[#allocation48_spill] sm:$0xff] %v12842_v62 }
 0x280   : > { %v12844_v55 = vpop.f32.mrf.mxu0  ;;  %v12846_v60 = vpop.f32.mrf.mxu1 }
 0x281   : > { %15126 = vst [vmem:[#allocation49_spill] sm:$0xff] %v12844_v55  ;;  %15127 = vst [vmem:[#allocation50_spill] sm:$0xff] %v12846_v60 }
 0x282   : > { %v12848_v29 = vpop.f32.mrf.mxu0  ;;  %v12850_v58 = vpop.f32.mrf.mxu1 }
 0x283   : > { %15128 = vst [vmem:[#allocation51_spill] sm:$0xff] %v12848_v29  ;;  %15129 = vst [vmem:[#allocation52_spill] sm:$0xff] %v12850_v58 }
 0x284   : > { %v12852_v37 = vpop.f32.mrf.mxu0  ;;  %v12854_v17 = vpop.f32.mrf.mxu1 }
 0x285   : > { %15130 = vst [vmem:[#allocation53_spill] sm:$0xff] %v12852_v37  ;;  %15131 = vst [vmem:[#allocation54_spill] sm:$0xff] %v12854_v17 }
 0x286   : > { %v3690_v3 = vpop.f32.mrf.mxu0  ;;  %v3888_v13 = vpop.f32.mrf.mxu1 }
 0x288   : > { %v3692_v15 = vpop.f32.mrf.mxu0  ;;  %v3890_v42 = vpop.f32.mrf.mxu1 }
 0x28a   : > { %v3694_v36 = vpop.f32.mrf.mxu0  ;;  %v12856_v57 = vpop.f32.mrf.mxu1 }
 0x28b   : > { %15132 = vst [vmem:[#allocation55_spill] sm:$0xff] %v12856_v57 }
 0x28c   : > { %v3696_v12 = vpop.f32.mrf.mxu0  ;;  %v12862_v60 = vpop.f32.mrf.mxu1 }
 0x28d   : > { %15135 = vst [vmem:[#allocation58_spill] sm:$0xff] %v12862_v60  ;;  %v3115_v60 = vadd.f32 %v12696_v40, %v12694_v39  ;;  %v3119_v39 = vadd.f32 %v12716_v59, %v12714_v34  ;;  %v3127_v34 = vadd.f32 %v12752_v32, %v12750_v20 }
 0x28e   : > { %v12858_v62 = vpop.f32.mrf.mxu0  ;;  %v12868_v37 = vpop.f32.mrf.mxu1 }
 0x28f   : > { %15133 = vst [vmem:[#allocation56_spill] sm:$0xff] %v12858_v62  ;;  %15138 = vst [vmem:[#allocation61_spill] sm:$0xff] %v12868_v37  ;;  %v3334_v37 = vadd.f32 %v3296_v46, %v3115_v60  ;;  %v12909_v46 = vrot.slane %v4169_v21, %v11950_v9 }
 0x290   : > { %v12860_v55 = vpop.f32.mrf.mxu0  ;;  %v12876_v57 = vpop.f32.mrf.mxu1 }
 0x291   : > { %15134 = vst [vmem:[#allocation57_spill] sm:$0xff] %v12860_v55  ;;  %v3333_v55 = vadd.f32 %v3294_v31, %v3113_v5  ;;  %v12897_v5 = vsub.s32 1, %v11936_v18  ;;  %v12906_v31 = vrot.slane %v4141_v14, %v11950_v9  ;;  %v3336_v18 = vadd.f32 %v3300_v1, %v3119_v39 }
 0x292   : > { %v12864_v29 = vpop.f32.mrf.mxu0 }
 0x293   : > { %15136 = vst [vmem:[#allocation59_spill] sm:$0xff] %v12864_v29  ;;  %v3531_v40 = vadd.f32 %v3492_v22, %v3333_v55  ;;  %v12915_v55 = vrot.slane %v4141_v14, %v12897_v5 }
 0x294   : > { %v12866_v58 = vpop.f32.mrf.mxu0  ;;  %v15152_v39 = vld [vmem:[#allocation58_spill] sm:$0xff] }
 0x295   : > { %15137 = vst [vmem:[#allocation60_spill] sm:$0xff] %v12866_v58  ;;  %v3117_v58 = vadd.f32 %v12706_v27, %v12698_v6  ;;  %v3123_v6 = vadd.f32 %v12729_v24, %v12727_v4  ;;  %v12925_v24 = vrot.slane %v4169_v21, %v12897_v5 }
 0x296   : > { %v12870_v17 = vpop.f32.mrf.mxu0 }
 0x297   : > { %15139 = vst [vmem:[#allocation62_spill] sm:$0xff] %v12870_v17  ;;  %v12886_v17 = vpop.f32.mrf.mxu1  ;;  %v3335_v60 = vadd.f32 %v3298_v49, %v3117_v58  ;;  %v3125_v58 = vadd.f32 %v12739_v19, %v12737_v8  ;;  %v3337_v59 = vadd.f32 %v12808_v11, %v3123_v6  ;;  %v3135_v8 = vadd.f32 %v12776_v43, %v12774_v48 }
 0x298   : > { %v12872_v0 = vpop.f32.mrf.mxu0  ;;  %v3137_v11 = vadd.f32 %v12780_v2, %v12778_v51  ;;  %v3139_v19 = vadd.f32 %v12784_v38, %v12782_v23  ;;  %v15144_v51 = vld [vmem:[#allocation39_spill] sm:$0xff]  ;;  %v15145_v23 = vld [vmem:[#allocation56_spill] sm:$0xff]  ;;  %v15151_v49 = vld [vmem:[#allocation57_spill] sm:$0xff] }
 0x299   : > { %15140 = vst [vmem:[#allocation63_spill] sm:$0xff] %v12872_v0  ;;  %v12912_v0 = vpop.f32.mrf.mxu1  ;;  %v3533_v1 = vadd.f32 %v12804_v7, %v3335_v60  ;;  %v3338_v20 = vadd.f32 %v12812_v30, %v3125_v58  ;;  %v3535_v48 = vadd.f32 %v12810_v50, %v3337_v59 }
 0x29a   : > { %v12878_v62 = vpop.f32.mrf.mxu0 }
 0x29b   : > { %15141 = vst [vmem:[#allocation64_spill] sm:$0xff] %v12878_v62  ;;  %v3731_v7 = vadd.f32 %v3694_v36, %v3533_v1  ;;  %v12955_v36 = vadd.f32 %v12800_v28, %v12798_v10  ;;  %v3733_v38 = vadd.f32 %v15145_v23, %v3535_v48  ;;  %v15149_v10 = vld [vmem:[#allocation41_spill] sm:$0xff] }
 0x29c   : > { %v12882_v29 = vpop.f32.mrf.mxu0  ;;  %v3342_v28 = vadd.f32 %v15149_v10, %v3135_v8  ;;  %v15155_v1 = vld [vmem:[#allocation61_spill] sm:$0xff]  ;;  %v15156_v8 = vld [vmem:[#allocation59_spill] sm:$0xff] }
 0x29d   : > { %15142 = vst [vmem:[#allocation65_spill] sm:$0xff] %v12882_v29  ;;  %v3729_v29 = vadd.f32 %v3690_v3, %v3531_v40  ;;  %v3129_v3 = vadd.f32 %v12762_v41, %v12760_v63  ;;  %v3534_v63 = vadd.f32 %v12806_v53, %v3336_v18  ;;  %v3339_v41 = vadd.f32 %v12816_v54, %v3127_v34  ;;  %v15153_v34 = vld [vmem:[#allocation40_spill] sm:$0xff] }
 0x29e   : > { %v12894_v62 = vpop.f32.mrf.mxu0  ;;  %v3147_v18 = vadd.f32 %v12796_v25, %v12794_v44  ;;  %v15148_v44 = vld [vmem:[#allocation38_spill] sm:$0xff] }
 0x29f   : > { %15143 = vst [vmem:[#allocation66_spill] sm:$0xff] %v12894_v62  ;;  %v3532_v62 = vadd.f32 %v12802_v35, %v3334_v37  ;;  %v3133_v37 = vadd.f32 %v12769_v16, %v12767_v33  ;;  %v3927_v33 = vadd.f32 %v3888_v13, %v3729_v29  ;;  %v3145_v16 = vadd.f32 %v12792_v52, %v12790_v47  ;;  %v15150_v35 = vld [vmem:[#allocation43_spill] sm:$0xff] }
 0x2a0   : > { %v12903_v27 = vpop.f32.mrf.mxu0  ;;  %v3340_v30 = vadd.f32 %v12820_v61, %v3129_v3  ;;  %v3732_v54 = vadd.f32 %v3696_v12, %v3534_v63  ;;  %v3536_v29 = vadd.f32 %v12814_v56, %v3338_v20  ;;  %v3343_v56 = vadd.f32 %v15150_v35, %v3137_v11  ;;  %v15154_v3 = vld [vmem:[#allocation45_spill] sm:$0xff] }
 0x2a1   : > { %v3730_v22 = vadd.f32 %v3692_v15, %v3532_v62  ;;  %v12943_v62 = vpop.f32.mrf.mxu1  ;;  %v3143_v15 = vadd.f32 %v12788_v45, %v12786_v26  ;;  %v3341_v2 = vadd.f32 %v15144_v51, %v3133_v37  ;;  %v15146_v26 = vld [vmem:[#allocation37_spill] sm:$0xff]  ;;  %v15147_v45 = vld [vmem:[#allocation55_spill] sm:$0xff]  ;;  %v3344_v37 = vadd.f32 %v15154_v3, %v3139_v19  ;;  %v15159_v19 = vld [vmem:[#allocation60_spill] sm:$0xff] }
 0x2a2   : > { %v12922_v4 = vpop.f32.mrf.mxu0  ;;  %v3537_v61 = vadd.f32 %v15146_v26, %v3339_v41  ;;  %v3929_v47 = vadd.f32 %v15147_v45, %v3731_v7  ;;  %v3538_v25 = vadd.f32 %v15148_v44, %v3340_v30  ;;  %v3734_v14 = vadd.f32 %v15151_v49, %v3536_v29  ;;  %v15157_v30 = vld [vmem:[#allocation42_spill] sm:$0xff]  ;;  %v15161_v45 = vld [vmem:[#allocation47_spill] sm:$0xff]  ;;  %v15163_v49 = vld [vmem:[#allocation49_spill] sm:$0xff] }
 0x2a3   : > { %v3928_v53 = vadd.f32 %v3890_v42, %v3730_v22  ;;  %v12962_v52 = vpop.f32.mrf.mxu1  ;;  %v3930_v40 = vadd.f32 %v15152_v39, %v3732_v54  ;;  %v3539_v59 = vadd.f32 %v15153_v34, %v3341_v2  ;;  %v3931_v22 = vadd.f32 %v15155_v1, %v3733_v38  ;;  %v15160_v26 = vld [vmem:[#allocation46_spill] sm:$0xff] }
 0x2a4   : > { %v12939_v32 = vpop.f32.mrf.mxu0  ;;  %v3735_v20 = vadd.f32 %v15156_v8, %v3537_v61  ;;  %v3736_v29 = vadd.f32 %v15159_v19, %v3538_v25  ;;  %v3542_v61 = vadd.f32 %v15160_v26, %v3344_v37  ;;  %v15166_v37 = vld [vmem:[#allocation48_spill] sm:$0xff] }
 0x2a5   : > { %v3912_v63 = vpop.f32.mrf.mxu1  ;;  %v15167_v8 = vld [vmem:[#allocation64_spill] sm:$0xff] }
 0x2a6   : > { %v4086_v43 = vpop.f32.mrf.mxu0 }
 0x2a7   : > { %v4125_v13 = vadd.f32 %v4086_v43, %v3927_v33  ;;  %v3540_v43 = vadd.f32 %v15157_v30, %v3342_v28  ;;  %v3914_v28 = vpop.f32.mrf.mxu1  ;;  %v15168_v30 = vld [vmem:[#allocation50_spill] sm:$0xff] }
 0x2a8   : > { %v4088_v50 = vpop.f32.mrf.mxu0 }
 0x2a9   : > { %v4153_v12 = vmul.f32 %v12906_v31, %v4125_v13  ;;  %v4126_v42 = vadd.f32 %v4088_v50, %v3928_v53  ;;  %v15158_v53 = vld [vmem:[#allocation44_spill] sm:$0xff]  ;;  %v3932_v13 = vadd.f32 %v12876_v57, %v3734_v14  ;;  %v3346_v14 = vadd.f32 %v15163_v49, %v3145_v16 }
 0x2aa   : > { %v4090_v21 = vpop.f32.mrf.mxu0  ;;  %v3541_v54 = vadd.f32 %v15158_v53, %v3343_v56  ;;  %v15169_v53 = vld [vmem:[#allocation52_spill] sm:$0xff] }
 0x2ab   : > { %v12971_v60 = vadd.f32 %v12909_v46, %v4153_v12  ;;  %v4154_v6 = vmul.f32 %v12915_v55, %v4126_v42  ;;  %v4127_v58 = vadd.f32 %v4090_v21, %v3929_v47  ;;  %v3345_v47 = vadd.f32 %v15161_v45, %v3143_v15  ;;  %v15162_v42 = vld [vmem:[#allocation62_spill] sm:$0xff]  ;;  %v15164_v21 = vld [vmem:[#allocation51_spill] sm:$0xff] }
 0x2ac   : > { %v4092_v11 = vpop.f32.mrf.mxu0  ;;  %v3933_v12 = vadd.f32 %v12886_v17, %v3735_v20  ;;  %v3737_v44 = vadd.f32 %v15162_v42, %v3539_v59  ;;  %v3347_v39 = vadd.f32 %v15164_v21, %v3147_v18  ;;  %v3934_v15 = vadd.f32 %v12912_v0, %v3736_v29  ;;  %v3918_v0 = vpop.f32.mrf.mxu1 }
 0x2ad   : > { %v4197_v41 = vmax.f32 %v12971_v60, 0.0  ;;  %v4182_v33 = vadd.f32 %v12925_v24, %v4154_v6  ;;  %v4155_v7 = vmul.f32 %v12906_v31, %v4127_v58  ;;  %v4128_v48 = vadd.f32 %v4092_v11, %v3930_v40  ;;  %v15165_v40 = vld [vmem:[#allocation63_spill] sm:$0xff] }
 0x2ae   : > { %v4096_v51 = vpop.f32.mrf.mxu0  ;;  %v3738_v17 = vadd.f32 %v15165_v40, %v3540_v43  ;;  %v3543_v1 = vadd.f32 %v15166_v37, %v3345_v47  ;;  %v3739_v20 = vadd.f32 %v15167_v8, %v3541_v54  ;;  %v3544_v43 = vadd.f32 %v15168_v30, %v3346_v14  ;;  %v15172_v47 = vld [vmem:[#allocation66_spill] sm:$0xff] }
 0x2af   : > { %v4198_v2 = vmax.f32 %v4182_v33, 0.0  ;;  %v4183_v23 = vadd.f32 %v12909_v46, %v4155_v7  ;;  %v4156_v38 = vmul.f32 %v12915_v55, %v4128_v48  ;;  %v4129_v50 = vadd.f32 %v4096_v51, %v3931_v22 }
 0x2b0   : > { %v4098_v10 = vpop.f32.mrf.mxu0  ;;  %v3935_v22 = vadd.f32 %v12943_v62, %v3737_v44  ;;  %v3545_v62 = vadd.f32 %v15169_v53, %v3347_v39  ;;  %v3936_v54 = vadd.f32 %v12962_v52, %v3738_v17  ;;  %v3937_v45 = vadd.f32 %v3912_v63, %v3739_v20  ;;  %v3920_v52 = vpop.f32.mrf.mxu1  ;;  %v15173_v63 = vld [vmem:[#allocation36_spill] sm:$0xff]  ;;  %v15174_v39 = vld [vmem:[#allocation35_spill] sm:$0xff] }
 0x2b1   : > { %4244 = vst.msk [vmem:[#allocation3 + $0x38] sm:$0xff] %vm4214_vm1, %v4198_v2  ;;  %v4199_v57 = vmax.f32 %v4183_v23, 0.0  ;;  %v4184_v25 = vadd.f32 %v12925_v24, %v4156_v38  ;;  %v4157_v35 = vmul.f32 %v12906_v31, %v4129_v50  ;;  %v4130_v56 = vadd.f32 %v4098_v10, %v3932_v13  ;;  %v15170_v13 = vld [vmem:[#allocation65_spill] sm:$0xff] }
 0x2b2   : > { %v4100_v6 = vpop.f32.mrf.mxu0  ;;  %v3740_v19 = vadd.f32 %v15170_v13, %v3542_v61  ;;  %v15171_v50 = vld [vmem:[#allocation53_spill] sm:$0xff]  ;;  %v3742_v14 = vadd.f32 %v12903_v27, %v3544_v43  ;;  %v3743_v27 = vadd.f32 %v12922_v4, %v3545_v62 }
 0x2b3   : > { %v4200_v58 = vmax.f32 %v4184_v25, 0.0  ;;  %v4185_v34 = vadd.f32 %v12909_v46, %v4157_v35  ;;  %v4158_v59 = vmul.f32 %v12915_v55, %v4130_v56  ;;  %v4131_v3 = vadd.f32 %v4100_v6, %v3933_v12 }
 0x2b4   : > { %v4102_v16 = vpop.f32.mrf.mxu0  ;;  %v13005_v18 = vpack.c.bf16 %v4199_v57, %v4197_v41  ;;  %v3348_v26 = vadd.f32 %v15171_v50, %v12955_v36  ;;  %v3741_v12 = vadd.f32 %v15172_v47, %v3543_v1  ;;  %v3938_v49 = vadd.f32 %v3914_v28, %v3740_v19 }
 0x2b5   : > { %4246 = vst.msk [vmem:[#allocation3 + $0x48] sm:$0xff] %vm4214_vm1, %v4200_v58  ;;  %v4201_v11 = vmax.f32 %v4185_v34, 0.0  ;;  %v4186_v33 = vadd.f32 %v12925_v24, %v4158_v59  ;;  %v4159_v7 = vmul.f32 %v12906_v31, %v4131_v3  ;;  %v4132_v48 = vadd.f32 %v4102_v16, %v3934_v15  ;;  %v15175_v58 = vld [vmem:[#allocation54_spill] sm:$0xff] }
 0x2b6   : > { %v4106_v29 = vpop.f32.mrf.mxu0  ;;  %v3546_v28 = vadd.f32 %v15175_v58, %v3348_v26  ;;  %v3939_v34 = vadd.f32 %v3918_v0, %v3741_v12  ;;  %v3940_v4 = vadd.f32 %v3920_v52, %v3742_v14  ;;  %v10408_v58 = vld [vmem:[%s15046_s8 + $0x2f0] ss:$8 sps:$4 sm:$0xff]  }
 0x2b7   : > { %v4202_v51 = vmax.f32 %v4186_v33, 0.0  ;;  %v4187_v2 = vadd.f32 %v12909_v46, %v4159_v7  ;;  %v4160_v23 = vmul.f32 %v12915_v55, %v4132_v48  ;;  %v4133_v38 = vadd.f32 %v4106_v29, %v3935_v22 }
 0x2b8   : > { %v4108_v42 = vpop.f32.mrf.mxu0  ;;  %v4266_v44 = vld [vmem:[#allocation3 + $0x38] sm:$0xff]  ;;  %v13019_v10 = vpack.c.bf16 %v4201_v11, %v4199_v57  ;;  %v13031_v57 = vpack.c.bf16 %v4197_v41, %v15174_v39  ;;  %v3922_v41 = vpop.f32.mrf.mxu1  ;;  %v3744_v20 = vadd.f32 %v12939_v32, %v3546_v28  ;;  %v10416_v28 = vld [vmem:[%s15046_s8 + $0x2e4] ss:$8 sps:$4 sm:$0xff]  }
 0x2b9   : > { %4248 = vst.msk [vmem:[#allocation3 + $0x58] sm:$0xff] %vm4214_vm1, %v4202_v51  ;;  %v4203_v61 = vmax.f32 %v4187_v2, 0.0  ;;  %v4188_v25 = vadd.f32 %v12925_v24, %v4160_v23  ;;  %v4161_v35 = vmul.f32 %v12906_v31, %v4133_v38  ;;  %v4134_v56 = vadd.f32 %v4108_v42, %v3936_v54 }
 0x2ba   : > { %v4110_v36 = vpop.f32.mrf.mxu0  ;;  %v13026_v21 = vpack.c.bf16 %v4266_v44, %v15173_v63  ;;  %v3941_v30 = vadd.f32 %v3922_v41, %v3743_v27  ;;  %v3924_v54 = vpop.f32.mrf.mxu1  ;;  %v10417_v27 = vld [vmem:[%s15046_s8 + $0x370] ss:$8 sps:$4 sm:$0xff]   ;;  %v10423_v41 = vld [vmem:[%s15046_s8 + $0x360] ss:$8 sps:$4 sm:$0xff]  }
 0x2bb   : > { %4249 = vst [vmem:[#allocation3 + $0x60] sm:$0xff] %v4203_v61  ;;  %v4204_v15 = vmax.f32 %v4188_v25, 0.0  ;;  %v4189_v40 = vadd.f32 %v12909_v46, %v4161_v35  ;;  %v4162_v17 = vmul.f32 %v12915_v55, %v4134_v56  ;;  %v4135_v6 = vadd.f32 %v4110_v36, %v3937_v45 }
 0x2bc   : > { %9166 = vmatprep.mubr.msk.bf16.mxu0 %vm4214_vm1, %v13026_v21  ;;  %v4112_v59 = vpop.f32.mrf.mxu0  ;;  %v4311_v3 = vld [vmem:[#allocation3 + $0x48] sm:$0xff]  ;;  %v13039_v60 = vpack.c.bf16 %v4203_v61, %v4201_v11  ;;  %v3942_v51 = vadd.f32 %v3924_v54, %v3744_v20 }
 0x2bd   : > { %4250 = vst.msk [vmem:[#allocation3 + $0x68] sm:$0xff] %vm4214_vm1, %v4204_v15  ;;  %v13042_v37 = vmax.f32 %v4189_v40, 0.0  ;;  %v4190_v1 = vadd.f32 %v12925_v24, %v4162_v17  ;;  %v4163_v22 = vmul.f32 %v12906_v31, %v4135_v6  ;;  %v4136_v8 = vadd.f32 %v4112_v59, %v3938_v49  ;;  %4689 = vmatmul.mubr.bf16.gmra.mxu0 %v13031_v57  ;;  %v10413_v6 = vld [vmem:[%s15046_s8 + $0x384] ss:$8 sps:$4 sm:$0xff]   ;;  %v10422_v59 = vld [vmem:[%s15046_s8 + $0x2d4] ss:$8 sps:$4 sm:$0xff]  }
 0x2be   : > { %v4116_v16 = vpop.f32.mrf.mxu0  ;;  %v4323_v0 = vpack.c.bf16 %v4311_v3, %v4266_v44  ;;  %v10438_v54 = vld [vmem:[%s15046_s8 + $0x2a0] ss:$8 sps:$4 sm:$0xff]  }
 0x2bf   : > { %v4206_v33 = vmax.f32 %v4190_v1, 0.0  ;;  %v4191_v11 = vadd.f32 %v12909_v46, %v4163_v22  ;;  %v4164_v7 = vmul.f32 %v12915_v55, %v4136_v8  ;;  %v4137_v48 = vadd.f32 %v4116_v16, %v3939_v34  ;;  %v10414_v34 = vld [vmem:[%s15046_s8 + $0x2e0] ss:$8 sps:$4 sm:$0xff]   ;;  %v10428_v1 = vld [vmem:[%s15046_s8 + $0x2c4] ss:$8 sps:$4 sm:$0xff]  }
 0x2c0   : > { %9142 = vmatprep.mubr.msk.bf16.mxu1 %vm4214_vm1, %v4323_v0  ;;  %v4118_v43 = vpop.f32.mrf.mxu0  ;;  %v4270_v53 = vld [vmem:[#allocation3 + $0x58] sm:$0xff]  ;;  %v13052_v62 = vpack.c.bf16 %v13042_v37, %v4203_v61  ;;  %v10426_v8 = vld [vmem:[%s15046_s8 + $0x2c0] ss:$8 sps:$4 sm:$0xff]  }
 0x2c1   : > { %4252 = vst.msk [vmem:[#allocation3 + $0x78] sm:$0xff] %vm4214_vm1, %v4206_v33  ;;  %v4207_v32 = vmax.f32 %v4191_v11, 0.0  ;;  %v4192_v13 = vadd.f32 %v12925_v24, %v4164_v7  ;;  %v4165_v19 = vmul.f32 %v12906_v31, %v4137_v48  ;;  %v4138_v29 = vadd.f32 %v4118_v43, %v3940_v4  ;;  %4504 = vmatmul.mubr.bf16.gmra.mxu1 %v13005_v18  ;;  %v10431_v22 = vld [vmem:[%s15046_s8 + $0x354] ss:$8 sps:$4 sm:$0xff]   ;;  %v10429_v4 = vld [vmem:[%s15046_s8 + $0x350] ss:$8 sps:$4 sm:$0xff]  }
 0x2c2   : > { %v4120_v2 = vpop.f32.mrf.mxu0  ;;  %v13058_v23 = vpack.c.bf16 %v4270_v53, %v4311_v3  ;;  %v10420_v3 = vld [vmem:[%s15046_s8 + $0x2d0] ss:$8 sps:$4 sm:$0xff]   ;;  %v10434_v16 = vld [vmem:[%s15046_s8 + $0x2b4] ss:$8 sps:$4 sm:$0xff]   ;;  %v10437_v33 = vld [vmem:[%s15046_s8 + $0x344] ss:$8 sps:$4 sm:$0xff]  }
 0x2c3   : > { %v4208_v38 = vmax.f32 %v4192_v13, 0.0  ;;  %v4193_v50 = vadd.f32 %v12909_v46, %v4165_v19  ;;  %v4166_v26 = vmul.f32 %v12915_v55, %v4138_v29  ;;  %v4139_v45 = vadd.f32 %v4120_v2, %v3941_v30  ;;  %v10432_v7 = vld [vmem:[%s15046_s8 + $0x2b0] ss:$8 sps:$4 sm:$0xff]   ;;  %v10435_v48 = vld [vmem:[%s15046_s8 + $0x340] ss:$8 sps:$4 sm:$0xff]  }
 0x2c4   : > { %9167 = vmatprep.mubr.msk.bf16.mxu0 %vm4214_vm1, %v13058_v23  ;;  %v4122_v47 = vpop.f32.mrf.mxu0  ;;  %v4315_v12 = vld [vmem:[#allocation3 + $0x68] sm:$0xff]  ;;  %v13065_v42 = vpack.c.bf16 %v4207_v32, %v13042_v37  ;;  %v10443_v43 = vld [vmem:[%s15046_s8 + $0x334] ss:$8 sps:$4 sm:$0xff]   ;;  %v10444_v29 = vld [vmem:[%s15046_s8 + $0x290] ss:$8 sps:$4 sm:$0xff]  }
 0x2c5   : > { %4254 = vst.msk [vmem:[#allocation3 + $0x88] sm:$0xff] %vm4214_vm1, %v4208_v38  ;;  %v4209_v44 = vmax.f32 %v4193_v50, 0.0  ;;  %v4194_v52 = vadd.f32 %v12925_v24, %v4166_v26  ;;  %v4167_v61 = vmul.f32 %v12906_v31, %v4139_v45  ;;  %v4140_v25 = vadd.f32 %v4122_v47, %v3942_v51  ;;  %4699 = vmatmul.mubr.bf16.gmra.mxu0 %v13019_v10  ;;  %v10440_v30 = vld [vmem:[%s15046_s8 + $0x2a4] ss:$8 sps:$4 sm:$0xff]   ;;  %v10446_v13 = vld [vmem:[%s15046_s8 + $0x294] ss:$8 sps:$4 sm:$0xff]  }
 0x2c6   : > { %v13071_v35 = vpack.c.bf16 %v4315_v12, %v4270_v53  ;;  %v10449_v19 = vld [vmem:[%s15046_s8 + $0x324] ss:$8 sps:$4 sm:$0xff]   ;;  %v10447_v51 = vld [vmem:[%s15046_s8 + $0x320] ss:$8 sps:$4 sm:$0xff]   ;;  %v10455_v38 = vld [vmem:[%s15046_s8 + $0x3b4] ss:$8 sps:$4 sm:$0xff]  }
 0x2c7   : > { %v4210_v56 = vmax.f32 %v4194_v52, 0.0  ;;  %v13074_v49 = vadd.f32 %v12909_v46, %v4167_v61  ;;  %v4168_v14 = vmul.f32 %v12915_v55, %v4140_v25  ;;  %v13077_v36 = vpack.c.bf16 %v4209_v44, %v4207_v32  ;;  %v10441_v32 = vld [vmem:[%s15046_s8 + $0x330] ss:$8 sps:$4 sm:$0xff]   ;;  %v10452_v2 = vld [vmem:[%s15046_s8 + $0x284] ss:$8 sps:$4 sm:$0xff]  }
 0x2c8   : > { %9143 = vmatprep.mubr.msk.bf16.mxu1 %vm4214_vm1, %v13071_v35  ;;  %v4274_v63 = vld [vmem:[#allocation3 + $0x78] sm:$0xff]  ;;  %v10450_v50 = vld [vmem:[%s15046_s8 + $0x280] ss:$8 sps:$4 sm:$0xff]   ;;  %v10461_v47 = vld [vmem:[%s15046_s8 + $0x3a4] ss:$8 sps:$4 sm:$0xff]  }
 0x2c9   : > { %4256 = vst.msk [vmem:[#allocation3 + $0x98] sm:$0xff] %vm4214_vm1, %v4210_v56  ;;  %v4211_v31 = vmax.f32 %v13074_v49, 0.0  ;;  %v4196_v39 = vadd.f32 %v12925_v24, %v4168_v14  ;;  %4514 = vmatmul.mubr.bf16.gmra.mxu1 %v13039_v60  ;;  %v13085_v15 = vpack.c.bf16 %v4274_v63, %v4315_v12  ;;  %v10405_v24 = vld [vmem:[%s15046_s8 + $0x390] ss:$8 sps:$4 sm:$0xff]   ;;  %v10458_v45 = vld [vmem:[%s15046_s8 + $0x314] ss:$8 sps:$4 sm:$0xff]  }
 0x2ca   : > { %v10453_v26 = vld [vmem:[%s15046_s8 + $0x3b0] ss:$8 sps:$4 sm:$0xff]   ;;  %v10462_v52 = vld [vmem:[%s15046_s8 + $0x300] ss:$8 sps:$4 sm:$0xff]   ;;  %v10467_v61 = vld [vmem:[%s15046_s8 + $0x434] ss:$8 sps:$4 sm:$0xff]  }
 0x2cb   : > { %v4212_v46 = vmax.f32 %v4196_v39, 0.0  ;;  %9168 = vmatprep.mubr.msk.bf16.mxu0 %vm4214_vm1, %v13085_v15  ;;  %v13091_v55 = vpack.c.bf16 %v4211_v31, %v4209_v44  ;;  %v10456_v12 = vld [vmem:[%s15046_s8 + $0x310] ss:$8 sps:$4 sm:$0xff]   ;;  %v10464_v44 = vld [vmem:[%s15046_s8 + $0x304] ss:$8 sps:$4 sm:$0xff]  }
 0x2cc   : > { %v4319_v40 = vld [vmem:[#allocation3 + $0x88] sm:$0xff]  ;;  %v10465_v25 = vld [vmem:[%s15046_s8 + $0x430] ss:$8 sps:$4 sm:$0xff]   ;;  %v10473_v56 = vld [vmem:[%s15046_s8 + $0x414] ss:$8 sps:$4 sm:$0xff]  }
 0x2cd   : > { %4258 = vst.msk [vmem:[#allocation3 + $0xa8] sm:$0xff] %vm4214_vm1, %v4212_v46  ;;  %4709 = vmatmul.mubr.bf16.gmra.mxu0 %v13052_v62  ;;  %v13095_v17 = vpack.c.bf16 %v4319_v40, %v4274_v63  ;;  %v10476_v14 = vld [vmem:[%s15046_s8 + $0x404] ss:$8 sps:$4 sm:$0xff]   ;;  %v5228_v39 = vld [vmem:[#allocation3 + $0xb8] sm:$0xff] }
 0x2ce   : > { %9253 = vmatprep.mubr.msk.bf16.mxu0 %vm4214_vm1, %v4323_v0  ;;  %v5475_v63 = vld [vmem:[#allocation3 + $0xc8] sm:$0xff]  ;;  %v10491_v49 = vld [vmem:[%s15046_s8 + $0x454] ss:$8 sps:$4 sm:$0xff]  }
 0x2cf   : > { %9144 = vmatprep.mubr.msk.bf16.mxu1 %vm4214_vm1, %v13095_v17  ;;  %v5483_v46 = vpack.c.bf16 %v5475_v63, %v5228_v39 }
 0x2d0   : > { %v4979_v0 = vld [vmem:[#allocation3 + $0x98] sm:$0xff] }
 0x2d1   : > { %4524 = vmatmul.mubr.bf16.gmra.mxu1 %v13065_v42  ;;  %v13190_v53 = vpack.c.bf16 %v4979_v0, %v4319_v40  ;;  %v10479_v40 = vld [vmem:[%s15046_s8 + $0x3f4] ss:$8 sps:$4 sm:$0xff]  }
 0x2d2   : > { %9209 = vmatprep.mubr.msk.bf16.mxu1 %vm4214_vm1, %v13026_v21  ;;  %v10411_v21 = vld [vmem:[%s15046_s8 + $0x380] ss:$8 sps:$4 sm:$0xff]  }
 0x2d4   : > { %v13161_v20 = vld [vmem:[#allocation3 + $0xa8] sm:$0xff] }
 0x2d5   : > { %5156 = vmatmul.mubr.bf16.vlgmr.msra.gmra.mxu0 %v13005_v18  ;;  %v10419_v18 = vld [vmem:[%s15046_s8 + $0x374] ss:$8 sps:$4 sm:$0xff]   ;;  %v13173_v11 = vpack.c.bf16 %v13161_v20, %v4979_v0 }
 0x2d6   : > { %5618 = vmatpush1.bf16.msra.mxu0 %v10405_v24  ;;  %9254 = vmatprep.mubr.msk.bf16.mxu0 %vm4214_vm1, %v13071_v35  ;;  %v5236_v24 = vpack.c.bf16 %v5228_v39, %v13161_v20  ;;  %v10503_v20 = vld [vmem:[%s15050_s12 + $0x1b4] ss:$36 sps:$4 sm:$0xff]   ;;  %v10506_v0 = vld [vmem:[%s15050_s12 + $0x1bc] ss:$36 sps:$4 sm:$0xff]  }
 0x2d7   : > { %5619 = vmatprep.subr.bf16.mxu0 %v10413_v6  ;;  %v10808_v6 = vld [vmem:[#allocation2] sm:$0xff]  ;;  %v10549_v39 = vld [vmem:[%s15050_s12 + $0x2d0] ss:$36 sps:$4 sm:$0xff]  }
 0x2d9   : > { %4910 = vmatmul.mubr.bf16.vlgmr.msra.gmra.mxu1 %v13031_v57  ;;  %v10425_v57 = vld [vmem:[%s15046_s8 + $0x364] ss:$8 sps:$4 sm:$0xff]  }
 0x2da   : > { %5371 = vmatpush1.bf16.msra.mxu1 %v10408_v58  ;;  %5620 = vmatpush1.bf16.msra.mxu0 %v10411_v21  ;;  %v5482_v58 = vpack.c.bf16 %v10808_v6, %v10808_v6  ;;  %v10485_v21 = vld [vmem:[%s15046_s8 + $0x3d4] ss:$8 sps:$4 sm:$0xff]  }
 0x2db   : > { %9210 = vmatprep.mubr.msk.bf16.mxu1 %vm4214_vm1, %v13058_v23  ;;  %5372 = vmatprep.subr.bf16.mxu1 %v10416_v28  ;;  %v10483_v28 = vld [vmem:[%s15046_s8 + $0x3d0] ss:$8 sps:$4 sm:$0xff]  }
 0x2dc   : > { %5621 = vmatprep.subr.bf16.mxu0 %v10419_v18  ;;  %v5235_v18 = vpack.c.bf16 %v10808_v6, %v4211_v31  ;;  %v10489_v31 = vld [vmem:[%s15046_s8 + $0x450] ss:$8 sps:$4 sm:$0xff]  }
 0x2dd   : > { %5166 = vmatmul.mubr.bf16.gmra.mxu0 %v13039_v60  ;;  %v10558_v6 = vld [vmem:[%s15050_s12 + $0x290] ss:$36 sps:$4 sm:$0xff]  }
 0x2de   : > { %5373 = vmatpush1.bf16.msra.mxu1 %v10414_v34  ;;  %5622 = vmatpush1.bf16.msra.mxu0 %v10417_v27  ;;  %v10488_v34 = vld [vmem:[%s15046_s8 + $0x3c4] ss:$8 sps:$4 sm:$0xff]   ;;  %v10486_v27 = vld [vmem:[%s15046_s8 + $0x3c0] ss:$8 sps:$4 sm:$0xff]  }
 0x2df   : > { %9255 = vmatprep.mubr.msk.bf16.mxu0 %vm4214_vm1, %v13095_v17  ;;  %5374 = vmatprep.subr.bf16.mxu1 %v10422_v59  ;;  %v10494_v59 = vld [vmem:[%s15046_s8 + $0x444] ss:$8 sps:$4 sm:$0xff]  }
 0x2e0   : > { %5623 = vmatprep.subr.bf16.mxu0 %v10425_v57  ;;  %v5707_v57 = vld [vmem:[#allocation3 + $0x60] sm:$0xff] }
 0x2e1   : > { %4920 = vmatmul.mubr.bf16.gmra.mxu1 %v13019_v10 }
 0x2e2   : > { %5375 = vmatpush1.bf16.msra.mxu1 %v10420_v3  ;;  %5624 = vmatpush1.bf16.msra.mxu0 %v10423_v41  ;;  %v5723_v3 = vpack.c.bf16 %v13042_v37, %v5707_v57  ;;  %v5722_v41 = vld [vmem:[#allocation3 + $0xd8] sm:$0xff] }
 0x2e3   : > { %9211 = vmatprep.mubr.msk.bf16.mxu1 %vm4214_vm1, %v13085_v15  ;;  %5376 = vmatprep.subr.bf16.mxu1 %v10428_v1  ;;  %v5730_v1 = vpack.c.bf16 %v5722_v41, %v5475_v63  ;;  %v10497_v37 = vld [vmem:[%s15050_s12 + $0x1fc] ss:$36 sps:$4 sm:$0xff]   ;;  %v13449_v63 = vpop.f32.mrf.mxu0 }
 0x2e4   : > { %5625 = vmatprep.subr.bf16.mxu0 %v10431_v22  ;;  %v10495_v22 = vld [vmem:[%s15050_s12 + $0x1f8] ss:$36 sps:$4 sm:$0xff]  }
 0x2e5   : > { %5176 = vmatmul.mubr.bf16.gmra.mxu0 %v13065_v42 }
 0x2e6   : > { %5377 = vmatpush1.bf16.msra.mxu1 %v10426_v8  ;;  %5626 = vmatpush1.bf16.msra.mxu0 %v10429_v4  ;;  %v10500_v8 = vld [vmem:[%s15050_s12 + $0x204] ss:$36 sps:$4 sm:$0xff]   ;;  %v10501_v4 = vld [vmem:[%s15050_s12 + $0x1b0] ss:$36 sps:$4 sm:$0xff]  }
 0x2e7   : > { %9256 = vmatprep.mubr.msk.bf16.mxu0 %vm4214_vm1, %v13173_v11  ;;  %5378 = vmatprep.subr.bf16.mxu1 %v10434_v16  ;;  %v10504_v16 = vld [vmem:[%s15050_s12 + $0x1b8] ss:$36 sps:$4 sm:$0xff]  }
 0x2e8   : > { %5627 = vmatprep.subr.bf16.mxu0 %v10437_v33  ;;  %v10507_v33 = vld [vmem:[%s15050_s12 + $0x168] ss:$36 sps:$4 sm:$0xff]  }
 0x2e9   : > { %4930 = vmatmul.mubr.bf16.gmra.mxu1 %v13052_v62 }
 0x2ea   : > { %5379 = vmatpush1.bf16.msra.mxu1 %v10432_v7  ;;  %5628 = vmatpush1.bf16.msra.mxu0 %v10435_v48  ;;  %v10510_v7 = vld [vmem:[%s15050_s12 + $0x170] ss:$36 sps:$4 sm:$0xff]  }
 0x2eb   : > { %9212 = vmatprep.mubr.msk.bf16.mxu1 %vm4214_vm1, %v13190_v53  ;;  %5380 = vmatprep.subr.bf16.mxu1 %v10440_v30  ;;  %v10512_v48 = vld [vmem:[%s15050_s12 + $0x174] ss:$36 sps:$4 sm:$0xff]   ;;  %v10513_v30 = vld [vmem:[%s15050_s12 + $0x120] ss:$36 sps:$4 sm:$0xff]  }
 0x2ec   : > { %5629 = vmatprep.subr.bf16.mxu0 %v10443_v43  ;;  %v10515_v43 = vld [vmem:[%s15050_s12 + $0x124] ss:$36 sps:$4 sm:$0xff]  }
 0x2ed   : > { %5186 = vmatmul.mubr.bf16.gmra.mxu0 %v13091_v55 }
 0x2ee   : > { %5381 = vmatpush1.bf16.msra.mxu1 %v10438_v54  ;;  %5630 = vmatpush1.bf16.msra.mxu0 %v10441_v32  ;;  %v10518_v54 = vld [vmem:[%s15050_s12 + $0x12c] ss:$36 sps:$4 sm:$0xff]   ;;  %v10519_v32 = vld [vmem:[%s15050_s12 + $0xd8] ss:$36 sps:$4 sm:$0xff]  }
 0x2ef   : > { %9341 = vmatprep.mubr.msk.bf16.mxu0 %vm4214_vm1, %v13071_v35  ;;  %5382 = vmatprep.subr.bf16.mxu1 %v10446_v13  ;;  %v10470_v35 = vld [vmem:[%s15046_s8 + $0x424] ss:$8 sps:$4 sm:$0xff]   ;;  %v10521_v13 = vld [vmem:[%s15050_s12 + $0xdc] ss:$36 sps:$4 sm:$0xff]  }
 0x2f0   : > { %5631 = vmatprep.subr.bf16.mxu0 %v10449_v19  ;;  %v10522_v19 = vld [vmem:[%s15050_s12 + $0xe0] ss:$36 sps:$4 sm:$0xff]  }
 0x2f1   : > { %4940 = vmatmul.mubr.bf16.gmra.mxu1 %v13077_v36 }
 0x2f2   : > { %5383 = vmatpush1.bf16.msra.mxu1 %v10444_v29  ;;  %5632 = vmatpush1.bf16.msra.mxu0 %v10447_v51  ;;  %v10524_v29 = vld [vmem:[%s15050_s12 + $0xe4] ss:$36 sps:$4 sm:$0xff]   ;;  %v10525_v51 = vld [vmem:[%s15050_s12 + $0x90] ss:$36 sps:$4 sm:$0xff]  }
 0x2f3   : > { %9297 = vmatprep.mubr.msk.bf16.mxu1 %vm4214_vm1, %v13058_v23  ;;  %5384 = vmatprep.subr.bf16.mxu1 %v10452_v2  ;;  %v10459_v23 = vld [vmem:[%s15046_s8 + $0x3a0] ss:$8 sps:$4 sm:$0xff]   ;;  %v10527_v2 = vld [vmem:[%s15050_s12 + $0x94] ss:$36 sps:$4 sm:$0xff]  }
 0x2f4   : > { %5645 = vmatprep.subr.bf16.mxu0 %v10455_v38  ;;  %v10528_v38 = vld [vmem:[%s15050_s12 + $0x98] ss:$36 sps:$4 sm:$0xff]  }
 0x2f6   : > { %5385 = vmatpush1.bf16.msra.mxu1 %v10450_v50  ;;  %5646 = vmatpush2.bf16.msra.mxu0 %v10453_v26  ;;  %v10530_v50 = vld [vmem:[%s15050_s12 + $0x9c] ss:$36 sps:$4 sm:$0xff]   ;;  %v10531_v26 = vld [vmem:[%s15050_s12 + $0x48] ss:$36 sps:$4 sm:$0xff]  }
 0x2f7   : > { %5398 = vmatprep.subr.bf16.mxu1 %v10458_v45  ;;  %5647 = vmatprep.subr.bf16.mxu0 %v10461_v47  ;;  %v10533_v45 = vld [vmem:[%s15050_s12 + $0x4c] ss:$36 sps:$4 sm:$0xff]  }
 0x2f8   : > { %v10534_v47 = vld [vmem:[%s15050_s12 + $0x50] ss:$36 sps:$4 sm:$0xff]  }
 0x2fa   : > { %5399 = vmatpush2.bf16.msra.mxu1 %v10456_v12  ;;  %5648 = vmatpush2.bf16.msra.mxu0 %v10459_v23  ;;  %v10536_v12 = vld [vmem:[%s15050_s12 + $0x54] ss:$36 sps:$4 sm:$0xff]   ;;  %v10539_v23 = vld [vmem:[%s15050_s12 + $0x4] ss:$36 sps:$4 sm:$0xff]  }
 0x2fb   : > { %5400 = vmatprep.subr.bf16.mxu1 %v10464_v44  ;;  %6845 = vmatprep.subr.bf16.mxu0 %v10497_v37  ;;  %v10542_v44 = vld [vmem:[%s15050_s12 + $0xc] ss:$36 sps:$4 sm:$0xff]  }
 0x2fd   : > { %5650 = vmatmul.mubr.bf16.vlgmr.msra.gmra.mxu0 %v13039_v60  ;;  %v10468_v60 = vld [vmem:[%s15046_s8 + $0x420] ss:$8 sps:$4 sm:$0xff]  }
 0x2fe   : > { %5401 = vmatpush2.bf16.msra.mxu1 %v10462_v52  ;;  %9342 = vmatprep.mubr.msk.bf16.mxu0 %vm4214_vm1, %v13095_v17  ;;  %v10482_v17 = vld [vmem:[%s15046_s8 + $0x3e4] ss:$8 sps:$4 sm:$0xff]  }
 0x2ff   : > { %5864 = vmatprep.subr.bf16.mxu1 %v10467_v61  ;;  %6846 = vmatpush1.bf16.msra.mxu0 %v10495_v22  ;;  %v10537_v52 = vld [vmem:[%s15050_s12] ss:$36 sps:$4 sm:$0xff]   ;;  %v10540_v61 = vld [vmem:[%s15050_s12 + $0x8] ss:$36 sps:$4 sm:$0xff]  }
 0x300   : > { %6847 = vmatprep.subr.bf16.mxu0 %v10503_v20 }
 0x301   : > { %5403 = vmatmul.mubr.bf16.vlgmr.msra.gmra.mxu1 %v13019_v10  ;;  %v10471_v10 = vld [vmem:[%s15046_s8 + $0x410] ss:$8 sps:$4 sm:$0xff]  }
 0x302   : > { %9298 = vmatprep.mubr.msk.bf16.mxu1 %vm4214_vm1, %v13085_v15  ;;  %5865 = vmatpush1.bf16.msra.mxu1 %v10465_v25  ;;  %v10545_v25 = vld [vmem:[%s15050_s12 + $0x31c] ss:$36 sps:$4 sm:$0xff]  }
 0x303   : > { %5866 = vmatprep.subr.bf16.mxu1 %v10470_v35  ;;  %6848 = vmatpush1.bf16.msra.mxu0 %v10501_v4  ;;  %v10548_v35 = vld [vmem:[%s15050_s12 + $0x324] ss:$36 sps:$4 sm:$0xff]  }
 0x305   : > { %5660 = vmatmul.mubr.bf16.gmra.mxu0 %v13065_v42  ;;  %v10474_v42 = vld [vmem:[%s15046_s8 + $0x400] ss:$8 sps:$4 sm:$0xff]  }
 0x306   : > { %9343 = vmatprep.mubr.msk.bf16.mxu0 %vm4214_vm1, %v13173_v11  ;;  %5867 = vmatpush1.bf16.msra.mxu1 %v10468_v60  ;;  %v10509_v11 = vld [vmem:[%s15050_s12 + $0x16c] ss:$36 sps:$4 sm:$0xff]   ;;  %v10543_v60 = vld [vmem:[%s15050_s12 + $0x318] ss:$36 sps:$4 sm:$0xff]  }
 0x307   : > { %5868 = vmatprep.subr.bf16.mxu1 %v10473_v56  ;;  %6849 = vmatprep.subr.bf16.mxu0 %v10509_v11  ;;  %v10546_v56 = vld [vmem:[%s15050_s12 + $0x320] ss:$36 sps:$4 sm:$0xff]  }
 0x308   : > { %6850 = vmatpush1.bf16.msra.mxu0 %v10507_v33 }
 0x309   : > { %5413 = vmatmul.mubr.bf16.gmra.mxu1 %v13052_v62  ;;  %v10477_v62 = vld [vmem:[%s15046_s8 + $0x3f0] ss:$8 sps:$4 sm:$0xff]   ;;  %6851 = vmatprep.subr.bf16.mxu0 %v10515_v43 }
 0x30a   : > { %9299 = vmatprep.mubr.msk.bf16.mxu1 %vm4214_vm1, %v13190_v53  ;;  %5869 = vmatpush1.bf16.msra.mxu1 %v10471_v10  ;;  %v10551_v10 = vld [vmem:[%s15050_s12 + $0x2d4] ss:$36 sps:$4 sm:$0xff]  }
 0x30b   : > { %5870 = vmatprep.subr.bf16.mxu1 %v10476_v14  ;;  %v10554_v14 = vld [vmem:[%s15050_s12 + $0x2dc] ss:$36 sps:$4 sm:$0xff]  }
 0x30c   : > { %6852 = vmatpush1.bf16.msra.mxu0 %v10513_v30 }
 0x30d   : > { %5670 = vmatmul.mubr.bf16.gmra.mxu0 %v13091_v55  ;;  %v10480_v55 = vld [vmem:[%s15046_s8 + $0x3e0] ss:$8 sps:$4 sm:$0xff]   ;;  %6853 = vmatprep.subr.bf16.mxu0 %v10521_v13 }
 0x30e   : > { %5871 = vmatpush1.bf16.msra.mxu1 %v10474_v42  ;;  %9344 = vmatprep.mubr.msk.bf16.mxu0 %vm4214_vm1, %v5483_v46  ;;  %v10552_v42 = vld [vmem:[%s15050_s12 + $0x2d8] ss:$36 sps:$4 sm:$0xff]   ;;  %v10557_v46 = vld [vmem:[%s15050_s12 + $0x28c] ss:$36 sps:$4 sm:$0xff]  }
 0x30f   : > { %5872 = vmatprep.subr.bf16.mxu1 %v10479_v40  ;;  %v10560_v40 = vld [vmem:[%s15050_s12 + $0x294] ss:$36 sps:$4 sm:$0xff]  }
 0x310   : > { %6854 = vmatpush1.bf16.msra.mxu0 %v10519_v32 }
 0x311   : > { %5423 = vmatmul.mubr.bf16.gmra.mxu1 %v13077_v36  ;;  %6855 = vmatprep.subr.bf16.mxu0 %v10527_v2 }
 0x312   : > { %9300 = vmatprep.mubr.msk.bf16.mxu1 %vm4214_vm1, %v5236_v24  ;;  %5873 = vmatpush1.bf16.msra.mxu1 %v10477_v62  ;;  %v13463_v62 = vpop.f32.mrf.mxu1 }
 0x313   : > { %5874 = vmatprep.subr.bf16.mxu1 %v10482_v17  ;;  %v13465_v17 = vpop.f32.mrf.mxu0 }
 0x314   : > { %6856 = vmatpush1.bf16.msra.mxu0 %v10525_v51 }
 0x315   : > { %5680 = vmatmul.mubr.bf16.gmra.mxu0 %v5482_v58  ;;  %6857 = vmatprep.subr.bf16.mxu0 %v10533_v45 }
 0x316   : > { %5875 = vmatpush1.bf16.msra.mxu1 %v10480_v55  ;;  %v10566_v55 = vld [vmem:[%s15050_s12 + $0x24c] ss:$36 sps:$4 sm:$0xff]  }
 0x317   : > { %5876 = vmatprep.subr.bf16.mxu1 %v10485_v21  ;;  %v13479_v21 = vpop.f32.mrf.mxu1 }
 0x318   : > { %6858 = vmatpush1.bf16.msra.mxu0 %v10531_v26 }
 0x319   : > { %5433 = vmatmul.mubr.bf16.gmra.mxu1 %v5235_v18  ;;  %6859 = vmatprep.subr.bf16.mxu0 %v10539_v23 }
 0x31a   : > { %5877 = vmatpush1.bf16.msra.mxu1 %v10483_v28  ;;  %9385 = vmatprep.mubr.msk.bf16.mxu1 %vm4214_vm1, %v13085_v15  ;;  %v10492_v15 = vld [vmem:[%s15046_s8 + $0x440] ss:$8 sps:$4 sm:$0xff]   ;;  %v13481_v28 = vpop.f32.mrf.mxu0 }
 0x31b   : > { %5878 = vmatprep.subr.bf16.mxu1 %v10488_v34  ;;  %v10564_v34 = vld [vmem:[%s15050_s12 + $0x248] ss:$36 sps:$4 sm:$0xff]  }
 0x31c   : > { %6860 = vmatpush1.bf16.msra.mxu0 %v10537_v52 }
 0x31d   : > { %6869 = vmatprep.subr.bf16.mxu0 %v10545_v25 }
 0x31e   : > { %5879 = vmatpush1.bf16.msra.mxu1 %v10486_v27  ;;  %v10569_v27 = vld [vmem:[%s15050_s12 + $0x20c] ss:$36 sps:$4 sm:$0xff]  }
 0x31f   : > { %5892 = vmatprep.subr.bf16.mxu1 %v10491_v49  ;;  %v10572_v49 = vld [vmem:[%s15050_s12 + $0x214] ss:$36 sps:$4 sm:$0xff]  }
 0x320   : > { %6870 = vmatpush2.bf16.msra.mxu0 %v10543_v60 }
 0x321   : > { %6871 = vmatprep.subr.bf16.mxu0 %v10551_v10 }
 0x322   : > { %5893 = vmatpush2.bf16.msra.mxu1 %v10489_v31  ;;  %v13495_v31 = vpop.f32.mrf.mxu1 }
 0x323   : > { %5894 = vmatprep.subr.bf16.mxu1 %v10494_v59  ;;  %v13497_v59 = vpop.f32.mrf.mxu0 }
 0x324   : > { %6872 = vmatpush2.bf16.msra.mxu0 %v10549_v39  ;;  %v13501_v57 = vpop.f32.mrf.mxu1 }
 0x325   : > { %6873 = vmatprep.subr.bf16.mxu0 %v10557_v46 }
 0x326   : > { %5895 = vmatpush2.bf16.msra.mxu1 %v10492_v15 }
 0x327   : > { %6918 = vmatprep.subr.bf16.mxu1 %v10500_v8 }
 0x329   : > { %5897 = vmatmul.mubr.bf16.vlgmr.msra.gmra.mxu1 %v5723_v3 }
 0x32a   : > { %9386 = vmatprep.mubr.msk.bf16.mxu1 %vm4214_vm1, %v13190_v53  ;;  %v10516_v53 = vld [vmem:[%s15050_s12 + $0x128] ss:$36 sps:$4 sm:$0xff]  }
 0x331   : > { %5907 = vmatmul.mubr.bf16.gmra.mxu1 %v13077_v36  ;;  %v10498_v36 = vld [vmem:[%s15050_s12 + $0x200] ss:$36 sps:$4 sm:$0xff]  }
 0x332   : > { %9387 = vmatprep.mubr.msk.bf16.mxu1 %vm4214_vm1, %v5236_v24  ;;  %6919 = vmatpush1.bf16.msra.mxu1 %v10498_v36  ;;  %v10555_v24 = vld [vmem:[%s15050_s12 + $0x288] ss:$36 sps:$4 sm:$0xff]  }
 0x333   : > { %6920 = vmatprep.subr.bf16.mxu1 %v10506_v0  ;;  %6874 = vmatpush2.bf16.msra.mxu0 %v10555_v24 }
 0x336   : > { %6921 = vmatpush1.bf16.msra.mxu1 %v10504_v16 }
 0x337   : > { %6922 = vmatprep.subr.bf16.mxu1 %v10512_v48 }
 0x339   : > { %5917 = vmatmul.mubr.bf16.gmra.mxu1 %v5235_v18  ;;  %v10561_v18 = vld [vmem:[%s15050_s12 + $0x240] ss:$36 sps:$4 sm:$0xff]  }
 0x33a   : > { %9388 = vmatprep.mubr.msk.bf16.mxu1 %vm4214_vm1, %v5730_v1  ;;  %6923 = vmatpush1.bf16.msra.mxu1 %v10510_v7 }
 0x33b   : > { %6924 = vmatprep.subr.bf16.mxu1 %v10518_v54 }
 0x33e   : > { %6925 = vmatpush1.bf16.msra.mxu1 %v10516_v53 }
 0x33f   : > { %6926 = vmatprep.subr.bf16.mxu1 %v10524_v29 }
 0x341   : > { %5927 = vmatmul.mubr.bf16.gmra.mxu1 %v5482_v58  ;;  %v10563_v58 = vld [vmem:[%s15050_s12 + $0x244] ss:$36 sps:$4 sm:$0xff]  }
 0x342   : > { %6927 = vmatpush1.bf16.msra.mxu1 %v10522_v19  ;;  %6875 = vmatprep.subr.bf16.mxu0 %v10563_v58 }
 0x343   : > { %6928 = vmatprep.subr.bf16.mxu1 %v10530_v50  ;;  %6876 = vmatpush2.bf16.msra.mxu0 %v10561_v18 }
 0x344   : > { %6991 = vmatprep.subr.bf16.mxu0 %v10569_v27 }
 0x346   : > { %6929 = vmatpush1.bf16.msra.mxu1 %v10528_v38 }
 0x347   : > { %6930 = vmatprep.subr.bf16.mxu1 %v10536_v12 }
 0x34a   : > { %6931 = vmatpush1.bf16.msra.mxu1 %v10534_v47 }
 0x34b   : > { %6932 = vmatprep.subr.bf16.mxu1 %v10542_v44 }
 0x34e   : > { %6933 = vmatpush1.bf16.msra.mxu1 %v10540_v61 }
 0x34f   : > { %6942 = vmatprep.subr.bf16.mxu1 %v10548_v35 }
 0x352   : > { %6943 = vmatpush2.bf16.msra.mxu1 %v10546_v56 }
 0x353   : > { %6944 = vmatprep.subr.bf16.mxu1 %v10554_v14 }
 0x356   : > { %6945 = vmatpush2.bf16.msra.mxu1 %v10552_v42 }
 0x357   : > { %6946 = vmatprep.subr.bf16.mxu1 %v10560_v40 }
 0x35a   : > { %6947 = vmatpush2.bf16.msra.mxu1 %v10558_v6 }
 0x35b   : > { %6948 = vmatprep.subr.bf16.mxu1 %v10566_v55 }
 0x35e   : > { %6949 = vmatpush2.bf16.msra.mxu1 %v10564_v34 }
 0x35f   : > { %7064 = vmatprep.subr.bf16.mxu1 %v10572_v49 }
 0x37d   : > { %v13499_v15 = vpop.f32.mrf.mxu0 }
 0x37f   : > { %v13503_v3 = vpop.f32.mrf.mxu0 }
 0x381   : > { %v13505_v41 = vpop.f32.mrf.mxu1  ;;  %v13507_v1 = vpop.f32.mrf.mxu0 }
 0x383   : > { %v13509_v22 = vpop.f32.mrf.mxu1  ;;  %v13511_v37 = vpop.f32.mrf.mxu0 }
 0x385   : > { %v13513_v36 = vpop.f32.mrf.mxu1  ;;  %v4700_v8 = vpop.f32.mrf.mxu0 }
 0x387   : > { %v13515_v4 = vpop.f32.mrf.mxu1  ;;  %v13517_v20 = vpop.f32.mrf.mxu0 }
 0x389   : > { %v4515_v16 = vpop.f32.mrf.mxu1  ;;  %v13519_v0 = vpop.f32.mrf.mxu0 }
 0x38a   : > { %v4701_v33 = vadd.f32 %v4700_v8, %v4515_v16 }
 0x38b   : > { %v13521_v11 = vpop.f32.mrf.mxu1  ;;  %v13523_v7 = vpop.f32.mrf.mxu0 }
 0x38d   : > { %v13525_v48 = vpop.f32.mrf.mxu1  ;;  %v4710_v30 = vpop.f32.mrf.mxu0 }
 0x38f   : > { %v13527_v43 = vpop.f32.mrf.mxu1  ;;  %v13529_v53 = vpop.f32.mrf.mxu0 }
 0x391   : > { %v4525_v54 = vpop.f32.mrf.mxu1  ;;  %v13531_v32 = vpop.f32.mrf.mxu0 }
 0x392   : > { %v4711_v13 = vadd.f32 %v4710_v30, %v4525_v54 }
 0x393   : > { %v13533_v19 = vpop.f32.mrf.mxu1  ;;  %v13535_v29 = vpop.f32.mrf.mxu0 }
 0x395   : > { %v13537_v51 = vpop.f32.mrf.mxu1  ;;  %v13539_v2 = vpop.f32.mrf.mxu0 }
 0x397   : > { %v13541_v38 = vpop.f32.mrf.mxu1  ;;  %v13543_v50 = vpop.f32.mrf.mxu0 }
 0x399   : > { %v4911_v26 = vpop.f32.mrf.mxu1  ;;  %v13545_v45 = vpop.f32.mrf.mxu0 }
 0x39b   : > { %v4913_v47 = vpop.f32.mrf.mxu1  ;;  %v13547_v12 = vpop.f32.mrf.mxu0 }
 0x39d   : > { %v4915_v23 = vpop.f32.mrf.mxu1  ;;  %v13549_v44 = vpop.f32.mrf.mxu0 }
 0x39f   : > { %v4917_v52 = vpop.f32.mrf.mxu1  ;;  %v13551_v61 = vpop.f32.mrf.mxu0 }
 0x3a1   : > { %v4921_v25 = vpop.f32.mrf.mxu1  ;;  %v13553_v35 = vpop.f32.mrf.mxu0 }
 0x3a2   : > { %15176 = vst [vmem:[#allocation39_spill] sm:$0xff] %v13553_v35 }
 0x3a3   : > { %v13555_v60 = vpop.f32.mrf.mxu1  ;;  %v13559_v10 = vpop.f32.mrf.mxu0 }
 0x3a4   : > { %15177 = vst [vmem:[#allocation56_spill] sm:$0xff] %v13559_v10 }
 0x3a5   : > { %v13557_v56 = vpop.f32.mrf.mxu1  ;;  %v13565_v46 = vpop.f32.mrf.mxu0 }
 0x3a6   : > { %15179 = vst [vmem:[#allocation55_spill] sm:$0xff] %v13565_v46 }
 0x3a7   : > { %v13561_v14 = vpop.f32.mrf.mxu1  ;;  %v13571_v6 = vpop.f32.mrf.mxu0 }
 0x3a8   : > { %15180 = vst [vmem:[#allocation38_spill] sm:$0xff] %v13571_v6 }
 0x3a9   : > { %v4931_v39 = vpop.f32.mrf.mxu1  ;;  %v13577_v34 = vpop.f32.mrf.mxu0 }
 0x3aa   : > { %v13563_v42 = vadd.f32 %v4931_v39, %v4701_v33  ;;  %15183 = vst [vmem:[#allocation57_spill] sm:$0xff] %v13577_v34 }
 0x3ab   : > { %v13567_v40 = vpop.f32.mrf.mxu1  ;;  %v13579_v27 = vpop.f32.mrf.mxu0 }
 0x3ac   : > { %15178 = vst [vmem:[#allocation37_spill] sm:$0xff] %v13563_v42  ;;  %15184 = vst [vmem:[#allocation58_spill] sm:$0xff] %v13579_v27 }
 0x3ad   : > { %v13569_v24 = vpop.f32.mrf.mxu1  ;;  %v13583_v8 = vpop.f32.mrf.mxu0 }
 0x3ae   : > { %15186 = vst [vmem:[#allocation45_spill] sm:$0xff] %v13583_v8 }
 0x3af   : > { %v13573_v58 = vpop.f32.mrf.mxu1  ;;  %v13587_v33 = vpop.f32.mrf.mxu0 }
 0x3b0   : > { %15181 = vst [vmem:[#allocation41_spill] sm:$0xff] %v13573_v58  ;;  %15188 = vst [vmem:[#allocation59_spill] sm:$0xff] %v13587_v33 }
 0x3b1   : > { %v4941_v55 = vpop.f32.mrf.mxu1  ;;  %v13591_v39 = vpop.f32.mrf.mxu0 }
 0x3b2   : > { %v13575_v18 = vadd.f32 %v4941_v55, %v4711_v13  ;;  %15190 = vst [vmem:[#allocation44_spill] sm:$0xff] %v13591_v39 }
 0x3b3   : > { %v13581_v49 = vpop.f32.mrf.mxu1  ;;  %v13593_v55 = vpop.f32.mrf.mxu0 }
 0x3b4   : > { %15182 = vst [vmem:[#allocation43_spill] sm:$0xff] %v13575_v18  ;;  %15185 = vst [vmem:[#allocation40_spill] sm:$0xff] %v13581_v49 }
 0x3b5   : > { %v13585_v16 = vpop.f32.mrf.mxu1  ;;  %15191 = vst [vmem:[#allocation60_spill] sm:$0xff] %v13593_v55 }
 0x3b6   : > { %15187 = vst [vmem:[#allocation61_spill] sm:$0xff] %v13585_v16 }
 0x3b7   : > { %v13589_v30 = vpop.f32.mrf.mxu1 }
 0x3b8   : > { %15189 = vst [vmem:[#allocation42_spill] sm:$0xff] %v13589_v30 }
 0x3bd   : > { %v5651_v34 = vpop.f32.mrf.mxu0 }
 0x3bf   : > { %v5653_v8 = vpop.f32.mrf.mxu0 }
 0x3c1   : > { %v5404_v54 = vpop.f32.mrf.mxu1  ;;  %v5655_v33 = vpop.f32.mrf.mxu0 }
 0x3c3   : > { %v5406_v6 = vpop.f32.mrf.mxu1  ;;  %v13607_v39 = vpop.f32.mrf.mxu0 }
 0x3c4   : > { %15197 = vst [vmem:[#allocation63_spill] sm:$0xff] %v13607_v39 }
 0x3c5   : > { %v5408_v13 = vpop.f32.mrf.mxu1  ;;  %v13613_v35 = vpop.f32.mrf.mxu0 }
 0x3c6   : > { %15200 = vst [vmem:[#allocation50_spill] sm:$0xff] %v13613_v35 }
 0x3c7   : > { %v5410_v18 = vpop.f32.mrf.mxu1 }
 0x3c9   : > { %v13595_v27 = vpop.f32.mrf.mxu1 }
 0x3cb   : > { %v13597_v49 = vpop.f32.mrf.mxu1 }
 0x3cc   : > { %15192 = vst [vmem:[#allocation46_spill] sm:$0xff] %v13597_v49  ;;  %v13619_v49 = vpop.f32.mrf.mxu0 }
 0x3cd   : > { %v13599_v46 = vpop.f32.mrf.mxu1 }
 0x3ce   : > { %15193 = vst [vmem:[#allocation47_spill] sm:$0xff] %v13599_v46  ;;  %v4681_v46 = vadd.f32 %v13449_v63, %v13463_v62  ;;  %v5953_v62 = vld [vmem:[%s15047_s9] sm:$0x3] }
 0x3cf   : > { %v13601_v16 = vpop.f32.mrf.mxu1 }
 0x3d0   : > { %15194 = vst [vmem:[#allocation62_spill] sm:$0xff] %v13601_v16  ;;  %v4950_v16 = vadd.f32 %v4911_v26, %v4681_v46 }
 0x3d1   : > { %v13603_v30 = vpop.f32.mrf.mxu1 }
 0x3d2   : > { %15195 = vst [vmem:[#allocation49_spill] sm:$0xff] %v13603_v30  ;;  %v4683_v30 = vadd.f32 %v13465_v17, %v13479_v21  ;;  %v5196_v63 = vadd.f32 %v13539_v2, %v4950_v16  ;;  %v4691_v17 = vadd.f32 %v13499_v15, %v13505_v41 }
 0x3d3   : > { %v13605_v42 = vpop.f32.mrf.mxu1 }
 0x3d4   : > { %15196 = vst [vmem:[#allocation51_spill] sm:$0xff] %v13605_v42  ;;  %v4951_v39 = vadd.f32 %v4913_v47, %v4683_v30  ;;  %v5443_v26 = vadd.f32 %v5404_v54, %v5196_v63  ;;  %v4954_v2 = vadd.f32 %v4921_v25, %v4691_v17  ;;  %v15205_v17 = vld [vmem:[#allocation63_spill] sm:$0xff] }
 0x3d5   : > { %v13609_v10 = vpop.f32.mrf.mxu1 }
 0x3d6   : > { %15198 = vst [vmem:[#allocation48_spill] sm:$0xff] %v13609_v10  ;;  %v4685_v10 = vadd.f32 %v13481_v28, %v13495_v31  ;;  %v5981_v28 = vld [vmem:[%s15048_s10] sm:$0x3] }
 0x3d7   : > { %v13611_v55 = vpop.f32.mrf.mxu1  ;;  %v13665_v46 = vrot.slane %v5981_v28, %v12897_v5 }
 0x3d8   : > { %15199 = vst [vmem:[#allocation64_spill] sm:$0xff] %v13611_v55  ;;  %v13627_v55 = vpop.f32.mrf.mxu0  ;;  %v4952_v35 = vadd.f32 %v4915_v23, %v4685_v10  ;;  %v13648_v23 = vrot.slane %v5953_v62, %v11950_v9  ;;  %v13652_v10 = vrot.slane %v5981_v28, %v11950_v9 }
 0x3d9   : > { %v13615_v58 = vpop.f32.mrf.mxu1 }
 0x3da   : > { %15201 = vst [vmem:[#allocation52_spill] sm:$0xff] %v13615_v58  ;;  %v4687_v58 = vadd.f32 %v13497_v59, %v13501_v57  ;;  %v5197_v59 = vadd.f32 %v13543_v50, %v4951_v39  ;;  %v4693_v57 = vadd.f32 %v13503_v3, %v13509_v22  ;;  %v13645_v47 = vpop.f32.mrf.mxu0  ;;  %v5198_v41 = vadd.f32 %v13545_v45, %v4952_v35 }
 0x3db   : > { %v13623_v42 = vpop.f32.mrf.mxu1  ;;  %v4695_v50 = vadd.f32 %v13507_v1, %v13513_v36  ;;  %v4697_v3 = vadd.f32 %v13511_v37, %v13515_v4  ;;  %v4703_v45 = vadd.f32 %v13517_v20, %v13521_v11  ;;  %v4705_v1 = vadd.f32 %v13519_v0, %v13525_v48 }
 0x3dc   : > { %v4953_v31 = vadd.f32 %v4917_v52, %v4687_v58  ;;  %v5444_v15 = vadd.f32 %v5406_v6, %v5197_v59  ;;  %v13655_v52 = vrot.slane %v5953_v62, %v12897_v5  ;;  %v4955_v22 = vadd.f32 %v13555_v60, %v4693_v57  ;;  %v13677_v60 = vpop.f32.mrf.mxu0  ;;  %v15209_v59 = vld [vmem:[#allocation38_spill] sm:$0xff] }
 0x3dd   : > { %v13637_v21 = vpop.f32.mrf.mxu1  ;;  %v5445_v35 = vadd.f32 %v5408_v13, %v5198_v41  ;;  %v5690_v58 = vadd.f32 %v5651_v34, %v5443_v26  ;;  %v4707_v37 = vadd.f32 %v13523_v7, %v13527_v43  ;;  %v4713_v36 = vadd.f32 %v13529_v53, %v13533_v19  ;;  %v15207_v26 = vld [vmem:[#allocation37_spill] sm:$0xff] }
 0x3de   : > { %v5199_v6 = vadd.f32 %v13547_v12, %v4953_v31  ;;  %v5200_v4 = vadd.f32 %v13549_v44, %v4954_v2  ;;  %v4956_v20 = vadd.f32 %v13557_v56, %v4695_v50  ;;  %v5691_v12 = vadd.f32 %v5653_v8, %v5444_v15 }
 0x3df   : > { %v13662_v25 = vpop.f32.mrf.mxu1  ;;  %v4957_v34 = vadd.f32 %v13561_v14, %v4697_v3  ;;  %v4959_v0 = vadd.f32 %v13567_v40, %v4703_v45  ;;  %v4960_v48 = vadd.f32 %v13569_v24, %v4705_v1  ;;  %v5201_v7 = vadd.f32 %v13551_v61, %v4955_v22  ;;  %v15202_v14 = vld [vmem:[#allocation41_spill] sm:$0xff]  ;;  %v15203_v40 = vld [vmem:[#allocation46_spill] sm:$0xff]  ;;  %v5673_v24 = vpop.f32.mrf.mxu0  ;;  %v15204_v61 = vld [vmem:[#allocation39_spill] sm:$0xff] }
 0x3e0   : > { %v5446_v11 = vadd.f32 %v5410_v18, %v5199_v6  ;;  %v5447_v53 = vadd.f32 %v13595_v27, %v5200_v4  ;;  %v5692_v54 = vadd.f32 %v5655_v33, %v5445_v35  ;;  %v4715_v56 = vadd.f32 %v13531_v32, %v13537_v51  ;;  %v15206_v33 = vld [vmem:[#allocation56_spill] sm:$0xff]  ;;  %v15208_v32 = vld [vmem:[#allocation55_spill] sm:$0xff]  ;;  %v15211_v3 = vld [vmem:[#allocation50_spill] sm:$0xff] }
 0x3e1   : > { %v4717_v18 = vadd.f32 %v13535_v29, %v13541_v38  ;;  %v4961_v8 = vadd.f32 %v15202_v14, %v4707_v37  ;;  %v5448_v39 = vadd.f32 %v15203_v40, %v5201_v7  ;;  %v5202_v63 = vadd.f32 %v15204_v61, %v4956_v20  ;;  %v15210_v38 = vld [vmem:[#allocation57_spill] sm:$0xff]  ;;  %v15212_v45 = vld [vmem:[#allocation47_spill] sm:$0xff]  ;;  %v15213_v6 = vld [vmem:[#allocation62_spill] sm:$0xff]  ;;  %v5675_v1 = vpop.f32.mrf.mxu0 }
 0x3e2   : > { %v5693_v28 = vadd.f32 %v15205_v17, %v5446_v11  ;;  %v5203_v31 = vadd.f32 %v15206_v33, %v4957_v34  ;;  %v5204_v51 = vadd.f32 %v15208_v32, %v15207_v26  ;;  %v5205_v29 = vadd.f32 %v15209_v59, %v4959_v0  ;;  %v15214_v37 = vld [vmem:[#allocation58_spill] sm:$0xff]  ;;  %v15215_v0 = vld [vmem:[#allocation40_spill] sm:$0xff]  ;;  %v15216_v7 = vld [vmem:[#allocation61_spill] sm:$0xff] }
 0x3e3   : > { %v5206_v57 = vadd.f32 %v15210_v38, %v4960_v48  ;;  %v5694_v22 = vadd.f32 %v15211_v3, %v5447_v53  ;;  %v5449_v35 = vadd.f32 %v15212_v45, %v5202_v63  ;;  %v5207_v4 = vadd.f32 %v15214_v37, %v4961_v8  ;;  %v15217_v53 = vld [vmem:[#allocation49_spill] sm:$0xff]  ;;  %v15220_v61 = vld [vmem:[#allocation51_spill] sm:$0xff]  ;;  %v15221_v32 = vld [vmem:[#allocation42_spill] sm:$0xff] }
 0x3e4   : > { %v5695_v20 = vadd.f32 %v13619_v49, %v5448_v39  ;;  %v4963_v48 = vadd.f32 %v15215_v0, %v4713_v36  ;;  %v5452_v63 = vadd.f32 %v15220_v61, %v5205_v29  ;;  %v15222_v59 = vld [vmem:[#allocation48_spill] sm:$0xff] }
 0x3e5   : > { %v5696_v36 = vadd.f32 %v13627_v55, %v5449_v35  ;;  %v5453_v38 = vadd.f32 %v15222_v59, %v5206_v57  ;;  %v15224_v3 = vld [vmem:[#allocation44_spill] sm:$0xff]  ;;  %v10567_v35 = vld [vmem:[%s15050_s12 + $0x208] ss:$36 sps:$4 sm:$0xff]  }
 0x3e6   : > { %v15225_v57 = vld [vmem:[#allocation64_spill] sm:$0xff] }
 0x3e7   : > { %v10581_v61 = vld [vmem:[%s15050_s12 + $0x17c] ss:$36 sps:$4 sm:$0xff]  }
 0x3e9   : > { %v5898_v16 = vpop.f32.mrf.mxu1 }
 0x3ea   : > { %v5937_v30 = vadd.f32 %v5898_v16, %v5690_v58  ;;  %v5450_v58 = vadd.f32 %v15213_v6, %v5203_v31  ;;  %v5454_v6 = vadd.f32 %v15225_v57, %v5207_v4 }
 0x3eb   : > { %v5900_v43 = vpop.f32.mrf.mxu1 }
 0x3ec   : > { %v5965_v19 = vmul.f32 %v13648_v23, %v5937_v30  ;;  %v5938_v44 = vadd.f32 %v5900_v43, %v5691_v12  ;;  %v4964_v43 = vadd.f32 %v15216_v7, %v4715_v56  ;;  %v5697_v56 = vadd.f32 %v13645_v47, %v5450_v58 }
 0x3ed   : > { %v5902_v13 = vpop.f32.mrf.mxu1 }
 0x3ee   : > { %v5966_v27 = vmul.f32 %v13655_v52, %v5938_v44  ;;  %v5939_v62 = vadd.f32 %v5902_v13, %v5692_v54  ;;  %v5993_v15 = vadd.f32 %v13652_v10, %v5965_v19  ;;  %v5451_v19 = vadd.f32 %v15217_v53, %v5204_v51  ;;  %v15218_v44 = vld [vmem:[#allocation43_spill] sm:$0xff]  ;;  %v15219_v54 = vld [vmem:[#allocation45_spill] sm:$0xff] }
 0x3ef   : > { %v5904_v2 = vpop.f32.mrf.mxu1  ;;  %v5208_v14 = vadd.f32 %v15219_v54, %v15218_v44  ;;  %v4965_v51 = vadd.f32 %v15221_v32, %v4717_v18  ;;  %v5210_v55 = vadd.f32 %v15224_v3, %v4964_v43  ;;  %v10570_v18 = vld [vmem:[%s15050_s12 + $0x210] ss:$36 sps:$4 sm:$0xff]   ;;  %v5700_v43 = vadd.f32 %v5675_v1, %v5453_v38  ;;  %v10573_v54 = vld [vmem:[%s15050_s12 + $0x1c0] ss:$36 sps:$4 sm:$0xff]  }
 0x3f0   : > { %v5967_v41 = vmul.f32 %v13648_v23, %v5939_v62  ;;  %v5940_v50 = vadd.f32 %v5904_v2, %v5693_v28  ;;  %v5994_v11 = vadd.f32 %v13665_v46, %v5966_v27  ;;  %v6009_v40 = vmax.f32 %v5993_v15, 0.0  ;;  %v5677_v27 = vpop.f32.mrf.mxu0  ;;  %v15223_v2 = vld [vmem:[#allocation59_spill] sm:$0xff]  ;;  %v10590_v3 = vld [vmem:[%s15050_s12 + $0x13c] ss:$36 sps:$4 sm:$0xff]  }
 0x3f1   : > { %v5908_v16 = vpop.f32.mrf.mxu1  ;;  %v5209_v29 = vadd.f32 %v15223_v2, %v4963_v48  ;;  %v5698_v45 = vadd.f32 %v13677_v60, %v5451_v19  ;;  %v10575_v60 = vld [vmem:[%s15050_s12 + $0x1c4] ss:$36 sps:$4 sm:$0xff]  }
 0x3f2   : > { %v5995_v30 = vadd.f32 %v13652_v10, %v5967_v41  ;;  %v5968_v12 = vmul.f32 %v13655_v52, %v5940_v50  ;;  %v5941_v34 = vadd.f32 %v5908_v16, %v5694_v22  ;;  %v6010_v28 = vmax.f32 %v5994_v11, 0.0  ;;  %v5681_v15 = vpop.f32.mrf.mxu0  ;;  %v10578_v11 = vld [vmem:[%s15050_s12 + $0x1cc] ss:$36 sps:$4 sm:$0xff]  }
 0x3f3   : > { %v5910_v8 = vpop.f32.mrf.mxu1 }
 0x3f4   : > { %v6011_v13 = vmax.f32 %v5995_v30, 0.0  ;;  %v5996_v49 = vadd.f32 %v13665_v46, %v5968_v12  ;;  %v5942_v39 = vadd.f32 %v5910_v8, %v5695_v20  ;;  %v5969_v62 = vmul.f32 %v13648_v23, %v5941_v34  ;;  %v5683_v0 = vpop.f32.mrf.mxu0 }
 0x3f5   : > { %v5912_v17 = vpop.f32.mrf.mxu1  ;;  %v5699_v20 = vadd.f32 %v5673_v24, %v5452_v63  ;;  %v15226_v24 = vld [vmem:[#allocation52_spill] sm:$0xff]  ;;  %v5456_v8 = vadd.f32 %v13623_v42, %v5209_v29  ;;  %v10584_v63 = vld [vmem:[%s15050_s12 + $0x184] ss:$36 sps:$4 sm:$0xff]  }
 0x3f6   : > { %v13720_v33 = vpack.c.bf16 %v6011_v13, %v6009_v40  ;;  %v6012_v31 = vmax.f32 %v5996_v49, 0.0  ;;  %v5970_v26 = vmul.f32 %v13655_v52, %v5942_v39  ;;  %v5943_v41 = vadd.f32 %v5912_v17, %v5696_v36  ;;  %v15227_v40 = vld [vmem:[#allocation60_spill] sm:$0xff] }
 0x3f7   : > { %v5914_v50 = vpop.f32.mrf.mxu1  ;;  %v5997_v58 = vadd.f32 %v13652_v10, %v5969_v62  ;;  %v5455_v4 = vadd.f32 %v15226_v24, %v5208_v14  ;;  %v10576_v14 = vld [vmem:[%s15050_s12 + $0x1c8] ss:$36 sps:$4 sm:$0xff]   ;;  %v5211_v13 = vadd.f32 %v15227_v40, %v4965_v51  ;;  %v5703_v29 = vadd.f32 %v5683_v0, %v5456_v8  ;;  %v10596_v24 = vld [vmem:[%s15050_s12 + $0xf4] ss:$36 sps:$4 sm:$0xff]  }
 0x3f8   : > { %v13727_v22 = vpack.c.bf16 %v6012_v31, %v6010_v28  ;;  %v5944_v47 = vadd.f32 %v5914_v50, %v5697_v56  ;;  %v5971_v37 = vmul.f32 %v13648_v23, %v5943_v41  ;;  %v5998_v30 = vadd.f32 %v13665_v46, %v5970_v26  ;;  %v5685_v31 = vpop.f32.mrf.mxu0  ;;  %v10587_v50 = vld [vmem:[%s15050_s12 + $0x134] ss:$36 sps:$4 sm:$0xff]   ;;  %v10591_v40 = vld [vmem:[%s15050_s12 + $0xe8] ss:$36 sps:$4 sm:$0xff]  }
 0x3f9   : > { %v5918_v16 = vpop.f32.mrf.mxu1  ;;  %v6013_v1 = vmax.f32 %v5997_v58, 0.0  ;;  %v5701_v56 = vadd.f32 %v5677_v27, %v5454_v6  ;;  %v5702_v42 = vadd.f32 %v5681_v15, %v5455_v4  ;;  %v5457_v28 = vadd.f32 %v13637_v21, %v5210_v55  ;;  %v10579_v27 = vld [vmem:[%s15050_s12 + $0x178] ss:$36 sps:$4 sm:$0xff]   ;;  %v10582_v21 = vld [vmem:[%s15050_s12 + $0x180] ss:$36 sps:$4 sm:$0xff]  }
 0x3fa   : > { %v5972_v12 = vmul.f32 %v13655_v52, %v5944_v47  ;;  %v5945_v34 = vadd.f32 %v5918_v16, %v5698_v45  ;;  %9497 = vmatprep.mubr.msk.bf16.mxu0 %vm1947_vm0, %v13727_v22  ;;  %9501 = vmatprep.mubr.msk.bf16.mxu1 %vm1947_vm0, %v13727_v22  ;;  %v5999_v48 = vadd.f32 %v13652_v10, %v5971_v37  ;;  %v6014_v62 = vmax.f32 %v5998_v30, 0.0 }
 0x3fb   : > { %v5920_v7 = vpop.f32.mrf.mxu1  ;;  %6878 = vmatmul.mubr.bf16.vlgmr.msra.gmra.mxu0 %v13720_v33  ;;  %6951 = vmatmul.mubr.bf16.vlgmr.msra.gmra.mxu1 %v13720_v33  ;;  %v5458_v55 = vadd.f32 %v13662_v25, %v5211_v13  ;;  %v10594_v13 = vld [vmem:[%s15050_s12 + $0xf0] ss:$36 sps:$4 sm:$0xff]  }
 0x3fc   : > { %v6000_v53 = vadd.f32 %v13665_v46, %v5972_v12  ;;  %v5973_v19 = vmul.f32 %v13648_v23, %v5945_v34  ;;  %v5946_v44 = vadd.f32 %v5920_v7, %v5699_v20  ;;  %6992 = vmatpush1.bf16.msra.mxu0 %v10567_v35  ;;  %7065 = vmatpush1.bf16.msra.mxu1 %v10570_v18  ;;  %v6015_v49 = vmax.f32 %v5999_v48, 0.0  ;;  %v5687_v18 = vpop.f32.mrf.mxu0  ;;  %v10593_v34 = vld [vmem:[%s15050_s12 + $0xec] ss:$36 sps:$4 sm:$0xff]  }
 0x3fd   : > { %v5922_v39 = vpop.f32.mrf.mxu1  ;;  %6993 = vmatprep.subr.bf16.mxu0 %v10575_v60  ;;  %7066 = vmatprep.subr.bf16.mxu1 %v10578_v11  ;;  %v5704_v35 = vadd.f32 %v5685_v31, %v5457_v28  ;;  %v10585_v60 = vld [vmem:[%s15050_s12 + $0x130] ss:$36 sps:$4 sm:$0xff]   ;;  %v10588_v11 = vld [vmem:[%s15050_s12 + $0x138] ss:$36 sps:$4 sm:$0xff]   ;;  %v5705_v4 = vadd.f32 %v5687_v18, %v5458_v55  ;;  %v10608_v28 = vld [vmem:[%s15050_s12 + $0x64] ss:$36 sps:$4 sm:$0xff]  }
 0x3fe   : > { %v6016_v36 = vmax.f32 %v6000_v53, 0.0  ;;  %v5947_v17 = vadd.f32 %v5922_v39, %v5700_v43  ;;  %v13772_v26 = vpack.c.bf16 %v6015_v49, %v6013_v1  ;;  %v5974_v32 = vmul.f32 %v13655_v52, %v5946_v44  ;;  %v10599_v39 = vld [vmem:[%s15050_s12 + $0xa4] ss:$36 sps:$4 sm:$0xff]   ;;  %v10626_v55 = vld [vmem:[%s15050_s12 + $0x2ec] ss:$36 sps:$4 sm:$0xff]  }
 0x3ff   : > { %v5924_v51 = vpop.f32.mrf.mxu1  ;;  %v6001_v38 = vadd.f32 %v13652_v10, %v5973_v19  ;;  %v10632_v18 = vld [vmem:[%s15050_s12 + $0x2a4] ss:$36 sps:$4 sm:$0xff]  }
 0x400   : > { %v13775_v59 = vpack.c.bf16 %v6016_v36, %v6014_v62  ;;  %v5975_v2 = vmul.f32 %v13648_v23, %v5947_v17  ;;  %6994 = vmatpush1.bf16.msra.mxu0 %v10573_v54  ;;  %7067 = vmatpush1.bf16.msra.mxu1 %v10576_v14  ;;  %v5948_v15 = vadd.f32 %v5924_v51, %v5701_v56  ;;  %v10600_v36 = vld [vmem:[%s15050_s12 + $0xa8] ss:$36 sps:$4 sm:$0xff]   ;;  %v10606_v51 = vld [vmem:[%s15050_s12 + $0x60] ss:$36 sps:$4 sm:$0xff]  }
 0x401   : > { %v5928_v41 = vpop.f32.mrf.mxu1  ;;  %6995 = vmatprep.subr.bf16.mxu0 %v10581_v61  ;;  %7068 = vmatprep.subr.bf16.mxu1 %v10584_v63  ;;  %v6002_v57 = vadd.f32 %v13665_v46, %v5974_v32  ;;  %v6017_v25 = vmax.f32 %v6001_v38, 0.0  ;;  %v10602_v61 = vld [vmem:[%s15050_s12 + $0xac] ss:$36 sps:$4 sm:$0xff]   ;;  %v10603_v32 = vld [vmem:[%s15050_s12 + $0x58] ss:$36 sps:$4 sm:$0xff]  }
 0x402   : > { %v6003_v47 = vadd.f32 %v13652_v10, %v5975_v2  ;;  %v5949_v45 = vadd.f32 %v5928_v41, %v5702_v42  ;;  %9498 = vmatprep.mubr.msk.bf16.mxu0 %vm1947_vm0, %v13775_v59  ;;  %9502 = vmatprep.mubr.msk.bf16.mxu1 %vm1947_vm0, %v13775_v59  ;;  %v5976_v6 = vmul.f32 %v13655_v52, %v5948_v15  ;;  %v10611_v38 = vld [vmem:[%s15050_s12 + $0x14] ss:$36 sps:$4 sm:$0xff]   ;;  %v10614_v2 = vld [vmem:[%s15050_s12 + $0x1c] ss:$36 sps:$4 sm:$0xff]   ;;  %v10615_v41 = vld [vmem:[%s15050_s12 + $0x328] ss:$36 sps:$4 sm:$0xff]  }
 0x403   : > { %v5930_v58 = vpop.f32.mrf.mxu1  ;;  %6888 = vmatmul.mubr.bf16.gmra.mxu0 %v13772_v26  ;;  %6961 = vmatmul.mubr.bf16.gmra.mxu1 %v13772_v26  ;;  %v6018_v43 = vmax.f32 %v6002_v57, 0.0  ;;  %v10620_v15 = vld [vmem:[%s15050_s12 + $0x334] ss:$36 sps:$4 sm:$0xff]  }
 0x404   : > { %v6019_v37 = vmax.f32 %v6003_v47, 0.0  ;;  %v5977_v16 = vmul.f32 %v13648_v23, %v5949_v45  ;;  %v5950_v20 = vadd.f32 %v5930_v58, %v5703_v29  ;;  %6996 = vmatpush1.bf16.msra.mxu0 %v10579_v27  ;;  %7069 = vmatpush1.bf16.msra.mxu1 %v10582_v21  ;;  %v6004_v30 = vadd.f32 %v13665_v46, %v5976_v6  ;;  %v10609_v27 = vld [vmem:[%s15050_s12 + $0x10] ss:$36 sps:$4 sm:$0xff]   ;;  %v10612_v21 = vld [vmem:[%s15050_s12 + $0x18] ss:$36 sps:$4 sm:$0xff]  }
 0x405   : > { %v5932_v12 = vpop.f32.mrf.mxu1  ;;  %6997 = vmatprep.subr.bf16.mxu0 %v10587_v50  ;;  %7070 = vmatprep.subr.bf16.mxu1 %v10590_v3  ;;  %v10617_v29 = vld [vmem:[%s15050_s12 + $0x32c] ss:$36 sps:$4 sm:$0xff]   ;;  %v10623_v3 = vld [vmem:[%s15050_s12 + $0x2e4] ss:$36 sps:$4 sm:$0xff]   ;;  %v10627_v57 = vld [vmem:[%s15050_s12 + $0x298] ss:$36 sps:$4 sm:$0xff]  }
 0x406   : > { %v13815_v0 = vpack.c.bf16 %v6019_v37, %v6017_v25  ;;  %v5978_v48 = vmul.f32 %v13655_v52, %v5950_v20  ;;  %v5951_v7 = vadd.f32 %v5932_v12, %v5704_v35  ;;  %v6020_v53 = vmax.f32 %v6004_v30, 0.0  ;;  %v10618_v50 = vld [vmem:[%s15050_s12 + $0x330] ss:$36 sps:$4 sm:$0xff]   ;;  %v10621_v47 = vld [vmem:[%s15050_s12 + $0x2e0] ss:$36 sps:$4 sm:$0xff]  }
 0x407   : > { %v5934_v19 = vpop.f32.mrf.mxu1  ;;  %v6005_v44 = vadd.f32 %v13652_v10, %v5977_v16  ;;  %v10624_v45 = vld [vmem:[%s15050_s12 + $0x2e8] ss:$36 sps:$4 sm:$0xff]   ;;  %v10629_v35 = vld [vmem:[%s15050_s12 + $0x29c] ss:$36 sps:$4 sm:$0xff]   ;;  %v10635_v58 = vld [vmem:[%s15050_s12 + $0x254] ss:$36 sps:$4 sm:$0xff]  }
 0x408   : > { %v5979_v54 = vmul.f32 %v13648_v23, %v5951_v7  ;;  %v5952_v14 = vadd.f32 %v5934_v19, %v5705_v4  ;;  %6998 = vmatpush1.bf16.msra.mxu0 %v10585_v60  ;;  %7071 = vmatpush1.bf16.msra.mxu1 %v10588_v11  ;;  %v13820_v8 = vpack.c.bf16 %v6020_v53, %v6018_v43  ;;  %v10630_v6 = vld [vmem:[%s15050_s12 + $0x2a0] ss:$36 sps:$4 sm:$0xff]   ;;  %v10633_v37 = vld [vmem:[%s15050_s12 + $0x250] ss:$36 sps:$4 sm:$0xff]   ;;  %v10636_v16 = vld [vmem:[%s15050_s12 + $0x258] ss:$36 sps:$4 sm:$0xff]  }
 0x409   : > { %6999 = vmatprep.subr.bf16.mxu0 %v10593_v34  ;;  %7072 = vmatprep.subr.bf16.mxu1 %v10596_v24  ;;  %v6006_v1 = vadd.f32 %v13665_v46, %v5978_v48  ;;  %v6021_v63 = vmax.f32 %v6005_v44, 0.0  ;;  %v10638_v25 = vld [vmem:[%s15050_s12 + $0x25c] ss:$36 sps:$4 sm:$0xff]   ;;  %v15228_v11 = vmov 0   ;;  %v10645_v34 = vld [vmem:[%s15049_s11 + $0x1b4] ss:$36 sps:$4 sm:$0xff]  }
 0x40a   : > { %v6007_v49 = vadd.f32 %v13652_v10, %v5979_v54  ;;  %v5980_v23 = vmul.f32 %v13655_v52, %v5952_v14  ;;  %9499 = vmatprep.mubr.msk.bf16.mxu0 %vm1947_vm0, %v13820_v8  ;;  %9503 = vmatprep.mubr.msk.bf16.mxu1 %vm1947_vm0, %v13820_v8  ;;  %v10597_v52 = vld [vmem:[%s15050_s12 + $0xa0] ss:$36 sps:$4 sm:$0xff]   ;;  %v10639_v30 = vld [vmem:[%s15049_s11 + $0x1f8] ss:$36 sps:$4 sm:$0xff]   ;;  %v10643_v24 = vld [vmem:[%s15049_s11 + $0x1b0] ss:$36 sps:$4 sm:$0xff]  }
 0x40b   : > { %6898 = vmatmul.mubr.bf16.gmra.mxu0 %v13815_v0  ;;  %6971 = vmatmul.mubr.bf16.gmra.mxu1 %v13815_v0  ;;  %v6022_v17 = vmax.f32 %v6006_v1, 0.0  ;;  %v10641_v20 = vld [vmem:[%s15049_s11 + $0x1fc] ss:$36 sps:$4 sm:$0xff]   ;;  %v10646_v4 = vld [vmem:[%s15050_s12 + $0x1d0] ss:$36 sps:$4 sm:$0xff]  }
 0x40c   : > { %v6023_v62 = vmax.f32 %v6007_v49, 0.0  ;;  %v6008_v10 = vadd.f32 %v13665_v46, %v5980_v23  ;;  %7000 = vmatpush1.bf16.msra.mxu0 %v10591_v40  ;;  %7073 = vmatpush1.bf16.msra.mxu1 %v10594_v13  ;;  %v10605_v46 = vld [vmem:[%s15050_s12 + $0x5c] ss:$36 sps:$4 sm:$0xff]   ;;  %v10649_v48 = vld [vmem:[%s15049_s11 + $0x16c] ss:$36 sps:$4 sm:$0xff]  }
 0x40d   : > { %7001 = vmatprep.subr.bf16.mxu0 %v10599_v39  ;;  %7074 = vmatprep.subr.bf16.mxu1 %v10602_v61  ;;  %v9646_v60 = vld [vmem:[#allocation4] ss:$0 sm:$0xff]  ;;  %v10642_v12 = vld [vmem:[%s15050_s12 + $0x218] ss:$36 sps:$4 sm:$0xff]   ;;  %v10647_v7 = vld [vmem:[%s15049_s11 + $0x168] ss:$36 sps:$4 sm:$0xff]  }
 0x40e   : > { %v13850_v56 = vpack.c.bf16 %v6023_v62, %v6021_v63  ;;  %v6024_v42 = vmax.f32 %v6008_v10, 0.0  ;;  %8251 = vperm.xlu0 %9844, %v9646_v60   ;;  %v10650_v43 = vld [vmem:[%s15050_s12 + $0x188] ss:$36 sps:$4 sm:$0xff]   ;;  %v10651_v19 = vld [vmem:[%s15049_s11 + $0x120] ss:$36 sps:$4 sm:$0xff]  }
 0x40f   : > { %v10653_v53 = vld [vmem:[%s15049_s11 + $0x124] ss:$36 sps:$4 sm:$0xff]   ;;  %v10657_v54 = vld [vmem:[%s15049_s11 + $0xdc] ss:$36 sps:$4 sm:$0xff]   ;;  %v10661_v13 = vld [vmem:[%s15049_s11 + $0x94] ss:$36 sps:$4 sm:$0xff]  }
 0x410   : > { %v13858_v31 = vpack.c.bf16 %v6024_v42, %v6022_v17  ;;  %7002 = vmatpush1.bf16.msra.mxu0 %v10597_v52  ;;  %7075 = vmatpush1.bf16.msra.mxu1 %v10600_v36  ;;  %v10654_v44 = vld [vmem:[%s15050_s12 + $0x140] ss:$36 sps:$4 sm:$0xff]   ;;  %v10655_v14 = vld [vmem:[%s15049_s11 + $0xd8] ss:$36 sps:$4 sm:$0xff]   ;;  %v10659_v1 = vld [vmem:[%s15049_s11 + $0x90] ss:$36 sps:$4 sm:$0xff]  }
 0x411   : > { %7003 = vmatprep.subr.bf16.mxu0 %v10605_v46  ;;  %7076 = vmatprep.subr.bf16.mxu1 %v10608_v28  ;;  %v10658_v40 = vld [vmem:[%s15050_s12 + $0xf8] ss:$36 sps:$4 sm:$0xff]   ;;  %v10662_v49 = vld [vmem:[%s15050_s12 + $0xb0] ss:$36 sps:$4 sm:$0xff]   ;;  %v10663_v39 = vld [vmem:[%s15049_s11 + $0x48] ss:$36 sps:$4 sm:$0xff]  }
 0x412   : > { %9500 = vmatprep.mubr.msk.bf16.mxu0 %vm1947_vm0, %v13858_v31  ;;  %9504 = vmatprep.mubr.msk.bf16.mxu1 %vm1947_vm0, %v13858_v31  ;;  %v10665_v23 = vld [vmem:[%s15049_s11 + $0x4c] ss:$36 sps:$4 sm:$0xff]   ;;  %v15229_v63 = vld [vmem:[#allocation5_spill] sm:$0xff] }
 0x413   : > { %6908 = vmatmul.mubr.bf16.gmra.mxu0 %v13850_v56  ;;  %6981 = vmatmul.mubr.bf16.gmra.mxu1 %v13850_v56  ;;  %v10666_v61 = vld [vmem:[%s15050_s12 + $0x68] ss:$36 sps:$4 sm:$0xff]   ;;  %v15232_v42 = vld [vmem:[#allocation31_spill] sm:$0xff]  ;;  %v10667_v46 = vld [vmem:[%s15049_s11] ss:$36 sps:$4 sm:$0xff]  }
 0x414   : > { %7004 = vmatpush1.bf16.msra.mxu0 %v10603_v32  ;;  %7077 = vmatpush1.bf16.msra.mxu1 %v10606_v51  ;;  %v15230_v62 = vld [vmem:[#allocation6_spill] sm:$0xff]  ;;  %v15231_v36 = vld [vmem:[#allocation13_spill] sm:$0xff] }
 0x415   : > { %9505 = vmatprep.mubr.msk.bf16.mxu0 %vm1947_vm0, %v13727_v22  ;;  %9509 = vmatprep.mubr.msk.bf16.mxu1 %vm1947_vm0, %v13727_v22  ;;  %v2074_v10 = vadd.f32 %v15230_v62, %v15229_v63  ;;  %v10669_v52 = vld [vmem:[%s15049_s11 + $0x4] ss:$36 sps:$4 sm:$0xff]   ;;  %v15245_v62 = vld [vmem:[#allocation24_spill] sm:$0xff] }
 0x416   : > { %7005 = vmatprep.subr.bf16.mxu0 %v10611_v38  ;;  %7078 = vmatprep.subr.bf16.mxu1 %v10614_v2  ;;  %v10670_v28 = vld [vmem:[%s15050_s12 + $0x20] ss:$36 sps:$4 sm:$0xff]   ;;  %v15233_v32 = vld [vmem:[#allocation14_spill] sm:$0xff]  ;;  %v10671_v38 = vld [vmem:[%s15049_s11 + $0x318] ss:$36 sps:$4 sm:$0xff]  }
 0x417   : > { %v2147_v17 = vadd.f32 %v15231_v36, %v2074_v10  ;;  %v10674_v2 = vld [vmem:[%s15050_s12 + $0x338] ss:$36 sps:$4 sm:$0xff]  }
 0x418   : > { %7006 = vmatpush1.bf16.msra.mxu0 %v10609_v27  ;;  %7079 = vmatpush1.bf16.msra.mxu1 %v10612_v21  ;;  %v15234_v27 = vld [vmem:[#allocation7_spill] sm:$0xff]  ;;  %v15235_v21 = vld [vmem:[#allocation8_spill] sm:$0xff] }
 0x419   : > { %7015 = vmatprep.subr.bf16.mxu0 %v10617_v29  ;;  %7088 = vmatprep.subr.bf16.mxu1 %v10620_v15  ;;  %v2220_v51 = vadd.f32 %v15233_v32, %v2147_v17  ;;  %v2084_v29 = vadd.f32 %v15235_v21, %v15234_v27  ;;  %v15236_v15 = vld [vmem:[#allocation23_spill] sm:$0xff]  ;;  %v15247_v36 = vld [vmem:[#allocation12_spill] sm:$0xff]  ;;  %v10698_v27 = vld [vmem:[%s15049_s11 + $0x1c4] ss:$36 sps:$4 sm:$0xff]  }
 0x41a   : > { %v15249_v21 = vld [vmem:[#allocation20_spill] sm:$0xff] }
 0x41c   : > { %7016 = vmatpush2.bf16.msra.mxu0 %v10615_v41  ;;  %7089 = vmatpush2.bf16.msra.mxu1 %v10618_v50  ;;  %v2293_v41 = vadd.f32 %v15236_v15, %v2220_v51  ;;  %v10677_v50 = vld [vmem:[%s15049_s11 + $0x2d4] ss:$36 sps:$4 sm:$0xff]   ;;  %v10687_v51 = vld [vmem:[%s15049_s11 + $0x200] ss:$36 sps:$4 sm:$0xff]  }
 0x41d   : > { %7017 = vmatprep.subr.bf16.mxu0 %v10623_v3  ;;  %7090 = vmatprep.subr.bf16.mxu1 %v10626_v55  ;;  %v15237_v3 = vld [vmem:[#allocation15_spill] sm:$0xff] }
 0x41e   : > { %v2157_v55 = vadd.f32 %v15237_v3, %v2084_v29 }
 0x420   : > { %7018 = vmatpush2.bf16.msra.mxu0 %v10621_v47  ;;  %7091 = vmatpush2.bf16.msra.mxu1 %v10624_v45  ;;  %v10809_v47 = vld [vmem:[%s15041_s3] sm:$0x7] }
 0x421   : > { %7019 = vmatprep.subr.bf16.mxu0 %v10629_v35  ;;  %7092 = vmatprep.subr.bf16.mxu1 %v10632_v18  ;;  %v14065_v45 = vrot.slane %v10809_v47, %v12897_v5  ;;  %v10675_v35 = vld [vmem:[%s15049_s11 + $0x2d0] ss:$36 sps:$4 sm:$0xff]   ;;  %v10704_v47 = vld [vmem:[%s15049_s11 + $0x17c] ss:$36 sps:$4 sm:$0xff]  }
 0x422   : > { %v10678_v18 = vld [vmem:[%s15050_s12 + $0x2f0] ss:$36 sps:$4 sm:$0xff]  }
 0x423   : > { %v2674_v10 = vmul.f32 %v14065_v45, %v15245_v62  ;;  %v10717_v62 = vld [vmem:[%s15049_s11 + $0x98] ss:$36 sps:$4 sm:$0xff]  }
 0x424   : > { %7020 = vmatpush2.bf16.msra.mxu0 %v10627_v57  ;;  %7093 = vmatpush2.bf16.msra.mxu1 %v10630_v6  ;;  %v2671_v57 = vmul.f32 %v14065_v45, %v2293_v41  ;;  %v10681_v6 = vld [vmem:[%s15049_s11 + $0x28c] ss:$36 sps:$4 sm:$0xff]   ;;  %v15250_v41 = vld [vmem:[#allocation32_spill] sm:$0xff] }
 0x425   : > { %7021 = vmatprep.subr.bf16.mxu0 %v10635_v58  ;;  %7094 = vmatprep.subr.bf16.mxu1 %v10638_v25  ;;  %v15238_v58 = vld [vmem:[#allocation16_spill] sm:$0xff] }
 0x426   : > { %v2230_v25 = vadd.f32 %v15238_v58, %v2157_v55  ;;  %v10693_v55 = vld [vmem:[%s15049_s11 + $0x1b8] ss:$36 sps:$4 sm:$0xff]  }
 0x428   : > { %7022 = vmatpush2.bf16.msra.mxu0 %v10633_v37  ;;  %7095 = vmatpush2.bf16.msra.mxu1 %v10636_v16  ;;  %v15239_v37 = vld [vmem:[#allocation22_spill] sm:$0xff] }
 0x429   : > { %7137 = vmatprep.subr.bf16.mxu0 %v15228_v11  ;;  %7766 = vmatprep.subr.bf16.mxu1 %v10641_v20  ;;  %v2668_v16 = vmul.f32 %v14065_v45, %v15239_v37  ;;  %v10810_v20 = vld [vmem:[%s15042_s4] sm:$0x7] }
 0x42a   : > { %v14085_v60 = vrot.slane %v10810_v20, %v12897_v5 }
 0x42b   : > { %7024 = vmatmul.mubr.bf16.vlgmr.msra.gmra.mxu0 %v13720_v33  ;;  %7097 = vmatmul.mubr.bf16.vlgmr.msra.gmra.mxu1 %v13720_v33 }
 0x42c   : > { %9506 = vmatprep.mubr.msk.bf16.mxu0 %vm1947_vm0, %v13775_v59  ;;  %9510 = vmatprep.mubr.msk.bf16.mxu1 %vm1947_vm0, %v13775_v59  ;;  %v2715_v15 = vadd.f32 %v14085_v60, %v2674_v10 }
 0x42d   : > { %7138 = vmatpush1.bf16.msra.mxu0 %v10642_v12  ;;  %7767 = vmatpush1.bf16.msra.mxu1 %v10639_v30  ;;  %v10679_v30 = vld [vmem:[%s15049_s11 + $0x288] ss:$36 sps:$4 sm:$0xff]  }
 0x42e   : > { %7139 = vmatprep.subr.bf16.mxu0 %v15228_v11  ;;  %7768 = vmatprep.subr.bf16.mxu1 %v10645_v34  ;;  %v10682_v12 = vld [vmem:[%s15050_s12 + $0x2a8] ss:$36 sps:$4 sm:$0xff]  }
 0x42f   : > { %v15240_v34 = vld [vmem:[#allocation9_spill] sm:$0xff] }
 0x431   : > { %7140 = vmatpush1.bf16.msra.mxu0 %v10646_v4  ;;  %7769 = vmatpush1.bf16.msra.mxu1 %v10643_v24  ;;  %v15241_v24 = vld [vmem:[#allocation10_spill] sm:$0xff] }
 0x432   : > { %7141 = vmatprep.subr.bf16.mxu0 %v15228_v11  ;;  %7770 = vmatprep.subr.bf16.mxu1 %v10649_v48  ;;  %v2094_v4 = vadd.f32 %v15241_v24, %v15240_v34  ;;  %v2712_v48 = vadd.f32 %v14085_v60, %v2671_v57  ;;  %v2739_v57 = vmax.f32 %v2715_v15, 0.0  ;;  %v10707_v34 = vld [vmem:[%s15049_s11 + $0x12c] ss:$36 sps:$4 sm:$0xff]   ;;  %v10710_v24 = vld [vmem:[%s15049_s11 + $0x134] ss:$36 sps:$4 sm:$0xff]  }
 0x433   : > { %7034 = vmatmul.mubr.bf16.gmra.mxu0 %v13772_v26  ;;  %7107 = vmatmul.mubr.bf16.gmra.mxu1 %v13772_v26  ;;  %v10741_v15 = vld [vmem:[%s15049_s11 + $0x2d8] ss:$36 sps:$4 sm:$0xff]  }
 0x434   : > { %9507 = vmatprep.mubr.msk.bf16.mxu0 %vm1947_vm0, %v13820_v8  ;;  %9511 = vmatprep.mubr.msk.bf16.mxu1 %vm1947_vm0, %v13820_v8 }
 0x435   : > { %7142 = vmatpush1.bf16.msra.mxu0 %v10650_v43  ;;  %7771 = vmatpush1.bf16.msra.mxu1 %v10647_v7  ;;  %v15242_v7 = vld [vmem:[#allocation25_spill] sm:$0xff] }
 0x436   : > { %7143 = vmatprep.subr.bf16.mxu0 %v15228_v11  ;;  %7772 = vmatprep.subr.bf16.mxu1 %v10653_v53  ;;  %v2303_v43 = vadd.f32 %v15242_v7, %v2230_v25  ;;  %v10685_v53 = vld [vmem:[%s15049_s11 + $0x244] ss:$36 sps:$4 sm:$0xff]  }
 0x439   : > { %7144 = vmatpush1.bf16.msra.mxu0 %v10654_v44  ;;  %7773 = vmatpush1.bf16.msra.mxu1 %v10651_v19  ;;  %v15243_v19 = vld [vmem:[#allocation17_spill] sm:$0xff] }
 0x43a   : > { %7145 = vmatprep.subr.bf16.mxu0 %v15228_v11  ;;  %7774 = vmatprep.subr.bf16.mxu1 %v10657_v54  ;;  %v2167_v44 = vadd.f32 %v15243_v19, %v2094_v4  ;;  %v2709_v54 = vadd.f32 %v14085_v60, %v2668_v16  ;;  %v15253_v16 = vld [vmem:[#allocation29_spill] sm:$0xff]  ;;  %v10716_v19 = vld [vmem:[%s15049_s11 + $0xec] ss:$36 sps:$4 sm:$0xff]  }
 0x43b   : > { %7044 = vmatmul.mubr.bf16.gmra.mxu0 %v13815_v0  ;;  %7117 = vmatmul.mubr.bf16.gmra.mxu1 %v13815_v0 }
 0x43c   : > { %9508 = vmatprep.mubr.msk.bf16.mxu0 %vm1947_vm0, %v13858_v31  ;;  %9512 = vmatprep.mubr.msk.bf16.mxu1 %vm1947_vm0, %v13858_v31  ;;  %v2733_v63 = vmax.f32 %v2709_v54, 0.0  ;;  %v15255_v54 = vld [vmem:[#allocation28_spill] sm:$0xff] }
 0x43d   : > { %7146 = vmatpush1.bf16.msra.mxu0 %v10658_v40  ;;  %7775 = vmatpush1.bf16.msra.mxu1 %v10655_v14  ;;  %v10683_v14 = vld [vmem:[%s15049_s11 + $0x240] ss:$36 sps:$4 sm:$0xff]  }
 0x43e   : > { %7147 = vmatprep.subr.bf16.mxu0 %v15228_v11  ;;  %7776 = vmatprep.subr.bf16.mxu1 %v10661_v13  ;;  %v10686_v40 = vld [vmem:[%s15050_s12 + $0x260] ss:$36 sps:$4 sm:$0xff]   ;;  %v2736_v13 = vmax.f32 %v2712_v48, 0.0 }
 0x43f   : > { %v15254_v48 = vld [vmem:[#allocation33_spill] sm:$0xff] }
 0x441   : > { %7148 = vmatpush1.bf16.msra.mxu0 %v10662_v49  ;;  %7777 = vmatpush1.bf16.msra.mxu1 %v10659_v1  ;;  %v2677_v1 = vmul.f32 %v14065_v45, %v2303_v43  ;;  %v10689_v49 = vld [vmem:[%s15049_s11 + $0x204] ss:$36 sps:$4 sm:$0xff]  }
 0x442   : > { %7149 = vmatprep.subr.bf16.mxu0 %v15228_v11  ;;  %7778 = vmatprep.subr.bf16.mxu1 %v10665_v23  ;;  %v10692_v23 = vld [vmem:[%s15049_s11 + $0x20c] ss:$36 sps:$4 sm:$0xff]  }
 0x443   : > { %7054 = vmatmul.mubr.bf16.gmra.mxu0 %v13850_v56  ;;  %7127 = vmatmul.mubr.bf16.gmra.mxu1 %v13850_v56 }
 0x444   : > { %9513 = vmatprep.mubr.msk.bf16.mxu0 %vm1947_vm0, %v13727_v22  ;;  %9625 = vmatprep.mubr.msk.bf16.mxu1 %vm1947_vm0, %v15232_v42  ;;  %v10673_v22 = vld [vmem:[%s15049_s11 + $0x31c] ss:$36 sps:$4 sm:$0xff]  }
 0x445   : > { %7150 = vmatpush1.bf16.msra.mxu0 %v10666_v61  ;;  %7779 = vmatpush1.bf16.msra.mxu1 %v10663_v39  ;;  %v15244_v39 = vld [vmem:[#allocation18_spill] sm:$0xff] }
 0x446   : > { %7151 = vmatprep.subr.bf16.mxu0 %v15228_v11  ;;  %7780 = vmatprep.subr.bf16.mxu1 %v10669_v52  ;;  %v2240_v61 = vadd.f32 %v15244_v39, %v2167_v44  ;;  %v15246_v52 = vld [vmem:[#allocation11_spill] sm:$0xff] }
 0x447   : > { %v2104_v17 = vadd.f32 %v15247_v36, %v15246_v52  ;;  %v10723_v36 = vld [vmem:[%s15049_s11 + $0x50] ss:$36 sps:$4 sm:$0xff]  }
 0x449   : > { %7152 = vmatpush1.bf16.msra.mxu0 %v10670_v28  ;;  %7781 = vmatpush1.bf16.msra.mxu1 %v10667_v46  ;;  %v14122_v46 = vpack.c.bf16 %v2736_v13, %v2733_v63  ;;  %v2718_v28 = vadd.f32 %v14085_v60, %v2677_v1  ;;  %v2177_v29 = vadd.f32 %v15249_v21, %v2104_v17  ;;  %v10711_v1 = vld [vmem:[%s15049_s11 + $0xe0] ss:$36 sps:$4 sm:$0xff]   ;;  %v10726_v17 = vld [vmem:[%s15049_s11 + $0x58] ss:$36 sps:$4 sm:$0xff]  }
 0x44a   : > { %7161 = vmatprep.subr.bf16.mxu0 %v15228_v11  ;;  %7790 = vmatprep.subr.bf16.mxu1 %v10673_v22  ;;  %v15248_v22 = vld [vmem:[#allocation27_spill] sm:$0xff]  ;;  %v10743_v21 = vld [vmem:[%s15049_s11 + $0x2dc] ss:$36 sps:$4 sm:$0xff]  }
 0x44b   : > { %v2313_v32 = vadd.f32 %v15248_v22, %v2240_v61  ;;  %v15256_v61 = vld [vmem:[#allocation34_spill] sm:$0xff]  ;;  %v10734_v22 = vld [vmem:[%s15049_s11 + $0x14] ss:$36 sps:$4 sm:$0xff]  }
 0x44d   : > { %7162 = vmatpush2.bf16.msra.mxu0 %v10674_v2  ;;  %7791 = vmatpush2.bf16.msra.mxu1 %v10671_v38  ;;  %v10690_v38 = vld [vmem:[%s15049_s11 + $0x208] ss:$36 sps:$4 sm:$0xff]   ;;  %v10695_v2 = vld [vmem:[%s15049_s11 + $0x1bc] ss:$36 sps:$4 sm:$0xff]   ;;  %v2683_v3 = vmul.f32 %v14065_v45, %v2313_v32 }
 0x44e   : > { %7163 = vmatprep.subr.bf16.mxu0 %v15228_v11  ;;  %7792 = vmatprep.subr.bf16.mxu1 %v10677_v50  ;;  %v2742_v50 = vmax.f32 %v2718_v28, 0.0  ;;  %v10731_v28 = vld [vmem:[%s15049_s11 + $0xc] ss:$36 sps:$4 sm:$0xff]  }
 0x44f   : > { %v2724_v37 = vadd.f32 %v14085_v60, %v2683_v3  ;;  %v10729_v32 = vld [vmem:[%s15049_s11 + $0x8] ss:$36 sps:$4 sm:$0xff]   ;;  %v10749_v3 = vld [vmem:[%s15049_s11 + $0x294] ss:$36 sps:$4 sm:$0xff]  }
 0x450   : > { %v14162_v25 = vpack.c.bf16 %v2742_v50, %v2739_v57  ;;  %v10744_v50 = vld [vmem:[%s15049_s11 + $0x2e0] ss:$36 sps:$4 sm:$0xff]   ;;  %v10756_v57 = vld [vmem:[%s15049_s11 + $0x250] ss:$36 sps:$4 sm:$0xff]  }
 0x451   : > { %7164 = vmatpush2.bf16.msra.mxu0 %v10678_v18  ;;  %7793 = vmatpush2.bf16.msra.mxu1 %v10675_v35  ;;  %v15251_v35 = vld [vmem:[#allocation21_spill] sm:$0xff]  ;;  %v2748_v7 = vmax.f32 %v2724_v37, 0.0  ;;  %v10762_v37 = vld [vmem:[%s15049_s11 + $0x218] ss:$36 sps:$4 sm:$0xff]  }
 0x452   : > { %7165 = vmatprep.subr.bf16.mxu0 %v15228_v11  ;;  %7794 = vmatprep.subr.bf16.mxu1 %v10681_v6  ;;  %v2250_v18 = vadd.f32 %v15251_v35, %v2177_v29  ;;  %v15252_v6 = vld [vmem:[#allocation26_spill] sm:$0xff]  ;;  %v10758_v35 = vld [vmem:[%s15049_s11 + $0x254] ss:$36 sps:$4 sm:$0xff]  }
 0x453   : > { %v2680_v58 = vmul.f32 %v14065_v45, %v15252_v6  ;;  %v10746_v29 = vld [vmem:[%s15049_s11 + $0x2e4] ss:$36 sps:$4 sm:$0xff]   ;;  %v10761_v6 = vld [vmem:[%s15049_s11 + $0x214] ss:$36 sps:$4 sm:$0xff]  }
 0x454   : > { %v2323_v20 = vadd.f32 %v15253_v16, %v2250_v18  ;;  %v10753_v18 = vld [vmem:[%s15049_s11 + $0x248] ss:$36 sps:$4 sm:$0xff]  }
 0x455   : > { %7166 = vmatpush2.bf16.msra.mxu0 %v10682_v12  ;;  %7795 = vmatpush2.bf16.msra.mxu1 %v10679_v30  ;;  %v10699_v30 = vld [vmem:[%s15049_s11 + $0x170] ss:$36 sps:$4 sm:$0xff]   ;;  %v10702_v12 = vld [vmem:[%s15049_s11 + $0x178] ss:$36 sps:$4 sm:$0xff]   ;;  %v2721_v4 = vadd.f32 %v14085_v60, %v2680_v58 }
 0x456   : > { %7167 = vmatprep.subr.bf16.mxu0 %v15228_v11  ;;  %7796 = vmatprep.subr.bf16.mxu1 %v10685_v53  ;;  %v2689_v43 = vmul.f32 %v14065_v45, %v2323_v20  ;;  %v10705_v53 = vld [vmem:[%s15049_s11 + $0x128] ss:$36 sps:$4 sm:$0xff]   ;;  %v10759_v58 = vld [vmem:[%s15049_s11 + $0x210] ss:$36 sps:$4 sm:$0xff]  }
 0x457   : > { %v2745_v44 = vmax.f32 %v2721_v4, 0.0  ;;  %v10765_v16 = vld [vmem:[%s15049_s11 + $0x1cc] ss:$36 sps:$4 sm:$0xff]   ;;  %v10773_v4 = vld [vmem:[%s15049_s11 + $0x13c] ss:$36 sps:$4 sm:$0xff]  }
 0x458   : > { %v2730_v13 = vadd.f32 %v14085_v60, %v2689_v43  ;;  %v10763_v20 = vld [vmem:[%s15049_s11 + $0x1c8] ss:$36 sps:$4 sm:$0xff]   ;;  %v10774_v43 = vld [vmem:[%s15049_s11 + $0x140] ss:$36 sps:$4 sm:$0xff]  }
 0x459   : > { %7168 = vmatpush2.bf16.msra.mxu0 %v10686_v40  ;;  %7797 = vmatpush2.bf16.msra.mxu1 %v10683_v14  ;;  %v2686_v14 = vmul.f32 %v14065_v45, %v15255_v54  ;;  %v14200_v40 = vpack.c.bf16 %v2748_v7, %v2745_v44  ;;  %v10719_v45 = vld [vmem:[%s15049_s11 + $0x9c] ss:$36 sps:$4 sm:$0xff]   ;;  %v10779_v44 = vld [vmem:[%s15049_s11 + $0xa8] ss:$36 sps:$4 sm:$0xff]   ;;  %v10782_v54 = vld [vmem:[%s15049_s11 + $0xb0] ss:$36 sps:$4 sm:$0xff]  }
 0x45a   : > { %7839 = vmatprep.subr.bf16.mxu0 %v10689_v49  ;;  %7912 = vmatprep.subr.bf16.mxu1 %v10692_v23  ;;  %v10714_v49 = vld [vmem:[%s15049_s11 + $0xe8] ss:$36 sps:$4 sm:$0xff]   ;;  %v2754_v63 = vmax.f32 %v2730_v13, 0.0  ;;  %v10771_v7 = vld [vmem:[%s15049_s11 + $0x138] ss:$36 sps:$4 sm:$0xff]  }
 0x45b   : > { %v10722_v23 = vld [vmem:[%s15049_s11 + $0xa4] ss:$36 sps:$4 sm:$0xff]   ;;  %v2727_v39 = vadd.f32 %v14085_v60, %v2686_v14 }
 0x45c   : > { %7170 = vmatmul.mubr.bf16.vlgmr.msra.gmra.mxu0 %v13720_v33  ;;  %7799 = vmatmul.mubr.bf16.vlgmr.msra.gmra.mxu1 %v14122_v46  ;;  %v10696_v33 = vld [vmem:[%s15049_s11 + $0x1c0] ss:$36 sps:$4 sm:$0xff]  }
 0x45d   : > { %9514 = vmatprep.mubr.msk.bf16.mxu0 %vm1947_vm0, %v13775_v59  ;;  %9626 = vmatprep.mubr.msk.bf16.mxu1 %vm1947_vm0, %v15250_v41  ;;  %v10701_v59 = vld [vmem:[%s15049_s11 + $0x174] ss:$36 sps:$4 sm:$0xff]   ;;  %v10720_v60 = vld [vmem:[%s15049_s11 + $0xa0] ss:$36 sps:$4 sm:$0xff]   ;;  %v2751_v10 = vmax.f32 %v2727_v39, 0.0 }
 0x45e   : > { %7840 = vmatpush1.bf16.msra.mxu0 %v10687_v51  ;;  %7913 = vmatpush1.bf16.msra.mxu1 %v10690_v38  ;;  %v10732_v51 = vld [vmem:[%s15049_s11 + $0x10] ss:$36 sps:$4 sm:$0xff]   ;;  %v10785_v14 = vld [vmem:[%s15049_s11 + $0x64] ss:$36 sps:$4 sm:$0xff]  }
 0x45f   : > { %7841 = vmatprep.subr.bf16.mxu0 %v10695_v2  ;;  %7914 = vmatprep.subr.bf16.mxu1 %v10698_v27  ;;  %v14234_v52 = vpack.c.bf16 %v2754_v63, %v2751_v10  ;;  %v10740_v38 = vld [vmem:[%s15049_s11 + $0x32c] ss:$36 sps:$4 sm:$0xff]   ;;  %v10735_v2 = vld [vmem:[%s15049_s11 + $0x320] ss:$36 sps:$4 sm:$0xff]   ;;  %v10793_v39 = vld [vmem:[%s15049_s11 + $0x334] ss:$36 sps:$4 sm:$0xff]  }
 0x460   : > { %v10738_v27 = vld [vmem:[%s15049_s11 + $0x328] ss:$36 sps:$4 sm:$0xff]   ;;  %v10783_v13 = vld [vmem:[%s15049_s11 + $0x60] ss:$36 sps:$4 sm:$0xff]   ;;  %v10794_v63 = vld [vmem:[%s15049_s11 + $0x338] ss:$36 sps:$4 sm:$0xff]  }
 0x461   : > { %v10799_v10 = vld [vmem:[%s15049_s11 + $0x2a0] ss:$36 sps:$4 sm:$0xff]  }
 0x462   : > { %7842 = vmatpush1.bf16.msra.mxu0 %v10693_v55  ;;  %7915 = vmatpush1.bf16.msra.mxu1 %v10696_v33  ;;  %v10752_v55 = vld [vmem:[%s15049_s11 + $0x29c] ss:$36 sps:$4 sm:$0xff]   ;;  %v10747_v33 = vld [vmem:[%s15049_s11 + $0x290] ss:$36 sps:$4 sm:$0xff]  }
 0x463   : > { %7843 = vmatprep.subr.bf16.mxu0 %v10701_v59  ;;  %7916 = vmatprep.subr.bf16.mxu1 %v10704_v47  ;;  %v10750_v59 = vld [vmem:[%s15049_s11 + $0x298] ss:$36 sps:$4 sm:$0xff]   ;;  %v10755_v47 = vld [vmem:[%s15049_s11 + $0x24c] ss:$36 sps:$4 sm:$0xff]  }
 0x464   : > { %7178 = vmatmul.mubr.bf16.gmra.mxu0 %v13772_v26  ;;  %7809 = vmatmul.mubr.bf16.gmra.mxu1 %v14162_v25  ;;  %v10708_v26 = vld [vmem:[%s15049_s11 + $0x130] ss:$36 sps:$4 sm:$0xff]  }
 0x465   : > { %9515 = vmatprep.mubr.msk.bf16.mxu0 %vm1947_vm0, %v13820_v8  ;;  %9627 = vmatprep.mubr.msk.bf16.mxu1 %vm1947_vm0, %v15254_v48  ;;  %v10713_v8 = vld [vmem:[%s15049_s11 + $0xe4] ss:$36 sps:$4 sm:$0xff]  }
 0x466   : > { %7844 = vmatpush1.bf16.msra.mxu0 %v10699_v30  ;;  %7917 = vmatpush1.bf16.msra.mxu1 %v10702_v12  ;;  %v10766_v30 = vld [vmem:[%s15049_s11 + $0x1d0] ss:$36 sps:$4 sm:$0xff]   ;;  %v10769_v12 = vld [vmem:[%s15049_s11 + $0x184] ss:$36 sps:$4 sm:$0xff]  }
 0x467   : > { %7845 = vmatprep.subr.bf16.mxu0 %v10707_v34  ;;  %7918 = vmatprep.subr.bf16.mxu1 %v10710_v24  ;;  %v10767_v34 = vld [vmem:[%s15049_s11 + $0x180] ss:$36 sps:$4 sm:$0xff]   ;;  %v10770_v24 = vld [vmem:[%s15049_s11 + $0x188] ss:$36 sps:$4 sm:$0xff]  }
 0x46a   : > { %7846 = vmatpush1.bf16.msra.mxu0 %v10705_v53  ;;  %7919 = vmatpush1.bf16.msra.mxu1 %v10708_v26  ;;  %v10777_v53 = vld [vmem:[%s15049_s11 + $0xf4] ss:$36 sps:$4 sm:$0xff]  }
 0x46b   : > { %7847 = vmatprep.subr.bf16.mxu0 %v10713_v8  ;;  %7920 = vmatprep.subr.bf16.mxu1 %v10716_v19  ;;  %v10775_v26 = vld [vmem:[%s15049_s11 + $0xf0] ss:$36 sps:$4 sm:$0xff]   ;;  %v10778_v8 = vld [vmem:[%s15049_s11 + $0xf8] ss:$36 sps:$4 sm:$0xff]  }
 0x46c   : > { %7186 = vmatmul.mubr.bf16.gmra.mxu0 %v13815_v0  ;;  %7819 = vmatmul.mubr.bf16.gmra.mxu1 %v14200_v40  ;;  %v10725_v0 = vld [vmem:[%s15049_s11 + $0x54] ss:$36 sps:$4 sm:$0xff]   ;;  %v10781_v19 = vld [vmem:[%s15049_s11 + $0xac] ss:$36 sps:$4 sm:$0xff]  }
 0x46d   : > { %9516 = vmatprep.mubr.msk.bf16.mxu0 %vm1947_vm0, %v13858_v31  ;;  %9628 = vmatprep.mubr.msk.bf16.mxu1 %vm1947_vm0, %v15256_v61  ;;  %v10728_v31 = vld [vmem:[%s15049_s11 + $0x5c] ss:$36 sps:$4 sm:$0xff]  }
 0x46e   : > { %7848 = vmatpush1.bf16.msra.mxu0 %v10711_v1  ;;  %7921 = vmatpush1.bf16.msra.mxu1 %v10714_v49  ;;  %v10786_v1 = vld [vmem:[%s15049_s11 + $0x68] ss:$36 sps:$4 sm:$0xff]   ;;  %v10789_v49 = vld [vmem:[%s15049_s11 + $0x1c] ss:$36 sps:$4 sm:$0xff]  }
 0x46f   : > { %7849 = vmatprep.subr.bf16.mxu0 %v10719_v45  ;;  %7922 = vmatprep.subr.bf16.mxu1 %v10722_v23  ;;  %v10787_v45 = vld [vmem:[%s15049_s11 + $0x18] ss:$36 sps:$4 sm:$0xff]   ;;  %v10790_v23 = vld [vmem:[%s15049_s11 + $0x20] ss:$36 sps:$4 sm:$0xff]  }
 0x472   : > { %7850 = vmatpush1.bf16.msra.mxu0 %v10717_v62  ;;  %7923 = vmatpush1.bf16.msra.mxu1 %v10720_v60  ;;  %v10797_v62 = vld [vmem:[%s15049_s11 + $0x2ec] ss:$36 sps:$4 sm:$0xff]  }
 0x473   : > { %7851 = vmatprep.subr.bf16.mxu0 %v10725_v0  ;;  %7924 = vmatprep.subr.bf16.mxu1 %v10728_v31  ;;  %v10795_v60 = vld [vmem:[%s15049_s11 + $0x2e8] ss:$36 sps:$4 sm:$0xff]   ;;  %v10798_v0 = vld [vmem:[%s15049_s11 + $0x2f0] ss:$36 sps:$4 sm:$0xff]  }
 0x474   : > { %7194 = vmatmul.mubr.bf16.gmra.mxu0 %v13850_v56  ;;  %7829 = vmatmul.mubr.bf16.gmra.mxu1 %v14234_v52  ;;  %v10737_v56 = vld [vmem:[%s15049_s11 + $0x324] ss:$36 sps:$4 sm:$0xff]  }
 0x475   : > { %9629 = vmatprep.mubr.msk.bf16.mxu0 %vm1947_vm0, %v15232_v42  ;;  %9633 = vmatprep.mubr.msk.bf16.mxu1 %vm1947_vm0, %v15232_v42  ;;  %v10801_v31 = vld [vmem:[%s15049_s11 + $0x2a4] ss:$36 sps:$4 sm:$0xff]  }
 0x476   : > { %7852 = vmatpush1.bf16.msra.mxu0 %v10723_v36  ;;  %7925 = vmatpush1.bf16.msra.mxu1 %v10726_v17  ;;  %v10802_v36 = vld [vmem:[%s15049_s11 + $0x2a8] ss:$36 sps:$4 sm:$0xff]   ;;  %v10805_v17 = vld [vmem:[%s15049_s11 + $0x25c] ss:$36 sps:$4 sm:$0xff]  }
 0x477   : > { %7853 = vmatprep.subr.bf16.mxu0 %v10731_v28  ;;  %7926 = vmatprep.subr.bf16.mxu1 %v10734_v22  ;;  %v10803_v28 = vld [vmem:[%s15049_s11 + $0x258] ss:$36 sps:$4 sm:$0xff]   ;;  %v10806_v22 = vld [vmem:[%s15049_s11 + $0x260] ss:$36 sps:$4 sm:$0xff]  }
 0x47a   : > { %7854 = vmatpush1.bf16.msra.mxu0 %v10729_v32  ;;  %7927 = vmatpush1.bf16.msra.mxu1 %v10732_v51 }
 0x47b   : > { %7863 = vmatprep.subr.bf16.mxu0 %v10737_v56  ;;  %7936 = vmatprep.subr.bf16.mxu1 %v10740_v38 }
 0x47e   : > { %7864 = vmatpush2.bf16.msra.mxu0 %v10735_v2  ;;  %7937 = vmatpush2.bf16.msra.mxu1 %v10738_v27 }
 0x47f   : > { %7865 = vmatprep.subr.bf16.mxu0 %v10743_v21  ;;  %7938 = vmatprep.subr.bf16.mxu1 %v10746_v29 }
 0x482   : > { %7866 = vmatpush2.bf16.msra.mxu0 %v10741_v15  ;;  %7939 = vmatpush2.bf16.msra.mxu1 %v10744_v50 }
 0x483   : > { %7867 = vmatprep.subr.bf16.mxu0 %v10749_v3  ;;  %7940 = vmatprep.subr.bf16.mxu1 %v10752_v55 }
 0x486   : > { %7868 = vmatpush2.bf16.msra.mxu0 %v10747_v33  ;;  %7941 = vmatpush2.bf16.msra.mxu1 %v10750_v59 }
 0x487   : > { %7869 = vmatprep.subr.bf16.mxu0 %v10755_v47  ;;  %7942 = vmatprep.subr.bf16.mxu1 %v10758_v35 }
 0x48a   : > { %7870 = vmatpush2.bf16.msra.mxu0 %v10753_v18  ;;  %7943 = vmatpush2.bf16.msra.mxu1 %v10756_v57 }
 0x48b   : > { %7985 = vmatprep.subr.bf16.mxu0 %v10761_v6  ;;  %8058 = vmatprep.subr.bf16.mxu1 %v15228_v11 }
 0x48d   : > { %7872 = vmatmul.mubr.bf16.vlgmr.msra.gmra.mxu0 %v14122_v46  ;;  %7945 = vmatmul.mubr.bf16.vlgmr.msra.gmra.mxu1 %v14122_v46 }
 0x48e   : > { %9630 = vmatprep.mubr.msk.bf16.mxu0 %vm1947_vm0, %v15250_v41  ;;  %9634 = vmatprep.mubr.msk.bf16.mxu1 %vm1947_vm0, %v15250_v41 }
 0x48f   : > { %7986 = vmatpush1.bf16.msra.mxu0 %v10759_v58  ;;  %8059 = vmatpush1.bf16.msra.mxu1 %v10762_v37 }
 0x490   : > { %7987 = vmatprep.subr.bf16.mxu0 %v10765_v16  ;;  %8060 = vmatprep.subr.bf16.mxu1 %v15228_v11 }
 0x493   : > { %7988 = vmatpush1.bf16.msra.mxu0 %v10763_v20  ;;  %8061 = vmatpush1.bf16.msra.mxu1 %v10766_v30 }
 0x494   : > { %7989 = vmatprep.subr.bf16.mxu0 %v10769_v12  ;;  %8062 = vmatprep.subr.bf16.mxu1 %v15228_v11 }
 0x495   : > { %7882 = vmatmul.mubr.bf16.gmra.mxu0 %v14162_v25  ;;  %7955 = vmatmul.mubr.bf16.gmra.mxu1 %v14162_v25 }
 0x496   : > { %9631 = vmatprep.mubr.msk.bf16.mxu0 %vm1947_vm0, %v15254_v48  ;;  %9635 = vmatprep.mubr.msk.bf16.mxu1 %vm1947_vm0, %v15254_v48 }
 0x497   : > { %7990 = vmatpush1.bf16.msra.mxu0 %v10767_v34  ;;  %8063 = vmatpush1.bf16.msra.mxu1 %v10770_v24 }
 0x498   : > { %7991 = vmatprep.subr.bf16.mxu0 %v10773_v4  ;;  %8064 = vmatprep.subr.bf16.mxu1 %v15228_v11 }
 0x49b   : > { %7992 = vmatpush1.bf16.msra.mxu0 %v10771_v7  ;;  %8065 = vmatpush1.bf16.msra.mxu1 %v10774_v43 }
 0x49c   : > { %7993 = vmatprep.subr.bf16.mxu0 %v10777_v53  ;;  %8066 = vmatprep.subr.bf16.mxu1 %v15228_v11 }
 0x49d   : > { %7892 = vmatmul.mubr.bf16.gmra.mxu0 %v14200_v40  ;;  %7965 = vmatmul.mubr.bf16.gmra.mxu1 %v14200_v40 }
 0x49e   : > { %9632 = vmatprep.mubr.msk.bf16.mxu0 %vm1947_vm0, %v15256_v61  ;;  %9636 = vmatprep.mubr.msk.bf16.mxu1 %vm1947_vm0, %v15256_v61 }
 0x49f   : > { %7994 = vmatpush1.bf16.msra.mxu0 %v10775_v26  ;;  %8067 = vmatpush1.bf16.msra.mxu1 %v10778_v8 }
 0x4a0   : > { %7995 = vmatprep.subr.bf16.mxu0 %v10781_v19  ;;  %8068 = vmatprep.subr.bf16.mxu1 %v15228_v11 }
 0x4a3   : > { %7996 = vmatpush1.bf16.msra.mxu0 %v10779_v44  ;;  %8069 = vmatpush1.bf16.msra.mxu1 %v10782_v54 }
 0x4a4   : > { %7997 = vmatprep.subr.bf16.mxu0 %v10785_v14  ;;  %8070 = vmatprep.subr.bf16.mxu1 %v15228_v11 }
 0x4a5   : > { %7902 = vmatmul.mubr.bf16.gmra.mxu0 %v14234_v52  ;;  %7975 = vmatmul.mubr.bf16.gmra.mxu1 %v14234_v52 }
 0x4a6   : > { %9637 = vmatprep.mubr.msk.bf16.mxu0 %vm1947_vm0, %v15232_v42  ;;  %9641 = vmatprep.mubr.msk.bf16.mxu1 %vm1947_vm0, %v15232_v42  ;;  %v10791_v42 = vld [vmem:[%s15049_s11 + $0x330] ss:$36 sps:$4 sm:$0xff]  }
 0x4a7   : > { %7998 = vmatpush1.bf16.msra.mxu0 %v10783_v13  ;;  %8071 = vmatpush1.bf16.msra.mxu1 %v10786_v1 }
 0x4a8   : > { %7999 = vmatprep.subr.bf16.mxu0 %v10789_v49  ;;  %8072 = vmatprep.subr.bf16.mxu1 %v15228_v11 }
 0x4ab   : > { %8000 = vmatpush1.bf16.msra.mxu0 %v10787_v45  ;;  %8073 = vmatpush1.bf16.msra.mxu1 %v10790_v23 }
 0x4ac   : > { %8009 = vmatprep.subr.bf16.mxu0 %v10793_v39  ;;  %8082 = vmatprep.subr.bf16.mxu1 %v15228_v11 }
 0x4af   : > { %8010 = vmatpush2.bf16.msra.mxu0 %v10791_v42  ;;  %8083 = vmatpush2.bf16.msra.mxu1 %v10794_v63 }
 0x4b0   : > { %8011 = vmatprep.subr.bf16.mxu0 %v10797_v62  ;;  %8084 = vmatprep.subr.bf16.mxu1 %v15228_v11 }
 0x4b3   : > { %8012 = vmatpush2.bf16.msra.mxu0 %v10795_v60  ;;  %8085 = vmatpush2.bf16.msra.mxu1 %v10798_v0 }
 0x4b4   : > { %8013 = vmatprep.subr.bf16.mxu0 %v10801_v31  ;;  %8086 = vmatprep.subr.bf16.mxu1 %v15228_v11 }
 0x4b7   : > { %8014 = vmatpush2.bf16.msra.mxu0 %v10799_v10  ;;  %8087 = vmatpush2.bf16.msra.mxu1 %v10802_v36 }
 0x4b8   : > { %8015 = vmatprep.subr.bf16.mxu0 %v10805_v17  ;;  %8088 = vmatprep.subr.bf16.mxu1 %v15228_v11 }
 0x4bb   : > { %v14452_v32 = vpop.f32.mrf.mxu0  ;;  %v14454_v51 = vpop.f32.mrf.mxu1  ;;  %8016 = vmatpush2.bf16.msra.mxu0 %v10803_v28  ;;  %8089 = vmatpush2.bf16.msra.mxu1 %v10806_v22 }
 0x4bd   : > { %v14456_v56 = vpop.f32.mrf.mxu0  ;;  %v14458_v38 = vpop.f32.mrf.mxu1 }
 0x4be   : > { %8018 = vmatmul.mubr.bf16.vlgmr.msra.gmra.mxu0 %v14122_v46  ;;  %8091 = vmatmul.mubr.bf16.vlgmr.msra.gmra.mxu1 %v14122_v46 }
 0x4bf   : > { %v14462_v2 = vpop.f32.mrf.mxu0  ;;  %v14464_v27 = vpop.f32.mrf.mxu1  ;;  %9638 = vmatprep.mubr.msk.bf16.mxu0 %vm1947_vm0, %v15250_v41  ;;  %9642 = vmatprep.mubr.msk.bf16.mxu1 %vm1947_vm0, %v15250_v41 }
 0x4c1   : > { %v14470_v11 = vpop.f32.mrf.mxu0  ;;  %v14472_v21 = vpop.f32.mrf.mxu1 }
 0x4c3   : > { %v14474_v29 = vpop.f32.mrf.mxu0  ;;  %v14476_v15 = vpop.f32.mrf.mxu1 }
 0x4c5   : > { %v14478_v50 = vpop.f32.mrf.mxu0  ;;  %v14480_v46 = vpop.f32.mrf.mxu1 }
 0x4c6   : > { %8028 = vmatmul.mubr.bf16.gmra.mxu0 %v14162_v25  ;;  %8099 = vmatmul.mubr.bf16.gmra.mxu1 %v14162_v25 }
 0x4c7   : > { %v14484_v3 = vpop.f32.mrf.mxu0  ;;  %v14486_v55 = vpop.f32.mrf.mxu1  ;;  %9639 = vmatprep.mubr.msk.bf16.mxu0 %vm1947_vm0, %v15254_v48  ;;  %9643 = vmatprep.mubr.msk.bf16.mxu1 %vm1947_vm0, %v15254_v48 }
 0x4c9   : > { %v14492_v41 = vpop.f32.mrf.mxu0  ;;  %v14494_v33 = vpop.f32.mrf.mxu1 }
 0x4cb   : > { %v14496_v59 = vpop.f32.mrf.mxu0  ;;  %v14498_v47 = vpop.f32.mrf.mxu1 }
 0x4cd   : > { %v14506_v25 = vpop.f32.mrf.mxu0  ;;  %v14508_v48 = vpop.f32.mrf.mxu1 }
 0x4ce   : > { %8038 = vmatmul.mubr.bf16.gmra.mxu0 %v14200_v40  ;;  %8107 = vmatmul.mubr.bf16.gmra.mxu1 %v14200_v40 }
 0x4cf   : > { %9640 = vmatprep.mubr.msk.bf16.mxu0 %vm1947_vm0, %v15256_v61  ;;  %9644 = vmatprep.mubr.msk.bf16.mxu1 %vm1947_vm0, %v15256_v61  ;;  %v14510_v35 = vpop.f32.mrf.mxu0  ;;  %v14512_v18 = vpop.f32.mrf.mxu1 }
 0x4d1   : > { %v14516_v57 = vpop.f32.mrf.mxu0  ;;  %v14518_v40 = vpop.f32.mrf.mxu1 }
 0x4d3   : > { %v14520_v6 = vpop.f32.mrf.mxu0  ;;  %v14522_v58 = vpop.f32.mrf.mxu1 }
 0x4d5   : > { %v14524_v61 = vpop.f32.mrf.mxu0  ;;  %v14526_v37 = vpop.f32.mrf.mxu1 }
 0x4d6   : > { %8048 = vmatmul.mubr.bf16.gmra.mxu0 %v14234_v52  ;;  %8115 = vmatmul.mubr.bf16.gmra.mxu1 %v14234_v52 }
 0x4d7   : > { %v14528_v16 = vpop.f32.mrf.mxu0  ;;  %v14530_v20 = vpop.f32.mrf.mxu1 }
 0x4d9   : > { %v14532_v30 = vpop.f32.mrf.mxu0  ;;  %v14534_v12 = vpop.f32.mrf.mxu1 }
 0x4da   : > { %15257 = vst [vmem:[#allocation65_spill] sm:$0xff] %v14534_v12 }
 0x4eb   : > { %v14536_v52 = vpop.f32.mrf.mxu0  ;;  %v14538_v34 = vpop.f32.mrf.mxu1 }
 0x4ec   : > { %15258 = vst [vmem:[#allocation53_spill] sm:$0xff] %v14538_v34 }
 0x4ed   : > { %v14540_v24 = vpop.f32.mrf.mxu0  ;;  %v14542_v4 = vpop.f32.mrf.mxu1 }
 0x4ee   : > { %15259 = vst [vmem:[#allocation66_spill] sm:$0xff] %v14542_v4 }
 0x4ef   : > { %v14544_v7 = vpop.f32.mrf.mxu0  ;;  %v14546_v43 = vpop.f32.mrf.mxu1 }
 0x4f0   : > { %15260 = vst [vmem:[#allocation36_spill] sm:$0xff] %v14546_v43 }
 0x4f1   : > { %v14548_v53 = vpop.f32.mrf.mxu0  ;;  %v14550_v26 = vpop.f32.mrf.mxu1 }
 0x4f2   : > { %15261 = vst [vmem:[#allocation35_spill] sm:$0xff] %v14550_v26  ;;  %v8326_v26 = vld [vmem:[%s11050_s1] sm:$0xff] }
 0x4f3   : > { %v14552_v8 = vpop.f32.mrf.mxu0  ;;  %v14554_v19 = vpop.f32.mrf.mxu1 }
 0x4f4   : > { %15262 = vst [vmem:[#allocation54_spill] sm:$0xff] %v14554_v19 }
 0x4f5   : > { %v14556_v44 = vpop.f32.mrf.mxu0  ;;  %v14558_v54 = vpop.f32.mrf.mxu1 }
 0x4f6   : > { %15263 = vst [vmem:[#allocation41_spill] sm:$0xff] %v14558_v54 }
 0x4f7   : > { %v14560_v14 = vpop.f32.mrf.mxu0  ;;  %v14562_v13 = vpop.f32.mrf.mxu1 }
 0x4f8   : > { %15264 = vst [vmem:[#allocation46_spill] sm:$0xff] %v14562_v13  ;;  %v14616_v13 = vpop.permute.xlu0 %8251 }
 0x4f9   : > { %v14564_v1 = vpop.f32.mrf.mxu0  ;;  %v14566_v49 = vpop.f32.mrf.mxu1 }
 0x4fa   : > { %15265 = vst [vmem:[#allocation39_spill] sm:$0xff] %v14566_v49 }
 0x4fb   : > { %v14568_v45 = vpop.f32.mrf.mxu0  ;;  %v14570_v23 = vpop.f32.mrf.mxu1 }
 0x4fc   : > { %15266 = vst [vmem:[#allocation63_spill] sm:$0xff] %v14570_v23 }
 0x4fd   : > { %v14572_v39 = vpop.f32.mrf.mxu0  ;;  %v14574_v42 = vpop.f32.mrf.mxu1 }
 0x4fe   : > { %15267 = vst [vmem:[#allocation56_spill] sm:$0xff] %v14574_v42 }
 0x4ff   : > { %v14576_v63 = vpop.f32.mrf.mxu0  ;;  %v14578_v62 = vpop.f32.mrf.mxu1 }
 0x500   : > { %15268 = vst [vmem:[#allocation37_spill] sm:$0xff] %v14578_v62  ;;  %v14599_v62 = vld [vmem:[%s15051_s13] sm:$0xff] }
 0x501   : > { %v14580_v60 = vpop.f32.mrf.mxu0  ;;  %v14582_v0 = vpop.f32.mrf.mxu1 }
 0x502   : > { %15269 = vst [vmem:[#allocation55_spill] sm:$0xff] %v14582_v0 }
 0x503   : > { %v14584_v31 = vpop.f32.mrf.mxu0  ;;  %v14586_v10 = vpop.f32.mrf.mxu1 }
 0x504   : > { %15270 = vst [vmem:[#allocation38_spill] sm:$0xff] %v14586_v10  ;;  %v14607_v10 = vrot.slane %v14599_v62, %v11950_v9 }
 0x505   : > { %v14588_v36 = vpop.f32.mrf.mxu0  ;;  %v14590_v17 = vpop.f32.mrf.mxu1 }
 0x506   : > { %15271 = vst [vmem:[#allocation57_spill] sm:$0xff] %v14590_v17 }
 0x507   : > { %v14592_v28 = vpop.f32.mrf.mxu0  ;;  %v14594_v22 = vpop.f32.mrf.mxu1 }
 0x508   : > { %15272 = vst [vmem:[#allocation50_spill] sm:$0xff] %v14594_v22  ;;  %v14614_v22 = vrot.slane %v14599_v62, %v12897_v5 }
 0x509   : > { %v14601_v42 = vpop.f32.mrf.mxu0  ;;  %v14603_v0 = vpop.f32.mrf.mxu1 }
 0x50a   : > { %15273 = vst [vmem:[#allocation47_spill] sm:$0xff] %v14601_v42  ;;  %15274 = vst [vmem:[#allocation62_spill] sm:$0xff] %v14603_v0 }
 0x51c   : > { %v14609_v17 = vpop.f32.mrf.mxu0  ;;  %v7800_v23 = vpop.f32.mrf.mxu1 }
 0x51d   : > { %15275 = vst [vmem:[#allocation58_spill] sm:$0xff] %v14609_v17  ;;  %v7801_v49 = vadd.f32 %v7800_v23, %v14452_v32  ;;  %v8327_v17 = vld [vmem:[%s11050_s1 + $0x8] sm:$0xff] }
 0x51e   : > { %v7173_v54 = vpop.f32.mrf.mxu0  ;;  %v7802_v19 = vpop.f32.mrf.mxu1 }
 0x51f   : > { %v8172_v0 = vadd.f32 %v14607_v10, %v7801_v49  ;;  %v7803_v9 = vadd.f32 %v7802_v19, %v14456_v56  ;;  %v8335_v19 = vld [vmem:[%s11050_s1 + $0x48] sm:$0xff] }
 0x520   : > { %v14621_v43 = vpop.f32.mrf.mxu0  ;;  %v7804_v4 = vpop.f32.mrf.mxu1 }
 0x521   : > { %15276 = vst [vmem:[#allocation40_spill] sm:$0xff] %v14621_v43  ;;  %v8173_v32 = vadd.f32 %v14614_v22, %v7803_v9  ;;  %v8254_v23 = vmul.f32 %v14616_v13, %v8172_v0  ;;  %v7805_v5 = vadd.f32 %v7804_v4, %v14462_v2 }
 0x522   : > { %v7176_v54 = vpop.f32.mrf.mxu0  ;;  %v7806_v34 = vpop.f32.mrf.mxu1 }
 0x523   : > { %v8255_v42 = vmul.f32 %v14616_v13, %v8173_v32  ;;  %v8398_v49 = vadd.f32 %v8326_v26, %v8254_v23  ;;  %v8181_v12 = vadd.f32 %v14607_v10, %v7805_v5  ;;  %v7807_v56 = vadd.f32 %v7806_v34, %v14470_v11  ;;  %v8336_v11 = vld [vmem:[%s11050_s1 + $0x50] sm:$0xff] }
 0x524   : > { %v14638_v2 = vpop.f32.mrf.mxu0  ;;  %v7810_v4 = vpop.f32.mrf.mxu1 }
 0x525   : > { %15277 = vst [vmem:[#allocation61_spill] sm:$0xff] %v14638_v2  ;;  %v8399_v0 = vadd.f32 %v8327_v17, %v8255_v42  ;;  %v8470_v9 = vmax.f32 %v8398_v49, 0.0  ;;  %v8263_v26 = vmul.f32 %v14616_v13, %v8181_v12  ;;  %v8182_v32 = vadd.f32 %v14614_v22, %v7807_v56 }
 0x526   : > { %v7811_v34 = vadd.f32 %v7810_v4, %v14474_v29  ;;  %v7181_v23 = vpop.f32.mrf.mxu0  ;;  %v7812_v5 = vpop.f32.mrf.mxu1  ;;  %v8344_v4 = vld [vmem:[%s11050_s1 + $0x90] sm:$0xff] }
 0x527   : > { %v8471_v54 = vmax.f32 %v8399_v0, 0.0  ;;  %8542 = vst [vmem:[%s14635_s22] sm:$0xff] %v8470_v9  ;;  %v8407_v43 = vadd.f32 %v8335_v19, %v8263_v26  ;;  %v8264_v2 = vmul.f32 %v14616_v13, %v8182_v32  ;;  %v7813_v42 = vadd.f32 %v7812_v5, %v14478_v50  ;;  %v8345_v26 = vld [vmem:[%s11050_s1 + $0x98] sm:$0xff] }
 0x528   : > { %v8190_v17 = vadd.f32 %v14607_v10, %v7811_v34  ;;  %v14648_v12 = vpop.f32.mrf.mxu0  ;;  %v7814_v49 = vpop.f32.mrf.mxu1 }
 0x529   : > { %8543 = vst [vmem:[%s14635_s22 + $0x8] sm:$0xff] %v8471_v54  ;;  %v8479_v56 = vmax.f32 %v8407_v43, 0.0  ;;  %v8408_v29 = vadd.f32 %v8336_v11, %v8264_v2  ;;  %v8191_v0 = vadd.f32 %v14614_v22, %v7813_v42  ;;  %v7815_v19 = vadd.f32 %v7814_v49, %v14484_v3  ;;  %v8353_v11 = vld [vmem:[%s11050_s1 + $0xd8] sm:$0xff] }
 0x52a   : > { %v8272_v9 = vmul.f32 %v14616_v13, %v8190_v17  ;;  %v7184_v32 = vpop.f32.mrf.mxu0  ;;  %v7816_v50 = vpop.f32.mrf.mxu1 }
 0x52b   : > { %8551 = vst [vmem:[%s14635_s22 + $0x48] sm:$0xff] %v8479_v56  ;;  %v8480_v34 = vmax.f32 %v8408_v29, 0.0  ;;  %v8273_v23 = vmul.f32 %v14616_v13, %v8191_v0  ;;  %v8199_v5 = vadd.f32 %v14607_v10, %v7815_v19  ;;  %v7817_v43 = vadd.f32 %v7816_v50, %v14492_v41  ;;  %v8354_v0 = vld [vmem:[%s11050_s1 + $0xe0] sm:$0xff] }
 0x52c   : > { %v8416_v2 = vadd.f32 %v8344_v4, %v8272_v9  ;;  %v14661_v54 = vpop.f32.mrf.mxu0  ;;  %v7820_v3 = vpop.f32.mrf.mxu1 }
 0x52d   : > { %8552 = vst [vmem:[%s14635_s22 + $0x50] sm:$0xff] %v8480_v34  ;;  %v8417_v42 = vadd.f32 %v8345_v26, %v8273_v23  ;;  %v8281_v17 = vmul.f32 %v14616_v13, %v8199_v5  ;;  %v8200_v49 = vadd.f32 %v14614_v22, %v7817_v43  ;;  %v7821_v56 = vadd.f32 %v7820_v3, %v14496_v59  ;;  %v8362_v26 = vld [vmem:[%s11050_s1 + $0x120] sm:$0xff] }
 0x52e   : > { %v8488_v29 = vmax.f32 %v8416_v2, 0.0  ;;  %v7189_v19 = vpop.f32.mrf.mxu0  ;;  %v7822_v41 = vpop.f32.mrf.mxu1 }
 0x52f   : > { %v8489_v4 = vmax.f32 %v8417_v42, 0.0  ;;  %v8425_v9 = vadd.f32 %v8353_v11, %v8281_v17  ;;  %v8282_v32 = vmul.f32 %v14616_v13, %v8200_v49  ;;  %v8208_v50 = vadd.f32 %v14607_v10, %v7821_v56  ;;  %v8363_v56 = vld [vmem:[%s11050_s1 + $0x128] sm:$0xff] }
 0x530   : > { %8560 = vst [vmem:[%s14635_s22 + $0x90] sm:$0xff] %v8488_v29  ;;  %v7823_v34 = vadd.f32 %v7822_v41, %v14506_v25  ;;  %v14673_v23 = vpop.f32.mrf.mxu0  ;;  %v7824_v5 = vpop.f32.mrf.mxu1  ;;  %v8371_v41 = vld [vmem:[%s11050_s1 + $0x168] sm:$0xff] }
 0x531   : > { %8561 = vst [vmem:[%s14635_s22 + $0x98] sm:$0xff] %v8489_v4  ;;  %v8497_v59 = vmax.f32 %v8425_v9, 0.0  ;;  %v8426_v43 = vadd.f32 %v8354_v0, %v8282_v32  ;;  %v8290_v2 = vmul.f32 %v14616_v13, %v8208_v50  ;;  %v7825_v11 = vadd.f32 %v7824_v5, %v14510_v35  ;;  %v8372_v5 = vld [vmem:[%s11050_s1 + $0x170] sm:$0xff] }
 0x532   : > { %v8209_v3 = vadd.f32 %v14614_v22, %v7823_v34  ;;  %v7192_v42 = vpop.f32.mrf.mxu0  ;;  %v7826_v17 = vpop.f32.mrf.mxu1 }
 0x533   : > { %8569 = vst [vmem:[%s14635_s22 + $0xd8] sm:$0xff] %v8497_v59  ;;  %v8498_v49 = vmax.f32 %v8426_v43, 0.0  ;;  %v8434_v25 = vadd.f32 %v8362_v26, %v8290_v2  ;;  %v8217_v29 = vadd.f32 %v14607_v10, %v7825_v11  ;;  %v7827_v19 = vadd.f32 %v7826_v17, %v14516_v57  ;;  %v8380_v17 = vld [vmem:[%s11050_s1 + $0x1b0] sm:$0xff] }
 0x534   : > { %v8291_v0 = vmul.f32 %v14616_v13, %v8209_v3  ;;  %v14685_v4 = vpop.f32.mrf.mxu0  ;;  %v7830_v35 = vpop.f32.mrf.mxu1 }
 0x535   : > { %8570 = vst [vmem:[%s14635_s22 + $0xe0] sm:$0xff] %v8498_v49  ;;  %v8506_v9 = vmax.f32 %v8434_v25, 0.0  ;;  %v8299_v32 = vmul.f32 %v14616_v13, %v8217_v29  ;;  %v8218_v50 = vadd.f32 %v14614_v22, %v7827_v19  ;;  %v7831_v26 = vadd.f32 %v7830_v35, %v14520_v6 }
 0x536   : > { %v8435_v34 = vadd.f32 %v8363_v56, %v8291_v0  ;;  %v7197_v59 = vpop.f32.mrf.mxu0  ;;  %v7832_v57 = vpop.f32.mrf.mxu1  ;;  %v8381_v0 = vld [vmem:[%s11050_s1 + $0x1b8] sm:$0xff] }
 0x537   : > { %8578 = vst [vmem:[%s14635_s22 + $0x120] sm:$0xff] %v8506_v9  ;;  %v8443_v43 = vadd.f32 %v8371_v41, %v8299_v32  ;;  %v8300_v2 = vmul.f32 %v14616_v13, %v8218_v50  ;;  %v8226_v11 = vadd.f32 %v14607_v10, %v7831_v26  ;;  %v7833_v3 = vadd.f32 %v7832_v57, %v14524_v61  ;;  %v8389_v57 = vld [vmem:[%s11050_s1 + $0x1f8] sm:$0xff] }
 0x538   : > { %v8507_v42 = vmax.f32 %v8435_v34, 0.0  ;;  %v14697_v49 = vpop.f32.mrf.mxu0  ;;  %v7834_v6 = vpop.f32.mrf.mxu1 }
 0x539   : > { %v8515_v25 = vmax.f32 %v8443_v43, 0.0  ;;  %v8444_v56 = vadd.f32 %v8372_v5, %v8300_v2  ;;  %v8308_v29 = vmul.f32 %v14616_v13, %v8226_v11  ;;  %v8227_v19 = vadd.f32 %v14614_v22, %v7833_v3  ;;  %v8390_v2 = vld [vmem:[%s11050_s1 + $0x200] sm:$0xff] }
 0x53a   : > { %8579 = vst [vmem:[%s14635_s22 + $0x128] sm:$0xff] %v8507_v42  ;;  %v7835_v41 = vadd.f32 %v7834_v6, %v14528_v16  ;;  %v7200_v61 = vpop.f32.mrf.mxu0  ;;  %v7836_v35 = vpop.f32.mrf.mxu1  ;;  %v15278_v6 = vld [vmem:[#allocation19_spill] sm:$0xff] }
 0x53b   : > { %8587 = vst [vmem:[%s14635_s22 + $0x168] sm:$0xff] %v8515_v25  ;;  %v8516_v9 = vmax.f32 %v8444_v56, 0.0  ;;  %v8452_v32 = vadd.f32 %v8380_v17, %v8308_v29  ;;  %v8309_v50 = vmul.f32 %v14616_v13, %v8227_v19  ;;  %v7837_v26 = vadd.f32 %v7836_v35, %v14532_v30  ;;  %v15279_v29 = vld [vmem:[#allocation30_spill] sm:$0xff] }
 0x53c   : > { %v8235_v34 = vadd.f32 %v14607_v10, %v7835_v41  ;;  %v8145_v25 = vsub.s32 4, %v15278_v6  ;;  %v8141_v56 = vsub.s32 3, %v15278_v6  ;;  %v14723_v19 = vrot.slane %v14599_v62, %v15279_v29 }
 0x53d   : > { %8588 = vst [vmem:[%s14635_s22 + $0x170] sm:$0xff] %v8516_v9  ;;  %v8524_v5 = vmax.f32 %v8452_v32, 0.0  ;;  %v8453_v59 = vadd.f32 %v8381_v0, %v8309_v50  ;;  %v8236_v16 = vadd.f32 %v14614_v22, %v7837_v26  ;;  %v8149_v22 = vsub.s32 5, %v15278_v6 }
 0x53e   : > { %v8317_v43 = vmul.f32 %v14616_v13, %v8235_v34  ;;  %v14726_v0 = vrot.slane %v14599_v62, %v8145_v25  ;;  %v14731_v32 = vrot.slane %v14599_v62, %v8141_v56 }
 0x53f   : > { %8596 = vst [vmem:[%s14635_s22 + $0x1b0] sm:$0xff] %v8524_v5  ;;  %v8525_v11 = vmax.f32 %v8453_v59, 0.0  ;;  %v8318_v3 = vmul.f32 %v14616_v13, %v8236_v16  ;;  %v14734_v50 = vrot.slane %v14599_v62, %v8149_v22  ;;  %v8328_v16 = vld [vmem:[%s11050_s1 + $0x10] sm:$0xff] }
 0x540   : > { %v8461_v42 = vadd.f32 %v8389_v57, %v8317_v43 }
 0x541   : > { %8597 = vst [vmem:[%s14635_s22 + $0x1b8] sm:$0xff] %v8525_v11  ;;  %v8462_v30 = vadd.f32 %v8390_v2, %v8318_v3 }
 0x542   : > { %v8533_v17 = vmax.f32 %v8461_v42, 0.0 }
 0x543   : > { %v8534_v10 = vmax.f32 %v8462_v30, 0.0 }
 0x544   : > { %8605 = vst [vmem:[%s14635_s22 + $0x1f8] sm:$0xff] %v8533_v17  ;;  %v8329_v17 = vld [vmem:[%s11050_s1 + $0x18] sm:$0xff] }
 0x545   : > { %8606 = vst [vmem:[%s14635_s22 + $0x200] sm:$0xff] %v8534_v10  ;;  %v8331_v10 = vld [vmem:[%s11050_s1 + $0x28] sm:$0xff] }
 0x54d   : > { %v7873_v41 = vpop.f32.mrf.mxu0  ;;  %v7946_v61 = vpop.f32.mrf.mxu1 }
 0x54e   : > { %v7874_v35 = vadd.f32 %v7873_v41, %v14454_v51  ;;  %v7947_v9 = vadd.f32 %v7946_v61, %v14536_v52  ;;  %v8330_v52 = vld [vmem:[%s11050_s1 + $0x20] sm:$0xff] }
 0x54f   : > { %v7875_v26 = vpop.f32.mrf.mxu0  ;;  %v7948_v34 = vpop.f32.mrf.mxu1 }
 0x550   : > { %v8174_v5 = vadd.f32 %v14723_v19, %v7874_v35  ;;  %v8176_v59 = vadd.f32 %v14726_v0, %v7947_v9  ;;  %v7876_v57 = vadd.f32 %v7875_v26, %v14458_v38  ;;  %v7949_v51 = vadd.f32 %v7948_v34, %v14540_v24 }
 0x551   : > { %v7877_v43 = vpop.f32.mrf.mxu0  ;;  %v7950_v2 = vpop.f32.mrf.mxu1 }
 0x552   : > { %v8256_v11 = vmul.f32 %v14616_v13, %v8174_v5  ;;  %v8258_v3 = vmul.f32 %v14616_v13, %v8176_v59  ;;  %v8175_v42 = vadd.f32 %v14731_v32, %v7876_v57  ;;  %v8177_v30 = vadd.f32 %v14734_v50, %v7949_v51 }
 0x553   : > { %v7878_v25 = vadd.f32 %v7877_v43, %v14464_v27  ;;  %v7951_v38 = vadd.f32 %v7950_v2, %v14544_v7  ;;  %v7879_v56 = vpop.f32.mrf.mxu0  ;;  %v7952_v24 = vpop.f32.mrf.mxu1 }
 0x554   : > { %v8400_v22 = vadd.f32 %v8328_v16, %v8256_v11  ;;  %v8402_v29 = vadd.f32 %v8330_v52, %v8258_v3  ;;  %v8257_v41 = vmul.f32 %v14616_v13, %v8175_v42  ;;  %v8259_v61 = vmul.f32 %v14616_v13, %v8177_v30  ;;  %v8337_v16 = vld [vmem:[%s11050_s1 + $0x58] sm:$0xff]  ;;  %v8339_v52 = vld [vmem:[%s11050_s1 + $0x68] sm:$0xff] }
 0x555   : > { %v8183_v35 = vadd.f32 %v14723_v19, %v7878_v25  ;;  %v8185_v9 = vadd.f32 %v14726_v0, %v7951_v38  ;;  %v7880_v26 = vadd.f32 %v7879_v56, %v14472_v21  ;;  %v7953_v27 = vadd.f32 %v7952_v24, %v14548_v53  ;;  %v7883_v7 = vpop.f32.mrf.mxu0  ;;  %v7956_v34 = vpop.f32.mrf.mxu1 }
 0x556   : > { %v8472_v5 = vmax.f32 %v8400_v22, 0.0  ;;  %v8474_v59 = vmax.f32 %v8402_v29, 0.0  ;;  %v8401_v57 = vadd.f32 %v8329_v17, %v8257_v41  ;;  %v8403_v51 = vadd.f32 %v8331_v10, %v8259_v61  ;;  %v8338_v17 = vld [vmem:[%s11050_s1 + $0x60] sm:$0xff]  ;;  %v8340_v10 = vld [vmem:[%s11050_s1 + $0x70] sm:$0xff] }
 0x557   : > { %v8265_v43 = vmul.f32 %v14616_v13, %v8183_v35  ;;  %v8267_v2 = vmul.f32 %v14616_v13, %v8185_v9  ;;  %v8184_v21 = vadd.f32 %v14731_v32, %v7880_v26  ;;  %v8186_v11 = vadd.f32 %v14734_v50, %v7953_v27  ;;  %v7885_v53 = vpop.f32.mrf.mxu0  ;;  %v7958_v3 = vpop.f32.mrf.mxu1 }
 0x558   : > { %8544 = vst [vmem:[%s14635_s22 + $0x10] sm:$0xff] %v8472_v5  ;;  %8546 = vst [vmem:[%s14635_s22 + $0x20] sm:$0xff] %v8474_v59  ;;  %v8473_v42 = vmax.f32 %v8401_v57, 0.0  ;;  %v8475_v30 = vmax.f32 %v8403_v51, 0.0  ;;  %v7884_v25 = vadd.f32 %v7883_v7, %v14476_v15  ;;  %v7957_v38 = vadd.f32 %v7956_v34, %v14552_v8  ;;  %v8346_v5 = vld [vmem:[%s11050_s1 + $0xa0] sm:$0xff]  ;;  %v8348_v59 = vld [vmem:[%s11050_s1 + $0xb0] sm:$0xff] }
 0x559   : > { %v8409_v56 = vadd.f32 %v8337_v16, %v8265_v43  ;;  %v8411_v24 = vadd.f32 %v8339_v52, %v8267_v2  ;;  %v8266_v22 = vmul.f32 %v14616_v13, %v8184_v21  ;;  %v8268_v29 = vmul.f32 %v14616_v13, %v8186_v11  ;;  %v7887_v41 = vpop.f32.mrf.mxu0  ;;  %v7960_v61 = vpop.f32.mrf.mxu1  ;;  %v8347_v21 = vld [vmem:[%s11050_s1 + $0xa8] sm:$0xff]  ;;  %v8349_v11 = vld [vmem:[%s11050_s1 + $0xb8] sm:$0xff] }
 0x55a   : > { %8545 = vst [vmem:[%s14635_s22 + $0x18] sm:$0xff] %v8473_v42  ;;  %8547 = vst [vmem:[%s14635_s22 + $0x28] sm:$0xff] %v8475_v30  ;;  %v8192_v35 = vadd.f32 %v14723_v19, %v7884_v25  ;;  %v8194_v9 = vadd.f32 %v14726_v0, %v7957_v38  ;;  %v7886_v15 = vadd.f32 %v7885_v53, %v14480_v46 }
 0x55b   : > { %v7959_v8 = vadd.f32 %v7958_v3, %v14556_v44  ;;  %v8481_v26 = vmax.f32 %v8409_v56, 0.0  ;;  %v8483_v27 = vmax.f32 %v8411_v24, 0.0  ;;  %v8410_v7 = vadd.f32 %v8338_v17, %v8266_v22  ;;  %v7889_v57 = vpop.f32.mrf.mxu0  ;;  %v7962_v51 = vpop.f32.mrf.mxu1 }
 0x55c   : > { %v8412_v34 = vadd.f32 %v8340_v10, %v8268_v29  ;;  %v8274_v16 = vmul.f32 %v14616_v13, %v8192_v35  ;;  %v8276_v52 = vmul.f32 %v14616_v13, %v8194_v9  ;;  %v8193_v43 = vadd.f32 %v14731_v32, %v7886_v15  ;;  %v8355_v15 = vld [vmem:[%s11050_s1 + $0xe8] sm:$0xff] }
 0x55d   : > { %v8195_v46 = vadd.f32 %v14734_v50, %v7959_v8  ;;  %8553 = vst [vmem:[%s14635_s22 + $0x58] sm:$0xff] %v8481_v26  ;;  %8555 = vst [vmem:[%s14635_s22 + $0x68] sm:$0xff] %v8483_v27  ;;  %v8482_v44 = vmax.f32 %v8410_v7, 0.0  ;;  %v7888_v53 = vadd.f32 %v7887_v41, %v14486_v55  ;;  %v7961_v3 = vadd.f32 %v7960_v61, %v14560_v14  ;;  %v7893_v42 = vpop.f32.mrf.mxu0  ;;  %v7966_v30 = vpop.f32.mrf.mxu1  ;;  %v8357_v8 = vld [vmem:[%s11050_s1 + $0xf8] sm:$0xff] }
 0x55e   : > { %v8484_v2 = vmax.f32 %v8412_v34, 0.0  ;;  %v8418_v17 = vadd.f32 %v8346_v5, %v8274_v16  ;;  %v8420_v10 = vadd.f32 %v8348_v59, %v8276_v52  ;;  %v8275_v25 = vmul.f32 %v14616_v13, %v8193_v43 }
 0x55f   : > { %v8277_v38 = vmul.f32 %v14616_v13, %v8195_v46  ;;  %8554 = vst [vmem:[%s14635_s22 + $0x60] sm:$0xff] %v8482_v44  ;;  %v8201_v56 = vadd.f32 %v14723_v19, %v7888_v53  ;;  %v8203_v24 = vadd.f32 %v14726_v0, %v7961_v3  ;;  %v7890_v55 = vadd.f32 %v7889_v57, %v14494_v33  ;;  %v7895_v22 = vpop.f32.mrf.mxu0  ;;  %v7968_v29 = vpop.f32.mrf.mxu1  ;;  %v8356_v57 = vld [vmem:[%s11050_s1 + $0xf0] sm:$0xff] }
 0x560   : > { %8556 = vst [vmem:[%s14635_s22 + $0x70] sm:$0xff] %v8484_v2  ;;  %v7963_v14 = vadd.f32 %v7962_v51, %v14564_v1  ;;  %v8490_v41 = vmax.f32 %v8418_v17, 0.0  ;;  %v8492_v61 = vmax.f32 %v8420_v10, 0.0  ;;  %v8419_v35 = vadd.f32 %v8347_v21, %v8275_v25  ;;  %v8358_v51 = vld [vmem:[%s11050_s1 + $0x100] sm:$0xff]  ;;  %v8364_v25 = vld [vmem:[%s11050_s1 + $0x130] sm:$0xff] }
 0x561   : > { %v8421_v9 = vadd.f32 %v8349_v11, %v8277_v38  ;;  %v8283_v26 = vmul.f32 %v14616_v13, %v8201_v56  ;;  %v8285_v27 = vmul.f32 %v14616_v13, %v8203_v24  ;;  %v8202_v33 = vadd.f32 %v14731_v32, %v7890_v55  ;;  %v7897_v1 = vpop.f32.mrf.mxu0  ;;  %v7970_v34 = vpop.f32.mrf.mxu1  ;;  %v8366_v38 = vld [vmem:[%s11050_s1 + $0x140] sm:$0xff] }
 0x562   : > { %v8204_v7 = vadd.f32 %v14734_v50, %v7963_v14  ;;  %8562 = vst [vmem:[%s14635_s22 + $0xa0] sm:$0xff] %v8490_v41  ;;  %8564 = vst [vmem:[%s14635_s22 + $0xb0] sm:$0xff] %v8492_v61  ;;  %v8491_v5 = vmax.f32 %v8419_v35, 0.0  ;;  %v7894_v16 = vadd.f32 %v7893_v42, %v14498_v47  ;;  %v7967_v52 = vadd.f32 %v7966_v30, %v14568_v45  ;;  %v8367_v61 = vld [vmem:[%s11050_s1 + $0x148] sm:$0xff] }
 0x563   : > { %v8493_v59 = vmax.f32 %v8421_v9, 0.0  ;;  %v8427_v43 = vadd.f32 %v8355_v15, %v8283_v26  ;;  %v8429_v46 = vadd.f32 %v8357_v8, %v8285_v27  ;;  %v8284_v44 = vmul.f32 %v14616_v13, %v8202_v33  ;;  %v7899_v21 = vpop.f32.mrf.mxu0  ;;  %v7972_v11 = vpop.f32.mrf.mxu1 }
 0x564   : > { %v8286_v2 = vmul.f32 %v14616_v13, %v8204_v7  ;;  %8563 = vst [vmem:[%s14635_s22 + $0xa8] sm:$0xff] %v8491_v5  ;;  %v8210_v53 = vadd.f32 %v14723_v19, %v7894_v16  ;;  %v8212_v3 = vadd.f32 %v14726_v0, %v7967_v52  ;;  %v7896_v47 = vadd.f32 %v7895_v22, %v14508_v48  ;;  %v8373_v16 = vld [vmem:[%s11050_s1 + $0x178] sm:$0xff]  ;;  %v8375_v52 = vld [vmem:[%s11050_s1 + $0x188] sm:$0xff] }
 0x565   : > { %8565 = vst [vmem:[%s14635_s22 + $0xb8] sm:$0xff] %v8493_v59  ;;  %v7969_v45 = vadd.f32 %v7968_v29, %v14572_v39  ;;  %v8499_v42 = vmax.f32 %v8427_v43, 0.0  ;;  %v8501_v30 = vmax.f32 %v8429_v46, 0.0  ;;  %v8428_v17 = vadd.f32 %v8356_v57, %v8284_v44  ;;  %v7903_v56 = vpop.f32.mrf.mxu0  ;;  %v7976_v24 = vpop.f32.mrf.mxu1  ;;  %v8365_v29 = vld [vmem:[%s11050_s1 + $0x138] sm:$0xff] }
 0x566   : > { %v8430_v10 = vadd.f32 %v8358_v51, %v8286_v2  ;;  %v8292_v55 = vmul.f32 %v14616_v13, %v8210_v53  ;;  %v8294_v14 = vmul.f32 %v14616_v13, %v8212_v3  ;;  %v8211_v41 = vadd.f32 %v14731_v32, %v7896_v47 }
 0x567   : > { %v8213_v48 = vadd.f32 %v14734_v50, %v7969_v45  ;;  %8571 = vst [vmem:[%s14635_s22 + $0xe8] sm:$0xff] %v8499_v42  ;;  %8573 = vst [vmem:[%s14635_s22 + $0xf8] sm:$0xff] %v8501_v30  ;;  %v8500_v39 = vmax.f32 %v8428_v17, 0.0  ;;  %v7898_v35 = vadd.f32 %v7897_v1, %v14512_v18  ;;  %v7971_v9 = vadd.f32 %v7970_v34, %v14576_v63  ;;  %v7905_v33 = vpop.f32.mrf.mxu0  ;;  %v7978_v7 = vpop.f32.mrf.mxu1 }
 0x568   : > { %v8502_v22 = vmax.f32 %v8430_v10, 0.0  ;;  %v8436_v15 = vadd.f32 %v8364_v25, %v8292_v55  ;;  %v8438_v8 = vadd.f32 %v8366_v38, %v8294_v14  ;;  %v8293_v26 = vmul.f32 %v14616_v13, %v8211_v41  ;;  %v8382_v41 = vld [vmem:[%s11050_s1 + $0x1c0] sm:$0xff] }
 0x569   : > { %v8295_v27 = vmul.f32 %v14616_v13, %v8213_v48  ;;  %8572 = vst [vmem:[%s14635_s22 + $0xf0] sm:$0xff] %v8500_v39  ;;  %v8219_v5 = vadd.f32 %v14723_v19, %v7898_v35  ;;  %v8221_v18 = vadd.f32 %v14726_v0, %v7971_v9  ;;  %v7900_v63 = vadd.f32 %v7899_v21, %v14518_v40  ;;  %v8374_v21 = vld [vmem:[%s11050_s1 + $0x180] sm:$0xff]  ;;  %v7907_v47 = vpop.f32.mrf.mxu0  ;;  %v7980_v45 = vpop.f32.mrf.mxu1  ;;  %v8384_v48 = vld [vmem:[%s11050_s1 + $0x1d0] sm:$0xff] }
 0x56a   : > { %8574 = vst [vmem:[%s14635_s22 + $0x100] sm:$0xff] %v8502_v22  ;;  %v7973_v1 = vadd.f32 %v7972_v11, %v14580_v60  ;;  %v8508_v34 = vmax.f32 %v8436_v15, 0.0  ;;  %v8510_v59 = vmax.f32 %v8438_v8, 0.0  ;;  %v8437_v57 = vadd.f32 %v8365_v29, %v8293_v26  ;;  %v8376_v11 = vld [vmem:[%s11050_s1 + $0x190] sm:$0xff]  ;;  %v8383_v15 = vld [vmem:[%s11050_s1 + $0x1c8] sm:$0xff]  ;;  %v8385_v8 = vld [vmem:[%s11050_s1 + $0x1d8] sm:$0xff] }
 0x56b   : > { %v8439_v51 = vadd.f32 %v8367_v61, %v8295_v27  ;;  %v8301_v43 = vmul.f32 %v14616_v13, %v8219_v5  ;;  %v8303_v46 = vmul.f32 %v14616_v13, %v8221_v18  ;;  %v8220_v44 = vadd.f32 %v14731_v32, %v7900_v63 }
 0x56c   : > { %v8222_v2 = vadd.f32 %v14734_v50, %v7973_v1  ;;  %8580 = vst [vmem:[%s14635_s22 + $0x130] sm:$0xff] %v8508_v34  ;;  %8582 = vst [vmem:[%s14635_s22 + $0x140] sm:$0xff] %v8510_v59  ;;  %v8509_v40 = vmax.f32 %v8437_v57, 0.0  ;;  %v7904_v53 = vadd.f32 %v7903_v56, %v14522_v58  ;;  %v7977_v3 = vadd.f32 %v7976_v24, %v14584_v31  ;;  %v15280_v34 = vld [vmem:[#allocation65_spill] sm:$0xff]  ;;  %v15281_v59 = vld [vmem:[#allocation47_spill] sm:$0xff] }
 0x56d   : > { %v8511_v60 = vmax.f32 %v8439_v51, 0.0  ;;  %v8445_v42 = vadd.f32 %v8373_v16, %v8301_v43  ;;  %v8447_v30 = vadd.f32 %v8375_v52, %v8303_v46  ;;  %v8302_v17 = vmul.f32 %v14616_v13, %v8220_v44  ;;  %v8391_v43 = vld [vmem:[%s11050_s1 + $0x208] sm:$0xff]  ;;  %v8393_v46 = vld [vmem:[%s11050_s1 + $0x218] sm:$0xff] }
 0x56e   : > { %v8304_v10 = vmul.f32 %v14616_v13, %v8222_v2  ;;  %8581 = vst [vmem:[%s14635_s22 + $0x138] sm:$0xff] %v8509_v40  ;;  %v8228_v25 = vadd.f32 %v14723_v19, %v7904_v53  ;;  %v8230_v38 = vadd.f32 %v14726_v0, %v7977_v3  ;;  %v7906_v58 = vadd.f32 %v7905_v33, %v14526_v37  ;;  %v7909_v37 = vpop.f32.mrf.mxu0 }
 0x56f   : > { %8583 = vst [vmem:[%s14635_s22 + $0x148] sm:$0xff] %v8511_v60  ;;  %v7979_v31 = vadd.f32 %v7978_v7, %v14588_v36  ;;  %v8517_v56 = vmax.f32 %v8445_v42, 0.0  ;;  %v8519_v24 = vmax.f32 %v8447_v30, 0.0  ;;  %v8446_v55 = vadd.f32 %v8374_v21, %v8302_v17  ;;  %v7982_v36 = vpop.f32.mrf.mxu1  ;;  %v8392_v21 = vld [vmem:[%s11050_s1 + $0x210] sm:$0xff] }
 0x570   : > { %v8448_v14 = vadd.f32 %v8376_v11, %v8304_v10  ;;  %v8310_v39 = vmul.f32 %v14616_v13, %v8228_v25  ;;  %v8312_v22 = vmul.f32 %v14616_v13, %v8230_v38  ;;  %v8229_v29 = vadd.f32 %v14731_v32, %v7906_v58  ;;  %v8394_v11 = vld [vmem:[%s11050_s1 + $0x220] sm:$0xff] }
 0x571   : > { %v8231_v61 = vadd.f32 %v14734_v50, %v7979_v31  ;;  %8589 = vst [vmem:[%s14635_s22 + $0x178] sm:$0xff] %v8517_v56  ;;  %8591 = vst [vmem:[%s14635_s22 + $0x188] sm:$0xff] %v8519_v24  ;;  %v8518_v35 = vmax.f32 %v8446_v55, 0.0  ;;  %v7908_v26 = vadd.f32 %v7907_v47, %v14530_v20  ;;  %v7981_v27 = vadd.f32 %v7980_v45, %v14592_v28  ;;  %v14902_v24 = vld [vmem:[%s15051_s13 + $0x8] ss:$0 sm:$0xff] }
 0x572   : > { %v8520_v9 = vmax.f32 %v8448_v14, 0.0  ;;  %v8454_v33 = vadd.f32 %v8382_v41, %v8310_v39  ;;  %v8456_v7 = vadd.f32 %v8384_v48, %v8312_v22  ;;  %v8311_v5 = vmul.f32 %v14616_v13, %v8229_v29  ;;  %v15282_v55 = vld [vmem:[#allocation53_spill] sm:$0xff]  ;;  %v15283_v41 = vld [vmem:[#allocation58_spill] sm:$0xff] }
 0x573   : > { %v8313_v18 = vmul.f32 %v14616_v13, %v8231_v61  ;;  %8590 = vst [vmem:[%s14635_s22 + $0x180] sm:$0xff] %v8518_v35  ;;  %v8237_v63 = vadd.f32 %v14723_v19, %v7908_v26  ;;  %v8239_v1 = vadd.f32 %v14726_v0, %v7981_v27  ;;  %v7910_v20 = vadd.f32 %v7909_v37, %v15280_v34  ;;  %v15284_v37 = vld [vmem:[#allocation66_spill] sm:$0xff] }
 0x574   : > { %8592 = vst [vmem:[%s14635_s22 + $0x190] sm:$0xff] %v8520_v9  ;;  %v7983_v28 = vadd.f32 %v7982_v36, %v15281_v59  ;;  %v8526_v57 = vmax.f32 %v8454_v33, 0.0  ;;  %v8528_v51 = vmax.f32 %v8456_v7, 0.0  ;;  %v8455_v16 = vadd.f32 %v8383_v15, %v8311_v5  ;;  %v8332_v35 = vld [vmem:[%s11050_s1 + $0x30] sm:$0xff]  ;;  %v8334_v9 = vld [vmem:[%s11050_s1 + $0x40] sm:$0xff]  ;;  %v8333_v5 = vld [vmem:[%s11050_s1 + $0x38] sm:$0xff] }
 0x575   : > { %v8457_v52 = vadd.f32 %v8385_v8, %v8313_v18  ;;  %v8319_v44 = vmul.f32 %v14616_v13, %v8237_v63  ;;  %v8321_v19 = vmul.f32 %v14616_v13, %v8239_v1  ;;  %v8238_v0 = vadd.f32 %v14731_v32, %v7910_v20  ;;  %v15285_v33 = vld [vmem:[#allocation36_spill] sm:$0xff] }
 0x576   : > { %v8240_v2 = vadd.f32 %v14734_v50, %v7983_v28  ;;  %8598 = vst [vmem:[%s14635_s22 + $0x1c0] sm:$0xff] %v8526_v57  ;;  %8600 = vst [vmem:[%s14635_s22 + $0x1d0] sm:$0xff] %v8528_v51  ;;  %v8527_v40 = vmax.f32 %v8455_v16, 0.0  ;;  %v8153_v32 = vsub.s32 6, %v15278_v6  ;;  %v8157_v38 = vsub.s32 7, %v15278_v6  ;;  %v15286_v18 = vld [vmem:[#allocation40_spill] sm:$0xff] }
 0x577   : > { %v8529_v60 = vmax.f32 %v8457_v52, 0.0  ;;  %v8463_v53 = vadd.f32 %v8391_v43, %v8319_v44  ;;  %v8465_v3 = vadd.f32 %v8393_v46, %v8321_v19  ;;  %v8320_v47 = vmul.f32 %v14616_v13, %v8238_v0  ;;  %v8341_v51 = vld [vmem:[%s11050_s1 + $0x78] sm:$0xff] }
 0x578   : > { %v8322_v45 = vmul.f32 %v14616_v13, %v8240_v2  ;;  %8599 = vst [vmem:[%s14635_s22 + $0x1c8] sm:$0xff] %v8527_v40  ;;  %v14897_v58 = vrot.slane %v14599_v62, %v8153_v32  ;;  %v14907_v6 = vrot.slane %v14599_v62, %v8157_v38  ;;  %v15287_v52 = vld [vmem:[#allocation35_spill] sm:$0xff] }
 0x579   : > { %8601 = vst [vmem:[%s14635_s22 + $0x1d8] sm:$0xff] %v8529_v60  ;;  %v8535_v50 = vmax.f32 %v8463_v53, 0.0  ;;  %v8537_v42 = vmax.f32 %v8465_v3, 0.0  ;;  %v8464_v30 = vadd.f32 %v8392_v21, %v8320_v47  ;;  %v8343_v60 = vld [vmem:[%s11050_s1 + $0x88] sm:$0xff] }
 0x57a   : > { %v8466_v17 = vadd.f32 %v8394_v11, %v8322_v45  ;;  %v15288_v53 = vld [vmem:[#allocation54_spill] sm:$0xff]  ;;  %v15289_v47 = vld [vmem:[#allocation61_spill] sm:$0xff] }
 0x57b   : > { %8607 = vst [vmem:[%s14635_s22 + $0x208] sm:$0xff] %v8535_v50  ;;  %8609 = vst [vmem:[%s14635_s22 + $0x218] sm:$0xff] %v8537_v42  ;;  %v8536_v10 = vmax.f32 %v8464_v30, 0.0 }
 0x57c   : > { %v8538_v25 = vmax.f32 %v8466_v17, 0.0  ;;  %v8342_v17 = vld [vmem:[%s11050_s1 + $0x80] sm:$0xff] }
 0x57d   : > { %8608 = vst [vmem:[%s14635_s22 + $0x210] sm:$0xff] %v8536_v10  ;;  %v15290_v10 = vld [vmem:[#allocation41_spill] sm:$0xff] }
 0x57e   : > { %8610 = vst [vmem:[%s14635_s22 + $0x220] sm:$0xff] %v8538_v25  ;;  %v8019_v31 = vpop.f32.mrf.mxu0  ;;  %v8092_v56 = vpop.f32.mrf.mxu1 }
 0x57f   : > { %v8020_v14 = vadd.f32 %v8019_v31, %v15282_v55  ;;  %v8093_v48 = vadd.f32 %v8092_v56, %v15283_v41 }
 0x580   : > { %v8021_v39 = vpop.f32.mrf.mxu0  ;;  %v8094_v22 = vpop.f32.mrf.mxu1 }
 0x581   : > { %v8178_v29 = vadd.f32 %v14897_v58, %v8020_v14  ;;  %v8180_v61 = vadd.f32 %v14902_v24, %v8093_v48  ;;  %v8022_v36 = vadd.f32 %v8021_v39, %v15284_v37  ;;  %v8350_v39 = vld [vmem:[%s11050_s1 + $0xc0] sm:$0xff]  ;;  %v8352_v22 = vld [vmem:[%s11050_s1 + $0xd0] sm:$0xff] }
 0x582   : > { %v8023_v15 = vpop.f32.mrf.mxu0  ;;  %v8095_v8 = vpop.f32.mrf.mxu1 }
 0x583   : > { %v8260_v26 = vmul.f32 %v14616_v13, %v8178_v29  ;;  %v8262_v27 = vmul.f32 %v14616_v13, %v8180_v61  ;;  %v8179_v62 = vadd.f32 %v14907_v6, %v8022_v36  ;;  %v8024_v7 = vadd.f32 %v8023_v15, %v15285_v33  ;;  %v15291_v61 = vld [vmem:[#allocation46_spill] sm:$0xff] }
 0x584   : > { %v8096_v63 = vadd.f32 %v8095_v8, %v15286_v18  ;;  %v8025_v1 = vpop.f32.mrf.mxu0  ;;  %v8097_v34 = vpop.f32.mrf.mxu1 }
 0x585   : > { %v8404_v20 = vadd.f32 %v8332_v35, %v8260_v26  ;;  %v8406_v59 = vadd.f32 %v8334_v9, %v8262_v27  ;;  %v8261_v28 = vmul.f32 %v14616_v13, %v8179_v62  ;;  %v8187_v57 = vadd.f32 %v14897_v58, %v8024_v7  ;;  %v8351_v26 = vld [vmem:[%s11050_s1 + $0xc8] sm:$0xff] }
 0x586   : > { %v8189_v16 = vadd.f32 %v14902_v24, %v8096_v63  ;;  %v8026_v43 = vadd.f32 %v8025_v1, %v15287_v52  ;;  %v8029_v46 = vpop.f32.mrf.mxu0  ;;  %v8100_v44 = vpop.f32.mrf.mxu1 }
 0x587   : > { %v8476_v19 = vmax.f32 %v8404_v20, 0.0  ;;  %v8478_v0 = vmax.f32 %v8406_v59, 0.0  ;;  %v8405_v2 = vadd.f32 %v8333_v5, %v8261_v28  ;;  %v8269_v40 = vmul.f32 %v14616_v13, %v8187_v57  ;;  %v8359_v20 = vld [vmem:[%s11050_s1 + $0x108] sm:$0xff]  ;;  %v8361_v59 = vld [vmem:[%s11050_s1 + $0x118] sm:$0xff] }
 0x588   : > { %v8271_v21 = vmul.f32 %v14616_v13, %v8189_v16  ;;  %v8188_v11 = vadd.f32 %v14907_v6, %v8026_v43  ;;  %v8030_v3 = vadd.f32 %v8029_v46, %v15288_v53  ;;  %v8101_v45 = vadd.f32 %v8100_v44, %v15289_v47  ;;  %v8031_v32 = vpop.f32.mrf.mxu0  ;;  %v8102_v50 = vpop.f32.mrf.mxu1 }
 0x589   : > { %8548 = vst [vmem:[%s14635_s22 + $0x30] sm:$0xff] %v8476_v19  ;;  %8550 = vst.msk [vmem:[%s14635_s22 + $0x40] sm:$0xff] %vm1947_vm0, %v8478_v0  ;;  %v8477_v42 = vmax.f32 %v8405_v2, 0.0  ;;  %v8413_v30 = vadd.f32 %v8341_v51, %v8269_v40  ;;  %v8032_v25 = vadd.f32 %v8031_v32, %v15290_v10  ;;  %v8360_v19 = vld [vmem:[%s11050_s1 + $0x110] sm:$0xff]  ;;  %v15294_v50 = vld [vmem:[#allocation56_spill] sm:$0xff] }
 0x58a   : > { %v8415_v38 = vadd.f32 %v8343_v60, %v8271_v21  ;;  %v8270_v31 = vmul.f32 %v14616_v13, %v8188_v11  ;;  %v8196_v56 = vadd.f32 %v14897_v58, %v8030_v3  ;;  %v8198_v55 = vadd.f32 %v14902_v24, %v8101_v45  ;;  %v8033_v14 = vpop.f32.mrf.mxu0  ;;  %v8103_v41 = vpop.f32.mrf.mxu1  ;;  %v15293_v0 = vld [vmem:[#allocation63_spill] sm:$0xff] }
 0x58b   : > { %8549 = vst [vmem:[%s14635_s22 + $0x38] sm:$0xff] %v8477_v42  ;;  %v8485_v48 = vmax.f32 %v8413_v30, 0.0  ;;  %v8197_v29 = vadd.f32 %v14907_v6, %v8032_v25  ;;  %v8034_v37 = vadd.f32 %v8033_v14, %v15291_v61  ;;  %v8104_v36 = vadd.f32 %v8103_v41, %v14648_v12  ;;  %v15292_v12 = vld [vmem:[#allocation39_spill] sm:$0xff] }
 0x58c   : > { %v8487_v35 = vmax.f32 %v8415_v38, 0.0  ;;  %v8414_v9 = vadd.f32 %v8342_v17, %v8270_v31  ;;  %v8278_v15 = vmul.f32 %v14616_v13, %v8196_v56  ;;  %v8280_v8 = vmul.f32 %v14616_v13, %v8198_v55  ;;  %v8035_v27 = vpop.f32.mrf.mxu0  ;;  %v8105_v62 = vpop.f32.mrf.mxu1  ;;  %v8368_v38 = vld [vmem:[%s11050_s1 + $0x150] sm:$0xff]  ;;  %v8370_v31 = vld [vmem:[%s11050_s1 + $0x160] sm:$0xff] }
 0x58d   : > { %8557 = vst [vmem:[%s14635_s22 + $0x78] sm:$0xff] %v8485_v48  ;;  %v8279_v33 = vmul.f32 %v14616_v13, %v8197_v29  ;;  %v8205_v7 = vadd.f32 %v14897_v58, %v8034_v37  ;;  %v8207_v5 = vadd.f32 %v14902_v24, %v8104_v36  ;;  %v8036_v18 = vadd.f32 %v8035_v27, %v15292_v12  ;;  %v15295_v56 = vld [vmem:[#allocation37_spill] sm:$0xff]  ;;  %v8369_v37 = vld [vmem:[%s11050_s1 + $0x158] sm:$0xff] }
 0x58e   : > { %8559 = vst.msk [vmem:[%s14635_s22 + $0x88] sm:$0xff] %vm1947_vm0, %v8487_v35  ;;  %v8486_v63 = vmax.f32 %v8414_v9, 0.0  ;;  %v8422_v1 = vadd.f32 %v8350_v39, %v8278_v15  ;;  %v8424_v34 = vadd.f32 %v8352_v22, %v8280_v8  ;;  %v8039_v28 = vpop.f32.mrf.mxu0  ;;  %v8108_v57 = vpop.f32.mrf.mxu1  ;;  %v15296_v35 = vld [vmem:[#allocation55_spill] sm:$0xff] }
 0x58f   : > { %v8423_v51 = vadd.f32 %v8351_v26, %v8279_v33  ;;  %v8287_v16 = vmul.f32 %v14616_v13, %v8205_v7  ;;  %v8289_v52 = vmul.f32 %v14616_v13, %v8207_v5  ;;  %v8206_v43 = vadd.f32 %v14907_v6, %v8036_v18  ;;  %v8377_v27 = vld [vmem:[%s11050_s1 + $0x198] sm:$0xff]  ;;  %v8379_v5 = vld [vmem:[%s11050_s1 + $0x1a8] sm:$0xff] }
 0x590   : > { %8558 = vst [vmem:[%s14635_s22 + $0x80] sm:$0xff] %v8486_v63  ;;  %v8494_v46 = vmax.f32 %v8422_v1, 0.0  ;;  %v8496_v44 = vmax.f32 %v8424_v34, 0.0  ;;  %v8040_v2 = vadd.f32 %v8039_v28, %v15293_v0  ;;  %v8109_v40 = vadd.f32 %v8108_v57, %v14661_v54  ;;  %v8041_v60 = vpop.f32.mrf.mxu0  ;;  %v8110_v21 = vpop.f32.mrf.mxu1  ;;  %v15297_v18 = vld [vmem:[#allocation38_spill] sm:$0xff]  ;;  %v8378_v57 = vld [vmem:[%s11050_s1 + $0x1a0] sm:$0xff] }
 0x591   : > { %v8495_v11 = vmax.f32 %v8423_v51, 0.0  ;;  %v8431_v53 = vadd.f32 %v8359_v20, %v8287_v16  ;;  %v8433_v3 = vadd.f32 %v8361_v59, %v8289_v52  ;;  %v8288_v47 = vmul.f32 %v14616_v13, %v8206_v43  ;;  %v8386_v0 = vld [vmem:[%s11050_s1 + $0x1e0] sm:$0xff] }
 0x592   : > { %8566 = vst [vmem:[%s14635_s22 + $0xc0] sm:$0xff] %v8494_v46  ;;  %8568 = vst.msk [vmem:[%s14635_s22 + $0xd0] sm:$0xff] %vm1947_vm0, %v8496_v44  ;;  %v8214_v45 = vadd.f32 %v14897_v58, %v8040_v2  ;;  %v8216_v32 = vadd.f32 %v14902_v24, %v8109_v40  ;;  %v8042_v42 = vadd.f32 %v8041_v60, %v15294_v50  ;;  %v8043_v54 = vpop.f32.mrf.mxu0  ;;  %v8111_v30 = vpop.f32.mrf.mxu1  ;;  %v8388_v2 = vld [vmem:[%s11050_s1 + $0x1f0] sm:$0xff]  ;;  %v15298_v40 = vld [vmem:[#allocation57_spill] sm:$0xff] }
 0x593   : > { %8567 = vst [vmem:[%s14635_s22 + $0xc8] sm:$0xff] %v8495_v11  ;;  %v8503_v17 = vmax.f32 %v8431_v53, 0.0  ;;  %v8505_v10 = vmax.f32 %v8433_v3, 0.0  ;;  %v8432_v25 = vadd.f32 %v8360_v19, %v8288_v47  ;;  %v8044_v55 = vadd.f32 %v8043_v54, %v15295_v56  ;;  %v8387_v56 = vld [vmem:[%s11050_s1 + $0x1e8] sm:$0xff] }
 0x594   : > { %v8296_v14 = vmul.f32 %v14616_v13, %v8214_v45  ;;  %v8298_v41 = vmul.f32 %v14616_v13, %v8216_v32  ;;  %v8215_v48 = vadd.f32 %v14907_v6, %v8042_v42  ;;  %v8112_v39 = vadd.f32 %v8111_v30, %v14673_v23  ;;  %v8045_v22 = vpop.f32.mrf.mxu0  ;;  %v8113_v29 = vpop.f32.mrf.mxu1  ;;  %v15299_v42 = vld [vmem:[#allocation50_spill] sm:$0xff] }
 0x595   : > { %8575 = vst [vmem:[%s14635_s22 + $0x108] sm:$0xff] %v8503_v17  ;;  %8577 = vst.msk [vmem:[%s14635_s22 + $0x118] sm:$0xff] %vm1947_vm0, %v8505_v10  ;;  %v8504_v61 = vmax.f32 %v8432_v25, 0.0  ;;  %v8223_v36 = vadd.f32 %v14897_v58, %v8044_v55  ;;  %v8046_v9 = vadd.f32 %v8045_v22, %v15296_v35  ;;  %v15300_v55 = vld [vmem:[#allocation62_spill] sm:$0xff] }
 0x596   : > { %v8440_v15 = vadd.f32 %v8368_v38, %v8296_v14  ;;  %v8442_v8 = vadd.f32 %v8370_v31, %v8298_v41  ;;  %v8297_v26 = vmul.f32 %v14616_v13, %v8215_v48  ;;  %v8225_v23 = vadd.f32 %v14902_v24, %v8112_v39  ;;  %v8049_v62 = vpop.f32.mrf.mxu0  ;;  %v8116_v33 = vpop.f32.mrf.mxu1  ;;  %v8395_v29 = vld [vmem:[%s11050_s1 + $0x228] sm:$0xff] }
 0x597   : > { %8576 = vst [vmem:[%s14635_s22 + $0x110] sm:$0xff] %v8504_v61  ;;  %v8305_v7 = vmul.f32 %v14616_v13, %v8223_v36  ;;  %v8224_v12 = vadd.f32 %v14907_v6, %v8046_v9  ;;  %v8050_v63 = vadd.f32 %v8049_v62, %v15297_v18  ;;  %v8117_v1 = vadd.f32 %v8116_v33, %v14685_v4  ;;  %v8397_v61 = vld [vmem:[%s11050_s1 + $0x238] sm:$0xff] }
 0x598   : > { %v8512_v34 = vmax.f32 %v8440_v15, 0.0  ;;  %v8514_v20 = vmax.f32 %v8442_v8, 0.0  ;;  %v8441_v59 = vadd.f32 %v8369_v37, %v8297_v26  ;;  %v8307_v28 = vmul.f32 %v14616_v13, %v8225_v23  ;;  %v8051_v51 = vpop.f32.mrf.mxu0  ;;  %v8118_v16 = vpop.f32.mrf.mxu1  ;;  %v8396_v15 = vld [vmem:[%s11050_s1 + $0x230] sm:$0xff] }
 0x599   : > { %v8449_v52 = vadd.f32 %v8377_v27, %v8305_v7  ;;  %v8306_v43 = vmul.f32 %v14616_v13, %v8224_v12  ;;  %v8232_v46 = vadd.f32 %v14897_v58, %v8050_v63  ;;  %v8234_v44 = vadd.f32 %v14902_v24, %v8117_v1 }
 0x59a   : > { %8584 = vst [vmem:[%s14635_s22 + $0x150] sm:$0xff] %v8512_v34  ;;  %8586 = vst.msk [vmem:[%s14635_s22 + $0x160] sm:$0xff] %vm1947_vm0, %v8514_v20  ;;  %v8513_v4 = vmax.f32 %v8441_v59, 0.0  ;;  %v8451_v19 = vadd.f32 %v8379_v5, %v8307_v28  ;;  %v8052_v60 = vadd.f32 %v8051_v51, %v15298_v40  ;;  %v8053_v21 = vpop.f32.mrf.mxu0  ;;  %v8119_v11 = vpop.f32.mrf.mxu1 }
 0x59b   : > { %v8521_v53 = vmax.f32 %v8449_v52, 0.0  ;;  %v8450_v3 = vadd.f32 %v8378_v57, %v8306_v43  ;;  %v8314_v47 = vmul.f32 %v14616_v13, %v8232_v46  ;;  %v8316_v45 = vmul.f32 %v14616_v13, %v8234_v44 }
 0x59c   : > { %8585 = vst [vmem:[%s14635_s22 + $0x158] sm:$0xff] %v8513_v4  ;;  %v8523_v32 = vmax.f32 %v8451_v19, 0.0  ;;  %v8233_v50 = vadd.f32 %v14907_v6, %v8052_v60  ;;  %v8054_v54 = vadd.f32 %v8053_v21, %v15299_v42  ;;  %v8120_v30 = vadd.f32 %v8119_v11, %v14697_v49  ;;  %v8055_v17 = vpop.f32.mrf.mxu0  ;;  %v8121_v10 = vpop.f32.mrf.mxu1 }
 0x59d   : > { %8593 = vst [vmem:[%s14635_s22 + $0x198] sm:$0xff] %v8521_v53  ;;  %v8522_v25 = vmax.f32 %v8450_v3, 0.0  ;;  %v8458_v38 = vadd.f32 %v8386_v0, %v8314_v47  ;;  %v8460_v31 = vadd.f32 %v8388_v2, %v8316_v45  ;;  %v8056_v14 = vadd.f32 %v8055_v17, %v15300_v55 }
 0x59e   : > { %8595 = vst.msk [vmem:[%s14635_s22 + $0x1a8] sm:$0xff] %vm1947_vm0, %v8523_v32  ;;  %v8315_v41 = vmul.f32 %v14616_v13, %v8233_v50  ;;  %v8241_v49 = vadd.f32 %v14897_v58, %v8054_v54  ;;  %v8243_v48 = vadd.f32 %v14902_v24, %v8120_v30 }
 0x59f   : > { %8594 = vst [vmem:[%s14635_s22 + $0x1a0] sm:$0xff] %v8522_v25  ;;  %v8530_v39 = vmax.f32 %v8458_v38, 0.0  ;;  %v8532_v22 = vmax.f32 %v8460_v31, 0.0  ;;  %v8242_v37 = vadd.f32 %v14907_v6, %v8056_v14 }
 0x5a0   : > { %v8459_v36 = vadd.f32 %v8387_v56, %v8315_v41  ;;  %v8323_v35 = vmul.f32 %v14616_v13, %v8241_v49  ;;  %v8325_v9 = vmul.f32 %v14616_v13, %v8243_v48 }
 0x5a1   : > { %8602 = vst [vmem:[%s14635_s22 + $0x1e0] sm:$0xff] %v8530_v39  ;;  %8604 = vst.msk [vmem:[%s14635_s22 + $0x1f0] sm:$0xff] %vm1947_vm0, %v8532_v22  ;;  %v8324_v58 = vmul.f32 %v14616_v13, %v8242_v37 }
 0x5a2   : > { %v8531_v24 = vmax.f32 %v8459_v36, 0.0  ;;  %v8467_v8 = vadd.f32 %v8395_v29, %v8323_v35  ;;  %v8469_v26 = vadd.f32 %v8397_v61, %v8325_v9 }
 0x5a3   : > { %v8468_v27 = vadd.f32 %v8396_v15, %v8324_v58 }
 0x5a4   : > { %8603 = vst [vmem:[%s14635_s22 + $0x1e8] sm:$0xff] %v8531_v24  ;;  %v8539_v6 = vmax.f32 %v8467_v8, 0.0  ;;  %v8541_v23 = vmax.f32 %v8469_v26, 0.0 }
 0x5a5   : > { %v8540_v62 = vmax.f32 %v8468_v27, 0.0 }
 0x5a6   : > { %8611 = vst [vmem:[%s14635_s22 + $0x228] sm:$0xff] %v8539_v6  ;;  %8613 = vst.msk [vmem:[%s14635_s22 + $0x238] sm:$0xff] %vm1947_vm0, %v8541_v23 }
 0x5a7   : > { %8612 = vst [vmem:[%s14635_s22 + $0x230] sm:$0xff] %v8540_v62 }
 0x5a8 PF: > { %s26_s15 = sadd.s32 1, %s10817_s15  }
 0x5a9   : > { %p23_p4 = scmp.ge.s32.totalorder %s26_s15, 4  }
 0x5ab   :  { %25 = sbr.rel (!%p23_p4) target bundleno = 3 (0x3), region = 124 }

</bundles_post_ra>
